<compile_context>
chip_gen: v6e
topology: v6e:2x2x1
jax: 0.10.0
libtpu: 0.0.40
codegen_flags: <defaults>
</compile_context>

<pallas_src>
import numpy as np

import jax
import jax.numpy as jnp
from jax.experimental import pallas as pl
from jax.experimental.pallas import tpu as pltpu

# ----------------------- scaled-down config (same architecture) --------------
h_layer_1 = 8
h_layer_2 = 16
h_layer_5 = 128          # scaled from 1000
latent_dim = 32          # scaled from 256
kernel_size = (4, 4)
KH, KW = kernel_size
n_channels = 14          # scaled from 38   (input height)
sub_window_size = 22     # scaled from 460  (input width)
H, W = n_channels, sub_window_size
HW = H * W
img_size = HW                                      # 308
N = 2                                              # batch
C1, C2 = h_layer_1, h_layer_2

OH1, OW1 = H - KH + 1, W - KW + 1                  # 11, 19
OH2, OW2 = OH1 - KH + 1, OW1 - KW + 1              # 8, 16
P2 = OH2 * OW2                                     # 128
feat = C2 * P2                                     # 2048 == h2*(nc-6)*(sw-6)

NHW = N * H * W                                    # 616  encoder grid columns
SH1 = (KH - 1) * W + (KW - 1)                      # 69   max tap offset (width W)
NG1 = NHW + SH1                                    # 685  conv1 output columns
XPAD = NHW + 2 * SH1                               # 754  padded input columns
CNT1 = N * OH1 * OW1                               # 418  valid pixels after conv1
CNT2 = N * OH2 * OW2                               # 256  valid pixels after conv2

# decoder work grid: (H+6, W+6) per sample, dfc2 features placed at offset (6,6)
GH, GW = H + 2 * (KH - 1), W + 2 * (KW - 1)        # 20, 28
GSZ = GH * GW                                      # 560
NG = N * GSZ                                       # 1120
SH3 = (KH - 1) * GW + (KW - 1)                     # 87
NH3 = NG + SH3                                     # 1207 dconv3 output columns
NGP = NG + 2 * SH3                                 # 1294 scatter-grid columns
DOFF = 2 * (KH - 1)                                # 6
DH, DW = OH2, OW2                                  # 8, 16  decoder input spatial
MH, MW = OH1, OW1                                  # 11, 19 decoder mid spatial (at offset 3)
CNT3 = N * MH * MW                                 # 418

LAT_PAD = 128                                      # [mu | sc | z | pad] output slab width
NG_PAD = 1152                                      # decoder output padded to lane multiple

DROP_P = 0.3
LRELU_SLOPE = 0.01       # nn.LeakyReLU default
BN_EPS = 1e-5
RF = KH * KW             # 16 taps


# ----------------------- static valid-pixel masks (numpy, compile-time) ------
def _valid_mask(width, per_img, row_w, h_lo, h_hi, w_lo, w_hi, n_img):
    s = np.arange(width)
    n = s // per_img
    rem = s % per_img
    hh = rem // row_w
    ww = rem % row_w
    v = (n < n_img) & (h_lo <= hh) & (hh < h_hi) & (w_lo <= ww) & (ww < w_hi)
    return v.astype(np.float32)[None, :]


MASK_BN1 = _valid_mask(NG1, HW, W, 0, OH1, 0, OW1, N)                               # (1, 685)
MASK_BN2 = _valid_mask(NHW, HW, W, 0, OH2, 0, OW2, N)                               # (1, 616)
MASK_BN3 = _valid_mask(NH3, GSZ, GW, KH - 1, KH - 1 + MH, KW - 1, KW - 1 + MW, N)   # (1, 1207)


# ----------------------------- in-kernel helpers ------------------------------
def _lrelu(x):
    return jnp.where(x >= 0.0, x, LRELU_SLOPE * x)


def _softplus(x):
    # numerically stable log(1 + exp(x))  (torch.nn.Softplus, beta=1)
    return jnp.maximum(x, 0.0) + jnp.log(1.0 + jnp.exp(-jnp.abs(x)))


def _bn_lrelu(x, mask, count, gamma, beta):
    # training-mode BatchNorm over the masked (valid) columns, biased variance,
    # two-pass form (sum((x-mean)^2)) to avoid catastrophic cancellation.
    inv = 1.0 / float(count)
    mean = jnp.sum(x * mask, axis=1, keepdims=True) * inv
    d = x - mean
    var = jnp.sum(d * d * mask, axis=1, keepdims=True) * inv
    y = d * jax.lax.rsqrt(var + BN_EPS) * gamma + beta
    return _lrelu(y)


def _taps(src, row_w, out_w):
    # stack the 16 shifted lane-slices of a channel-major flattened grid along
    # sublanes -> contraction depth (Cin*16) for a single MXU dot.
    return jnp.concatenate(
        [src[:, kh * row_w + kw: kh * row_w + kw + out_w]
         for kh in range(KH) for kw in range(KW)], axis=0)


# --------------------------------- fused kernel --------------------------------
def vae_kernel(x_ref, w1_ref, b1_ref, g1_ref, be1_ref, m1_ref,
               w2_ref, b2_ref, g2_ref, be2_ref, m2_ref,
               wf_ref, bf_ref, dm1_ref,
               wh_ref, bh_ref, eps_ref,
               wd1_ref, bd1_ref, wd2_ref, bd2_ref, dm2_ref,
               w3_ref, b3_ref, g3_ref, be3_ref, m3_ref,
               w4_ref, b4_ref,
               lat_ref, xg_ref,
               flat_s, dq_s, grid_s):
    f32 = jnp.float32

    # ---------------- encoder convs ----------------
    xr = x_ref[...]                                          # (1, XPAD)
    x16 = _taps(xr, W, NG1)                                  # (16, NG1)
    h1 = jnp.dot(w1_ref[...], x16, preferred_element_type=f32) + b1_ref[...]
    a1 = _bn_lrelu(h1, m1_ref[...], CNT1, g1_ref[...], be1_ref[...])   # (C1, NG1)

    a16 = _taps(a1, W, NHW)                                  # (C1*16=128, NHW)
    h2 = jnp.dot(w2_ref[...], a16, preferred_element_type=f32) + b2_ref[...]
    a2 = _bn_lrelu(h2, m2_ref[...], CNT2, g2_ref[...], be2_ref[...])   # (C2, NHW)

    # compact valid pixels -> flat (N, feat) in torch (c, oh, ow) flatten order.
    # per image: gather the 8 row slices into one 128-lane block, then 16 lane-dense
    # 128-lane row writes into the flat scratch.
    for n in range(N):
        blk = jnp.concatenate(
            [a2[:, n * HW + oh * W: n * HW + oh * W + OW2] for oh in range(OH2)],
            axis=1)                                          # (C2, P2=128)
        for c in range(C2):
            flat_s[n:n + 1, c * P2:(c + 1) * P2] = blk[c:c + 1, :]

    # ---------------- FC / latent / decoder FC ----------------
    flat = flat_s[...]                                       # (N, feat)
    # efc1 -> dropout -> LeakyReLU   (torch order: Linear -> Dropout -> LeakyReLU)
    h = jnp.dot(flat.astype(jnp.bfloat16), wf_ref[...],
                preferred_element_type=f32) + bf_ref[...]
    eh5 = _lrelu(h * dm1_ref[...])
    # fused [mu_z | scale_z] head
    hz = jnp.dot(eh5, wh_ref[...], preferred_element_type=f32) + bh_ref[...]
    mu = hz[:, :latent_dim]
    sc = hz[:, latent_dim:2 * latent_dim]
    z = mu + _softplus(sc) * eps_ref[...]
    lat_ref[...] = jnp.concatenate(
        [mu, sc, z, jnp.zeros((N, LAT_PAD - 3 * latent_dim), f32)], axis=1)

    d1 = _lrelu(jnp.dot(z, wd1_ref[...], preferred_element_type=f32) + bd1_ref[...])
    d2 = jnp.dot(d1.astype(jnp.bfloat16), wd2_ref[...],
                 preferred_element_type=f32) + bd2_ref[...]
    dh2 = _lrelu(d2 * dm2_ref[...])                          # (N, feat)

    # (n, c*P2+p) -> channel-major (C2, N*P2) via 32 lane-dense 128-lane row writes
    for n in range(N):
        for c in range(C2):
            dq_s[c:c + 1, n * P2:(n + 1) * P2] = dh2[n:n + 1, c * P2:(c + 1) * P2]

    # ---------------- decoder convs ----------------
    # scatter onto a zeroed work grid (true zero padding for the transposed convs).
    # destination rows are GW=28-strided, so these 16-lane writes cannot be lane-dense.
    grid_s[...] = jnp.zeros((C2, NGP), f32)
    dq = dq_s[...]
    for n in range(N):
        for oh in range(DH):
            src = n * P2 + oh * DW
            dst = n * GSZ + (DOFF + oh) * GW + DOFF
            grid_s[:, dst:dst + DW] = dq[:, src:src + DW]
    pv = grid_s[...]                                         # (C2, NGP)

    # dconv3 == valid conv with pre-flipped / channel-swapped weights, K=256 dot
    p16 = _taps(pv, GW, NH3)                                 # (C2*16=256, NH3)
    h3 = jnp.dot(w3_ref[...], p16, preferred_element_type=f32) + b3_ref[...]
    m3 = m3_ref[...]
    # BN3 + lrelu, then re-zero the padding ring (ConvTranspose pads with true zeros)
    a3 = _bn_lrelu(h3, m3, CNT3, g3_ref[...], be3_ref[...]) * m3       # (C1, NH3)

    # dconv4 (C1 -> 1) as a single K=128 dot + exact sigmoid
    a3_16 = _taps(a3, GW, NG)                                # (C1*16=128, NG)
    xg = jnp.dot(w4_ref[...], a3_16, preferred_element_type=f32) + b4_ref[...]
    sig = 1.0 / (1.0 + jnp.exp(-xg))                         # (1, NG)
    xg_ref[...] = jnp.concatenate([sig, jnp.zeros((1, NG_PAD - NG), f32)], axis=1)


# ------------------------------ pallas_call glue -------------------------------
def _vspec(shape):
    nd = len(shape)
    return pl.BlockSpec(shape, lambda i, _nd=nd: (0,) * _nd)


def run_vae(xrow, eps, dmask1, dmask2, p):
    ins = (xrow,
           p["w1"], p["b1"], p["g1"], p["be1"], MASK_BN1,
           p["w2"], p["b2"], p["g2"], p["be2"], MASK_BN2,
           p["wfc1"], p["bfc1"], dmask1,
           p["wheads"], p["bheads"], eps,
           p["wd1"], p["bd1"], p["wd2"], p["bd2"], dmask2,
           p["w3"], p["b3"], p["g3"], p["be3"], MASK_BN3,
           p["w4"], p["b4"])
    out_shape = (jax.ShapeDtypeStruct((N, LAT_PAD), jnp.float32),
                 jax.ShapeDtypeStruct((1, NG_PAD), jnp.float32))
    return pl.pallas_call(
        vae_kernel,
        grid=(1,),
        in_specs=[_vspec(a.shape) for a in ins],
        out_specs=tuple(_vspec(o.shape) for o in out_shape),
        out_shape=out_shape,
        scratch_shapes=[pltpu.VMEM((N, feat), jnp.float32),      # flat  (N, c*p)
                        pltpu.VMEM((C2, N * P2), jnp.float32),   # dq    (c, n*p)
                        pltpu.VMEM((C2, NGP), jnp.float32)],     # padded decoder grid
        compiler_params=pltpu.CompilerParams(
            dimension_semantics=("arbitrary",)),
    )(*ins)


# --------------------------------- parameters ----------------------------------
def _xavier(key, shape, fan_in, fan_out):
    a = (6.0 / (fan_in + fan_out)) ** 0.5
    return jax.random.uniform(key, shape, jnp.float32, -a, a)


def init_params(key):
    # all weights stored kernel-ready (pre-transposed / pre-flipped / tap-stacked)
    # -> no per-step weight transforms inside the jitted forward.
    ks = jax.random.split(key, 9)
    p = {}
    # econv1: torch (C1,1,KH,KW) -> (C1, taps)
    w1 = _xavier(ks[0], (C1, 1, KH, KW), 1 * RF, C1 * RF)
    p["w1"] = w1.reshape(C1, RF)
    p["b1"] = jnp.full((C1, 1), 0.01, jnp.float32)
    p["g1"] = jnp.ones((C1, 1), jnp.float32)
    p["be1"] = jnp.zeros((C1, 1), jnp.float32)
    # econv2: torch (C2,C1,KH,KW) -> (C2, taps*C1)  [tap-major columns]
    w2 = _xavier(ks[1], (C2, C1, KH, KW), C1 * RF, C2 * RF)
    p["w2"] = w2.transpose(0, 2, 3, 1).reshape(C2, RF * C1)
    p["b2"] = jnp.full((C2, 1), 0.01, jnp.float32)
    p["g2"] = jnp.ones((C2, 1), jnp.float32)
    p["be2"] = jnp.zeros((C2, 1), jnp.float32)
    # efc1 (pre-transposed to (in, out), bf16 weight bytes)
    p["wfc1"] = _xavier(ks[2], (feat, h_layer_5), feat, h_layer_5).astype(jnp.bfloat16)
    p["bfc1"] = jnp.full((1, h_layer_5), 0.01, jnp.float32)
    # mu_z / scale_z heads fused into one (in, 2*latent) matrix
    wmu = _xavier(ks[3], (h_layer_5, latent_dim), h_layer_5, latent_dim)
    wsc = _xavier(ks[4], (h_layer_5, latent_dim), h_layer_5, latent_dim)
    p["wheads"] = jnp.concatenate([wmu, wsc], axis=1)
    p["bheads"] = jnp.full((1, 2 * latent_dim), 0.01, jnp.float32)
    # dfc1 / dfc2 (pre-transposed; dfc2 in bf16)
    p["wd1"] = _xavier(ks[5], (latent_dim, h_layer_5), latent_dim, h_layer_5)
    p["bd1"] = jnp.full((1, h_layer_5), 0.01, jnp.float32)
    p["wd2"] = _xavier(ks[6], (h_layer_5, feat), h_layer_5, feat).astype(jnp.bfloat16)
    p["bd2"] = jnp.full((1, feat), 0.01, jnp.float32)
    # dconv3: torch ConvTranspose weight (C2,C1,KH,KW) -> flipped equiv-conv (C1, taps*C2)
    w3 = _xavier(ks[7], (C2, C1, KH, KW), C1 * RF, C2 * RF)
    p["w3"] = jnp.flip(w3, axis=(2, 3)).transpose(1, 2, 3, 0).reshape(C1, RF * C2)
    p["b3"] = jnp.full((C1, 1), 0.01, jnp.float32)
    p["g3"] = jnp.ones((C1, 1), jnp.float32)
    p["be3"] = jnp.zeros((C1, 1), jnp.float32)
    # dconv4: torch ConvTranspose weight (C1,1,KH,KW) -> (1, taps*C1)
    w4 = _xavier(ks[8], (C1, 1, KH, KW), 1 * RF, C1 * RF)
    p["w4"] = jnp.flip(w4, axis=(2, 3)).transpose(1, 2, 3, 0).reshape(1, RF * C1)
    p["b4"] = jnp.full((1, 1), 0.01, jnp.float32)
    return p


# ----------------------------------- forward -----------------------------------
def vae_forward(params, x, rng):
    # TODO(synk): torch RNG streams cannot be reproduced bit-exactly; dropout masks and
    # the reparam eps are drawn with jax.random and passed into the kernel as inputs.
    k_d1, k_d2, k_eps = jax.random.split(rng, 3)
    keep = 1.0 - DROP_P
    eps = jax.random.normal(k_eps, (N, latent_dim), jnp.float32)
    dmask1 = jax.random.bernoulli(k_d1, keep, (N, h_layer_5)).astype(jnp.float32) / keep
    dmask2 = jax.random.bernoulli(k_d2, keep, (N, feat)).astype(jnp.float32) / keep

    # flattened (n,h,w) channel-major input row + zero tail for shifted-slice taps
    xrow = jnp.pad(x.reshape(1, NHW), ((0, 0), (0, 2 * SH1)))

    lat, xg = run_vae(xrow, eps, dmask1, dmask2, params)

    mu_z = lat[:, :latent_dim]
    scale_z = lat[:, latent_dim:2 * latent_dim]
    z = lat[:, 2 * latent_dim:3 * latent_dim]
    x_rec = xg[:, :NG].reshape(N, GH, GW)[:, :H, :W].reshape(N, 1, img_size)
    return x_rec, mu_z, scale_z, z


# ------------------------------------- main -------------------------------------
if __name__ == "__main__":
    key = jax.random.PRNGKey(0)
    k_param, k_x, k_fwd = jax.random.split(key, 3)
    params = init_params(k_param)
    x = jax.random.uniform(k_x, (N, 1, H, W), jnp.float32)

    fwd = jax.jit(vae_forward)
    x_rec, mu_z, scale_z, z = fwd(params, x, k_fwd)
    jax.block_until_ready((x_rec, mu_z, scale_z, z))

    assert x_rec.shape == (N, 1, img_size)
    assert mu_z.shape == (N, latent_dim)
    assert scale_z.shape == (N, latent_dim)
    assert z.shape == (N, latent_dim)
    assert bool(jnp.all(jnp.isfinite(x_rec)))
    assert bool(jnp.all(jnp.isfinite(mu_z)))
    assert bool(jnp.all(jnp.isfinite(z)))
    # exact sigmoid -> strictly inside [0, 1]
    assert bool(jnp.all((x_rec >= 0.0) & (x_rec <= 1.0)))
    print("KERNEL_OK")
</pallas_src>

<mosaic_0001>
module attributes {stable_mosaic.version = 11 : i64} {
  func.func @vae_kernel(%arg0: i32, %arg1: memref<1x754xf32, #tpu.memory_space<vmem>>, %arg2: memref<8x16xf32, #tpu.memory_space<vmem>>, %arg3: memref<8x1xf32, #tpu.memory_space<vmem>>, %arg4: memref<8x1xf32, #tpu.memory_space<vmem>>, %arg5: memref<8x1xf32, #tpu.memory_space<vmem>>, %arg6: memref<1x685xf32, #tpu.memory_space<vmem>>, %arg7: memref<16x128xf32, #tpu.memory_space<vmem>>, %arg8: memref<16x1xf32, #tpu.memory_space<vmem>>, %arg9: memref<16x1xf32, #tpu.memory_space<vmem>>, %arg10: memref<16x1xf32, #tpu.memory_space<vmem>>, %arg11: memref<1x616xf32, #tpu.memory_space<vmem>>, %arg12: memref<2048x128xbf16, #tpu.memory_space<vmem>>, %arg13: memref<1x128xf32, #tpu.memory_space<vmem>>, %arg14: memref<2x128xf32, #tpu.memory_space<vmem>>, %arg15: memref<128x64xf32, #tpu.memory_space<vmem>>, %arg16: memref<1x64xf32, #tpu.memory_space<vmem>>, %arg17: memref<2x32xf32, #tpu.memory_space<vmem>>, %arg18: memref<32x128xf32, #tpu.memory_space<vmem>>, %arg19: memref<1x128xf32, #tpu.memory_space<vmem>>, %arg20: memref<128x2048xbf16, #tpu.memory_space<vmem>>, %arg21: memref<1x2048xf32, #tpu.memory_space<vmem>>, %arg22: memref<2x2048xf32, #tpu.memory_space<vmem>>, %arg23: memref<8x256xf32, #tpu.memory_space<vmem>>, %arg24: memref<8x1xf32, #tpu.memory_space<vmem>>, %arg25: memref<8x1xf32, #tpu.memory_space<vmem>>, %arg26: memref<8x1xf32, #tpu.memory_space<vmem>>, %arg27: memref<1x1207xf32, #tpu.memory_space<vmem>>, %arg28: memref<1x128xf32, #tpu.memory_space<vmem>>, %arg29: memref<1x1xf32, #tpu.memory_space<vmem>>, %arg30: memref<2x128xf32, #tpu.memory_space<vmem>>, %arg31: memref<1x1152xf32, #tpu.memory_space<vmem>>, %arg32: memref<2x2048xf32, #tpu.memory_space<vmem>>, %arg33: memref<16x256xf32, #tpu.memory_space<vmem>>, %arg34: memref<16x1294xf32, #tpu.memory_space<vmem>>) attributes {dimension_semantics = [#tpu.dimension_semantics<arbitrary>], iteration_bounds = array<i64: 1>, scalar_prefetch = 0 : i64, scratch_operands = 3 : i64, tpu.core_type = #tpu.core_type<tc>, window_params = [{pipeline_mode = #tpu.pipeline_mode<synchronous>, transform_indices = @transform_0, window_bounds = array<i64: 1, 754>}, {pipeline_mode = #tpu.pipeline_mode<synchronous>, transform_indices = @transform_1, window_bounds = array<i64: 8, 16>}, {pipeline_mode = #tpu.pipeline_mode<synchronous>, transform_indices = @transform_2, window_bounds = array<i64: 8, 1>}, {pipeline_mode = #tpu.pipeline_mode<synchronous>, transform_indices = @transform_3, window_bounds = array<i64: 8, 1>}, {pipeline_mode = #tpu.pipeline_mode<synchronous>, transform_indices = @transform_4, window_bounds = array<i64: 8, 1>}, {pipeline_mode = #tpu.pipeline_mode<synchronous>, transform_indices = @transform_5, window_bounds = array<i64: 1, 685>}, {pipeline_mode = #tpu.pipeline_mode<synchronous>, transform_indices = @transform_6, window_bounds = array<i64: 16, 128>}, {pipeline_mode = #tpu.pipeline_mode<synchronous>, transform_indices = @transform_7, window_bounds = array<i64: 16, 1>}, {pipeline_mode = #tpu.pipeline_mode<synchronous>, transform_indices = @transform_8, window_bounds = array<i64: 16, 1>}, {pipeline_mode = #tpu.pipeline_mode<synchronous>, transform_indices = @transform_9, window_bounds = array<i64: 16, 1>}, {pipeline_mode = #tpu.pipeline_mode<synchronous>, transform_indices = @transform_10, window_bounds = array<i64: 1, 616>}, {pipeline_mode = #tpu.pipeline_mode<synchronous>, transform_indices = @transform_11, window_bounds = array<i64: 2048, 128>}, {pipeline_mode = #tpu.pipeline_mode<synchronous>, transform_indices = @transform_12, window_bounds = array<i64: 1, 128>}, {pipeline_mode = #tpu.pipeline_mode<synchronous>, transform_indices = @transform_13, window_bounds = array<i64: 2, 128>}, {pipeline_mode = #tpu.pipeline_mode<synchronous>, transform_indices = @transform_14, window_bounds = array<i64: 128, 64>}, {pipeline_mode = #tpu.pipeline_mode<synchronous>, transform_indices = @transform_15, window_bounds = array<i64: 1, 64>}, {pipeline_mode = #tpu.pipeline_mode<synchronous>, transform_indices = @transform_16, window_bounds = array<i64: 2, 32>}, {pipeline_mode = #tpu.pipeline_mode<synchronous>, transform_indices = @transform_17, window_bounds = array<i64: 32, 128>}, {pipeline_mode = #tpu.pipeline_mode<synchronous>, transform_indices = @transform_18, window_bounds = array<i64: 1, 128>}, {pipeline_mode = #tpu.pipeline_mode<synchronous>, transform_indices = @transform_19, window_bounds = array<i64: 128, 2048>}, {pipeline_mode = #tpu.pipeline_mode<synchronous>, transform_indices = @transform_20, window_bounds = array<i64: 1, 2048>}, {pipeline_mode = #tpu.pipeline_mode<synchronous>, transform_indices = @transform_21, window_bounds = array<i64: 2, 2048>}, {pipeline_mode = #tpu.pipeline_mode<synchronous>, transform_indices = @transform_22, window_bounds = array<i64: 8, 256>}, {pipeline_mode = #tpu.pipeline_mode<synchronous>, transform_indices = @transform_23, window_bounds = array<i64: 8, 1>}, {pipeline_mode = #tpu.pipeline_mode<synchronous>, transform_indices = @transform_24, window_bounds = array<i64: 8, 1>}, {pipeline_mode = #tpu.pipeline_mode<synchronous>, transform_indices = @transform_25, window_bounds = array<i64: 8, 1>}, {pipeline_mode = #tpu.pipeline_mode<synchronous>, transform_indices = @transform_26, window_bounds = array<i64: 1, 1207>}, {pipeline_mode = #tpu.pipeline_mode<synchronous>, transform_indices = @transform_27, window_bounds = array<i64: 1, 128>}, {pipeline_mode = #tpu.pipeline_mode<synchronous>, transform_indices = @transform_28, window_bounds = array<i64: 1, 1>}, {pipeline_mode = #tpu.pipeline_mode<synchronous>, transform_indices = @transform_29, window_bounds = array<i64: 2, 128>}, {pipeline_mode = #tpu.pipeline_mode<synchronous>, transform_indices = @transform_30, window_bounds = array<i64: 1, 1152>}]} {
    %c0 = arith.constant 0 : index
    %c0_0 = arith.constant 0 : index
    %0 = vector.load %arg1[%c0, %c0_0] : memref<1x754xf32, #tpu.memory_space<vmem>>, vector<1x754xf32>
    %1 = vector.extract_strided_slice %0 {offsets = [0, 0], sizes = [1, 685], strides = [1, 1]} : vector<1x754xf32> to vector<1x685xf32>
    %2 = vector.extract_strided_slice %0 {offsets = [0, 1], sizes = [1, 685], strides = [1, 1]} : vector<1x754xf32> to vector<1x685xf32>
    %3 = vector.extract_strided_slice %0 {offsets = [0, 2], sizes = [1, 685], strides = [1, 1]} : vector<1x754xf32> to vector<1x685xf32>
    %4 = vector.extract_strided_slice %0 {offsets = [0, 3], sizes = [1, 685], strides = [1, 1]} : vector<1x754xf32> to vector<1x685xf32>
    %5 = vector.extract_strided_slice %0 {offsets = [0, 22], sizes = [1, 685], strides = [1, 1]} : vector<1x754xf32> to vector<1x685xf32>
    %6 = vector.extract_strided_slice %0 {offsets = [0, 23], sizes = [1, 685], strides = [1, 1]} : vector<1x754xf32> to vector<1x685xf32>
    %7 = vector.extract_strided_slice %0 {offsets = [0, 24], sizes = [1, 685], strides = [1, 1]} : vector<1x754xf32> to vector<1x685xf32>
    %8 = vector.extract_strided_slice %0 {offsets = [0, 25], sizes = [1, 685], strides = [1, 1]} : vector<1x754xf32> to vector<1x685xf32>
    %9 = vector.extract_strided_slice %0 {offsets = [0, 44], sizes = [1, 685], strides = [1, 1]} : vector<1x754xf32> to vector<1x685xf32>
    %10 = vector.extract_strided_slice %0 {offsets = [0, 45], sizes = [1, 685], strides = [1, 1]} : vector<1x754xf32> to vector<1x685xf32>
    %11 = vector.extract_strided_slice %0 {offsets = [0, 46], sizes = [1, 685], strides = [1, 1]} : vector<1x754xf32> to vector<1x685xf32>
    %12 = vector.extract_strided_slice %0 {offsets = [0, 47], sizes = [1, 685], strides = [1, 1]} : vector<1x754xf32> to vector<1x685xf32>
    %13 = vector.extract_strided_slice %0 {offsets = [0, 66], sizes = [1, 685], strides = [1, 1]} : vector<1x754xf32> to vector<1x685xf32>
    %14 = vector.extract_strided_slice %0 {offsets = [0, 67], sizes = [1, 685], strides = [1, 1]} : vector<1x754xf32> to vector<1x685xf32>
    %15 = vector.extract_strided_slice %0 {offsets = [0, 68], sizes = [1, 685], strides = [1, 1]} : vector<1x754xf32> to vector<1x685xf32>
    %16 = vector.extract_strided_slice %0 {offsets = [0, 69], sizes = [1, 685], strides = [1, 1]} : vector<1x754xf32> to vector<1x685xf32>
    %17 = tpu.concatenate %1, %2, %3, %4, %5, %6, %7, %8, %9, %10, %11, %12, %13, %14, %15, %16 in 0 : vector<1x685xf32>, vector<1x685xf32>, vector<1x685xf32>, vector<1x685xf32>, vector<1x685xf32>, vector<1x685xf32>, vector<1x685xf32>, vector<1x685xf32>, vector<1x685xf32>, vector<1x685xf32>, vector<1x685xf32>, vector<1x685xf32>, vector<1x685xf32>, vector<1x685xf32>, vector<1x685xf32>, vector<1x685xf32> -> vector<16x685xf32>
    %c0_1 = arith.constant 0 : index
    %c0_2 = arith.constant 0 : index
    %18 = vector.load %arg2[%c0_1, %c0_2] : memref<8x16xf32, #tpu.memory_space<vmem>>, vector<8x16xf32>
    %cst = arith.constant dense<0.000000e+00> : vector<8x685xf32>
    %19 = tpu.matmul %18, %17, %cst {dimension_numbers = #tpu.dot_dimension_numbers<[1], [0], [0], [1], [0, 0, 1, 1], [], []>} : vector<8x16xf32>, vector<16x685xf32>, vector<8x685xf32> -> vector<8x685xf32>
    %c0_3 = arith.constant 0 : index
    %c0_4 = arith.constant 0 : index
    %20 = vector.load %arg3[%c0_3, %c0_4] : memref<8x1xf32, #tpu.memory_space<vmem>>, vector<8x1xf32>
    %21 = vector.broadcast %20 : vector<8x1xf32> to vector<8x685xf32>
    %22 = arith.addf %19, %21 : vector<8x685xf32>
    %c0_5 = arith.constant 0 : index
    %c0_6 = arith.constant 0 : index
    %23 = vector.load %arg6[%c0_5, %c0_6] : memref<1x685xf32, #tpu.memory_space<vmem>>, vector<1x685xf32>
    %c0_7 = arith.constant 0 : index
    %c0_8 = arith.constant 0 : index
    %24 = vector.load %arg4[%c0_7, %c0_8] : memref<8x1xf32, #tpu.memory_space<vmem>>, vector<8x1xf32>
    %c0_9 = arith.constant 0 : index
    %c0_10 = arith.constant 0 : index
    %25 = vector.load %arg5[%c0_9, %c0_10] : memref<8x1xf32, #tpu.memory_space<vmem>>, vector<8x1xf32>
    %26 = vector.broadcast %23 : vector<1x685xf32> to vector<8x685xf32>
    %27 = arith.mulf %22, %26 : vector<8x685xf32>
    %cst_11 = arith.constant dense<0.000000e+00> : vector<8xf32>
    %28 = vector.multi_reduction <add>, %27, %cst_11 [1] : vector<8x685xf32> to vector<8xf32>
    %29 = vector.shape_cast %28 : vector<8xf32> to vector<8x1xf32>
    %cst_12 = arith.constant 0.00239234441 : f32
    %30 = vector.broadcast %cst_12 : f32 to vector<8x1xf32>
    %31 = arith.mulf %29, %30 : vector<8x1xf32>
    %32 = vector.broadcast %31 : vector<8x1xf32> to vector<8x685xf32>
    %33 = arith.subf %22, %32 : vector<8x685xf32>
    %34 = arith.mulf %33, %33 : vector<8x685xf32>
    %35 = vector.broadcast %23 : vector<1x685xf32> to vector<8x685xf32>
    %36 = arith.mulf %34, %35 : vector<8x685xf32>
    %cst_13 = arith.constant dense<0.000000e+00> : vector<8xf32>
    %37 = vector.multi_reduction <add>, %36, %cst_13 [1] : vector<8x685xf32> to vector<8xf32>
    %38 = vector.shape_cast %37 : vector<8xf32> to vector<8x1xf32>
    %cst_14 = arith.constant 0.00239234441 : f32
    %39 = vector.broadcast %cst_14 : f32 to vector<8x1xf32>
    %40 = arith.mulf %38, %39 : vector<8x1xf32>
    %cst_15 = arith.constant 9.99999974E-6 : f32
    %41 = vector.broadcast %cst_15 : f32 to vector<8x1xf32>
    %42 = arith.addf %40, %41 : vector<8x1xf32>
    %43 = math.rsqrt %42 : vector<8x1xf32>
    %44 = vector.broadcast %43 : vector<8x1xf32> to vector<8x685xf32>
    %45 = arith.mulf %33, %44 : vector<8x685xf32>
    %46 = vector.broadcast %24 : vector<8x1xf32> to vector<8x685xf32>
    %47 = arith.mulf %45, %46 : vector<8x685xf32>
    %48 = vector.broadcast %25 : vector<8x1xf32> to vector<8x685xf32>
    %49 = arith.addf %47, %48 : vector<8x685xf32>
    %cst_16 = arith.constant 0.000000e+00 : f32
    %50 = vector.broadcast %cst_16 : f32 to vector<8x685xf32>
    %51 = arith.cmpf oge, %49, %50 : vector<8x685xf32>
    %cst_17 = arith.constant 0.00999999977 : f32
    %52 = vector.broadcast %cst_17 : f32 to vector<8x685xf32>
    %53 = arith.mulf %52, %49 : vector<8x685xf32>
    %54 = arith.select %51, %49, %53 : vector<8x685xi1>, vector<8x685xf32>
    %55 = vector.extract_strided_slice %54 {offsets = [0, 0], sizes = [8, 616], strides = [1, 1]} : vector<8x685xf32> to vector<8x616xf32>
    %56 = vector.extract_strided_slice %54 {offsets = [0, 1], sizes = [8, 616], strides = [1, 1]} : vector<8x685xf32> to vector<8x616xf32>
    %57 = vector.extract_strided_slice %54 {offsets = [0, 2], sizes = [8, 616], strides = [1, 1]} : vector<8x685xf32> to vector<8x616xf32>
    %58 = vector.extract_strided_slice %54 {offsets = [0, 3], sizes = [8, 616], strides = [1, 1]} : vector<8x685xf32> to vector<8x616xf32>
    %59 = vector.extract_strided_slice %54 {offsets = [0, 22], sizes = [8, 616], strides = [1, 1]} : vector<8x685xf32> to vector<8x616xf32>
    %60 = vector.extract_strided_slice %54 {offsets = [0, 23], sizes = [8, 616], strides = [1, 1]} : vector<8x685xf32> to vector<8x616xf32>
    %61 = vector.extract_strided_slice %54 {offsets = [0, 24], sizes = [8, 616], strides = [1, 1]} : vector<8x685xf32> to vector<8x616xf32>
    %62 = vector.extract_strided_slice %54 {offsets = [0, 25], sizes = [8, 616], strides = [1, 1]} : vector<8x685xf32> to vector<8x616xf32>
    %63 = vector.extract_strided_slice %54 {offsets = [0, 44], sizes = [8, 616], strides = [1, 1]} : vector<8x685xf32> to vector<8x616xf32>
    %64 = vector.extract_strided_slice %54 {offsets = [0, 45], sizes = [8, 616], strides = [1, 1]} : vector<8x685xf32> to vector<8x616xf32>
    %65 = vector.extract_strided_slice %54 {offsets = [0, 46], sizes = [8, 616], strides = [1, 1]} : vector<8x685xf32> to vector<8x616xf32>
    %66 = vector.extract_strided_slice %54 {offsets = [0, 47], sizes = [8, 616], strides = [1, 1]} : vector<8x685xf32> to vector<8x616xf32>
    %67 = vector.extract_strided_slice %54 {offsets = [0, 66], sizes = [8, 616], strides = [1, 1]} : vector<8x685xf32> to vector<8x616xf32>
    %68 = vector.extract_strided_slice %54 {offsets = [0, 67], sizes = [8, 616], strides = [1, 1]} : vector<8x685xf32> to vector<8x616xf32>
    %69 = vector.extract_strided_slice %54 {offsets = [0, 68], sizes = [8, 616], strides = [1, 1]} : vector<8x685xf32> to vector<8x616xf32>
    %70 = vector.extract_strided_slice %54 {offsets = [0, 69], sizes = [8, 616], strides = [1, 1]} : vector<8x685xf32> to vector<8x616xf32>
    %71 = tpu.concatenate %55, %56, %57, %58, %59, %60, %61, %62, %63, %64, %65, %66, %67, %68, %69, %70 in 0 : vector<8x616xf32>, vector<8x616xf32>, vector<8x616xf32>, vector<8x616xf32>, vector<8x616xf32>, vector<8x616xf32>, vector<8x616xf32>, vector<8x616xf32>, vector<8x616xf32>, vector<8x616xf32>, vector<8x616xf32>, vector<8x616xf32>, vector<8x616xf32>, vector<8x616xf32>, vector<8x616xf32>, vector<8x616xf32> -> vector<128x616xf32>
    %c0_18 = arith.constant 0 : index
    %c0_19 = arith.constant 0 : index
    %72 = vector.load %arg7[%c0_18, %c0_19] : memref<16x128xf32, #tpu.memory_space<vmem>>, vector<16x128xf32>
    %cst_20 = arith.constant dense<0.000000e+00> : vector<16x616xf32>
    %73 = tpu.matmul %72, %71, %cst_20 {dimension_numbers = #tpu.dot_dimension_numbers<[1], [0], [0], [1], [0, 0, 1, 1], [], []>} : vector<16x128xf32>, vector<128x616xf32>, vector<16x616xf32> -> vector<16x616xf32>
    %c0_21 = arith.constant 0 : index
    %c0_22 = arith.constant 0 : index
    %74 = vector.load %arg8[%c0_21, %c0_22] : memref<16x1xf32, #tpu.memory_space<vmem>>, vector<16x1xf32>
    %75 = vector.broadcast %74 : vector<16x1xf32> to vector<16x616xf32>
    %76 = arith.addf %73, %75 : vector<16x616xf32>
    %c0_23 = arith.constant 0 : index
    %c0_24 = arith.constant 0 : index
    %77 = vector.load %arg11[%c0_23, %c0_24] : memref<1x616xf32, #tpu.memory_space<vmem>>, vector<1x616xf32>
    %c0_25 = arith.constant 0 : index
    %c0_26 = arith.constant 0 : index
    %78 = vector.load %arg9[%c0_25, %c0_26] : memref<16x1xf32, #tpu.memory_space<vmem>>, vector<16x1xf32>
    %c0_27 = arith.constant 0 : index
    %c0_28 = arith.constant 0 : index
    %79 = vector.load %arg10[%c0_27, %c0_28] : memref<16x1xf32, #tpu.memory_space<vmem>>, vector<16x1xf32>
    %80 = vector.broadcast %77 : vector<1x616xf32> to vector<16x616xf32>
    %81 = arith.mulf %76, %80 : vector<16x616xf32>
    %cst_29 = arith.constant dense<0.000000e+00> : vector<16xf32>
    %82 = vector.multi_reduction <add>, %81, %cst_29 [1] : vector<16x616xf32> to vector<16xf32>
    %83 = vector.shape_cast %82 : vector<16xf32> to vector<16x1xf32>
    %cst_30 = arith.constant 3.906250e-03 : f32
    %84 = vector.broadcast %cst_30 : f32 to vector<16x1xf32>
    %85 = arith.mulf %83, %84 : vector<16x1xf32>
    %86 = vector.broadcast %85 : vector<16x1xf32> to vector<16x616xf32>
    %87 = arith.subf %76, %86 : vector<16x616xf32>
    %88 = arith.mulf %87, %87 : vector<16x616xf32>
    %89 = vector.broadcast %77 : vector<1x616xf32> to vector<16x616xf32>
    %90 = arith.mulf %88, %89 : vector<16x616xf32>
    %cst_31 = arith.constant dense<0.000000e+00> : vector<16xf32>
    %91 = vector.multi_reduction <add>, %90, %cst_31 [1] : vector<16x616xf32> to vector<16xf32>
    %92 = vector.shape_cast %91 : vector<16xf32> to vector<16x1xf32>
    %cst_32 = arith.constant 3.906250e-03 : f32
    %93 = vector.broadcast %cst_32 : f32 to vector<16x1xf32>
    %94 = arith.mulf %92, %93 : vector<16x1xf32>
    %cst_33 = arith.constant 9.99999974E-6 : f32
    %95 = vector.broadcast %cst_33 : f32 to vector<16x1xf32>
    %96 = arith.addf %94, %95 : vector<16x1xf32>
    %97 = math.rsqrt %96 : vector<16x1xf32>
    %98 = vector.broadcast %97 : vector<16x1xf32> to vector<16x616xf32>
    %99 = arith.mulf %87, %98 : vector<16x616xf32>
    %100 = vector.broadcast %78 : vector<16x1xf32> to vector<16x616xf32>
    %101 = arith.mulf %99, %100 : vector<16x616xf32>
    %102 = vector.broadcast %79 : vector<16x1xf32> to vector<16x616xf32>
    %103 = arith.addf %101, %102 : vector<16x616xf32>
    %cst_34 = arith.constant 0.000000e+00 : f32
    %104 = vector.broadcast %cst_34 : f32 to vector<16x616xf32>
    %105 = arith.cmpf oge, %103, %104 : vector<16x616xf32>
    %cst_35 = arith.constant 0.00999999977 : f32
    %106 = vector.broadcast %cst_35 : f32 to vector<16x616xf32>
    %107 = arith.mulf %106, %103 : vector<16x616xf32>
    %108 = arith.select %105, %103, %107 : vector<16x616xi1>, vector<16x616xf32>
    %109 = vector.extract_strided_slice %108 {offsets = [0, 0], sizes = [16, 16], strides = [1, 1]} : vector<16x616xf32> to vector<16x16xf32>
    %110 = vector.extract_strided_slice %108 {offsets = [0, 22], sizes = [16, 16], strides = [1, 1]} : vector<16x616xf32> to vector<16x16xf32>
    %111 = vector.extract_strided_slice %108 {offsets = [0, 44], sizes = [16, 16], strides = [1, 1]} : vector<16x616xf32> to vector<16x16xf32>
    %112 = vector.extract_strided_slice %108 {offsets = [0, 66], sizes = [16, 16], strides = [1, 1]} : vector<16x616xf32> to vector<16x16xf32>
    %113 = vector.extract_strided_slice %108 {offsets = [0, 88], sizes = [16, 16], strides = [1, 1]} : vector<16x616xf32> to vector<16x16xf32>
    %114 = vector.extract_strided_slice %108 {offsets = [0, 110], sizes = [16, 16], strides = [1, 1]} : vector<16x616xf32> to vector<16x16xf32>
    %115 = vector.extract_strided_slice %108 {offsets = [0, 132], sizes = [16, 16], strides = [1, 1]} : vector<16x616xf32> to vector<16x16xf32>
    %116 = vector.extract_strided_slice %108 {offsets = [0, 154], sizes = [16, 16], strides = [1, 1]} : vector<16x616xf32> to vector<16x16xf32>
    %117 = tpu.concatenate %109, %110, %111, %112, %113, %114, %115, %116 in 1 : vector<16x16xf32>, vector<16x16xf32>, vector<16x16xf32>, vector<16x16xf32>, vector<16x16xf32>, vector<16x16xf32>, vector<16x16xf32>, vector<16x16xf32> -> vector<16x128xf32>
    %118 = vector.extract_strided_slice %117 {offsets = [0, 0], sizes = [1, 128], strides = [1, 1]} : vector<16x128xf32> to vector<1x128xf32>
    %c0_36 = arith.constant 0 : index
    %c0_37 = arith.constant 0 : index
    %119 = vector.load %arg32[%c0_36, %c0_37] : memref<2x2048xf32, #tpu.memory_space<vmem>>, vector<1x128xf32>
    tpu.vector_store %arg32[%c0_36, %c0_37], %118 {strides = array<i32>} : memref<2x2048xf32, #tpu.memory_space<vmem>>, vector<1x128xf32>,
    %120 = vector.extract_strided_slice %117 {offsets = [1, 0], sizes = [1, 128], strides = [1, 1]} : vector<16x128xf32> to vector<1x128xf32>
    %c0_38 = arith.constant 0 : index
    %c128 = arith.constant 128 : index
    %121 = vector.load %arg32[%c0_38, %c128] : memref<2x2048xf32, #tpu.memory_space<vmem>>, vector<1x128xf32>
    tpu.vector_store %arg32[%c0_38, %c128], %120 {strides = array<i32>} : memref<2x2048xf32, #tpu.memory_space<vmem>>, vector<1x128xf32>,
    %122 = vector.extract_strided_slice %117 {offsets = [2, 0], sizes = [1, 128], strides = [1, 1]} : vector<16x128xf32> to vector<1x128xf32>
    %c0_39 = arith.constant 0 : index
    %c256 = arith.constant 256 : index
    %123 = vector.load %arg32[%c0_39, %c256] : memref<2x2048xf32, #tpu.memory_space<vmem>>, vector<1x128xf32>
    tpu.vector_store %arg32[%c0_39, %c256], %122 {strides = array<i32>} : memref<2x2048xf32, #tpu.memory_space<vmem>>, vector<1x128xf32>,
    %124 = vector.extract_strided_slice %117 {offsets = [3, 0], sizes = [1, 128], strides = [1, 1]} : vector<16x128xf32> to vector<1x128xf32>
    %c0_40 = arith.constant 0 : index
    %c384 = arith.constant 384 : index
    %125 = vector.load %arg32[%c0_40, %c384] : memref<2x2048xf32, #tpu.memory_space<vmem>>, vector<1x128xf32>
    tpu.vector_store %arg32[%c0_40, %c384], %124 {strides = array<i32>} : memref<2x2048xf32, #tpu.memory_space<vmem>>, vector<1x128xf32>,
    %126 = vector.extract_strided_slice %117 {offsets = [4, 0], sizes = [1, 128], strides = [1, 1]} : vector<16x128xf32> to vector<1x128xf32>
    %c0_41 = arith.constant 0 : index
    %c512 = arith.constant 512 : index
    %127 = vector.load %arg32[%c0_41, %c512] : memref<2x2048xf32, #tpu.memory_space<vmem>>, vector<1x128xf32>
    tpu.vector_store %arg32[%c0_41, %c512], %126 {strides = array<i32>} : memref<2x2048xf32, #tpu.memory_space<vmem>>, vector<1x128xf32>,
    %128 = vector.extract_strided_slice %117 {offsets = [5, 0], sizes = [1, 128], strides = [1, 1]} : vector<16x128xf32> to vector<1x128xf32>
    %c0_42 = arith.constant 0 : index
    %c640 = arith.constant 640 : index
    %129 = vector.load %arg32[%c0_42, %c640] : memref<2x2048xf32, #tpu.memory_space<vmem>>, vector<1x128xf32>
    tpu.vector_store %arg32[%c0_42, %c640], %128 {strides = array<i32>} : memref<2x2048xf32, #tpu.memory_space<vmem>>, vector<1x128xf32>,
    %130 = vector.extract_strided_slice %117 {offsets = [6, 0], sizes = [1, 128], strides = [1, 1]} : vector<16x128xf32> to vector<1x128xf32>
    %c0_43 = arith.constant 0 : index
    %c768 = arith.constant 768 : index
    %131 = vector.load %arg32[%c0_43, %c768] : memref<2x2048xf32, #tpu.memory_space<vmem>>, vector<1x128xf32>
    tpu.vector_store %arg32[%c0_43, %c768], %130 {strides = array<i32>} : memref<2x2048xf32, #tpu.memory_space<vmem>>, vector<1x128xf32>,
    %132 = vector.extract_strided_slice %117 {offsets = [7, 0], sizes = [1, 128], strides = [1, 1]} : vector<16x128xf32> to vector<1x128xf32>
    %c0_44 = arith.constant 0 : index
    %c896 = arith.constant 896 : index
    %133 = vector.load %arg32[%c0_44, %c896] : memref<2x2048xf32, #tpu.memory_space<vmem>>, vector<1x128xf32>
    tpu.vector_store %arg32[%c0_44, %c896], %132 {strides = array<i32>} : memref<2x2048xf32, #tpu.memory_space<vmem>>, vector<1x128xf32>,
    %134 = vector.extract_strided_slice %117 {offsets = [8, 0], sizes = [1, 128], strides = [1, 1]} : vector<16x128xf32> to vector<1x128xf32>
    %c0_45 = arith.constant 0 : index
    %c1024 = arith.constant 1024 : index
    %135 = vector.load %arg32[%c0_45, %c1024] : memref<2x2048xf32, #tpu.memory_space<vmem>>, vector<1x128xf32>
    tpu.vector_store %arg32[%c0_45, %c1024], %134 {strides = array<i32>} : memref<2x2048xf32, #tpu.memory_space<vmem>>, vector<1x128xf32>,
    %136 = vector.extract_strided_slice %117 {offsets = [9, 0], sizes = [1, 128], strides = [1, 1]} : vector<16x128xf32> to vector<1x128xf32>
    %c0_46 = arith.constant 0 : index
    %c1152 = arith.constant 1152 : index
    %137 = vector.load %arg32[%c0_46, %c1152] : memref<2x2048xf32, #tpu.memory_space<vmem>>, vector<1x128xf32>
    tpu.vector_store %arg32[%c0_46, %c1152], %136 {strides = array<i32>} : memref<2x2048xf32, #tpu.memory_space<vmem>>, vector<1x128xf32>,
    %138 = vector.extract_strided_slice %117 {offsets = [10, 0], sizes = [1, 128], strides = [1, 1]} : vector<16x128xf32> to vector<1x128xf32>
    %c0_47 = arith.constant 0 : index
    %c1280 = arith.constant 1280 : index
    %139 = vector.load %arg32[%c0_47, %c1280] : memref<2x2048xf32, #tpu.memory_space<vmem>>, vector<1x128xf32>
    tpu.vector_store %arg32[%c0_47, %c1280], %138 {strides = array<i32>} : memref<2x2048xf32, #tpu.memory_space<vmem>>, vector<1x128xf32>,
    %140 = vector.extract_strided_slice %117 {offsets = [11, 0], sizes = [1, 128], strides = [1, 1]} : vector<16x128xf32> to vector<1x128xf32>
    %c0_48 = arith.constant 0 : index
    %c1408 = arith.constant 1408 : index
    %141 = vector.load %arg32[%c0_48, %c1408] : memref<2x2048xf32, #tpu.memory_space<vmem>>, vector<1x128xf32>
    tpu.vector_store %arg32[%c0_48, %c1408], %140 {strides = array<i32>} : memref<2x2048xf32, #tpu.memory_space<vmem>>, vector<1x128xf32>,
    %142 = vector.extract_strided_slice %117 {offsets = [12, 0], sizes = [1, 128], strides = [1, 1]} : vector<16x128xf32> to vector<1x128xf32>
    %c0_49 = arith.constant 0 : index
    %c1536 = arith.constant 1536 : index
    %143 = vector.load %arg32[%c0_49, %c1536] : memref<2x2048xf32, #tpu.memory_space<vmem>>, vector<1x128xf32>
    tpu.vector_store %arg32[%c0_49, %c1536], %142 {strides = array<i32>} : memref<2x2048xf32, #tpu.memory_space<vmem>>, vector<1x128xf32>,
    %144 = vector.extract_strided_slice %117 {offsets = [13, 0], sizes = [1, 128], strides = [1, 1]} : vector<16x128xf32> to vector<1x128xf32>
    %c0_50 = arith.constant 0 : index
    %c1664 = arith.constant 1664 : index
    %145 = vector.load %arg32[%c0_50, %c1664] : memref<2x2048xf32, #tpu.memory_space<vmem>>, vector<1x128xf32>
    tpu.vector_store %arg32[%c0_50, %c1664], %144 {strides = array<i32>} : memref<2x2048xf32, #tpu.memory_space<vmem>>, vector<1x128xf32>,
    %146 = vector.extract_strided_slice %117 {offsets = [14, 0], sizes = [1, 128], strides = [1, 1]} : vector<16x128xf32> to vector<1x128xf32>
    %c0_51 = arith.constant 0 : index
    %c1792 = arith.constant 1792 : index
    %147 = vector.load %arg32[%c0_51, %c1792] : memref<2x2048xf32, #tpu.memory_space<vmem>>, vector<1x128xf32>
    tpu.vector_store %arg32[%c0_51, %c1792], %146 {strides = array<i32>} : memref<2x2048xf32, #tpu.memory_space<vmem>>, vector<1x128xf32>,
    %148 = vector.extract_strided_slice %117 {offsets = [15, 0], sizes = [1, 128], strides = [1, 1]} : vector<16x128xf32> to vector<1x128xf32>
    %c0_52 = arith.constant 0 : index
    %c1920 = arith.constant 1920 : index
    %149 = vector.load %arg32[%c0_52, %c1920] : memref<2x2048xf32, #tpu.memory_space<vmem>>, vector<1x128xf32>
    tpu.vector_store %arg32[%c0_52, %c1920], %148 {strides = array<i32>} : memref<2x2048xf32, #tpu.memory_space<vmem>>, vector<1x128xf32>,
    %150 = vector.extract_strided_slice %108 {offsets = [0, 308], sizes = [16, 16], strides = [1, 1]} : vector<16x616xf32> to vector<16x16xf32>
    %151 = vector.extract_strided_slice %108 {offsets = [0, 330], sizes = [16, 16], strides = [1, 1]} : vector<16x616xf32> to vector<16x16xf32>
    %152 = vector.extract_strided_slice %108 {offsets = [0, 352], sizes = [16, 16], strides = [1, 1]} : vector<16x616xf32> to vector<16x16xf32>
    %153 = vector.extract_strided_slice %108 {offsets = [0, 374], sizes = [16, 16], strides = [1, 1]} : vector<16x616xf32> to vector<16x16xf32>
    %154 = vector.extract_strided_slice %108 {offsets = [0, 396], sizes = [16, 16], strides = [1, 1]} : vector<16x616xf32> to vector<16x16xf32>
    %155 = vector.extract_strided_slice %108 {offsets = [0, 418], sizes = [16, 16], strides = [1, 1]} : vector<16x616xf32> to vector<16x16xf32>
    %156 = vector.extract_strided_slice %108 {offsets = [0, 440], sizes = [16, 16], strides = [1, 1]} : vector<16x616xf32> to vector<16x16xf32>
    %157 = vector.extract_strided_slice %108 {offsets = [0, 462], sizes = [16, 16], strides = [1, 1]} : vector<16x616xf32> to vector<16x16xf32>
    %158 = tpu.concatenate %150, %151, %152, %153, %154, %155, %156, %157 in 1 : vector<16x16xf32>, vector<16x16xf32>, vector<16x16xf32>, vector<16x16xf32>, vector<16x16xf32>, vector<16x16xf32>, vector<16x16xf32>, vector<16x16xf32> -> vector<16x128xf32>
    %159 = vector.extract_strided_slice %158 {offsets = [0, 0], sizes = [1, 128], strides = [1, 1]} : vector<16x128xf32> to vector<1x128xf32>
    %c1 = arith.constant 1 : index
    %c0_53 = arith.constant 0 : index
    %160 = vector.load %arg32[%c1, %c0_53] : memref<2x2048xf32, #tpu.memory_space<vmem>>, vector<1x128xf32>
    tpu.vector_store %arg32[%c1, %c0_53], %159 {strides = array<i32>} : memref<2x2048xf32, #tpu.memory_space<vmem>>, vector<1x128xf32>,
    %161 = vector.extract_strided_slice %158 {offsets = [1, 0], sizes = [1, 128], strides = [1, 1]} : vector<16x128xf32> to vector<1x128xf32>
    %c1_54 = arith.constant 1 : index
    %c128_55 = arith.constant 128 : index
    %162 = vector.load %arg32[%c1_54, %c128_55] : memref<2x2048xf32, #tpu.memory_space<vmem>>, vector<1x128xf32>
    tpu.vector_store %arg32[%c1_54, %c128_55], %161 {strides = array<i32>} : memref<2x2048xf32, #tpu.memory_space<vmem>>, vector<1x128xf32>,
    %163 = vector.extract_strided_slice %158 {offsets = [2, 0], sizes = [1, 128], strides = [1, 1]} : vector<16x128xf32> to vector<1x128xf32>
    %c1_56 = arith.constant 1 : index
    %c256_57 = arith.constant 256 : index
    %164 = vector.load %arg32[%c1_56, %c256_57] : memref<2x2048xf32, #tpu.memory_space<vmem>>, vector<1x128xf32>
    tpu.vector_store %arg32[%c1_56, %c256_57], %163 {strides = array<i32>} : memref<2x2048xf32, #tpu.memory_space<vmem>>, vector<1x128xf32>,
    %165 = vector.extract_strided_slice %158 {offsets = [3, 0], sizes = [1, 128], strides = [1, 1]} : vector<16x128xf32> to vector<1x128xf32>
    %c1_58 = arith.constant 1 : index
    %c384_59 = arith.constant 384 : index
    %166 = vector.load %arg32[%c1_58, %c384_59] : memref<2x2048xf32, #tpu.memory_space<vmem>>, vector<1x128xf32>
    tpu.vector_store %arg32[%c1_58, %c384_59], %165 {strides = array<i32>} : memref<2x2048xf32, #tpu.memory_space<vmem>>, vector<1x128xf32>,
    %167 = vector.extract_strided_slice %158 {offsets = [4, 0], sizes = [1, 128], strides = [1, 1]} : vector<16x128xf32> to vector<1x128xf32>
    %c1_60 = arith.constant 1 : index
    %c512_61 = arith.constant 512 : index
    %168 = vector.load %arg32[%c1_60, %c512_61] : memref<2x2048xf32, #tpu.memory_space<vmem>>, vector<1x128xf32>
    tpu.vector_store %arg32[%c1_60, %c512_61], %167 {strides = array<i32>} : memref<2x2048xf32, #tpu.memory_space<vmem>>, vector<1x128xf32>,
    %169 = vector.extract_strided_slice %158 {offsets = [5, 0], sizes = [1, 128], strides = [1, 1]} : vector<16x128xf32> to vector<1x128xf32>
    %c1_62 = arith.constant 1 : index
    %c640_63 = arith.constant 640 : index
    %170 = vector.load %arg32[%c1_62, %c640_63] : memref<2x2048xf32, #tpu.memory_space<vmem>>, vector<1x128xf32>
    tpu.vector_store %arg32[%c1_62, %c640_63], %169 {strides = array<i32>} : memref<2x2048xf32, #tpu.memory_space<vmem>>, vector<1x128xf32>,
    %171 = vector.extract_strided_slice %158 {offsets = [6, 0], sizes = [1, 128], strides = [1, 1]} : vector<16x128xf32> to vector<1x128xf32>
    %c1_64 = arith.constant 1 : index
    %c768_65 = arith.constant 768 : index
    %172 = vector.load %arg32[%c1_64, %c768_65] : memref<2x2048xf32, #tpu.memory_space<vmem>>, vector<1x128xf32>
    tpu.vector_store %arg32[%c1_64, %c768_65], %171 {strides = array<i32>} : memref<2x2048xf32, #tpu.memory_space<vmem>>, vector<1x128xf32>,
    %173 = vector.extract_strided_slice %158 {offsets = [7, 0], sizes = [1, 128], strides = [1, 1]} : vector<16x128xf32> to vector<1x128xf32>
    %c1_66 = arith.constant 1 : index
    %c896_67 = arith.constant 896 : index
    %174 = vector.load %arg32[%c1_66, %c896_67] : memref<2x2048xf32, #tpu.memory_space<vmem>>, vector<1x128xf32>
    tpu.vector_store %arg32[%c1_66, %c896_67], %173 {strides = array<i32>} : memref<2x2048xf32, #tpu.memory_space<vmem>>, vector<1x128xf32>,
    %175 = vector.extract_strided_slice %158 {offsets = [8, 0], sizes = [1, 128], strides = [1, 1]} : vector<16x128xf32> to vector<1x128xf32>
    %c1_68 = arith.constant 1 : index
    %c1024_69 = arith.constant 1024 : index
    %176 = vector.load %arg32[%c1_68, %c1024_69] : memref<2x2048xf32, #tpu.memory_space<vmem>>, vector<1x128xf32>
    tpu.vector_store %arg32[%c1_68, %c1024_69], %175 {strides = array<i32>} : memref<2x2048xf32, #tpu.memory_space<vmem>>, vector<1x128xf32>,
    %177 = vector.extract_strided_slice %158 {offsets = [9, 0], sizes = [1, 128], strides = [1, 1]} : vector<16x128xf32> to vector<1x128xf32>
    %c1_70 = arith.constant 1 : index
    %c1152_71 = arith.constant 1152 : index
    %178 = vector.load %arg32[%c1_70, %c1152_71] : memref<2x2048xf32, #tpu.memory_space<vmem>>, vector<1x128xf32>
    tpu.vector_store %arg32[%c1_70, %c1152_71], %177 {strides = array<i32>} : memref<2x2048xf32, #tpu.memory_space<vmem>>, vector<1x128xf32>,
    %179 = vector.extract_strided_slice %158 {offsets = [10, 0], sizes = [1, 128], strides = [1, 1]} : vector<16x128xf32> to vector<1x128xf32>
    %c1_72 = arith.constant 1 : index
    %c1280_73 = arith.constant 1280 : index
    %180 = vector.load %arg32[%c1_72, %c1280_73] : memref<2x2048xf32, #tpu.memory_space<vmem>>, vector<1x128xf32>
    tpu.vector_store %arg32[%c1_72, %c1280_73], %179 {strides = array<i32>} : memref<2x2048xf32, #tpu.memory_space<vmem>>, vector<1x128xf32>,
    %181 = vector.extract_strided_slice %158 {offsets = [11, 0], sizes = [1, 128], strides = [1, 1]} : vector<16x128xf32> to vector<1x128xf32>
    %c1_74 = arith.constant 1 : index
    %c1408_75 = arith.constant 1408 : index
    %182 = vector.load %arg32[%c1_74, %c1408_75] : memref<2x2048xf32, #tpu.memory_space<vmem>>, vector<1x128xf32>
    tpu.vector_store %arg32[%c1_74, %c1408_75], %181 {strides = array<i32>} : memref<2x2048xf32, #tpu.memory_space<vmem>>, vector<1x128xf32>,
    %183 = vector.extract_strided_slice %158 {offsets = [12, 0], sizes = [1, 128], strides = [1, 1]} : vector<16x128xf32> to vector<1x128xf32>
    %c1_76 = arith.constant 1 : index
    %c1536_77 = arith.constant 1536 : index
    %184 = vector.load %arg32[%c1_76, %c1536_77] : memref<2x2048xf32, #tpu.memory_space<vmem>>, vector<1x128xf32>
    tpu.vector_store %arg32[%c1_76, %c1536_77], %183 {strides = array<i32>} : memref<2x2048xf32, #tpu.memory_space<vmem>>, vector<1x128xf32>,
    %185 = vector.extract_strided_slice %158 {offsets = [13, 0], sizes = [1, 128], strides = [1, 1]} : vector<16x128xf32> to vector<1x128xf32>
    %c1_78 = arith.constant 1 : index
    %c1664_79 = arith.constant 1664 : index
    %186 = vector.load %arg32[%c1_78, %c1664_79] : memref<2x2048xf32, #tpu.memory_space<vmem>>, vector<1x128xf32>
    tpu.vector_store %arg32[%c1_78, %c1664_79], %185 {strides = array<i32>} : memref<2x2048xf32, #tpu.memory_space<vmem>>, vector<1x128xf32>,
    %187 = vector.extract_strided_slice %158 {offsets = [14, 0], sizes = [1, 128], strides = [1, 1]} : vector<16x128xf32> to vector<1x128xf32>
    %c1_80 = arith.constant 1 : index
    %c1792_81 = arith.constant 1792 : index
    %188 = vector.load %arg32[%c1_80, %c1792_81] : memref<2x2048xf32, #tpu.memory_space<vmem>>, vector<1x128xf32>
    tpu.vector_store %arg32[%c1_80, %c1792_81], %187 {strides = array<i32>} : memref<2x2048xf32, #tpu.memory_space<vmem>>, vector<1x128xf32>,
    %189 = vector.extract_strided_slice %158 {offsets = [15, 0], sizes = [1, 128], strides = [1, 1]} : vector<16x128xf32> to vector<1x128xf32>
    %c1_82 = arith.constant 1 : index
    %c1920_83 = arith.constant 1920 : index
    %190 = vector.load %arg32[%c1_82, %c1920_83] : memref<2x2048xf32, #tpu.memory_space<vmem>>, vector<1x128xf32>
    tpu.vector_store %arg32[%c1_82, %c1920_83], %189 {strides = array<i32>} : memref<2x2048xf32, #tpu.memory_space<vmem>>, vector<1x128xf32>,
    %c0_84 = arith.constant 0 : index
    %c0_85 = arith.constant 0 : index
    %191 = vector.load %arg32[%c0_84, %c0_85] : memref<2x2048xf32, #tpu.memory_space<vmem>>, vector<2x2048xf32>
    %192 = arith.truncf %191 : vector<2x2048xf32> to vector<2x2048xbf16>
    %c0_86 = arith.constant 0 : index
    %c0_87 = arith.constant 0 : index
    %193 = vector.load %arg12[%c0_86, %c0_87] : memref<2048x128xbf16, #tpu.memory_space<vmem>>, vector<2048x128xbf16>
    %cst_88 = arith.constant dense<0.000000e+00> : vector<2x128xf32>
    %194 = tpu.matmul %192, %193, %cst_88 {dimension_numbers = #tpu.dot_dimension_numbers<[1], [0], [0], [1], [0, 0, 1, 1], [], []>} : vector<2x2048xbf16>, vector<2048x128xbf16>, vector<2x128xf32> -> vector<2x128xf32>
    %c0_89 = arith.constant 0 : index
    %c0_90 = arith.constant 0 : index
    %195 = vector.load %arg13[%c0_89, %c0_90] : memref<1x128xf32, #tpu.memory_space<vmem>>, vector<1x128xf32>
    %196 = vector.broadcast %195 : vector<1x128xf32> to vector<2x128xf32>
    %197 = arith.addf %194, %196 : vector<2x128xf32>
    %c0_91 = arith.constant 0 : index
    %c0_92 = arith.constant 0 : index
    %198 = vector.load %arg14[%c0_91, %c0_92] : memref<2x128xf32, #tpu.memory_space<vmem>>, vector<2x128xf32>
    %199 = arith.mulf %197, %198 : vector<2x128xf32>
    %cst_93 = arith.constant 0.000000e+00 : f32
    %200 = vector.broadcast %cst_93 : f32 to vector<2x128xf32>
    %201 = arith.cmpf oge, %199, %200 : vector<2x128xf32>
    %cst_94 = arith.constant 0.00999999977 : f32
    %202 = vector.broadcast %cst_94 : f32 to vector<2x128xf32>
    %203 = arith.mulf %202, %199 : vector<2x128xf32>
    %204 = arith.select %201, %199, %203 : vector<2x128xi1>, vector<2x128xf32>
    %c0_95 = arith.constant 0 : index
    %c0_96 = arith.constant 0 : index
    %205 = vector.load %arg15[%c0_95, %c0_96] : memref<128x64xf32, #tpu.memory_space<vmem>>, vector<128x64xf32>
    %cst_97 = arith.constant dense<0.000000e+00> : vector<2x64xf32>
    %206 = tpu.matmul %204, %205, %cst_97 {dimension_numbers = #tpu.dot_dimension_numbers<[1], [0], [0], [1], [0, 0, 1, 1], [], []>} : vector<2x128xf32>, vector<128x64xf32>, vector<2x64xf32> -> vector<2x64xf32>
    %c0_98 = arith.constant 0 : index
    %c0_99 = arith.constant 0 : index
    %207 = vector.load %arg16[%c0_98, %c0_99] : memref<1x64xf32, #tpu.memory_space<vmem>>, vector<1x64xf32>
    %208 = vector.broadcast %207 : vector<1x64xf32> to vector<2x64xf32>
    %209 = arith.addf %206, %208 : vector<2x64xf32>
    %210 = vector.extract_strided_slice %209 {offsets = [0, 0], sizes = [2, 32], strides = [1, 1]} : vector<2x64xf32> to vector<2x32xf32>
    %211 = vector.extract_strided_slice %209 {offsets = [0, 32], sizes = [2, 32], strides = [1, 1]} : vector<2x64xf32> to vector<2x32xf32>
    %cst_100 = arith.constant 0.000000e+00 : f32
    %212 = vector.broadcast %cst_100 : f32 to vector<2x32xf32>
    %213 = arith.maximumf %211, %212 : vector<2x32xf32>
    %214 = math.absf %211 : vector<2x32xf32>
    %cst_101 = arith.constant 0.000000e+00 : f32
    %215 = vector.broadcast %cst_101 : f32 to vector<2x32xf32>
    %216 = arith.subf %215, %214 : vector<2x32xf32>
    %217 = math.exp %216 : vector<2x32xf32>
    %cst_102 = arith.constant 1.000000e+00 : f32
    %218 = vector.broadcast %cst_102 : f32 to vector<2x32xf32>
    %219 = arith.addf %218, %217 : vector<2x32xf32>
    %220 = math.log %219 : vector<2x32xf32>
    %221 = arith.addf %213, %220 : vector<2x32xf32>
    %c0_103 = arith.constant 0 : index
    %c0_104 = arith.constant 0 : index
    %222 = vector.load %arg17[%c0_103, %c0_104] : memref<2x32xf32, #tpu.memory_space<vmem>>, vector<2x32xf32>
    %223 = arith.mulf %221, %222 : vector<2x32xf32>
    %224 = arith.addf %210, %223 : vector<2x32xf32>
    %cst_105 = arith.constant 0.000000e+00 : f32
    %225 = vector.broadcast %cst_105 : f32 to vector<2x32xf32>
    %226 = tpu.concatenate %210, %211, %224, %225 in 1 : vector<2x32xf32>, vector<2x32xf32>, vector<2x32xf32>, vector<2x32xf32> -> vector<2x128xf32>
    %c0_106 = arith.constant 0 : index
    %c0_107 = arith.constant 0 : index
    %227 = vector.load %arg30[%c0_106, %c0_107] : memref<2x128xf32, #tpu.memory_space<vmem>>, vector<2x128xf32>
    tpu.vector_store %arg30[%c0_106, %c0_107], %226 {strides = array<i32>} : memref<2x128xf32, #tpu.memory_space<vmem>>, vector<2x128xf32>,
    %c0_108 = arith.constant 0 : index
    %c0_109 = arith.constant 0 : index
    %228 = vector.load %arg18[%c0_108, %c0_109] : memref<32x128xf32, #tpu.memory_space<vmem>>, vector<32x128xf32>
    %cst_110 = arith.constant dense<0.000000e+00> : vector<2x128xf32>
    %229 = tpu.matmul %224, %228, %cst_110 {dimension_numbers = #tpu.dot_dimension_numbers<[1], [0], [0], [1], [0, 0, 1, 1], [], []>} : vector<2x32xf32>, vector<32x128xf32>, vector<2x128xf32> -> vector<2x128xf32>
    %c0_111 = arith.constant 0 : index
    %c0_112 = arith.constant 0 : index
    %230 = vector.load %arg19[%c0_111, %c0_112] : memref<1x128xf32, #tpu.memory_space<vmem>>, vector<1x128xf32>
    %231 = vector.broadcast %230 : vector<1x128xf32> to vector<2x128xf32>
    %232 = arith.addf %229, %231 : vector<2x128xf32>
    %cst_113 = arith.constant 0.000000e+00 : f32
    %233 = vector.broadcast %cst_113 : f32 to vector<2x128xf32>
    %234 = arith.cmpf oge, %232, %233 : vector<2x128xf32>
    %cst_114 = arith.constant 0.00999999977 : f32
    %235 = vector.broadcast %cst_114 : f32 to vector<2x128xf32>
    %236 = arith.mulf %235, %232 : vector<2x128xf32>
    %237 = arith.select %234, %232, %236 : vector<2x128xi1>, vector<2x128xf32>
    %238 = arith.truncf %237 : vector<2x128xf32> to vector<2x128xbf16>
    %c0_115 = arith.constant 0 : index
    %c0_116 = arith.constant 0 : index
    %239 = vector.load %arg20[%c0_115, %c0_116] : memref<128x2048xbf16, #tpu.memory_space<vmem>>, vector<128x2048xbf16>
    %cst_117 = arith.constant dense<0.000000e+00> : vector<2x2048xf32>
    %240 = tpu.matmul %238, %239, %cst_117 {dimension_numbers = #tpu.dot_dimension_numbers<[1], [0], [0], [1], [0, 0, 1, 1], [], []>} : vector<2x128xbf16>, vector<128x2048xbf16>, vector<2x2048xf32> -> vector<2x2048xf32>
    %c0_118 = arith.constant 0 : index
    %c0_119 = arith.constant 0 : index
    %241 = vector.load %arg21[%c0_118, %c0_119] : memref<1x2048xf32, #tpu.memory_space<vmem>>, vector<1x2048xf32>
    %242 = vector.broadcast %241 : vector<1x2048xf32> to vector<2x2048xf32>
    %243 = arith.addf %240, %242 : vector<2x2048xf32>
    %c0_120 = arith.constant 0 : index
    %c0_121 = arith.constant 0 : index
    %244 = vector.load %arg22[%c0_120, %c0_121] : memref<2x2048xf32, #tpu.memory_space<vmem>>, vector<2x2048xf32>
    %245 = arith.mulf %243, %244 : vector<2x2048xf32>
    %cst_122 = arith.constant 0.000000e+00 : f32
    %246 = vector.broadcast %cst_122 : f32 to vector<2x2048xf32>
    %247 = arith.cmpf oge, %245, %246 : vector<2x2048xf32>
    %cst_123 = arith.constant 0.00999999977 : f32
    %248 = vector.broadcast %cst_123 : f32 to vector<2x2048xf32>
    %249 = arith.mulf %248, %245 : vector<2x2048xf32>
    %250 = arith.select %247, %245, %249 : vector<2x2048xi1>, vector<2x2048xf32>
    %251 = vector.extract_strided_slice %250 {offsets = [0, 0], sizes = [1, 128], strides = [1, 1]} : vector<2x2048xf32> to vector<1x128xf32>
    %c0_124 = arith.constant 0 : index
    %c0_125 = arith.constant 0 : index
    %252 = vector.load %arg33[%c0_124, %c0_125] : memref<16x256xf32, #tpu.memory_space<vmem>>, vector<1x128xf32>
    tpu.vector_store %arg33[%c0_124, %c0_125], %251 {strides = array<i32>} : memref<16x256xf32, #tpu.memory_space<vmem>>, vector<1x128xf32>,
    %253 = vector.extract_strided_slice %250 {offsets = [0, 128], sizes = [1, 128], strides = [1, 1]} : vector<2x2048xf32> to vector<1x128xf32>
    %c1_126 = arith.constant 1 : index
    %c0_127 = arith.constant 0 : index
    %254 = vector.load %arg33[%c1_126, %c0_127] : memref<16x256xf32, #tpu.memory_space<vmem>>, vector<1x128xf32>
    tpu.vector_store %arg33[%c1_126, %c0_127], %253 {strides = array<i32>} : memref<16x256xf32, #tpu.memory_space<vmem>>, vector<1x128xf32>,
    %255 = vector.extract_strided_slice %250 {offsets = [0, 256], sizes = [1, 128], strides = [1, 1]} : vector<2x2048xf32> to vector<1x128xf32>
    %c2 = arith.constant 2 : index
    %c0_128 = arith.constant 0 : index
    %256 = vector.load %arg33[%c2, %c0_128] : memref<16x256xf32, #tpu.memory_space<vmem>>, vector<1x128xf32>
    tpu.vector_store %arg33[%c2, %c0_128], %255 {strides = array<i32>} : memref<16x256xf32, #tpu.memory_space<vmem>>, vector<1x128xf32>,
    %257 = vector.extract_strided_slice %250 {offsets = [0, 384], sizes = [1, 128], strides = [1, 1]} : vector<2x2048xf32> to vector<1x128xf32>
    %c3 = arith.constant 3 : index
    %c0_129 = arith.constant 0 : index
    %258 = vector.load %arg33[%c3, %c0_129] : memref<16x256xf32, #tpu.memory_space<vmem>>, vector<1x128xf32>
    tpu.vector_store %arg33[%c3, %c0_129], %257 {strides = array<i32>} : memref<16x256xf32, #tpu.memory_space<vmem>>, vector<1x128xf32>,
    %259 = vector.extract_strided_slice %250 {offsets = [0, 512], sizes = [1, 128], strides = [1, 1]} : vector<2x2048xf32> to vector<1x128xf32>
    %c4 = arith.constant 4 : index
    %c0_130 = arith.constant 0 : index
    %260 = vector.load %arg33[%c4, %c0_130] : memref<16x256xf32, #tpu.memory_space<vmem>>, vector<1x128xf32>
    tpu.vector_store %arg33[%c4, %c0_130], %259 {strides = array<i32>} : memref<16x256xf32, #tpu.memory_space<vmem>>, vector<1x128xf32>,
    %261 = vector.extract_strided_slice %250 {offsets = [0, 640], sizes = [1, 128], strides = [1, 1]} : vector<2x2048xf32> to vector<1x128xf32>
    %c5 = arith.constant 5 : index
    %c0_131 = arith.constant 0 : index
    %262 = vector.load %arg33[%c5, %c0_131] : memref<16x256xf32, #tpu.memory_space<vmem>>, vector<1x128xf32>
    tpu.vector_store %arg33[%c5, %c0_131], %261 {strides = array<i32>} : memref<16x256xf32, #tpu.memory_space<vmem>>, vector<1x128xf32>,
    %263 = vector.extract_strided_slice %250 {offsets = [0, 768], sizes = [1, 128], strides = [1, 1]} : vector<2x2048xf32> to vector<1x128xf32>
    %c6 = arith.constant 6 : index
    %c0_132 = arith.constant 0 : index
    %264 = vector.load %arg33[%c6, %c0_132] : memref<16x256xf32, #tpu.memory_space<vmem>>, vector<1x128xf32>
    tpu.vector_store %arg33[%c6, %c0_132], %263 {strides = array<i32>} : memref<16x256xf32, #tpu.memory_space<vmem>>, vector<1x128xf32>,
    %265 = vector.extract_strided_slice %250 {offsets = [0, 896], sizes = [1, 128], strides = [1, 1]} : vector<2x2048xf32> to vector<1x128xf32>
    %c7 = arith.constant 7 : index
    %c0_133 = arith.constant 0 : index
    %266 = vector.load %arg33[%c7, %c0_133] : memref<16x256xf32, #tpu.memory_space<vmem>>, vector<1x128xf32>
    tpu.vector_store %arg33[%c7, %c0_133], %265 {strides = array<i32>} : memref<16x256xf32, #tpu.memory_space<vmem>>, vector<1x128xf32>,
    %267 = vector.extract_strided_slice %250 {offsets = [0, 1024], sizes = [1, 128], strides = [1, 1]} : vector<2x2048xf32> to vector<1x128xf32>
    %c8 = arith.constant 8 : index
    %c0_134 = arith.constant 0 : index
    %268 = vector.load %arg33[%c8, %c0_134] : memref<16x256xf32, #tpu.memory_space<vmem>>, vector<1x128xf32>
    tpu.vector_store %arg33[%c8, %c0_134], %267 {strides = array<i32>} : memref<16x256xf32, #tpu.memory_space<vmem>>, vector<1x128xf32>,
    %269 = vector.extract_strided_slice %250 {offsets = [0, 1152], sizes = [1, 128], strides = [1, 1]} : vector<2x2048xf32> to vector<1x128xf32>
    %c9 = arith.constant 9 : index
    %c0_135 = arith.constant 0 : index
    %270 = vector.load %arg33[%c9, %c0_135] : memref<16x256xf32, #tpu.memory_space<vmem>>, vector<1x128xf32>
    tpu.vector_store %arg33[%c9, %c0_135], %269 {strides = array<i32>} : memref<16x256xf32, #tpu.memory_space<vmem>>, vector<1x128xf32>,
    %271 = vector.extract_strided_slice %250 {offsets = [0, 1280], sizes = [1, 128], strides = [1, 1]} : vector<2x2048xf32> to vector<1x128xf32>
    %c10 = arith.constant 10 : index
    %c0_136 = arith.constant 0 : index
    %272 = vector.load %arg33[%c10, %c0_136] : memref<16x256xf32, #tpu.memory_space<vmem>>, vector<1x128xf32>
    tpu.vector_store %arg33[%c10, %c0_136], %271 {strides = array<i32>} : memref<16x256xf32, #tpu.memory_space<vmem>>, vector<1x128xf32>,
    %273 = vector.extract_strided_slice %250 {offsets = [0, 1408], sizes = [1, 128], strides = [1, 1]} : vector<2x2048xf32> to vector<1x128xf32>
    %c11 = arith.constant 11 : index
    %c0_137 = arith.constant 0 : index
    %274 = vector.load %arg33[%c11, %c0_137] : memref<16x256xf32, #tpu.memory_space<vmem>>, vector<1x128xf32>
    tpu.vector_store %arg33[%c11, %c0_137], %273 {strides = array<i32>} : memref<16x256xf32, #tpu.memory_space<vmem>>, vector<1x128xf32>,
    %275 = vector.extract_strided_slice %250 {offsets = [0, 1536], sizes = [1, 128], strides = [1, 1]} : vector<2x2048xf32> to vector<1x128xf32>
    %c12 = arith.constant 12 : index
    %c0_138 = arith.constant 0 : index
    %276 = vector.load %arg33[%c12, %c0_138] : memref<16x256xf32, #tpu.memory_space<vmem>>, vector<1x128xf32>
    tpu.vector_store %arg33[%c12, %c0_138], %275 {strides = array<i32>} : memref<16x256xf32, #tpu.memory_space<vmem>>, vector<1x128xf32>,
    %277 = vector.extract_strided_slice %250 {offsets = [0, 1664], sizes = [1, 128], strides = [1, 1]} : vector<2x2048xf32> to vector<1x128xf32>
    %c13 = arith.constant 13 : index
    %c0_139 = arith.constant 0 : index
    %278 = vector.load %arg33[%c13, %c0_139] : memref<16x256xf32, #tpu.memory_space<vmem>>, vector<1x128xf32>
    tpu.vector_store %arg33[%c13, %c0_139], %277 {strides = array<i32>} : memref<16x256xf32, #tpu.memory_space<vmem>>, vector<1x128xf32>,
    %279 = vector.extract_strided_slice %250 {offsets = [0, 1792], sizes = [1, 128], strides = [1, 1]} : vector<2x2048xf32> to vector<1x128xf32>
    %c14 = arith.constant 14 : index
    %c0_140 = arith.constant 0 : index
    %280 = vector.load %arg33[%c14, %c0_140] : memref<16x256xf32, #tpu.memory_space<vmem>>, vector<1x128xf32>
    tpu.vector_store %arg33[%c14, %c0_140], %279 {strides = array<i32>} : memref<16x256xf32, #tpu.memory_space<vmem>>, vector<1x128xf32>,
    %281 = vector.extract_strided_slice %250 {offsets = [0, 1920], sizes = [1, 128], strides = [1, 1]} : vector<2x2048xf32> to vector<1x128xf32>
    %c15 = arith.constant 15 : index
    %c0_141 = arith.constant 0 : index
    %282 = vector.load %arg33[%c15, %c0_141] : memref<16x256xf32, #tpu.memory_space<vmem>>, vector<1x128xf32>
    tpu.vector_store %arg33[%c15, %c0_141], %281 {strides = array<i32>} : memref<16x256xf32, #tpu.memory_space<vmem>>, vector<1x128xf32>,
    %283 = vector.extract_strided_slice %250 {offsets = [1, 0], sizes = [1, 128], strides = [1, 1]} : vector<2x2048xf32> to vector<1x128xf32>
    %c0_142 = arith.constant 0 : index
    %c128_143 = arith.constant 128 : index
    %284 = vector.load %arg33[%c0_142, %c128_143] : memref<16x256xf32, #tpu.memory_space<vmem>>, vector<1x128xf32>
    tpu.vector_store %arg33[%c0_142, %c128_143], %283 {strides = array<i32>} : memref<16x256xf32, #tpu.memory_space<vmem>>, vector<1x128xf32>,
    %285 = vector.extract_strided_slice %250 {offsets = [1, 128], sizes = [1, 128], strides = [1, 1]} : vector<2x2048xf32> to vector<1x128xf32>
    %c1_144 = arith.constant 1 : index
    %c128_145 = arith.constant 128 : index
    %286 = vector.load %arg33[%c1_144, %c128_145] : memref<16x256xf32, #tpu.memory_space<vmem>>, vector<1x128xf32>
    tpu.vector_store %arg33[%c1_144, %c128_145], %285 {strides = array<i32>} : memref<16x256xf32, #tpu.memory_space<vmem>>, vector<1x128xf32>,
    %287 = vector.extract_strided_slice %250 {offsets = [1, 256], sizes = [1, 128], strides = [1, 1]} : vector<2x2048xf32> to vector<1x128xf32>
    %c2_146 = arith.constant 2 : index
    %c128_147 = arith.constant 128 : index
    %288 = vector.load %arg33[%c2_146, %c128_147] : memref<16x256xf32, #tpu.memory_space<vmem>>, vector<1x128xf32>
    tpu.vector_store %arg33[%c2_146, %c128_147], %287 {strides = array<i32>} : memref<16x256xf32, #tpu.memory_space<vmem>>, vector<1x128xf32>,
    %289 = vector.extract_strided_slice %250 {offsets = [1, 384], sizes = [1, 128], strides = [1, 1]} : vector<2x2048xf32> to vector<1x128xf32>
    %c3_148 = arith.constant 3 : index
    %c128_149 = arith.constant 128 : index
    %290 = vector.load %arg33[%c3_148, %c128_149] : memref<16x256xf32, #tpu.memory_space<vmem>>, vector<1x128xf32>
    tpu.vector_store %arg33[%c3_148, %c128_149], %289 {strides = array<i32>} : memref<16x256xf32, #tpu.memory_space<vmem>>, vector<1x128xf32>,
    %291 = vector.extract_strided_slice %250 {offsets = [1, 512], sizes = [1, 128], strides = [1, 1]} : vector<2x2048xf32> to vector<1x128xf32>
    %c4_150 = arith.constant 4 : index
    %c128_151 = arith.constant 128 : index
    %292 = vector.load %arg33[%c4_150, %c128_151] : memref<16x256xf32, #tpu.memory_space<vmem>>, vector<1x128xf32>
    tpu.vector_store %arg33[%c4_150, %c128_151], %291 {strides = array<i32>} : memref<16x256xf32, #tpu.memory_space<vmem>>, vector<1x128xf32>,
    %293 = vector.extract_strided_slice %250 {offsets = [1, 640], sizes = [1, 128], strides = [1, 1]} : vector<2x2048xf32> to vector<1x128xf32>
    %c5_152 = arith.constant 5 : index
    %c128_153 = arith.constant 128 : index
    %294 = vector.load %arg33[%c5_152, %c128_153] : memref<16x256xf32, #tpu.memory_space<vmem>>, vector<1x128xf32>
    tpu.vector_store %arg33[%c5_152, %c128_153], %293 {strides = array<i32>} : memref<16x256xf32, #tpu.memory_space<vmem>>, vector<1x128xf32>,
    %295 = vector.extract_strided_slice %250 {offsets = [1, 768], sizes = [1, 128], strides = [1, 1]} : vector<2x2048xf32> to vector<1x128xf32>
    %c6_154 = arith.constant 6 : index
    %c128_155 = arith.constant 128 : index
    %296 = vector.load %arg33[%c6_154, %c128_155] : memref<16x256xf32, #tpu.memory_space<vmem>>, vector<1x128xf32>
    tpu.vector_store %arg33[%c6_154, %c128_155], %295 {strides = array<i32>} : memref<16x256xf32, #tpu.memory_space<vmem>>, vector<1x128xf32>,
    %297 = vector.extract_strided_slice %250 {offsets = [1, 896], sizes = [1, 128], strides = [1, 1]} : vector<2x2048xf32> to vector<1x128xf32>
    %c7_156 = arith.constant 7 : index
    %c128_157 = arith.constant 128 : index
    %298 = vector.load %arg33[%c7_156, %c128_157] : memref<16x256xf32, #tpu.memory_space<vmem>>, vector<1x128xf32>
    tpu.vector_store %arg33[%c7_156, %c128_157], %297 {strides = array<i32>} : memref<16x256xf32, #tpu.memory_space<vmem>>, vector<1x128xf32>,
    %299 = vector.extract_strided_slice %250 {offsets = [1, 1024], sizes = [1, 128], strides = [1, 1]} : vector<2x2048xf32> to vector<1x128xf32>
    %c8_158 = arith.constant 8 : index
    %c128_159 = arith.constant 128 : index
    %300 = vector.load %arg33[%c8_158, %c128_159] : memref<16x256xf32, #tpu.memory_space<vmem>>, vector<1x128xf32>
    tpu.vector_store %arg33[%c8_158, %c128_159], %299 {strides = array<i32>} : memref<16x256xf32, #tpu.memory_space<vmem>>, vector<1x128xf32>,
    %301 = vector.extract_strided_slice %250 {offsets = [1, 1152], sizes = [1, 128], strides = [1, 1]} : vector<2x2048xf32> to vector<1x128xf32>
    %c9_160 = arith.constant 9 : index
    %c128_161 = arith.constant 128 : index
    %302 = vector.load %arg33[%c9_160, %c128_161] : memref<16x256xf32, #tpu.memory_space<vmem>>, vector<1x128xf32>
    tpu.vector_store %arg33[%c9_160, %c128_161], %301 {strides = array<i32>} : memref<16x256xf32, #tpu.memory_space<vmem>>, vector<1x128xf32>,
    %303 = vector.extract_strided_slice %250 {offsets = [1, 1280], sizes = [1, 128], strides = [1, 1]} : vector<2x2048xf32> to vector<1x128xf32>
    %c10_162 = arith.constant 10 : index
    %c128_163 = arith.constant 128 : index
    %304 = vector.load %arg33[%c10_162, %c128_163] : memref<16x256xf32, #tpu.memory_space<vmem>>, vector<1x128xf32>
    tpu.vector_store %arg33[%c10_162, %c128_163], %303 {strides = array<i32>} : memref<16x256xf32, #tpu.memory_space<vmem>>, vector<1x128xf32>,
    %305 = vector.extract_strided_slice %250 {offsets = [1, 1408], sizes = [1, 128], strides = [1, 1]} : vector<2x2048xf32> to vector<1x128xf32>
    %c11_164 = arith.constant 11 : index
    %c128_165 = arith.constant 128 : index
    %306 = vector.load %arg33[%c11_164, %c128_165] : memref<16x256xf32, #tpu.memory_space<vmem>>, vector<1x128xf32>
    tpu.vector_store %arg33[%c11_164, %c128_165], %305 {strides = array<i32>} : memref<16x256xf32, #tpu.memory_space<vmem>>, vector<1x128xf32>,
    %307 = vector.extract_strided_slice %250 {offsets = [1, 1536], sizes = [1, 128], strides = [1, 1]} : vector<2x2048xf32> to vector<1x128xf32>
    %c12_166 = arith.constant 12 : index
    %c128_167 = arith.constant 128 : index
    %308 = vector.load %arg33[%c12_166, %c128_167] : memref<16x256xf32, #tpu.memory_space<vmem>>, vector<1x128xf32>
    tpu.vector_store %arg33[%c12_166, %c128_167], %307 {strides = array<i32>} : memref<16x256xf32, #tpu.memory_space<vmem>>, vector<1x128xf32>,
    %309 = vector.extract_strided_slice %250 {offsets = [1, 1664], sizes = [1, 128], strides = [1, 1]} : vector<2x2048xf32> to vector<1x128xf32>
    %c13_168 = arith.constant 13 : index
    %c128_169 = arith.constant 128 : index
    %310 = vector.load %arg33[%c13_168, %c128_169] : memref<16x256xf32, #tpu.memory_space<vmem>>, vector<1x128xf32>
    tpu.vector_store %arg33[%c13_168, %c128_169], %309 {strides = array<i32>} : memref<16x256xf32, #tpu.memory_space<vmem>>, vector<1x128xf32>,
    %311 = vector.extract_strided_slice %250 {offsets = [1, 1792], sizes = [1, 128], strides = [1, 1]} : vector<2x2048xf32> to vector<1x128xf32>
    %c14_170 = arith.constant 14 : index
    %c128_171 = arith.constant 128 : index
    %312 = vector.load %arg33[%c14_170, %c128_171] : memref<16x256xf32, #tpu.memory_space<vmem>>, vector<1x128xf32>
    tpu.vector_store %arg33[%c14_170, %c128_171], %311 {strides = array<i32>} : memref<16x256xf32, #tpu.memory_space<vmem>>, vector<1x128xf32>,
    %313 = vector.extract_strided_slice %250 {offsets = [1, 1920], sizes = [1, 128], strides = [1, 1]} : vector<2x2048xf32> to vector<1x128xf32>
    %c15_172 = arith.constant 15 : index
    %c128_173 = arith.constant 128 : index
    %314 = vector.load %arg33[%c15_172, %c128_173] : memref<16x256xf32, #tpu.memory_space<vmem>>, vector<1x128xf32>
    tpu.vector_store %arg33[%c15_172, %c128_173], %313 {strides = array<i32>} : memref<16x256xf32, #tpu.memory_space<vmem>>, vector<1x128xf32>,
    %cst_174 = arith.constant 0.000000e+00 : f32
    %315 = vector.broadcast %cst_174 : f32 to vector<16x1294xf32>
    %c0_175 = arith.constant 0 : index
    %c0_176 = arith.constant 0 : index
    %316 = vector.load %arg34[%c0_175, %c0_176] : memref<16x1294xf32, #tpu.memory_space<vmem>>, vector<16x1294xf32>
    tpu.vector_store %arg34[%c0_175, %c0_176], %315 {strides = array<i32>} : memref<16x1294xf32, #tpu.memory_space<vmem>>, vector<16x1294xf32>,
    %c0_177 = arith.constant 0 : index
    %c0_178 = arith.constant 0 : index
    %317 = vector.load %arg33[%c0_177, %c0_178] : memref<16x256xf32, #tpu.memory_space<vmem>>, vector<16x256xf32>
    %318 = vector.extract_strided_slice %317 {offsets = [0, 0], sizes = [16, 16], strides = [1, 1]} : vector<16x256xf32> to vector<16x16xf32>
    %c0_179 = arith.constant 0 : index
    %c174 = arith.constant 174 : index
    %319 = vector.load %arg34[%c0_179, %c174] : memref<16x1294xf32, #tpu.memory_space<vmem>>, vector<16x16xf32>
    tpu.vector_store %arg34[%c0_179, %c174], %318 {strides = array<i32>} : memref<16x1294xf32, #tpu.memory_space<vmem>>, vector<16x16xf32>,
    %320 = vector.extract_strided_slice %317 {offsets = [0, 16], sizes = [16, 16], strides = [1, 1]} : vector<16x256xf32> to vector<16x16xf32>
    %c0_180 = arith.constant 0 : index
    %c202 = arith.constant 202 : index
    %321 = vector.load %arg34[%c0_180, %c202] : memref<16x1294xf32, #tpu.memory_space<vmem>>, vector<16x16xf32>
    tpu.vector_store %arg34[%c0_180, %c202], %320 {strides = array<i32>} : memref<16x1294xf32, #tpu.memory_space<vmem>>, vector<16x16xf32>,
    %322 = vector.extract_strided_slice %317 {offsets = [0, 32], sizes = [16, 16], strides = [1, 1]} : vector<16x256xf32> to vector<16x16xf32>
    %c0_181 = arith.constant 0 : index
    %c230 = arith.constant 230 : index
    %323 = vector.load %arg34[%c0_181, %c230] : memref<16x1294xf32, #tpu.memory_space<vmem>>, vector<16x16xf32>
    tpu.vector_store %arg34[%c0_181, %c230], %322 {strides = array<i32>} : memref<16x1294xf32, #tpu.memory_space<vmem>>, vector<16x16xf32>,
    %324 = vector.extract_strided_slice %317 {offsets = [0, 48], sizes = [16, 16], strides = [1, 1]} : vector<16x256xf32> to vector<16x16xf32>
    %c0_182 = arith.constant 0 : index
    %c258 = arith.constant 258 : index
    %325 = vector.load %arg34[%c0_182, %c258] : memref<16x1294xf32, #tpu.memory_space<vmem>>, vector<16x16xf32>
    tpu.vector_store %arg34[%c0_182, %c258], %324 {strides = array<i32>} : memref<16x1294xf32, #tpu.memory_space<vmem>>, vector<16x16xf32>,
    %326 = vector.extract_strided_slice %317 {offsets = [0, 64], sizes = [16, 16], strides = [1, 1]} : vector<16x256xf32> to vector<16x16xf32>
    %c0_183 = arith.constant 0 : index
    %c286 = arith.constant 286 : index
    %327 = vector.load %arg34[%c0_183, %c286] : memref<16x1294xf32, #tpu.memory_space<vmem>>, vector<16x16xf32>
    tpu.vector_store %arg34[%c0_183, %c286], %326 {strides = array<i32>} : memref<16x1294xf32, #tpu.memory_space<vmem>>, vector<16x16xf32>,
    %328 = vector.extract_strided_slice %317 {offsets = [0, 80], sizes = [16, 16], strides = [1, 1]} : vector<16x256xf32> to vector<16x16xf32>
    %c0_184 = arith.constant 0 : index
    %c314 = arith.constant 314 : index
    %329 = vector.load %arg34[%c0_184, %c314] : memref<16x1294xf32, #tpu.memory_space<vmem>>, vector<16x16xf32>
    tpu.vector_store %arg34[%c0_184, %c314], %328 {strides = array<i32>} : memref<16x1294xf32, #tpu.memory_space<vmem>>, vector<16x16xf32>,
    %330 = vector.extract_strided_slice %317 {offsets = [0, 96], sizes = [16, 16], strides = [1, 1]} : vector<16x256xf32> to vector<16x16xf32>
    %c0_185 = arith.constant 0 : index
    %c342 = arith.constant 342 : index
    %331 = vector.load %arg34[%c0_185, %c342] : memref<16x1294xf32, #tpu.memory_space<vmem>>, vector<16x16xf32>
    tpu.vector_store %arg34[%c0_185, %c342], %330 {strides = array<i32>} : memref<16x1294xf32, #tpu.memory_space<vmem>>, vector<16x16xf32>,
    %332 = vector.extract_strided_slice %317 {offsets = [0, 112], sizes = [16, 16], strides = [1, 1]} : vector<16x256xf32> to vector<16x16xf32>
    %c0_186 = arith.constant 0 : index
    %c370 = arith.constant 370 : index
    %333 = vector.load %arg34[%c0_186, %c370] : memref<16x1294xf32, #tpu.memory_space<vmem>>, vector<16x16xf32>
    tpu.vector_store %arg34[%c0_186, %c370], %332 {strides = array<i32>} : memref<16x1294xf32, #tpu.memory_space<vmem>>, vector<16x16xf32>,
    %334 = vector.extract_strided_slice %317 {offsets = [0, 128], sizes = [16, 16], strides = [1, 1]} : vector<16x256xf32> to vector<16x16xf32>
    %c0_187 = arith.constant 0 : index
    %c734 = arith.constant 734 : index
    %335 = vector.load %arg34[%c0_187, %c734] : memref<16x1294xf32, #tpu.memory_space<vmem>>, vector<16x16xf32>
    tpu.vector_store %arg34[%c0_187, %c734], %334 {strides = array<i32>} : memref<16x1294xf32, #tpu.memory_space<vmem>>, vector<16x16xf32>,
    %336 = vector.extract_strided_slice %317 {offsets = [0, 144], sizes = [16, 16], strides = [1, 1]} : vector<16x256xf32> to vector<16x16xf32>
    %c0_188 = arith.constant 0 : index
    %c762 = arith.constant 762 : index
    %337 = vector.load %arg34[%c0_188, %c762] : memref<16x1294xf32, #tpu.memory_space<vmem>>, vector<16x16xf32>
    tpu.vector_store %arg34[%c0_188, %c762], %336 {strides = array<i32>} : memref<16x1294xf32, #tpu.memory_space<vmem>>, vector<16x16xf32>,
    %338 = vector.extract_strided_slice %317 {offsets = [0, 160], sizes = [16, 16], strides = [1, 1]} : vector<16x256xf32> to vector<16x16xf32>
    %c0_189 = arith.constant 0 : index
    %c790 = arith.constant 790 : index
    %339 = vector.load %arg34[%c0_189, %c790] : memref<16x1294xf32, #tpu.memory_space<vmem>>, vector<16x16xf32>
    tpu.vector_store %arg34[%c0_189, %c790], %338 {strides = array<i32>} : memref<16x1294xf32, #tpu.memory_space<vmem>>, vector<16x16xf32>,
    %340 = vector.extract_strided_slice %317 {offsets = [0, 176], sizes = [16, 16], strides = [1, 1]} : vector<16x256xf32> to vector<16x16xf32>
    %c0_190 = arith.constant 0 : index
    %c818 = arith.constant 818 : index
    %341 = vector.load %arg34[%c0_190, %c818] : memref<16x1294xf32, #tpu.memory_space<vmem>>, vector<16x16xf32>
    tpu.vector_store %arg34[%c0_190, %c818], %340 {strides = array<i32>} : memref<16x1294xf32, #tpu.memory_space<vmem>>, vector<16x16xf32>,
    %342 = vector.extract_strided_slice %317 {offsets = [0, 192], sizes = [16, 16], strides = [1, 1]} : vector<16x256xf32> to vector<16x16xf32>
    %c0_191 = arith.constant 0 : index
    %c846 = arith.constant 846 : index
    %343 = vector.load %arg34[%c0_191, %c846] : memref<16x1294xf32, #tpu.memory_space<vmem>>, vector<16x16xf32>
    tpu.vector_store %arg34[%c0_191, %c846], %342 {strides = array<i32>} : memref<16x1294xf32, #tpu.memory_space<vmem>>, vector<16x16xf32>,
    %344 = vector.extract_strided_slice %317 {offsets = [0, 208], sizes = [16, 16], strides = [1, 1]} : vector<16x256xf32> to vector<16x16xf32>
    %c0_192 = arith.constant 0 : index
    %c874 = arith.constant 874 : index
    %345 = vector.load %arg34[%c0_192, %c874] : memref<16x1294xf32, #tpu.memory_space<vmem>>, vector<16x16xf32>
    tpu.vector_store %arg34[%c0_192, %c874], %344 {strides = array<i32>} : memref<16x1294xf32, #tpu.memory_space<vmem>>, vector<16x16xf32>,
    %346 = vector.extract_strided_slice %317 {offsets = [0, 224], sizes = [16, 16], strides = [1, 1]} : vector<16x256xf32> to vector<16x16xf32>
    %c0_193 = arith.constant 0 : index
    %c902 = arith.constant 902 : index
    %347 = vector.load %arg34[%c0_193, %c902] : memref<16x1294xf32, #tpu.memory_space<vmem>>, vector<16x16xf32>
    tpu.vector_store %arg34[%c0_193, %c902], %346 {strides = array<i32>} : memref<16x1294xf32, #tpu.memory_space<vmem>>, vector<16x16xf32>,
    %348 = vector.extract_strided_slice %317 {offsets = [0, 240], sizes = [16, 16], strides = [1, 1]} : vector<16x256xf32> to vector<16x16xf32>
    %c0_194 = arith.constant 0 : index
    %c930 = arith.constant 930 : index
    %349 = vector.load %arg34[%c0_194, %c930] : memref<16x1294xf32, #tpu.memory_space<vmem>>, vector<16x16xf32>
    tpu.vector_store %arg34[%c0_194, %c930], %348 {strides = array<i32>} : memref<16x1294xf32, #tpu.memory_space<vmem>>, vector<16x16xf32>,
    %c0_195 = arith.constant 0 : index
    %c0_196 = arith.constant 0 : index
    %350 = vector.load %arg34[%c0_195, %c0_196] : memref<16x1294xf32, #tpu.memory_space<vmem>>, vector<16x1294xf32>
    %351 = vector.extract_strided_slice %350 {offsets = [0, 0], sizes = [16, 1207], strides = [1, 1]} : vector<16x1294xf32> to vector<16x1207xf32>
    %352 = vector.extract_strided_slice %350 {offsets = [0, 1], sizes = [16, 1207], strides = [1, 1]} : vector<16x1294xf32> to vector<16x1207xf32>
    %353 = vector.extract_strided_slice %350 {offsets = [0, 2], sizes = [16, 1207], strides = [1, 1]} : vector<16x1294xf32> to vector<16x1207xf32>
    %354 = vector.extract_strided_slice %350 {offsets = [0, 3], sizes = [16, 1207], strides = [1, 1]} : vector<16x1294xf32> to vector<16x1207xf32>
    %355 = vector.extract_strided_slice %350 {offsets = [0, 28], sizes = [16, 1207], strides = [1, 1]} : vector<16x1294xf32> to vector<16x1207xf32>
    %356 = vector.extract_strided_slice %350 {offsets = [0, 29], sizes = [16, 1207], strides = [1, 1]} : vector<16x1294xf32> to vector<16x1207xf32>
    %357 = vector.extract_strided_slice %350 {offsets = [0, 30], sizes = [16, 1207], strides = [1, 1]} : vector<16x1294xf32> to vector<16x1207xf32>
    %358 = vector.extract_strided_slice %350 {offsets = [0, 31], sizes = [16, 1207], strides = [1, 1]} : vector<16x1294xf32> to vector<16x1207xf32>
    %359 = vector.extract_strided_slice %350 {offsets = [0, 56], sizes = [16, 1207], strides = [1, 1]} : vector<16x1294xf32> to vector<16x1207xf32>
    %360 = vector.extract_strided_slice %350 {offsets = [0, 57], sizes = [16, 1207], strides = [1, 1]} : vector<16x1294xf32> to vector<16x1207xf32>
    %361 = vector.extract_strided_slice %350 {offsets = [0, 58], sizes = [16, 1207], strides = [1, 1]} : vector<16x1294xf32> to vector<16x1207xf32>
    %362 = vector.extract_strided_slice %350 {offsets = [0, 59], sizes = [16, 1207], strides = [1, 1]} : vector<16x1294xf32> to vector<16x1207xf32>
    %363 = vector.extract_strided_slice %350 {offsets = [0, 84], sizes = [16, 1207], strides = [1, 1]} : vector<16x1294xf32> to vector<16x1207xf32>
    %364 = vector.extract_strided_slice %350 {offsets = [0, 85], sizes = [16, 1207], strides = [1, 1]} : vector<16x1294xf32> to vector<16x1207xf32>
    %365 = vector.extract_strided_slice %350 {offsets = [0, 86], sizes = [16, 1207], strides = [1, 1]} : vector<16x1294xf32> to vector<16x1207xf32>
    %366 = vector.extract_strided_slice %350 {offsets = [0, 87], sizes = [16, 1207], strides = [1, 1]} : vector<16x1294xf32> to vector<16x1207xf32>
    %367 = tpu.concatenate %351, %352, %353, %354, %355, %356, %357, %358, %359, %360, %361, %362, %363, %364, %365, %366 in 0 : vector<16x1207xf32>, vector<16x1207xf32>, vector<16x1207xf32>, vector<16x1207xf32>, vector<16x1207xf32>, vector<16x1207xf32>, vector<16x1207xf32>, vector<16x1207xf32>, vector<16x1207xf32>, vector<16x1207xf32>, vector<16x1207xf32>, vector<16x1207xf32>, vector<16x1207xf32>, vector<16x1207xf32>, vector<16x1207xf32>, vector<16x1207xf32> -> vector<256x1207xf32>
    %c0_197 = arith.constant 0 : index
    %c0_198 = arith.constant 0 : index
    %368 = vector.load %arg23[%c0_197, %c0_198] : memref<8x256xf32, #tpu.memory_space<vmem>>, vector<8x256xf32>
    %cst_199 = arith.constant dense<0.000000e+00> : vector<8x1207xf32>
    %369 = tpu.matmul %368, %367, %cst_199 {dimension_numbers = #tpu.dot_dimension_numbers<[1], [0], [0], [1], [0, 0, 1, 1], [], []>} : vector<8x256xf32>, vector<256x1207xf32>, vector<8x1207xf32> -> vector<8x1207xf32>
    %c0_200 = arith.constant 0 : index
    %c0_201 = arith.constant 0 : index
    %370 = vector.load %arg24[%c0_200, %c0_201] : memref<8x1xf32, #tpu.memory_space<vmem>>, vector<8x1xf32>
    %371 = vector.broadcast %370 : vector<8x1xf32> to vector<8x1207xf32>
    %372 = arith.addf %369, %371 : vector<8x1207xf32>
    %c0_202 = arith.constant 0 : index
    %c0_203 = arith.constant 0 : index
    %373 = vector.load %arg27[%c0_202, %c0_203] : memref<1x1207xf32, #tpu.memory_space<vmem>>, vector<1x1207xf32>
    %c0_204 = arith.constant 0 : index
    %c0_205 = arith.constant 0 : index
    %374 = vector.load %arg25[%c0_204, %c0_205] : memref<8x1xf32, #tpu.memory_space<vmem>>, vector<8x1xf32>
    %c0_206 = arith.constant 0 : index
    %c0_207 = arith.constant 0 : index
    %375 = vector.load %arg26[%c0_206, %c0_207] : memref<8x1xf32, #tpu.memory_space<vmem>>, vector<8x1xf32>
    %376 = vector.broadcast %373 : vector<1x1207xf32> to vector<8x1207xf32>
    %377 = arith.mulf %372, %376 : vector<8x1207xf32>
    %cst_208 = arith.constant dense<0.000000e+00> : vector<8xf32>
    %378 = vector.multi_reduction <add>, %377, %cst_208 [1] : vector<8x1207xf32> to vector<8xf32>
    %379 = vector.shape_cast %378 : vector<8xf32> to vector<8x1xf32>
    %cst_209 = arith.constant 0.00239234441 : f32
    %380 = vector.broadcast %cst_209 : f32 to vector<8x1xf32>
    %381 = arith.mulf %379, %380 : vector<8x1xf32>
    %382 = vector.broadcast %381 : vector<8x1xf32> to vector<8x1207xf32>
    %383 = arith.subf %372, %382 : vector<8x1207xf32>
    %384 = arith.mulf %383, %383 : vector<8x1207xf32>
    %385 = vector.broadcast %373 : vector<1x1207xf32> to vector<8x1207xf32>
    %386 = arith.mulf %384, %385 : vector<8x1207xf32>
    %cst_210 = arith.constant dense<0.000000e+00> : vector<8xf32>
    %387 = vector.multi_reduction <add>, %386, %cst_210 [1] : vector<8x1207xf32> to vector<8xf32>
    %388 = vector.shape_cast %387 : vector<8xf32> to vector<8x1xf32>
    %cst_211 = arith.constant 0.00239234441 : f32
    %389 = vector.broadcast %cst_211 : f32 to vector<8x1xf32>
    %390 = arith.mulf %388, %389 : vector<8x1xf32>
    %cst_212 = arith.constant 9.99999974E-6 : f32
    %391 = vector.broadcast %cst_212 : f32 to vector<8x1xf32>
    %392 = arith.addf %390, %391 : vector<8x1xf32>
    %393 = math.rsqrt %392 : vector<8x1xf32>
    %394 = vector.broadcast %393 : vector<8x1xf32> to vector<8x1207xf32>
    %395 = arith.mulf %383, %394 : vector<8x1207xf32>
    %396 = vector.broadcast %374 : vector<8x1xf32> to vector<8x1207xf32>
    %397 = arith.mulf %395, %396 : vector<8x1207xf32>
    %398 = vector.broadcast %375 : vector<8x1xf32> to vector<8x1207xf32>
    %399 = arith.addf %397, %398 : vector<8x1207xf32>
    %cst_213 = arith.constant 0.000000e+00 : f32
    %400 = vector.broadcast %cst_213 : f32 to vector<8x1207xf32>
    %401 = arith.cmpf oge, %399, %400 : vector<8x1207xf32>
    %cst_214 = arith.constant 0.00999999977 : f32
    %402 = vector.broadcast %cst_214 : f32 to vector<8x1207xf32>
    %403 = arith.mulf %402, %399 : vector<8x1207xf32>
    %404 = arith.select %401, %399, %403 : vector<8x1207xi1>, vector<8x1207xf32>
    %405 = vector.broadcast %373 : vector<1x1207xf32> to vector<8x1207xf32>
    %406 = arith.mulf %404, %405 : vector<8x1207xf32>
    %407 = vector.extract_strided_slice %406 {offsets = [0, 0], sizes = [8, 1120], strides = [1, 1]} : vector<8x1207xf32> to vector<8x1120xf32>
    %408 = vector.extract_strided_slice %406 {offsets = [0, 1], sizes = [8, 1120], strides = [1, 1]} : vector<8x1207xf32> to vector<8x1120xf32>
    %409 = vector.extract_strided_slice %406 {offsets = [0, 2], sizes = [8, 1120], strides = [1, 1]} : vector<8x1207xf32> to vector<8x1120xf32>
    %410 = vector.extract_strided_slice %406 {offsets = [0, 3], sizes = [8, 1120], strides = [1, 1]} : vector<8x1207xf32> to vector<8x1120xf32>
    %411 = vector.extract_strided_slice %406 {offsets = [0, 28], sizes = [8, 1120], strides = [1, 1]} : vector<8x1207xf32> to vector<8x1120xf32>
    %412 = vector.extract_strided_slice %406 {offsets = [0, 29], sizes = [8, 1120], strides = [1, 1]} : vector<8x1207xf32> to vector<8x1120xf32>
    %413 = vector.extract_strided_slice %406 {offsets = [0, 30], sizes = [8, 1120], strides = [1, 1]} : vector<8x1207xf32> to vector<8x1120xf32>
    %414 = vector.extract_strided_slice %406 {offsets = [0, 31], sizes = [8, 1120], strides = [1, 1]} : vector<8x1207xf32> to vector<8x1120xf32>
    %415 = vector.extract_strided_slice %406 {offsets = [0, 56], sizes = [8, 1120], strides = [1, 1]} : vector<8x1207xf32> to vector<8x1120xf32>
    %416 = vector.extract_strided_slice %406 {offsets = [0, 57], sizes = [8, 1120], strides = [1, 1]} : vector<8x1207xf32> to vector<8x1120xf32>
    %417 = vector.extract_strided_slice %406 {offsets = [0, 58], sizes = [8, 1120], strides = [1, 1]} : vector<8x1207xf32> to vector<8x1120xf32>
    %418 = vector.extract_strided_slice %406 {offsets = [0, 59], sizes = [8, 1120], strides = [1, 1]} : vector<8x1207xf32> to vector<8x1120xf32>
    %419 = vector.extract_strided_slice %406 {offsets = [0, 84], sizes = [8, 1120], strides = [1, 1]} : vector<8x1207xf32> to vector<8x1120xf32>
    %420 = vector.extract_strided_slice %406 {offsets = [0, 85], sizes = [8, 1120], strides = [1, 1]} : vector<8x1207xf32> to vector<8x1120xf32>
    %421 = vector.extract_strided_slice %406 {offsets = [0, 86], sizes = [8, 1120], strides = [1, 1]} : vector<8x1207xf32> to vector<8x1120xf32>
    %422 = vector.extract_strided_slice %406 {offsets = [0, 87], sizes = [8, 1120], strides = [1, 1]} : vector<8x1207xf32> to vector<8x1120xf32>
    %423 = tpu.concatenate %407, %408, %409, %410, %411, %412, %413, %414, %415, %416, %417, %418, %419, %420, %421, %422 in 0 : vector<8x1120xf32>, vector<8x1120xf32>, vector<8x1120xf32>, vector<8x1120xf32>, vector<8x1120xf32>, vector<8x1120xf32>, vector<8x1120xf32>, vector<8x1120xf32>, vector<8x1120xf32>, vector<8x1120xf32>, vector<8x1120xf32>, vector<8x1120xf32>, vector<8x1120xf32>, vector<8x1120xf32>, vector<8x1120xf32>, vector<8x1120xf32> -> vector<128x1120xf32>
    %c0_215 = arith.constant 0 : index
    %c0_216 = arith.constant 0 : index
    %424 = vector.load %arg28[%c0_215, %c0_216] : memref<1x128xf32, #tpu.memory_space<vmem>>, vector<1x128xf32>
    %cst_217 = arith.constant dense<0.000000e+00> : vector<1x1120xf32>
    %425 = tpu.matmul %424, %423, %cst_217 {dimension_numbers = #tpu.dot_dimension_numbers<[1], [0], [0], [1], [0, 0, 1, 1], [], []>} : vector<1x128xf32>, vector<128x1120xf32>, vector<1x1120xf32> -> vector<1x1120xf32>
    %c0_218 = arith.constant 0 : index
    %c0_219 = arith.constant 0 : index
    %426 = vector.load %arg29[%c0_218, %c0_219] : memref<1x1xf32, #tpu.memory_space<vmem>>, vector<1x1xf32>
    %427 = vector.broadcast %426 : vector<1x1xf32> to vector<1x1120xf32>
    %428 = arith.addf %425, %427 : vector<1x1120xf32>
    %cst_220 = arith.constant 0.000000e+00 : f32
    %429 = vector.broadcast %cst_220 : f32 to vector<1x1120xf32>
    %430 = arith.subf %429, %428 : vector<1x1120xf32>
    %431 = math.exp %430 : vector<1x1120xf32>
    %cst_221 = arith.constant 1.000000e+00 : f32
    %432 = vector.broadcast %cst_221 : f32 to vector<1x1120xf32>
    %433 = arith.addf %432, %431 : vector<1x1120xf32>
    %cst_222 = arith.constant 1.000000e+00 : f32
    %434 = vector.broadcast %cst_222 : f32 to vector<1x1120xf32>
    %435 = arith.divf %434, %433 : vector<1x1120xf32>
    %cst_223 = arith.constant 0.000000e+00 : f32
    %436 = vector.broadcast %cst_223 : f32 to vector<1x32xf32>
    %437 = tpu.concatenate %435, %436 in 1 : vector<1x1120xf32>, vector<1x32xf32> -> vector<1x1152xf32>
    %c0_224 = arith.constant 0 : index
    %c0_225 = arith.constant 0 : index
    %438 = vector.load %arg31[%c0_224, %c0_225] : memref<1x1152xf32, #tpu.memory_space<vmem>>, vector<1x1152xf32>
    tpu.vector_store %arg31[%c0_224, %c0_225], %437 {strides = array<i32>} : memref<1x1152xf32, #tpu.memory_space<vmem>>, vector<1x1152xf32>,
    return
  }
  func.func @transform_0(%arg0: i32) -> (i32, i32) {
    %c0_i32 = arith.constant 0 : i32
    %c0_i32_0 = arith.constant 0 : i32
    %c0_i32_1 = arith.constant 0 : i32
    return %c0_i32, %c0_i32_0 : i32, i32
  }
  func.func @transform_1(%arg0: i32) -> (i32, i32) {
    %c0_i32 = arith.constant 0 : i32
    %c0_i32_0 = arith.constant 0 : i32
    %c0_i32_1 = arith.constant 0 : i32
    return %c0_i32, %c0_i32_0 : i32, i32
  }
  func.func @transform_2(%arg0: i32) -> (i32, i32) {
    %c0_i32 = arith.constant 0 : i32
    %c0_i32_0 = arith.constant 0 : i32
    %c0_i32_1 = arith.constant 0 : i32
    return %c0_i32, %c0_i32_0 : i32, i32
  }
  func.func @transform_3(%arg0: i32) -> (i32, i32) {
    %c0_i32 = arith.constant 0 : i32
    %c0_i32_0 = arith.constant 0 : i32
    %c0_i32_1 = arith.constant 0 : i32
    return %c0_i32, %c0_i32_0 : i32, i32
  }
  func.func @transform_4(%arg0: i32) -> (i32, i32) {
    %c0_i32 = arith.constant 0 : i32
    %c0_i32_0 = arith.constant 0 : i32
    %c0_i32_1 = arith.constant 0 : i32
    return %c0_i32, %c0_i32_0 : i32, i32
  }
  func.func @transform_5(%arg0: i32) -> (i32, i32) {
    %c0_i32 = arith.constant 0 : i32
    %c0_i32_0 = arith.constant 0 : i32
    %c0_i32_1 = arith.constant 0 : i32
    return %c0_i32, %c0_i32_0 : i32, i32
  }
  func.func @transform_6(%arg0: i32) -> (i32, i32) {
    %c0_i32 = arith.constant 0 : i32
    %c0_i32_0 = arith.constant 0 : i32
    %c0_i32_1 = arith.constant 0 : i32
    return %c0_i32, %c0_i32_0 : i32, i32
  }
  func.func @transform_7(%arg0: i32) -> (i32, i32) {
    %c0_i32 = arith.constant 0 : i32
    %c0_i32_0 = arith.constant 0 : i32
    %c0_i32_1 = arith.constant 0 : i32
    return %c0_i32, %c0_i32_0 : i32, i32
  }
  func.func @transform_8(%arg0: i32) -> (i32, i32) {
    %c0_i32 = arith.constant 0 : i32
    %c0_i32_0 = arith.constant 0 : i32
    %c0_i32_1 = arith.constant 0 : i32
    return %c0_i32, %c0_i32_0 : i32, i32
  }
  func.func @transform_9(%arg0: i32) -> (i32, i32) {
    %c0_i32 = arith.constant 0 : i32
    %c0_i32_0 = arith.constant 0 : i32
    %c0_i32_1 = arith.constant 0 : i32
    return %c0_i32, %c0_i32_0 : i32, i32
  }
  func.func @transform_10(%arg0: i32) -> (i32, i32) {
    %c0_i32 = arith.constant 0 : i32
    %c0_i32_0 = arith.constant 0 : i32
    %c0_i32_1 = arith.constant 0 : i32
    return %c0_i32, %c0_i32_0 : i32, i32
  }
  func.func @transform_11(%arg0: i32) -> (i32, i32) {
    %c0_i32 = arith.constant 0 : i32
    %c0_i32_0 = arith.constant 0 : i32
    %c0_i32_1 = arith.constant 0 : i32
    return %c0_i32, %c0_i32_0 : i32, i32
  }
  func.func @transform_12(%arg0: i32) -> (i32, i32) {
    %c0_i32 = arith.constant 0 : i32
    %c0_i32_0 = arith.constant 0 : i32
    %c0_i32_1 = arith.constant 0 : i32
    return %c0_i32, %c0_i32_0 : i32, i32
  }
  func.func @transform_13(%arg0: i32) -> (i32, i32) {
    %c0_i32 = arith.constant 0 : i32
    %c0_i32_0 = arith.constant 0 : i32
    %c0_i32_1 = arith.constant 0 : i32
    return %c0_i32, %c0_i32_0 : i32, i32
  }
  func.func @transform_14(%arg0: i32) -> (i32, i32) {
    %c0_i32 = arith.constant 0 : i32
    %c0_i32_0 = arith.constant 0 : i32
    %c0_i32_1 = arith.constant 0 : i32
    return %c0_i32, %c0_i32_0 : i32, i32
  }
  func.func @transform_15(%arg0: i32) -> (i32, i32) {
    %c0_i32 = arith.constant 0 : i32
    %c0_i32_0 = arith.constant 0 : i32
    %c0_i32_1 = arith.constant 0 : i32
    return %c0_i32, %c0_i32_0 : i32, i32
  }
  func.func @transform_16(%arg0: i32) -> (i32, i32) {
    %c0_i32 = arith.constant 0 : i32
    %c0_i32_0 = arith.constant 0 : i32
    %c0_i32_1 = arith.constant 0 : i32
    return %c0_i32, %c0_i32_0 : i32, i32
  }
  func.func @transform_17(%arg0: i32) -> (i32, i32) {
    %c0_i32 = arith.constant 0 : i32
    %c0_i32_0 = arith.constant 0 : i32
    %c0_i32_1 = arith.constant 0 : i32
    return %c0_i32, %c0_i32_0 : i32, i32
  }
  func.func @transform_18(%arg0: i32) -> (i32, i32) {
    %c0_i32 = arith.constant 0 : i32
    %c0_i32_0 = arith.constant 0 : i32
    %c0_i32_1 = arith.constant 0 : i32
    return %c0_i32, %c0_i32_0 : i32, i32
  }
  func.func @transform_19(%arg0: i32) -> (i32, i32) {
    %c0_i32 = arith.constant 0 : i32
    %c0_i32_0 = arith.constant 0 : i32
    %c0_i32_1 = arith.constant 0 : i32
    return %c0_i32, %c0_i32_0 : i32, i32
  }
  func.func @transform_20(%arg0: i32) -> (i32, i32) {
    %c0_i32 = arith.constant 0 : i32
    %c0_i32_0 = arith.constant 0 : i32
    %c0_i32_1 = arith.constant 0 : i32
    return %c0_i32, %c0_i32_0 : i32, i32
  }
  func.func @transform_21(%arg0: i32) -> (i32, i32) {
    %c0_i32 = arith.constant 0 : i32
    %c0_i32_0 = arith.constant 0 : i32
    %c0_i32_1 = arith.constant 0 : i32
    return %c0_i32, %c0_i32_0 : i32, i32
  }
  func.func @transform_22(%arg0: i32) -> (i32, i32) {
    %c0_i32 = arith.constant 0 : i32
    %c0_i32_0 = arith.constant 0 : i32
    %c0_i32_1 = arith.constant 0 : i32
    return %c0_i32, %c0_i32_0 : i32, i32
  }
  func.func @transform_23(%arg0: i32) -> (i32, i32) {
    %c0_i32 = arith.constant 0 : i32
    %c0_i32_0 = arith.constant 0 : i32
    %c0_i32_1 = arith.constant 0 : i32
    return %c0_i32, %c0_i32_0 : i32, i32
  }
  func.func @transform_24(%arg0: i32) -> (i32, i32) {
    %c0_i32 = arith.constant 0 : i32
    %c0_i32_0 = arith.constant 0 : i32
    %c0_i32_1 = arith.constant 0 : i32
    return %c0_i32, %c0_i32_0 : i32, i32
  }
  func.func @transform_25(%arg0: i32) -> (i32, i32) {
    %c0_i32 = arith.constant 0 : i32
    %c0_i32_0 = arith.constant 0 : i32
    %c0_i32_1 = arith.constant 0 : i32
    return %c0_i32, %c0_i32_0 : i32, i32
  }
  func.func @transform_26(%arg0: i32) -> (i32, i32) {
    %c0_i32 = arith.constant 0 : i32
    %c0_i32_0 = arith.constant 0 : i32
    %c0_i32_1 = arith.constant 0 : i32
    return %c0_i32, %c0_i32_0 : i32, i32
  }
  func.func @transform_27(%arg0: i32) -> (i32, i32) {
    %c0_i32 = arith.constant 0 : i32
    %c0_i32_0 = arith.constant 0 : i32
    %c0_i32_1 = arith.constant 0 : i32
    return %c0_i32, %c0_i32_0 : i32, i32
  }
  func.func @transform_28(%arg0: i32) -> (i32, i32) {
    %c0_i32 = arith.constant 0 : i32
    %c0_i32_0 = arith.constant 0 : i32
    %c0_i32_1 = arith.constant 0 : i32
    return %c0_i32, %c0_i32_0 : i32, i32
  }
  func.func @transform_29(%arg0: i32) -> (i32, i32) {
    %c0_i32 = arith.constant 0 : i32
    %c0_i32_0 = arith.constant 0 : i32
    %c0_i32_1 = arith.constant 0 : i32
    return %c0_i32, %c0_i32_0 : i32, i32
  }
  func.func @transform_30(%arg0: i32) -> (i32, i32) {
    %c0_i32 = arith.constant 0 : i32
    %c0_i32_0 = arith.constant 0 : i32
    %c0_i32_1 = arith.constant 0 : i32
    return %c0_i32, %c0_i32_0 : i32, i32
  }
}

</mosaic_0001>

<bundles_post_ra>
// kernel: vae_forward.3
= control target key start
LH: loop header
LB: loop body
LE: loop exit
PB: predicated region body
PF: predicated region fallthrough
CT: control target
= control target key end

     0   :  { %s9173_s6 = smov 1   ;;  %s9174_s10 = smov 2   ;;  %s13550_s0 = inlined_call_operand.smem [shape: u32[31], index: -1, kind: input, shape index: {}] }
   0x1   :  { %s9268_s5 = sld [smem:[%s13550_s0]]   ;;  %s9175_s14 = smov 3  }
   0x2   :  { %s9273_s9 = sld [smem:[%s13550_s0 + %s9173_s6]]   ;;  %s9176_s18 = smov 4  }
   0x3   :  { %s9278_s13 = sld [smem:[%s13550_s0 + %s9174_s10]]   ;;  %s9177_s22 = smov 5  }
   0x4   :  { %s9283_s17 = sld [smem:[%s13550_s0 + %s9175_s14]]   ;;  %s9178_s26 = smov 6  }
   0x5   :  { %s9288_s21 = sld [smem:[%s13550_s0 + %s9176_s18]]   ;;  %s9179_s30 = smov 7  }
   0x6   :  { %s9293_s25 = sld [smem:[%s13550_s0 + %s9177_s22]]   ;;  %s9180_s4 = smov 8  }
   0x7   :  { %s9298_s29 = sld [smem:[%s13550_s0 + %s9178_s26]]   ;;  %s9181_s10 = smov 9  }
   0x8   :  { %s9303_s3 = sld [smem:[%s13550_s0 + %s9179_s30]]   ;;  %s9182_s15 = smov 10  }
   0x9   :  { %s9308_s8 = sld [smem:[%s13550_s0 + %s9180_s4]]   ;;  %s9183_s20 = smov 11  }
   0xa   :  { %s9313_s14 = sld [smem:[%s13550_s0 + %s9181_s10]]   ;;  %s9184_s26 = smov 12  }
   0xb   :  { %s9318_s19 = sld [smem:[%s13550_s0 + %s9182_s15]]   ;;  %s9185_s1 = smov 13  }
   0xc   :  { %s9323_s24 = sld [smem:[%s13550_s0 + %s9183_s20]]   ;;  %s9186_s7 = smov 14  }
   0xd   :  { %s9328_s30 = sld [smem:[%s13550_s0 + %s9184_s26]]   ;;  %s9187_s15 = smov 15  }
   0xe   :  { %s9333_s6 = sld [smem:[%s13550_s0 + %s9185_s1]]   ;;  %s9188_s22 = smov 16  }
   0xf   :  { %s9338_s12 = sld [smem:[%s13550_s0 + %s9186_s7]]   ;;  %s9189_s28 = smov 17  }
  0x10   :  { %s9343_s20 = sld [smem:[%s13550_s0 + %s9187_s15]]   ;;  %s9190_s7 = smov 18  }
  0x11   :  { %s9348_s27 = sld [smem:[%s13550_s0 + %s9188_s22]]   ;;  %s9191_s15 = smov 19  }
  0x12   :  { %s9353_s4 = sld [smem:[%s13550_s0 + %s9189_s28]]   ;;  %s9192_s22 = smov 20  }
  0x13   :  { %13720 = sst [smem:[#allocation12_spill]] %s9328_s30  ;;  %s9193_s28 = smov 21  }
  0x14   :  { %13721 = sst [smem:[#allocation13_spill]] %s9333_s6  ;;  %s9201_s1 = smov 29  }
  0x15   :  { %s9358_s6 = sld [smem:[%s13550_s0 + %s9190_s7]]   ;;  %s9194_s7 = smov 22  }
  0x16   :  { %13722 = sst [smem:[#allocation14_spill]] %s9343_s20  ;;  %s9202_s10 = smov 30  }
  0x17   :  { %13723 = sst [smem:[#allocation15_spill]] %s9348_s27 }
  0x18   :  { %13724 = sst [smem:[#allocation16_spill]] %s9353_s4 }
  0x19   :  { %s9363_s20 = sld [smem:[%s13550_s0 + %s9191_s15]]   ;;  %s9195_s15 = smov 23  }
  0x1a   :  { %s9368_s30 = sld [smem:[%s13550_s0 + %s9192_s22]]   ;;  %s9196_s22 = smov 24  }
  0x1b   :  { %13725 = sst [smem:[#allocation17_spill]] %s9358_s6 }
  0x1c   :  { %s9373_s4 = sld [smem:[%s13550_s0 + %s9193_s28]]   ;;  %s9197_s28 = smov 25  }
  0x1d   :  { %s9378_s6 = sld [smem:[%s13550_s0 + %s9194_s7]]   ;;  %s9198_s7 = smov 26  }
  0x1e   :  { %s9383_s27 = sld [smem:[%s13550_s0 + %s9195_s15]]   ;;  %s9199_s15 = smov 27  }
  0x20   :  { %13726 = sst [smem:[#allocation18_spill]] %s9368_s30 }
  0x21   :  { %s9388_s30 = sld [smem:[%s13550_s0 + %s9196_s22]]   ;;  %s9200_s22 = smov 28  }
  0x22   :  { %13727 = sst [smem:[#allocation19_spill]] %s9373_s4 }
  0x23   :  { %13728 = sst [smem:[#allocation20_spill]] %s9378_s6 }
  0x24   :  { %13729 = sst [smem:[#allocation21_spill]] %s9383_s27 }
  0x25   :  { %s9393_s4 = sld [smem:[%s13550_s0 + %s9197_s28]]  }
  0x26   :  { %s9398_s6 = sld [smem:[%s13550_s0 + %s9198_s7]]  }
  0x27   :  { %13730 = sst [smem:[#allocation22_spill]] %s9388_s30 }
  0x28   :  { %s9403_s27 = sld [smem:[%s13550_s0 + %s9199_s15]]  }
  0x29   :  { %s8209_s30 = sld [smem:[%s13550_s0 + %s9200_s22]]  }
  0x2b   :  { %13731 = sst [smem:[#allocation23_spill]] %s9393_s4 }
  0x2c   :  { %13732 = sst [smem:[#allocation24_spill]] %s9398_s6 }
  0x2d   :  { %s9411_s4 = sld [smem:[%s13550_s0 + %s9201_s1]]  }
  0x2e   :  { %s9416_s6 = sld [smem:[%s13550_s0 + %s9202_s10]]  }
  0x2f   :  { %v67_v0 = vstv %s8209_s30 }
  0x30   :  { %68 = vst [vmem:[#allocation5] sm:$0x1] %v67_v0 }
  0x31   :  { %69 = vsyncpa [#allocation7], 0 }
  0x32   :  { %70 = vsyncpa [#allocation9], 0  ;;  %s9203_s15 = smov [#allocation6]  }
  0x33   :  { %s98_s16 = sshll.u32 %s9203_s15, 4  ;;  %s99_s16 = int_to_ptr.vmem [resolvable:$true] %s98_s16 }
  0x34   :  { %s9137_s18 = scalar_lea.vmem %s99_s16, 16384  ;;  %p9142_p1 = scmp.lt.s32.totalorder %s99_s16, %s99_s16 }
  0x35   :  { %p9138_p0 = scmp.ne.s32.totalorder %s99_s16, %s9137_s18  ;;  %p9143_p2 = scmp.lt.s32.totalorder %s9137_s18, %s9137_s18 }
  0x37   :  { %p9144_p3 = por %p9143_p2, %p9142_p1 }
  0x39   :  { %p9145_p4 = pnand %p9144_p3, %p9138_p0 }
  0x3b   :  { %9148 = shalt.err (!%p9145_p4)
}
  0x3c   :  { %s9204_s22 = smov 64   ;;  %s9205_s23 = smov 4  }
  0x3d   :  { %104 = dma.hbm_to_vmem [thread:$0]  %s9323_s24, 16384, %s99_s16, [#allocation7], %s9204_s22, %s9204_s22, %s9205_s23  }
  0x3e   :  { %s9206_s0 = smov [#allocation8]  }
  0x3f   :  { %s124_s30 = sshll.u32 %s9206_s0, 4  ;;  %s125_s30 = int_to_ptr.vmem [resolvable:$true] %s124_s30 }
  0x40   :  { %s9157_s26 = scalar_lea.vmem %s125_s30, 16384  ;;  %p9162_p6 = scmp.lt.s32.totalorder %s125_s30, %s125_s30 }
  0x41   :  { %p9158_p5 = scmp.ne.s32.totalorder %s125_s30, %s9157_s26  ;;  %p9163_p7 = scmp.lt.s32.totalorder %s9157_s26, %s9157_s26 }
  0x43   :  { %p9164_p8 = por %p9163_p7, %p9162_p6 }
  0x45   :  { %p9165_p9 = pnand %p9164_p8, %p9158_p5 }
  0x47   :  { %9168 = shalt.err (!%p9165_p9)
}
  0x48   :  { %s9207_s1 = smov 1024  }
  0x49   :  { %130 = dma.hbm_to_vmem [thread:$0]  %s9363_s20, 16384, %s125_s30, [#allocation9], %s9207_s1, %s9207_s1, %s9204_s22  }
  0x4a   :  { %9169 = dma.done.wait [#allocation7], 16384  }
  0x4b   :  { %9170 = vsyncadd [#allocation7], 4294950912 }
  0x4c   :  { %9171 = dma.done.wait [#allocation9], 16384  }
  0x4d   :  { %9172 = vsyncadd [#allocation9], 4294950912  ;;  %v13556_v1 = vlaneseq  ;;  %v9433_v5 = vld [vmem:[%s9268_s5] sm:$0x3f]  ;;  %s9208_s24 = smov 83   ;;  %s9209_s20 = smov 84  }
  0x4e   :  { %s9210_s5 = smov 82   ;;  %s9211_s28 = smov 127   ;;  %v13559_v26 = vmov 0.0   ;;  %v13557_v45 = vmov 0   ;;  %v640_v50 = vld [vmem:[%s9278_s13] sm:$0xff]  ;;  %vm13587_vm0 = vcmask 678912  }
  0x4f   :  { %v9424_v2 = vshrl.u32 %v13556_v1, 7  ;;  %s9212_s2 = smov 81   ;;  %s9213_s10 = smov 126   ;;  %5114 = vst [vmem:[#allocation4] sm:$0xff] %v13559_v26  ;;  %5115 = vst [vmem:[#allocation4 + $0x8] sm:$0xff] %v13559_v26  ;;  %714 = vmatprep.mubr.f32.mxu1 %v13559_v26  ;;  %1461 = vmatprep.mubr.f32.mxu0 %v13559_v26  ;;  %v865_v53 = vld [vmem:[%s9288_s21] sm:$0xff] }
  0x50   :  { %s9214_s7 = smov 62   ;;  %s9215_s11 = smov 125   ;;  %5116 = vst [vmem:[#allocation4 + $0x10] sm:$0xff] %v13559_v26  ;;  %5117 = vst [vmem:[#allocation4 + $0x18] sm:$0xff] %v13559_v26  ;;  %8931 = vset.pattern.permute.xlu0 %v13557_v45  ;;  %8932 = vset.pattern.permute.xlu1 %v13557_v45  ;;  %vm13578_vm1 = vcmask 687104   ;;  %vm13588_vm2 = vcmask 670720  }
  0x51   :  { %13733 = vst [vmem:[#allocation25_spill] sm:$0xff] %v9424_v2  ;;  %v9427_v3 = vsub.s32 1, %v9424_v2  ;;  %v9430_v4 = vsub.s32 2, %v9424_v2  ;;  %v9440_v7 = vsub.s32 0, %v9424_v2  ;;  %v9479_v10 = vsub.s32 4, %v9424_v2  ;;  %s9216_s15 = smov 61  }
  0x52   :  { %v9482_v11 = vsub.s32 3, %v9424_v2  ;;  %s9217_s16 = smov 106   ;;  %s9218_s18 = smov 60   ;;  %v9597_v18 = vsub.s32 5, %v9424_v2  ;;  %5119 = vst [vmem:[#allocation4 + $0x28] sm:$0xff] %v13559_v26  ;;  %5120 = vst [vmem:[#allocation4 + $0x30] sm:$0xff] %v13559_v26 }
  0x53   :  { %13734 = vst [vmem:[#allocation26_spill] sm:$0xff] %v9427_v3  ;;  %13735 = vst [vmem:[#allocation27_spill] sm:$0xff] %v9430_v4  ;;  %v9437_v6 = vrot.slane %v9433_v5, %v9427_v3  ;;  %v9448_v8 = vrot.slane %v9433_v5, %v9430_v4  ;;  %v9456_v9 = vrot.slane %v9433_v5, %v9440_v7  ;;  %s9219_s23 = smov 105   ;;  %s9220_s0 = smov 59   ;;  %vm13577_vm3 = vcmask 662528  }
  0x54   :  { %13736 = vst [vmem:[#allocation28_spill] sm:$0xff] %v9440_v7  ;;  %13737 = vst [vmem:[#allocation29_spill] sm:$0xff] %v9479_v10  ;;  %v9502_v12 = vrot.slane %v9433_v5, %v9479_v10  ;;  %v9506_v13 = vrot.slane %v9433_v5, %v9482_v11  ;;  %s9221_s30 = smov 104   ;;  %s9222_s26 = smov 103   ;;  %v9609_v21 = vrot.slane %v9433_v5, %v9597_v18  ;;  %vm548_vm4 = vcmask 1040384  }
  0x55   :  { %382 = vrot.lane.b32.xlu1 %v9437_v6, %s9208_s24  ;;  %358 = vrot.lane.b32.xlu0 %v9437_v6, %s9209_s20  ;;  %13738 = vst [vmem:[#allocation30_spill] sm:$0xff] %v9482_v11  ;;  %13740 = vst [vmem:[#allocation32_spill] sm:$0xff] %v9597_v18  ;;  %vm13581_vm5 = vcmask 506880   ;;  %vm555_vm6 = vcmask 1041408   ;;  %vm13579_vm7 = vcmask 498688   ;;  %vm562_vm8 = vcmask 1042432  }
  0x56   :  { %13739 = vst [vmem:[#allocation31_spill] sm:$0xff] %v9502_v12  ;;  %13741 = vst [vmem:[#allocation33_spill] sm:$0xff] %v9609_v21  ;;  %vm13580_vm9 = vcmask 490496   ;;  %vm569_vm10 = vcmask 1043456   ;;  %vm576_vm11 = vcmask 1044480   ;;  %vm13582_vm12 = vcmask 482304  }
  0x57   :  { %5121 = vst [vmem:[#allocation4 + $0x38] sm:$0xff] %v13559_v26  ;;  %5127 = vst [vmem:[#allocation4 + $0x60] sm:$0xff] %v13559_v26  ;;  %vm583_vm13 = vcmask 1045504   ;;  %vm590_vm14 = vcmask 1046528   ;;  %vm13608_vm15 = vcmask 1039360   ;;  %s9226_s13 = smov 122  }
  0x58   :  { %5128 = vst [vmem:[#allocation4 + $0x68] sm:$0xff] %v13559_v26  ;;  %5129 = vst [vmem:[#allocation4 + $0x70] sm:$0xff] %v13559_v26  ;;  %s9228_s21 = smov 76   ;;  %s9235_s1 = smov 46  }
  0x59   :  { %384 = vrot.lane.b32.xlu1 %v9448_v8, %s9208_s24  ;;  %360 = vrot.lane.b32.xlu0 %v9448_v8, %s9209_s20  ;;  %5131 = vst [vmem:[#allocation4 + $0x80] sm:$0xff] %v13559_v26  ;;  %5132 = vst [vmem:[#allocation4 + $0x88] sm:$0xff] %v13559_v26 }
  0x5a   :  { %5133 = vst [vmem:[#allocation4 + $0x90] sm:$0xff] %v13559_v26 }
  0x5d   :  { %380 = vrot.lane.b32.xlu1 %v9456_v9, %s9208_s24  ;;  %356 = vrot.lane.b32.xlu0 %v9456_v9, %s9209_s20 }
  0x61   :  { %408 = vrot.lane.b32.xlu1 %v9448_v8, %s9210_s5  ;;  %406 = vrot.lane.b32.xlu0 %v9437_v6, %s9210_s5 }
  0x65   :  { %192 = vrot.lane.b32.xlu1 %v9448_v8, %s9211_s28  ;;  %190 = vrot.lane.b32.xlu0 %v9437_v6, %s9211_s28 }
  0x69   :  { %430 = vrot.lane.b32.xlu1 %v9437_v6, %s9212_s2  ;;  %404 = vrot.lane.b32.xlu0 %v9456_v9, %s9210_s5 }
  0x6d   :  { %188 = vrot.lane.b32.xlu1 %v9456_v9, %s9211_s28  ;;  %432 = vrot.lane.b32.xlu0 %v9448_v8, %s9212_s2 }
  0x71   :  { %216 = vrot.lane.b32.xlu1 %v9448_v8, %s9213_s10  ;;  %214 = vrot.lane.b32.xlu0 %v9437_v6, %s9213_s10 }
  0x75   :  { %454 = vrot.lane.b32.xlu1 %v9437_v6, %s9214_s7  ;;  %428 = vrot.lane.b32.xlu0 %v9456_v9, %s9212_s2 }
  0x79   :  { %212 = vrot.lane.b32.xlu1 %v9456_v9, %s9213_s10  ;;  %456 = vrot.lane.b32.xlu0 %v9448_v8, %s9214_s7 }
  0x7d   :  { %240 = vrot.lane.b32.xlu1 %v9448_v8, %s9215_s11  ;;  %238 = vrot.lane.b32.xlu0 %v9437_v6, %s9215_s11 }
  0x81   :  { %364 = vrot.lane.b32.xlu1 %v9502_v12, %s9209_s20  ;;  %362 = vrot.lane.b32.xlu0 %v9506_v13, %s9209_s20 }
  0x85   :  { %388 = vrot.lane.b32.xlu1 %v9502_v12, %s9208_s24  ;;  %386 = vrot.lane.b32.xlu0 %v9506_v13, %s9208_s24 }
  0x89   :  { %478 = vrot.lane.b32.xlu1 %v9437_v6, %s9216_s15  ;;  %452 = vrot.lane.b32.xlu0 %v9456_v9, %s9214_s7 }
  0x8d   :  { %236 = vrot.lane.b32.xlu1 %v9456_v9, %s9215_s11  ;;  %480 = vrot.lane.b32.xlu0 %v9448_v8, %s9216_s15 }
  0x91   :  { %264 = vrot.lane.b32.xlu1 %v9448_v8, %s9217_s16  ;;  %262 = vrot.lane.b32.xlu0 %v9437_v6, %s9217_s16 }
  0x95   :  { %412 = vrot.lane.b32.xlu1 %v9502_v12, %s9210_s5  ;;  %410 = vrot.lane.b32.xlu0 %v9506_v13, %s9210_s5 }
  0x99   :  { %502 = vrot.lane.b32.xlu1 %v9437_v6, %s9218_s18  ;;  %476 = vrot.lane.b32.xlu0 %v9456_v9, %s9216_s15 }
  0x9d   :  { %194 = vrot.lane.b32.xlu1 %v9506_v13, %s9211_s28  ;;  %504 = vrot.lane.b32.xlu0 %v9448_v8, %s9218_s18 }
  0xa1   :  { %260 = vrot.lane.b32.xlu1 %v9456_v9, %s9217_s16  ;;  %196 = vrot.lane.b32.xlu0 %v9502_v12, %s9211_s28 }
  0xa5   :  { %288 = vrot.lane.b32.xlu1 %v9448_v8, %s9219_s23  ;;  %286 = vrot.lane.b32.xlu0 %v9437_v6, %s9219_s23 }
  0xa9   :  { %436 = vrot.lane.b32.xlu1 %v9502_v12, %s9212_s2  ;;  %434 = vrot.lane.b32.xlu0 %v9506_v13, %s9212_s2 }
  0xad   :  { %526 = vrot.lane.b32.xlu1 %v9437_v6, %s9220_s0  ;;  %500 = vrot.lane.b32.xlu0 %v9456_v9, %s9218_s18 }
  0xb1   :  { %218 = vrot.lane.b32.xlu1 %v9506_v13, %s9213_s10  ;;  %528 = vrot.lane.b32.xlu0 %v9448_v8, %s9220_s0 }
  0xb5   :  { %284 = vrot.lane.b32.xlu1 %v9456_v9, %s9219_s23  ;;  %220 = vrot.lane.b32.xlu0 %v9502_v12, %s9213_s10 }
  0xb9   :  { %312 = vrot.lane.b32.xlu1 %v9448_v8, %s9221_s30  ;;  %310 = vrot.lane.b32.xlu0 %v9437_v6, %s9221_s30 }
  0xbd   :  { %460 = vrot.lane.b32.xlu1 %v9502_v12, %s9214_s7  ;;  %458 = vrot.lane.b32.xlu0 %v9506_v13, %s9214_s7 }
  0xc1   :  { %242 = vrot.lane.b32.xlu1 %v9506_v13, %s9215_s11  ;;  %524 = vrot.lane.b32.xlu0 %v9456_v9, %s9220_s0 }
  0xc5   :  { %308 = vrot.lane.b32.xlu1 %v9456_v9, %s9221_s30  ;;  %244 = vrot.lane.b32.xlu0 %v9502_v12, %s9215_s11 }
  0xc7   :  { %v9580_v14 = vpop.permute.xlu1 %382  ;;  %v9582_v15 = vpop.permute.xlu0 %358 }
  0xc9   :  { %336 = vrot.lane.b32.xlu1 %v9448_v8, %s9222_s26  ;;  %334 = vrot.lane.b32.xlu0 %v9437_v6, %s9222_s26 }
  0xcb   :  { %v9588_v16 = vpop.permute.xlu1 %384  ;;  %v9590_v17 = vpop.permute.xlu0 %360 }
  0xcc   :  { %v394_v0 = vsel %vm13587_vm0, %v9580_v14, %v9588_v16  ;;  %v370_v5 = vsel %vm13578_vm1, %v9582_v15, %v9590_v17 }
  0xcd   :  { %484 = vrot.lane.b32.xlu1 %v9502_v12, %s9216_s15  ;;  %482 = vrot.lane.b32.xlu0 %v9506_v13, %s9216_s15  ;;  %v598_v1 = vsel %vm548_vm4, %v370_v5, %v394_v0 }
  0xcf   :  { %v9599_v19 = vpop.permute.xlu1 %380  ;;  %v9601_v20 = vpop.permute.xlu0 %356 }
  0xd1   :  { %268 = vrot.lane.b32.xlu1 %v9502_v12, %s9217_s16  ;;  %266 = vrot.lane.b32.xlu0 %v9506_v13, %s9217_s16 }
  0xd3   :  { %v9611_v22 = vpop.permute.xlu1 %408  ;;  %v9613_v23 = vpop.permute.xlu0 %406 }
  0xd5   :  { %366 = vrot.lane.b32.xlu1 %v9609_v21, %s9209_s20  ;;  %332 = vrot.lane.b32.xlu0 %v9456_v9, %s9222_s26 }
  0xd7   :  { %v9619_v24 = vpop.permute.xlu1 %192  ;;  %v9621_v25 = vpop.permute.xlu0 %190 }
  0xd9   :  { %506 = vrot.lane.b32.xlu1 %v9506_v13, %s9218_s18  ;;  %390 = vrot.lane.b32.xlu0 %v9609_v21, %s9208_s24 }
  0xdb   :  { %v9642_v27 = vpop.permute.xlu1 %430  ;;  %v9644_v28 = vpop.permute.xlu0 %404 }
  0xdd   :  { %290 = vrot.lane.b32.xlu1 %v9506_v13, %s9219_s23  ;;  %508 = vrot.lane.b32.xlu0 %v9502_v12, %s9218_s18 }
  0xdf   :  { %v9650_v29 = vpop.permute.xlu1 %188  ;;  %v9652_v30 = vpop.permute.xlu0 %432 }
  0xe1   :  { %414 = vrot.lane.b32.xlu1 %v9609_v21, %s9210_s5  ;;  %292 = vrot.lane.b32.xlu0 %v9502_v12, %s9219_s23 }
  0xe3   :  { %v9658_v31 = vpop.permute.xlu1 %216  ;;  %v9660_v32 = vpop.permute.xlu0 %214 }
  0xe5   :  { %532 = vrot.lane.b32.xlu1 %v9502_v12, %s9220_s0  ;;  %530 = vrot.lane.b32.xlu0 %v9506_v13, %s9220_s0 }
  0xe7   :  { %v9666_v33 = vpop.permute.xlu1 %454  ;;  %v9668_v34 = vpop.permute.xlu0 %428 }
  0xe9   :  { %314 = vrot.lane.b32.xlu1 %v9506_v13, %s9221_s30  ;;  %198 = vrot.lane.b32.xlu0 %v9609_v21, %s9211_s28 }
  0xeb   :  { %v9674_v35 = vpop.permute.xlu1 %212  ;;  %v9676_v36 = vpop.permute.xlu0 %456 }
  0xec   :  { %v466_v45 = vsel %vm13581_vm5, %v9666_v33, %v9676_v36 }
  0xed   :  { %438 = vrot.lane.b32.xlu1 %v9609_v21, %s9212_s2  ;;  %316 = vrot.lane.b32.xlu0 %v9502_v12, %s9221_s30 }
  0xef   :  { %v9682_v37 = vpop.permute.xlu1 %240  ;;  %v9684_v38 = vpop.permute.xlu0 %238 }
  0xf1   :  { %338 = vrot.lane.b32.xlu1 %v9506_v13, %s9222_s26  ;;  %222 = vrot.lane.b32.xlu0 %v9609_v21, %s9213_s10 }
  0xf3   :  { %v9690_v39 = vpop.permute.xlu1 %364  ;;  %v9692_v40 = vpop.permute.xlu0 %362 }
  0xf5   :  { %462 = vrot.lane.b32.xlu1 %v9609_v21, %s9214_s7  ;;  %340 = vrot.lane.b32.xlu0 %v9502_v12, %s9222_s26 }
  0xf7   :  { %v9698_v41 = vpop.permute.xlu1 %388  ;;  %v9700_v42 = vpop.permute.xlu0 %386 }
  0xf9   :  { %486 = vrot.lane.b32.xlu1 %v9609_v21, %s9216_s15  ;;  %246 = vrot.lane.b32.xlu0 %v9609_v21, %s9215_s11 }
  0xfb   :  { %v9706_v43 = vpop.permute.xlu1 %478  ;;  %v9708_v44 = vpop.permute.xlu0 %452 }
  0xfd   :  { %510 = vrot.lane.b32.xlu1 %v9609_v21, %s9218_s18  ;;  %270 = vrot.lane.b32.xlu0 %v9609_v21, %s9217_s16 }
  0xff   :  { %v9716_v46 = vpop.permute.xlu1 %236  ;;  %v9718_v47 = vpop.permute.xlu0 %480 }
 0x100   :  { %v490_v10 = vsel %vm13579_vm7, %v9706_v43, %v9718_v47 }
 0x101   :  { %534 = vrot.lane.b32.xlu1 %v9609_v21, %s9220_s0  ;;  %294 = vrot.lane.b32.xlu0 %v9609_v21, %s9219_s23 }
 0x103   :  { %v9724_v48 = vpop.permute.xlu1 %264  ;;  %v9726_v49 = vpop.permute.xlu0 %262 }
 0x105   :  { %342 = vrot.lane.b32.xlu1 %v9609_v21, %s9222_s26  ;;  %318 = vrot.lane.b32.xlu0 %v9609_v21, %s9221_s30 }
 0x107   :  { %v9733_v51 = vpop.permute.xlu1 %412  ;;  %v9735_v52 = vpop.permute.xlu0 %410 }
 0x109   :  { %643 = vperm.xlu0 %8931, %v640_v50   ;;  %v418_v50 = vsel %vm13588_vm2, %v9613_v23, %v9611_v22 }
 0x10a   :  { %v604_v18 = vsel %vm555_vm6, %v598_v1, %v418_v50 }
 0x10b   :  { %v9738_v54 = vpop.permute.xlu1 %502  ;;  %v477_v55 = vpop.permute.xlu0 %476 }
 0x10d   :  { %961 = vperm.xlu0 %8931, %v865_v53   ;;  %v442_v53 = vsel %vm13577_vm3, %v9642_v27, %v9652_v30 }
 0x10e   :  { %v610_v11 = vsel %vm562_vm8, %v604_v18, %v442_v53 }
 0x10f   :  { %v9740_v56 = vpop.permute.xlu1 %194  ;;  %v9742_v57 = vpop.permute.xlu0 %504  ;;  %v616_v5 = vsel %vm569_vm10, %v610_v11, %v466_v45  ;;  %v393_v45 = vsel %vm13587_vm0, %v9599_v19, %v9580_v14  ;;  %v489_v19 = vsel %vm13579_vm7, %v477_v55, %v9706_v43  ;;  %vm13583_vm7 = vcmask 867328  }
 0x110   :  { %v514_v0 = vsel %vm13580_vm9, %v9738_v54, %v9742_v57  ;;  %v622_v1 = vsel %vm576_vm11, %v616_v5, %v490_v10  ;;  %v369_v10 = vsel %vm13578_vm1, %v9601_v20, %v9582_v15  ;;  %v441_v5 = vsel %vm13577_vm3, %v9668_v34, %v9642_v27 }
 0x111   :  { %v628_v18 = vsel %vm583_vm13, %v622_v1, %v514_v0  ;;  %v417_v0 = vsel %vm13588_vm2, %v9644_v28, %v9613_v23  ;;  %v597_v1 = vsel %vm548_vm4, %v369_v10, %v393_v45  ;;  %vm13609_vm3 = vcmask 1031168  }
 0x112   :  { %v603_v15 = vsel %vm555_vm6, %v597_v1, %v417_v0  ;;  %vm13610_vm1 = vcmask 1022976  }
 0x113   :  { %v9744_v58 = vpop.permute.xlu1 %260  ;;  %v9746_v59 = vpop.permute.xlu0 %196  ;;  %v609_v20 = vsel %vm562_vm8, %v603_v15, %v441_v5 }
 0x117   :  { %v9748_v60 = vpop.permute.xlu1 %288  ;;  %v9750_v61 = vpop.permute.xlu0 %286 }
 0x11b   :  { %v9752_v62 = vpop.permute.xlu1 %436  ;;  %v9754_v63 = vpop.permute.xlu0 %434 }
 0x11f   :  { %v527_v26 = vpop.permute.xlu1 %526  ;;  %v501_v2 = vpop.permute.xlu0 %500 }
 0x120   :  { %v513_v23 = vsel %vm13580_vm9, %v501_v2, %v9738_v54  ;;  %v226_v2 = vsel %vm13609_vm3, %v9660_v32, %v9658_v31  ;;  %vm296_vm9 = vcmask 859136  }
 0x121   :  { %v298_v1 = vsel %vm296_vm9, %v9750_v61, %v9748_v60 }
 0x123   :  { %v9781_v4 = vpop.permute.xlu1 %218  ;;  %v9783_v3 = vpop.permute.xlu0 %528 }
 0x124   :  { %v538_v50 = vsel %vm13582_vm12, %v527_v26, %v9783_v3 }
 0x125   :  { %v634_v53 = vsel %vm590_vm14, %v628_v18, %v538_v50  ;;  %v465_v50 = vsel %vm13581_vm5, %v9708_v44, %v9666_v33  ;;  %v202_v44 = vsel %vm13608_vm15, %v9621_v25, %v9619_v24  ;;  %vm13586_vm5 = vcmask 850944  }
 0x126   :  { %678 = vmatprep.subr.mxu1 %v634_v53  ;;  %v615_v27 = vsel %vm569_vm10, %v609_v20, %v465_v50  ;;  %v250_v53 = vsel %vm13610_vm1, %v9684_v38, %v9682_v37  ;;  %v550_v45 = vsel %vm548_vm4, %v9437_v6, %v202_v44 }
 0x127   :  { %v285_v7 = vpop.permute.xlu1 %284  ;;  %v9790_v12 = vpop.permute.xlu0 %220  ;;  %v621_v28 = vsel %vm576_vm11, %v615_v27, %v489_v19  ;;  %v557_v5 = vsel %vm555_vm6, %v550_v45, %v226_v2  ;;  %v225_v2 = vsel %vm13609_vm3, %v9674_v35, %v9660_v32  ;;  %v273_v45 = vsel %vm13583_vm7, %v9744_v58, %v9726_v49 }
 0x128   :  { %v627_v55 = vsel %vm583_vm13, %v621_v28, %v513_v23  ;;  %v564_v50 = vsel %vm562_vm8, %v557_v5, %v250_v53 }
 0x12b   :  { %v9792_v21 = vpop.permute.xlu1 %312  ;;  %v311_v11 = vpop.permute.xlu0 %310 }
 0x12c   :  { %v322_v15 = vsel %vm13586_vm5, %v311_v11, %v9792_v21 }
 0x12f   :  { %v9810_v18 = vpop.permute.xlu1 %460  ;;  %v9812_v14 = vpop.permute.xlu0 %458 }
 0x133   :  { %v9822_v33 = vpop.permute.xlu1 %242  ;;  %v525_v34 = vpop.permute.xlu0 %524 }
 0x134   :  { %v537_v43 = vsel %vm13582_vm12, %v525_v34, %v527_v26  ;;  %v274_v26 = vsel %vm13583_vm7, %v9726_v49, %v9724_v48  ;;  %vm13585_vm12 = vcmask 842752   ;;  %vm13584_vm7 = vcmask 130048  }
 0x135   :  { %v633_v54 = vsel %vm590_vm14, %v627_v55, %v537_v43  ;;  %v571_v6 = vsel %vm569_vm10, %v564_v50, %v274_v26  ;;  %v201_v55 = vsel %vm13608_vm15, %v9650_v29, %v9621_v25  ;;  %v297_v29 = vsel %vm296_vm9, %v285_v7, %v9750_v61  ;;  %v9890_v50 = vld [vmem:[%s9273_s9] sm:$0xff]  ;;  %s9225_s9 = smov 110  }
 0x136   :  { %679 = vmatpush1.msra.mxu1 %v633_v54  ;;  %v578_v19 = vsel %vm576_vm11, %v571_v6, %v298_v1  ;;  %v249_v54 = vsel %vm13610_vm1, %v9716_v46, %v9684_v38  ;;  %v549_v53 = vsel %vm548_vm4, %v9456_v9, %v201_v55 }
 0x137   :  { %v309_v10 = vpop.permute.xlu1 %308  ;;  %v9841_v0 = vpop.permute.xlu0 %244  ;;  %v585_v28 = vsel %vm583_vm13, %v578_v19, %v322_v15  ;;  %v556_v25 = vsel %vm555_vm6, %v549_v53, %v225_v2  ;;  %v395_v19 = vsel %vm13587_vm0, %v9588_v16, %v9700_v42 }
 0x138   :  { %v563_v32 = vsel %vm562_vm8, %v556_v25, %v249_v54  ;;  %v321_v35 = vsel %vm13586_vm5, %v309_v10, %v311_v11  ;;  %v13742_v11 = vmov 0.0   ;;  %vm13745_vm5 = vcmask 662528  }
 0x139   :  { %v570_v38 = vsel %vm569_vm10, %v563_v32, %v273_v45 }
 0x13a   :  { %v577_v9 = vsel %vm576_vm11, %v570_v38, %v297_v29 }
 0x13b   :  { %v9852_v20 = vpop.permute.xlu1 %336  ;;  %v335_v23 = vpop.permute.xlu0 %334  ;;  %v584_v1 = vsel %vm583_vm13, %v577_v9, %v321_v35 }
 0x13c   :  { %v346_v27 = vsel %vm13585_vm12, %v335_v23, %v9852_v20 }
 0x13d   :  { %v592_v34 = vsel %vm590_vm14, %v585_v28, %v346_v27  ;;  %v419_v27 = vsel %vm13588_vm2, %v9611_v22, %v9735_v52  ;;  %v420_v28 = vsel %vm13588_vm2, %v9735_v52, %v9733_v51  ;;  %vm13747_vm2 = vcmask 506880  }
 0x13e   :  { %680 = vmatprep.subr.mxu1 %v592_v34 }
 0x13f   :  { %v9858_v44 = vpop.permute.xlu1 %484  ;;  %v483_v43 = vpop.permute.xlu0 %482 }
 0x143   :  { %v9874_v26 = vpop.permute.xlu1 %268  ;;  %v9876_v5 = vpop.permute.xlu0 %266 }
 0x147   :  { %v9885_v46 = vpop.permute.xlu1 %366  ;;  %v333_v49 = vpop.permute.xlu0 %332 }
 0x148   :  { %v345_v58 = vsel %vm13585_vm12, %v333_v49, %v335_v23  ;;  %v396_v23 = vsel %vm13587_vm0, %v9700_v42, %v9698_v41  ;;  %v443_v42 = vsel %vm13745_vm5, %v9652_v30, %v9754_v63  ;;  %vm13746_vm0 = vmmov %vm13745_vm5 }
 0x149   :  { %v591_v7 = vsel %vm590_vm14, %v584_v1, %v345_v58  ;;  %v444_v22 = vsel %vm13746_vm0, %v9754_v63, %v9752_v62  ;;  %vm13749_vm0 = vcmask 498688  }
 0x14a   :  { %681 = vmatpush1.msra.mxu1 %v591_v7  ;;  %v491_v53 = vsel %vm13749_vm0, %v9718_v47, %v483_v43  ;;  %vm13750_vm5 = vmmov %vm13749_vm0 }
 0x14b   :  { %v507_v61 = vpop.permute.xlu1 %506  ;;  %v9893_v15 = vpop.permute.xlu0 %390  ;;  %8212 = vmatmul.mubr.msk.f32.vlgmr.msra.gmra.mxu1 %vm13584_vm7, %v9890_v50  ;;  %vm13743_vm7 = vcmask 687104   ;;  %v492_v45 = vsel %vm13750_vm5, %v483_v43, %v9858_v44  ;;  %vm13755_vm5 = vcmask 867328  }
 0x14c   :  { %785 = vmatprep.mubr.f32.mxu1 %v13742_v11  ;;  %v371_v34 = vsel %vm13743_vm7, %v9590_v17, %v9692_v40  ;;  %vm13744_vm12 = vmmov %vm13743_vm7  ;;  %v467_v17 = vsel %vm13747_vm2, %v9676_v36, %v9812_v14 }
 0x14d   :  { %v372_v16 = vsel %vm13744_vm12, %v9692_v40, %v9690_v39  ;;  %v599_v55 = vsel %vm548_vm4, %v371_v34, %v395_v19  ;;  %vm13748_vm7 = vmmov %vm13747_vm2  ;;  %vm13751_vm2 = vcmask 490496   ;;  %v203_v34 = vsel %vm13608_vm15, %v9619_v24, %v9740_v56 }
 0x14e   :  { %v600_v52 = vsel %vm548_vm4, %v372_v16, %v396_v23  ;;  %v468_v40 = vsel %vm13748_vm7, %v9812_v14, %v9810_v18  ;;  %v605_v30 = vsel %vm555_vm6, %v599_v55, %v419_v27  ;;  %v515_v14 = vsel %vm13751_vm2, %v9742_v57, %v507_v61  ;;  %vm13752_vm12 = vmmov %vm13751_vm2 }
 0x14f   :  { %v291_v10 = vpop.permute.xlu1 %290  ;;  %v9898_v6 = vpop.permute.xlu0 %508  ;;  %v606_v63 = vsel %vm555_vm6, %v600_v52, %v420_v28  ;;  %v611_v36 = vsel %vm562_vm8, %v605_v30, %v443_v42  ;;  %vm13753_vm7 = vcmask 482304   ;;  %v228_v16 = vsel %vm13609_vm3, %v9781_v4, %v9790_v12  ;;  %vm13756_vm2 = vmmov %vm13755_vm5 }
 0x150   :  { %v612_v25 = vsel %vm562_vm8, %v606_v63, %v444_v22  ;;  %v516_v29 = vsel %vm13752_vm12, %v507_v61, %v9898_v6  ;;  %v617_v32 = vsel %vm569_vm10, %v611_v36, %v467_v17  ;;  %vm13754_vm0 = vmmov %vm13753_vm7  ;;  %v227_v42 = vsel %vm13609_vm3, %v9658_v31, %v9781_v4 }
 0x151   :  { %v618_v35 = vsel %vm569_vm10, %v612_v25, %v468_v40  ;;  %v623_v38 = vsel %vm576_vm11, %v617_v32, %v491_v53  ;;  %v252_v22 = vsel %vm13610_vm1, %v9822_v33, %v9841_v0  ;;  %v251_v52 = vsel %vm13610_vm1, %v9682_v37, %v9822_v33 }
 0x152   :  { %v624_v47 = vsel %vm576_vm11, %v618_v35, %v492_v45  ;;  %v629_v1 = vsel %vm583_vm13, %v623_v38, %v515_v14  ;;  %v276_v24 = vsel %vm13755_vm5, %v9876_v5, %v9874_v26  ;;  %v551_v4 = vsel %vm548_vm4, %v9448_v8, %v203_v34 }
 0x153   :  { %v9932_v2 = vpop.permute.xlu1 %414  ;;  %v9934_v54 = vpop.permute.xlu0 %292  ;;  %v630_v58 = vsel %vm583_vm13, %v624_v47, %v516_v29  ;;  %v275_v40 = vsel %vm13756_vm2, %v9724_v48, %v9876_v5  ;;  %v558_v37 = vsel %vm555_vm6, %v551_v4, %v227_v42  ;;  %v299_v30 = vsel %vm296_vm9, %v9748_v60, %v291_v10 }
 0x154   :  { %vm13757_vm12 = vcmask 850944   ;;  %v565_v8 = vsel %vm562_vm8, %v558_v37, %v251_v52  ;;  %vm13761_vm2 = vcmask 678912  }
 0x155   :  { %v572_v5 = vsel %vm569_vm10, %v565_v8, %v275_v40 }
 0x156   :  { %v579_v60 = vsel %vm576_vm11, %v572_v5, %v299_v30 }
 0x157   :  { %v9952_v9 = vpop.permute.xlu1 %532  ;;  %v531_v43 = vpop.permute.xlu0 %530 }
 0x158   :  { %v539_v49 = vsel %vm13753_vm7, %v9783_v3, %v531_v43  ;;  %v540_v57 = vsel %vm13754_vm0, %v531_v43, %v9952_v9  ;;  %v204_v3 = vsel %vm13608_vm15, %v9740_v56, %v9746_v59  ;;  %vm13758_vm7 = vmmov %vm13757_vm12  ;;  %vm13759_vm0 = vcmask 842752  }
 0x159   :  { %v636_v7 = vsel %vm590_vm14, %v630_v58, %v540_v57  ;;  %v635_v61 = vsel %vm590_vm14, %v629_v1, %v539_v49  ;;  %v552_v55 = vsel %vm548_vm4, %v9506_v13, %v204_v3  ;;  %v300_v13 = vsel %vm296_vm9, %v291_v10, %v9934_v54  ;;  %vm13760_vm5 = vmmov %vm13759_vm0 }
 0x15a   :  { %749 = vmatprep.subr.mxu1 %v636_v7  ;;  %v559_v31 = vsel %vm555_vm6, %v552_v55, %v228_v16  ;;  %v602_v57 = vsel %vm548_vm4, %v9885_v46, %v9893_v15 }
 0x15b   :  { %v315_v19 = vpop.permute.xlu1 %314  ;;  %750 = vmatpush1.msra.mxu1 %v635_v61  ;;  %v199_v23 = vpop.permute.xlu0 %198  ;;  %v566_v33 = vsel %vm562_vm8, %v559_v31, %v252_v22  ;;  %v608_v1 = vsel %vm555_vm6, %v602_v57, %v9932_v2 }
 0x15c   :  { %v573_v53 = vsel %vm569_vm10, %v566_v33, %v276_v24  ;;  %v323_v48 = vsel %vm13758_vm7, %v9792_v21, %v315_v19  ;;  %vm13763_vm7 = vcmask 670720  }
 0x15d   :  { %v580_v45 = vsel %vm576_vm11, %v573_v53, %v300_v13  ;;  %v586_v35 = vsel %vm583_vm13, %v579_v60, %v323_v48  ;;  %v421_v43 = vsel %vm13763_vm7, %v9733_v51, %v9932_v2  ;;  %v205_v51 = vsel %vm13608_vm15, %v9746_v59, %v199_v23 }
 0x15e   :  { %vm13769_vm7 = vcmask 490496  }
 0x15f   :  { %v439_v27 = vpop.permute.xlu1 %438  ;;  %v9962_v28 = vpop.permute.xlu0 %316 }
 0x160   :  { %v324_v63 = vsel %vm13757_vm12, %v315_v19, %v9962_v28  ;;  %vm13762_vm12 = vcmask 130048  }
 0x161   :  { %v587_v29 = vsel %vm583_vm13, %v580_v45, %v324_v63 }
 0x163   :  { %v339_v56 = vpop.permute.xlu1 %338  ;;  %v223_v17 = vpop.permute.xlu0 %222 }
 0x164   :  { %v347_v36 = vsel %vm13759_vm0, %v9852_v20, %v339_v56  ;;  %v397_v20 = vsel %vm13761_vm2, %v9698_v41, %v9893_v15  ;;  %vm13764_vm0 = vcmask 687104   ;;  %vm13766_vm2 = vcmask 506880   ;;  %v13768_v15 = vld [vmem:[#allocation33_spill] sm:$0xff] }
 0x165   :  { %v593_v21 = vsel %vm590_vm14, %v586_v35, %v347_v36  ;;  %v373_v49 = vsel %vm13764_vm0, %v9690_v39, %v9885_v46  ;;  %v614_v46 = vsel %vm562_vm8, %v608_v1, %v439_v27  ;;  %v554_v3 = vsel %vm548_vm4, %v13768_v15, %v199_v23 }
 0x166   :  { %v601_v58 = vsel %vm548_vm4, %v373_v49, %v397_v20  ;;  %v229_v42 = vsel %vm13609_vm3, %v9790_v12, %v223_v17  ;;  %v561_v22 = vsel %vm555_vm6, %v554_v3, %v223_v17  ;;  %vm13772_vm0 = vcmask 482304   ;;  %v13781_v3 = vld [vmem:[#allocation32_spill] sm:$0xff] }
 0x167   :  { %v463_v25 = vpop.permute.xlu1 %462  ;;  %v341_v14 = vpop.permute.xlu0 %340  ;;  %v607_v19 = vsel %vm555_vm6, %v601_v58, %v421_v43  ;;  %v13778_v43 = vld [vmem:[#allocation27_spill] sm:$0xff] }
 0x168   :  { %v348_v10 = vsel %vm13760_vm5, %v339_v56, %v341_v14  ;;  %vm13765_vm5 = vcmask 662528   ;;  %v469_v7 = vsel %vm13766_vm2, %v9810_v18, %v463_v25  ;;  %v620_v34 = vsel %vm569_vm10, %v614_v46, %v463_v25  ;;  %v13770_v18 = vld [vmem:[#allocation31_spill] sm:$0xff] }
 0x169   :  { %v594_v32 = vsel %vm590_vm14, %v587_v29, %v348_v10  ;;  %v445_v41 = vsel %vm13765_vm5, %v9752_v62, %v439_v27  ;;  %v553_v16 = vsel %vm548_vm4, %v13770_v18, %v205_v51  ;;  %vm13771_vm4 = vcmask 867328   ;;  %v863_v10 = vld [vmem:[%s9293_s25] sm:$0x3f]  ;;  %s9229_s25 = smov 86  }
 0x16a   :  { %751 = vmatprep.subr.mxu1 %v594_v32  ;;  %v613_v2 = vsel %vm562_vm8, %v607_v19, %v445_v41  ;;  %v560_v17 = vsel %vm555_vm6, %v553_v16, %v229_v42  ;;  %vm13773_vm6 = vcmask 842752   ;;  %vm13774_vm5 = vcmask 850944   ;;  %v13776_v32 = vld [vmem:[#allocation28_spill] sm:$0xff]  ;;  %v13779_v51 = vld [vmem:[#allocation30_spill] sm:$0xff]  ;;  %v13780_v19 = vld [vmem:[#allocation29_spill] sm:$0xff] }
 0x16b   :  { %v487_v38 = vpop.permute.xlu1 %486  ;;  %752 = vmatpush1.msra.mxu1 %v593_v21  ;;  %v247_v47 = vpop.permute.xlu0 %246  ;;  %v619_v27 = vsel %vm569_vm10, %v613_v2, %v469_v7  ;;  %v870_v35 = vrot.slane %v863_v10, %v13776_v32  ;;  %v13777_v21 = vld [vmem:[#allocation26_spill] sm:$0xff]  ;;  %v878_v49 = vrot.slane %v863_v10, %v13778_v43  ;;  %v882_v7 = vrot.slane %v863_v10, %v13779_v51 }
 0x16c   :  { %8213 = vmatmul.mubr.msk.f32.vlgmr.msra.gmra.mxu1 %vm13762_vm12, %v9890_v50  ;;  %vm13767_vm12 = vcmask 498688   ;;  %v253_v55 = vsel %vm13610_vm1, %v9841_v0, %v247_v47  ;;  %v568_v40 = vsel %vm562_vm8, %v561_v22, %v247_v47  ;;  %v886_v46 = vrot.slane %v863_v10, %v13780_v19 }
 0x16d   :  { %856 = vmatprep.mubr.f32.mxu1 %v13742_v11  ;;  %v493_v62 = vsel %vm13767_vm12, %v9858_v44, %v487_v38  ;;  %v626_v44 = vsel %vm576_vm11, %v620_v34, %v487_v38  ;;  %v567_v37 = vsel %vm562_vm8, %v560_v17, %v253_v55  ;;  %vm13775_vm8 = vcmask 130048  }
 0x16e   :  { %v625_v23 = vsel %vm576_vm11, %v619_v27, %v493_v62  ;;  %v874_v38 = vrot.slane %v863_v10, %v13777_v21  ;;  %v890_v2 = vrot.slane %v863_v10, %v13781_v3 }
 0x16f   :  { %v511_v61 = vpop.permute.xlu1 %510  ;;  %v271_v39 = vpop.permute.xlu0 %270 }
 0x170   :  { %v517_v59 = vsel %vm13769_vm7, %v9898_v6, %v511_v61  ;;  %v632_v52 = vsel %vm583_vm13, %v626_v44, %v511_v61  ;;  %v277_v56 = vsel %vm13771_vm4, %v9874_v26, %v271_v39  ;;  %v575_v26 = vsel %vm569_vm10, %v568_v40, %v271_v39  ;;  %vm13782_vm4 = vmmov %vm13772_vm0 }
 0x171   :  { %v631_v31 = vsel %vm583_vm13, %v625_v23, %v517_v59  ;;  %v864_v23 = vld [vmem:[%s9283_s17] sm:$0xff]  ;;  %s9227_s17 = smov 92  }
 0x173   :  { %v535_v6 = vpop.permute.xlu1 %534  ;;  %v295_v24 = vpop.permute.xlu0 %294 }
 0x174   :  { %v541_v12 = vsel %vm13772_vm0, %v9952_v9, %v535_v6  ;;  %v638_v4 = vsel %vm590_vm14, %v632_v52, %v535_v6  ;;  %v301_v0 = vsel %vm296_vm9, %v9934_v54, %v295_v24  ;;  %v574_v9 = vsel %vm569_vm10, %v567_v37, %v277_v56 }
 0x175   :  { %820 = vmatprep.subr.mxu1 %v638_v4  ;;  %v637_v13 = vsel %vm590_vm14, %v631_v31, %v541_v12  ;;  %v582_v33 = vsel %vm576_vm11, %v575_v26, %v295_v24  ;;  %v581_v8 = vsel %vm576_vm11, %v574_v9, %v301_v0  ;;  %vm907_vm10 = vcmask 367616  }
 0x176   :  { %821 = vmatpush1.msra.mxu1 %v637_v13 }
 0x177   :  { %v343_v30 = vpop.permute.xlu1 %342  ;;  %v319_v63 = vpop.permute.xlu0 %318 }
 0x178   :  { %v349_v53 = vsel %vm13773_vm6, %v341_v14, %v343_v30  ;;  %v325_v54 = vsel %vm13774_vm5, %v9962_v28, %v319_v63  ;;  %v589_v48 = vsel %vm583_vm13, %v582_v33, %v319_v63  ;;  %vm13783_vm6 = vcmask 490496  }
 0x179   :  { %v596_v5 = vsel %vm590_vm14, %v589_v48, %v343_v30  ;;  %v588_v45 = vsel %vm583_vm13, %v581_v8, %v325_v54  ;;  %vm13784_vm5 = vmmov %vm13783_vm6 }
 0x17a   :  { %822 = vmatprep.subr.mxu1 %v596_v5  ;;  %v595_v36 = vsel %vm590_vm14, %v588_v45, %v349_v53 }
 0x17b   :  { %823 = vmatpush1.msra.mxu1 %v595_v36 }
 0x17c   :  { %8214 = vmatmul.mubr.msk.f32.vlgmr.msra.gmra.mxu1 %vm13775_vm8, %v9890_v50  ;;  %vm13785_vm8 = vcmask 498688  }
 0x17d   :  { %1384 = vmatprep.mubr.f32.mxu1 %v13742_v11 }
 0x184   :  { %v644_v60 = vpop.permute.xlu0 %643 }
 0x20b   :  { %v716_v25 = vpop.f32.mrf.mxu1 }
 0x20c   :  { %v717_v28 = vadd.f32 %v716_v25, %v644_v60 }
 0x20d   :  { %v718_v14 = vpop.f32.mrf.mxu1 }
 0x20e   :  { %v719_v29 = vadd.f32 %v718_v14, %v644_v60  ;;  %v897_v57 = vmul.f32 %v870_v35, %v717_v28  ;;  %v10108_v14 = vpop.permute.xlu0 %961 }
 0x210   :  { %v898_v41 = vmul.f32 %v874_v38, %v719_v29 }
 0x212   :  { %v903_v1 = vadd.f32 %v898_v41, %v897_v57 }
 0x22c   :  { %v787_v47 = vpop.f32.mrf.mxu1 }
 0x22d   :  { %v788_v20 = vadd.f32 %v787_v47, %v644_v60 }
 0x22e   :  { %v789_v58 = vpop.f32.mrf.mxu1 }
 0x22f   :  { %v899_v50 = vmul.f32 %v878_v49, %v788_v20  ;;  %v790_v11 = vadd.f32 %v789_v58, %v644_v60 }
 0x231   :  { %v904_v61 = vadd.f32 %v903_v1, %v899_v50  ;;  %v900_v39 = vmul.f32 %v882_v7, %v790_v11 }
 0x233   :  { %v905_v59 = vadd.f32 %v904_v61, %v900_v39 }
 0x23c   :  { %v858_v62 = vpop.f32.mrf.mxu1 }
 0x23d   :  { %v859_v15 = vadd.f32 %v858_v62, %v644_v60 }
 0x23e   :  { %v860_v34 = vpop.f32.mrf.mxu1 }
 0x23f   :  { %v901_v18 = vmul.f32 %v886_v46, %v859_v15  ;;  %v861_v16 = vadd.f32 %v860_v34, %v644_v60 }
 0x241   :  { %v902_v42 = vmul.f32 %v890_v2, %v861_v16  ;;  %v906_v27 = vadd.f32 %v905_v59, %v901_v18 }
 0x243   :  { %v908_v44 = vsel %vm907_vm10, %v902_v42, 0.0 }
 0x244   :  { %v909_v22 = vadd.f32 %v908_v44, %v906_v27 }
 0x246   :  { %910 = vadd.xlane.f32.xlu1 %v909_v22 }
 0x257   :  { %950 = vperm.xlu1 %8932, %v864_v23  }
 0x2cf   :  { %v911_v55 = vpop.xlane.xlu1 %910 }
 0x2d0   :  { %v912_v52 = vmul.f32 0.0023923444, %v911_v55 }
 0x2d2   :  { %v913_v6 = vsub.f32 %v717_v28, %v912_v52  ;;  %v914_v24 = vsub.f32 %v719_v29, %v912_v52  ;;  %v915_v56 = vsub.f32 %v788_v20, %v912_v52  ;;  %v10095_v12 = vsub.f32 %v790_v11, %v912_v52 }
 0x2d3   :  { %v10097_v4 = vsub.f32 %v861_v16, %v912_v52  ;;  %v10099_v31 = vsub.f32 %v859_v15, %v912_v52 }
 0x2d4   :  { %v919_v17 = vmul.f32 %v913_v6, %v913_v6  ;;  %v920_v40 = vmul.f32 %v914_v24, %v914_v24  ;;  %v921_v0 = vmul.f32 %v915_v56, %v915_v56  ;;  %v922_v13 = vmul.f32 %v10095_v12, %v10095_v12 }
 0x2d5   :  { %v924_v9 = vmul.f32 %v10097_v4, %v10097_v4  ;;  %v923_v33 = vmul.f32 %v10099_v31, %v10099_v31 }
 0x2d6   :  { %v925_v37 = vmul.f32 %v919_v17, %v870_v35  ;;  %v926_v26 = vmul.f32 %v920_v40, %v874_v38  ;;  %v927_v30 = vmul.f32 %v921_v0, %v878_v49  ;;  %v928_v8 = vmul.f32 %v922_v13, %v882_v7  ;;  %v10112_v35 = vpop.permute.xlu1 %950 }
 0x2d7   :  { %v930_v54 = vmul.f32 %v924_v9, %v890_v2  ;;  %v929_v48 = vmul.f32 %v923_v33, %v886_v46 }
 0x2d8   :  { %v931_v63 = vadd.f32 %v926_v26, %v925_v37 }
 0x2d9   :  { %v935_v36 = vsel %vm907_vm10, %v930_v54, 0.0  ;;  %vm13786_vm10 = vmmov %vm13785_vm8 }
 0x2da   :  { %v932_v53 = vadd.f32 %v931_v63, %v927_v30 }
 0x2dc   :  { %v933_v5 = vadd.f32 %v932_v53, %v928_v8 }
 0x2de   :  { %v934_v45 = vadd.f32 %v933_v5, %v929_v48 }
 0x2e0   :  { %v936_v25 = vadd.f32 %v935_v36, %v934_v45 }
 0x2e2   :  { %937 = vadd.xlane.f32.xlu0 %v936_v25 }
 0x36b   :  { %v938_v60 = vpop.xlane.xlu0 %937 }
 0x36c   :  { %v939_v10 = vmul.f32 0.0023923444, %v938_v60 }
 0x36e   :  { %v940_v28 = vadd.f32 1e-05, %v939_v10 }
 0x370   :  { %9069 = vrsqrt.f32 %v940_v28 }
 0x37d   :  { %v10110_v29 = vpop.eup %9069 }
 0x37e   :  { %v942_v38 = vmul.f32 %v10110_v29, %v913_v6  ;;  %v943_v47 = vmul.f32 %v10110_v29, %v914_v24  ;;  %v944_v20 = vmul.f32 %v10110_v29, %v915_v56  ;;  %v946_v15 = vmul.f32 %v10110_v29, %v10099_v31 }
 0x37f   :  { %v945_v2 = vmul.f32 %v10110_v29, %v10095_v12  ;;  %v947_v59 = vmul.f32 %v10110_v29, %v10097_v4 }
 0x380   :  { %v953_v49 = vmul.f32 %v10112_v35, %v942_v38  ;;  %v954_v57 = vmul.f32 %v10112_v35, %v943_v47  ;;  %v955_v41 = vmul.f32 %v10112_v35, %v944_v20  ;;  %v957_v34 = vmul.f32 %v10112_v35, %v946_v15 }
 0x381   :  { %v956_v18 = vmul.f32 %v10112_v35, %v945_v2  ;;  %v958_v42 = vmul.f32 %v10112_v35, %v947_v59  ;;  %v1308_v2 = vld [vmem:[%s9303_s3] sm:$0xff] }
 0x382   :  { %v964_v58 = vadd.f32 %v10108_v14, %v953_v49  ;;  %v965_v50 = vadd.f32 %v10108_v14, %v954_v57  ;;  %v966_v1 = vadd.f32 %v10108_v14, %v955_v41  ;;  %v968_v16 = vadd.f32 %v10108_v14, %v957_v34 }
 0x383   :  { %v967_v27 = vadd.f32 %v10108_v14, %v956_v18  ;;  %v969_v22 = vadd.f32 %v10108_v14, %v958_v42 }
 0x384   :  { %vm970_vm11 = vcmp.ge.f32.partialorder %v964_v58, 0.0  ;;  %vm971_vm13 = vcmp.ge.f32.partialorder %v965_v50, 0.0  ;;  %v976_v11 = vmul.f32 0.01, %v964_v58  ;;  %v977_v7 = vmul.f32 0.01, %v965_v50 }
 0x385   :  { %v978_v61 = vmul.f32 0.01, %v966_v1  ;;  %vm972_vm14 = vcmp.ge.f32.partialorder %v966_v1, 0.0  ;;  %v980_v44 = vmul.f32 0.01, %v968_v16  ;;  %vm974_vm2 = vcmp.ge.f32.partialorder %v968_v16, 0.0 }
 0x386   :  { %v10123_v39 = vsel %vm970_vm11, %v964_v58, %v976_v11  ;;  %v10125_v46 = vsel %vm971_vm13, %v965_v50, %v977_v7  ;;  %v979_v23 = vmul.f32 0.01, %v967_v27  ;;  %vm973_vm12 = vcmp.ge.f32.partialorder %v967_v27, 0.0 }
 0x387   :  { %1286 = vrot.lane.b32.xlu1 %v10125_v46, %s9220_s0  ;;  %1284 = vrot.lane.b32.xlu0 %v10123_v39, %s9220_s0  ;;  %v10131_v62 = vsel %vm972_vm14, %v966_v1, %v978_v61  ;;  %v10229_v55 = vsel %vm974_vm2, %v968_v16, %v980_v44  ;;  %v981_v52 = vmul.f32 0.01, %v969_v22  ;;  %vm975_vm7 = vcmp.ge.f32.partialorder %v969_v22, 0.0 }
 0x388   :  { %v10235_v6 = vsel %vm973_vm12, %v967_v27, %v979_v23  ;;  %vm13787_vm11 = vcmask 506880   ;;  %vm13789_vm14 = vcmask 662528   ;;  %vm13791_vm12 = vcmask 670720   ;;  %v1309_v27 = vld [vmem:[%s9303_s3 + $0x8] sm:$0xff]  ;;  %s9231_s3 = smov 116  }
 0x389   :  { %v987_v24 = vsel %vm975_vm7, %v969_v22, %v981_v52  ;;  %vm13788_vm13 = vmmov %vm13787_vm11 }
 0x38a   :  { %vm13790_vm2 = vmmov %vm13789_vm14 }
 0x38b   :  { %1288 = vrot.lane.b32.xlu1 %v10131_v62, %s9220_s0  ;;  %1266 = vrot.lane.b32.xlu0 %v10131_v62, %s9218_s18  ;;  %vm13792_vm7 = vmmov %vm13791_vm12 }
 0x38f   :  { %1264 = vrot.lane.b32.xlu1 %v10125_v46, %s9218_s18  ;;  %1242 = vrot.lane.b32.xlu0 %v10125_v46, %s9216_s15 }
 0x393   :  { %1262 = vrot.lane.b32.xlu1 %v10123_v39, %s9218_s18  ;;  %1240 = vrot.lane.b32.xlu0 %v10123_v39, %s9216_s15 }
 0x397   :  { %1244 = vrot.lane.b32.xlu1 %v10131_v62, %s9216_s15  ;;  %1222 = vrot.lane.b32.xlu0 %v10131_v62, %s9214_s7 }
 0x39b   :  { %1220 = vrot.lane.b32.xlu1 %v10125_v46, %s9214_s7  ;;  %1198 = vrot.lane.b32.xlu0 %v10125_v46, %s9212_s2 }
 0x39f   :  { %1218 = vrot.lane.b32.xlu1 %v10123_v39, %s9214_s7  ;;  %1196 = vrot.lane.b32.xlu0 %v10123_v39, %s9212_s2 }
 0x3a3   :  { %1200 = vrot.lane.b32.xlu1 %v10131_v62, %s9212_s2  ;;  %1178 = vrot.lane.b32.xlu0 %v10131_v62, %s9210_s5 }
 0x3a7   :  { %1176 = vrot.lane.b32.xlu1 %v10125_v46, %s9210_s5  ;;  %1154 = vrot.lane.b32.xlu0 %v10125_v46, %s9208_s24 }
 0x3ab   :  { %1174 = vrot.lane.b32.xlu1 %v10123_v39, %s9210_s5  ;;  %1152 = vrot.lane.b32.xlu0 %v10123_v39, %s9208_s24 }
 0x3af   :  { %1156 = vrot.lane.b32.xlu1 %v10131_v62, %s9208_s24  ;;  %1134 = vrot.lane.b32.xlu0 %v10131_v62, %s9209_s20 }
 0x3b3   :  { %1132 = vrot.lane.b32.xlu1 %v10125_v46, %s9209_s20  ;;  %1110 = vrot.lane.b32.xlu0 %v10125_v46, %s9222_s26 }
 0x3b7   :  { %1130 = vrot.lane.b32.xlu1 %v10123_v39, %s9209_s20  ;;  %1108 = vrot.lane.b32.xlu0 %v10123_v39, %s9222_s26 }
 0x3bb   :  { %1112 = vrot.lane.b32.xlu1 %v10131_v62, %s9222_s26  ;;  %1092 = vrot.lane.b32.xlu0 %v10131_v62, %s9221_s30 }
 0x3bf   :  { %1090 = vrot.lane.b32.xlu1 %v10125_v46, %s9221_s30  ;;  %1071 = vrot.lane.b32.xlu0 %v10125_v46, %s9219_s23 }
 0x3c3   :  { %1088 = vrot.lane.b32.xlu1 %v10123_v39, %s9221_s30  ;;  %1069 = vrot.lane.b32.xlu0 %v10123_v39, %s9219_s23 }
 0x3c7   :  { %1073 = vrot.lane.b32.xlu1 %v10131_v62, %s9219_s23  ;;  %1054 = vrot.lane.b32.xlu0 %v10131_v62, %s9217_s16 }
 0x3cb   :  { %1052 = vrot.lane.b32.xlu1 %v10125_v46, %s9217_s16  ;;  %1033 = vrot.lane.b32.xlu0 %v10125_v46, %s9215_s11 }
 0x3cf   :  { %1050 = vrot.lane.b32.xlu1 %v10123_v39, %s9217_s16  ;;  %1031 = vrot.lane.b32.xlu0 %v10123_v39, %s9215_s11 }
 0x3d3   :  { %1035 = vrot.lane.b32.xlu1 %v10131_v62, %s9215_s11  ;;  %1016 = vrot.lane.b32.xlu0 %v10131_v62, %s9213_s10 }
 0x3d7   :  { %1014 = vrot.lane.b32.xlu1 %v10125_v46, %s9213_s10  ;;  %995 = vrot.lane.b32.xlu0 %v10125_v46, %s9211_s28 }
 0x3db   :  { %1012 = vrot.lane.b32.xlu1 %v10123_v39, %s9213_s10  ;;  %993 = vrot.lane.b32.xlu0 %v10123_v39, %s9211_s28 }
 0x3df   :  { %997 = vrot.lane.b32.xlu1 %v10131_v62, %s9211_s28  ;;  %1292 = vrot.lane.b32.xlu0 %v10229_v55, %s9220_s0 }
 0x3e3   :  { %1290 = vrot.lane.b32.xlu1 %v10235_v6, %s9220_s0  ;;  %1268 = vrot.lane.b32.xlu0 %v10235_v6, %s9218_s18 }
 0x3e7   :  { %1294 = vrot.lane.b32.xlu1 %v987_v24, %s9220_s0  ;;  %1272 = vrot.lane.b32.xlu0 %v987_v24, %s9218_s18  ;;  %s9241_s0 = smov 96  }
 0x3eb   :  { %1270 = vrot.lane.b32.xlu1 %v10229_v55, %s9218_s18  ;;  %1248 = vrot.lane.b32.xlu0 %v10229_v55, %s9216_s15  ;;  %s13846_s18 = sld [smem:[#allocation16_spill]] }
 0x3ef   :  { %1246 = vrot.lane.b32.xlu1 %v10235_v6, %s9216_s15  ;;  %1224 = vrot.lane.b32.xlu0 %v10235_v6, %s9214_s7 }
 0x3f3   :  { %1250 = vrot.lane.b32.xlu1 %v987_v24, %s9216_s15  ;;  %1228 = vrot.lane.b32.xlu0 %v987_v24, %s9214_s7  ;;  %s9240_s15 = smov 32  }
 0x3f7   :  { %1226 = vrot.lane.b32.xlu1 %v10229_v55, %s9214_s7  ;;  %1204 = vrot.lane.b32.xlu0 %v10229_v55, %s9212_s2  ;;  %s13844_s7 = sld [smem:[#allocation12_spill]] }
 0x3f9   :  { %v1287_v56 = vpop.permute.xlu1 %1286  ;;  %v1285_v12 = vpop.permute.xlu0 %1284 }
 0x3fa   :  { %v1296_v40 = vsel %vm13772_vm0, %v1285_v12, %v1287_v56 }
 0x3fb   :  { %1202 = vrot.lane.b32.xlu1 %v10235_v6, %s9212_s2  ;;  %1180 = vrot.lane.b32.xlu0 %v10235_v6, %s9210_s5 }
 0x3fd   :  { %v10261_v4 = vpop.permute.xlu1 %1288  ;;  %v10263_v31 = vpop.permute.xlu0 %1266 }
 0x3fe   :  { %v1297_v17 = vsel %vm13782_vm4, %v1287_v56, %v10261_v4  ;;  %vm13793_vm4 = vcmask 678912  }
 0x3ff   :  { %1320 = vmatprep.subr.mxu1 %v1297_v17  ;;  %1206 = vrot.lane.b32.xlu1 %v987_v24, %s9212_s2  ;;  %vm13794_vm0 = vmmov %vm13793_vm4  ;;  %s13843_s2 = sld [smem:[#allocation15_spill]] }
 0x400   :  { %1184 = vrot.lane.b32.xlu0 %v987_v24, %s9210_s5  ;;  %1321 = vmatpush1.msra.mxu1 %v1296_v40 }
 0x401   :  { %v1265_v0 = vpop.permute.xlu1 %1264  ;;  %v1243_v13 = vpop.permute.xlu0 %1242 }
 0x402   :  { %v1275_v37 = vsel %vm13783_vm6, %v1265_v0, %v10263_v31  ;;  %vm13795_vm6 = vcmask 687104  }
 0x403   :  { %1182 = vrot.lane.b32.xlu1 %v10229_v55, %s9210_s5  ;;  %1322 = vmatprep.subr.mxu1 %v1275_v37 }
 0x404   :  { %1160 = vrot.lane.b32.xlu0 %v10229_v55, %s9208_s24 }
 0x405   :  { %v1263_v26 = vpop.permute.xlu1 %1262  ;;  %v1241_v9 = vpop.permute.xlu0 %1240 }
 0x406   :  { %v1274_v33 = vsel %vm13784_vm5, %v1263_v26, %v1265_v0  ;;  %v1252_v53 = vsel %vm13786_vm10, %v1241_v9, %v1243_v13  ;;  %vm13796_vm5 = vmmov %vm13795_vm6 }
 0x407   :  { %1158 = vrot.lane.b32.xlu1 %v10235_v6, %s9208_s24  ;;  %1323 = vmatpush1.msra.mxu1 %v1274_v33 }
 0x408   :  { %1136 = vrot.lane.b32.xlu0 %v10235_v6, %s9209_s20 }
 0x409   :  { %v10281_v30 = vpop.permute.xlu1 %1244  ;;  %v10283_v63 = vpop.permute.xlu0 %1222 }
 0x40a   :  { %v1253_v8 = vsel %vm13785_vm8, %v1243_v13, %v10281_v30  ;;  %vm13797_vm8 = vcmask 842752  }
 0x40b   :  { %1162 = vrot.lane.b32.xlu1 %v987_v24, %s9208_s24  ;;  %1324 = vmatprep.subr.mxu1 %v1253_v8  ;;  %vm13798_vm10 = vmmov %vm13797_vm8  ;;  %s9236_s24 = smov 40  }
 0x40c   :  { %1140 = vrot.lane.b32.xlu0 %v987_v24, %s9209_s20  ;;  %1325 = vmatpush1.msra.mxu1 %v1252_v53 }
 0x40d   :  { %v1221_v54 = vpop.permute.xlu1 %1220  ;;  %v1199_v48 = vpop.permute.xlu0 %1198 }
 0x40e   :  { %v1231_v5 = vsel %vm13787_vm11, %v1221_v54, %v10283_v63  ;;  %vm13799_vm11 = vcmask 850944  }
 0x40f   :  { %1138 = vrot.lane.b32.xlu1 %v10229_v55, %s9209_s20  ;;  %1326 = vmatprep.subr.mxu1 %v1231_v5  ;;  %s9237_s20 = smov 34  }
 0x410   :  { %1116 = vrot.lane.b32.xlu0 %v10229_v55, %s9222_s26 }
 0x411   :  { %v1219_v45 = vpop.permute.xlu1 %1218  ;;  %v1197_v36 = vpop.permute.xlu0 %1196 }
 0x412   :  { %v1230_v25 = vsel %vm13788_vm13, %v1219_v45, %v1221_v54  ;;  %v1208_v28 = vsel %vm13790_vm2, %v1197_v36, %v1199_v48  ;;  %vm13800_vm13 = vmmov %vm13799_vm11 }
 0x413   :  { %1114 = vrot.lane.b32.xlu1 %v10235_v6, %s9222_s26  ;;  %1327 = vmatpush1.msra.mxu1 %v1230_v25 }
 0x414   :  { %1094 = vrot.lane.b32.xlu0 %v10235_v6, %s9221_s30 }
 0x415   :  { %v10301_v14 = vpop.permute.xlu1 %1200  ;;  %v10303_v60 = vpop.permute.xlu0 %1178 }
 0x416   :  { %v1209_v10 = vsel %vm13789_vm14, %v1199_v48, %v10301_v14  ;;  %vm13801_vm14 = vcmask 867328  }
 0x417   :  { %1118 = vrot.lane.b32.xlu1 %v987_v24, %s9222_s26  ;;  %1328 = vmatprep.subr.mxu1 %v1209_v10  ;;  %vm13802_vm2 = vmmov %vm13801_vm14  ;;  %s9243_s26 = smov 99  }
 0x418   :  { %1075 = vrot.lane.b32.xlu0 %v10235_v6, %s9219_s23  ;;  %1329 = vmatpush1.msra.mxu1 %v1208_v28 }
 0x419   :  { %v1177_v29 = vpop.permute.xlu1 %1176  ;;  %v1155_v35 = vpop.permute.xlu0 %1154 }
 0x41a   :  { %v1187_v38 = vsel %vm13791_vm12, %v1177_v29, %v10303_v60  ;;  %vm13803_vm12 = vcmask 482304  }
 0x41b   :  { %1096 = vrot.lane.b32.xlu1 %v10229_v55, %s9221_s30  ;;  %1330 = vmatprep.subr.mxu1 %v1187_v38 }
 0x41c   :  { %1056 = vrot.lane.b32.xlu0 %v10235_v6, %s9217_s16 }
 0x41d   :  { %v1175_v47 = vpop.permute.xlu1 %1174  ;;  %v1153_v20 = vpop.permute.xlu0 %1152 }
 0x41e   :  { %v1186_v49 = vsel %vm13792_vm7, %v1175_v47, %v1177_v29  ;;  %v1164_v50 = vsel %vm13794_vm0, %v1153_v20, %v1155_v35  ;;  %vm13804_vm7 = vmmov %vm13803_vm12  ;;  %vm13806_vm0 = vcmask 490496  }
 0x41f   :  { %1077 = vrot.lane.b32.xlu1 %v10229_v55, %s9219_s23  ;;  %1331 = vmatpush1.msra.mxu1 %v1186_v49  ;;  %v10382_v49 = vld [vmem:[%s9298_s29] sm:$0xff]  ;;  %s13847_s23 = sld [smem:[#allocation14_spill]] }
 0x420   :  { %1037 = vrot.lane.b32.xlu0 %v10235_v6, %s9215_s11 }
 0x421   :  { %v10322_v57 = vpop.permute.xlu1 %1156  ;;  %v10324_v41 = vpop.permute.xlu0 %1134 }
 0x422   :  { %v1165_v58 = vsel %vm13793_vm4, %v1155_v35, %v10322_v57  ;;  %vm13805_vm4 = vmmov %vm13804_vm7 }
 0x423   :  { %1058 = vrot.lane.b32.xlu1 %v10229_v55, %s9217_s16  ;;  %1332 = vmatprep.subr.mxu1 %v1165_v58 }
 0x424   :  { %1018 = vrot.lane.b32.xlu0 %v10235_v6, %s9213_s10  ;;  %1333 = vmatpush1.msra.mxu1 %v1164_v50 }
 0x425   :  { %v1133_v1 = vpop.permute.xlu1 %1132  ;;  %v1111_v11 = vpop.permute.xlu0 %1110 }
 0x426   :  { %v1143_v7 = vsel %vm13795_vm6, %v1133_v1, %v10324_v41  ;;  %vm13807_vm6 = vmmov %vm13806_vm0 }
 0x427   :  { %1039 = vrot.lane.b32.xlu1 %v10229_v55, %s9215_s11  ;;  %1334 = vmatprep.subr.mxu1 %v1143_v7  ;;  %v10390_v7 = vld [vmem:[#allocation4] sm:$0xff] }
 0x428   :  { %999 = vrot.lane.b32.xlu0 %v10235_v6, %s9211_s28 }
 0x429   :  { %v1131_v61 = vpop.permute.xlu1 %1130  ;;  %v1109_v15 = vpop.permute.xlu0 %1108 }
 0x42a   :  { %v1142_v34 = vsel %vm13796_vm5, %v1131_v61, %v1133_v1  ;;  %v1120_v42 = vsel %vm13798_vm10, %v1109_v15, %v1111_v11  ;;  %v10394_v61 = vld [vmem:[%s9298_s29 + $0x8] sm:$0xff]  ;;  %vm13808_vm5 = vmmov %vm13806_vm0  ;;  %s9230_s29 = smov 70  }
 0x42b   :  { %1020 = vrot.lane.b32.xlu1 %v10229_v55, %s9213_s10  ;;  %1335 = vmatpush1.msra.mxu1 %v1142_v34 }
 0x42c   :  { %1312 = vperm.xlu0 %8931, %v1308_v2  }
 0x42d   :  { %v10343_v59 = vpop.permute.xlu1 %1112  ;;  %v10345_v18 = vpop.permute.xlu0 %1092 }
 0x42e   :  { %v1121_v16 = vsel %vm13797_vm8, %v1111_v11, %v10343_v59  ;;  %vm13809_vm8 = vcmask 498688  }
 0x42f   :  { %1001 = vrot.lane.b32.xlu1 %v10229_v55, %s9211_s28  ;;  %1336 = vmatprep.subr.mxu1 %v1121_v16  ;;  %vm13810_vm10 = vmmov %vm13809_vm8 }
 0x430   :  { %1337 = vmatpush1.msra.mxu1 %v1120_v42 }
 0x431   :  { %v1091_v44 = vpop.permute.xlu1 %1090  ;;  %v1072_v22 = vpop.permute.xlu0 %1071 }
 0x432   :  { %v1099_v23 = vsel %vm13799_vm11, %v1091_v44, %v10345_v18  ;;  %vm13811_vm11 = vmmov %vm13809_vm8 }
 0x433   :  { %1317 = vperm.xlu1 %8932, %v1309_v27   ;;  %1338 = vmatprep.subr.mxu1 %v1099_v23 }
 0x435   :  { %v1089_v52 = vpop.permute.xlu1 %1088  ;;  %v1070_v24 = vpop.permute.xlu0 %1069 }
 0x436   :  { %v1098_v56 = vsel %vm13800_vm13, %v1089_v52, %v1091_v44  ;;  %v1079_v0 = vsel %vm296_vm9, %v1070_v24, %v1072_v22  ;;  %vm13812_vm13 = vcmask 506880  }
 0x437   :  { %1339 = vmatpush1.msra.mxu1 %v1098_v56 }
 0x439   :  { %v10356_v12 = vpop.permute.xlu1 %1073  ;;  %v10358_v17 = vpop.permute.xlu0 %1054 }
 0x43a   :  { %v1080_v40 = vsel %vm296_vm9, %v1072_v22, %v10356_v12 }
 0x43b   :  { %1340 = vmatprep.subr.mxu1 %v1080_v40 }
 0x43c   :  { %1341 = vmatpush1.msra.mxu1 %v1079_v0 }
 0x43d   :  { %v1053_v13 = vpop.permute.xlu1 %1052  ;;  %v1034_v37 = vpop.permute.xlu0 %1033 }
 0x43e   :  { %v1061_v26 = vsel %vm13801_vm14, %v1053_v13, %v10358_v17  ;;  %vm13813_vm14 = vmmov %vm13812_vm13 }
 0x43f   :  { %1342 = vmatprep.subr.mxu1 %v1061_v26 }
 0x441   :  { %v1051_v9 = vpop.permute.xlu1 %1050  ;;  %v1032_v33 = vpop.permute.xlu0 %1031 }
 0x442   :  { %v1060_v8 = vsel %vm13802_vm2, %v1051_v9, %v1053_v13  ;;  %v1041_v5 = vsel %vm13610_vm1, %v1032_v33, %v1034_v37  ;;  %vm13814_vm2 = vmmov %vm13812_vm13 }
 0x443   :  { %1343 = vmatpush1.msra.mxu1 %v1060_v8 }
 0x445   :  { %v10366_v53 = vpop.permute.xlu1 %1035  ;;  %v10368_v54 = vpop.permute.xlu0 %1016 }
 0x446   :  { %v1042_v48 = vsel %vm13610_vm1, %v1034_v37, %v10366_v53 }
 0x447   :  { %1344 = vmatprep.subr.mxu1 %v1042_v48 }
 0x448   :  { %1345 = vmatpush1.msra.mxu1 %v1041_v5 }
 0x449   :  { %v1015_v45 = vpop.permute.xlu1 %1014  ;;  %v996_v36 = vpop.permute.xlu0 %995 }
 0x44a   :  { %v1023_v25 = vsel %vm13609_vm3, %v1015_v45, %v10368_v54 }
 0x44b   :  { %1346 = vmatprep.subr.mxu1 %v1023_v25 }
 0x44d   :  { %v1013_v10 = vpop.permute.xlu1 %1012  ;;  %v994_v28 = vpop.permute.xlu0 %993 }
 0x44e   :  { %v1022_v29 = vsel %vm13609_vm3, %v1013_v10, %v1015_v45  ;;  %v1003_v20 = vsel %vm13608_vm15, %v994_v28, %v996_v36 }
 0x44f   :  { %1347 = vmatpush1.msra.mxu1 %v1022_v29 }
 0x451   :  { %v10376_v35 = vpop.permute.xlu1 %997  ;;  %v1293_v38 = vpop.permute.xlu0 %1292 }
 0x452   :  { %v1004_v47 = vsel %vm13608_vm15, %v996_v36, %v10376_v35 }
 0x453   :  { %1348 = vmatprep.subr.mxu1 %v1004_v47 }
 0x454   :  { %1349 = vmatpush1.msra.mxu1 %v1003_v20 }
 0x455   :  { %v1291_v58 = vpop.permute.xlu1 %1290  ;;  %1350 = vmatprep.subr.mxu1 %v10125_v46  ;;  %v1269_v50 = vpop.permute.xlu0 %1268 }
 0x456   :  { %1351 = vmatpush1.msra.mxu1 %v10123_v39  ;;  %v1299_v1 = vsel %vm13803_vm12, %v1291_v58, %v1293_v38  ;;  %v1298_v11 = vsel %vm13804_vm7, %v10261_v4, %v1291_v58  ;;  %v1276_v42 = vsel %vm13808_vm5, %v10263_v31, %v1269_v50  ;;  %vm13815_vm12 = vcmask 662528  }
 0x457   :  { %1385 = vmatmul.mubr.f32.vlgmr.msra.gmra.mxu1 %v10382_v49  ;;  %1397 = vmatprep.subr.mxu0 %v1299_v1  ;;  %vm13816_vm7 = vmmov %vm13815_vm12 }
 0x458   :  { %1398 = vmatpush1.msra.mxu0 %v1298_v11  ;;  %1390 = vmatprep.mubr.f32.mxu1 %v10390_v7 }
 0x459   :  { %v1295_v15 = vpop.permute.xlu1 %1294  ;;  %v1273_v46 = vpop.permute.xlu0 %1272 }
 0x45a   :  { %v1300_v2 = vsel %vm13805_vm4, %v1293_v38, %v1295_v15  ;;  %vm13817_vm4 = vmmov %vm13816_vm7 }
 0x45b   :  { %1391 = vmatmul.mubr.f32.gmra.mxu1 %v10394_v61  ;;  %8728 = vmatprep.subr.mxu1 %v1300_v2 }
 0x45c   :  { %8729 = vmatpush3.msra.mxu1 %v1300_v2  ;;  %8760 = vmatprep.mubr.f32.mxu1 %v10382_v49 }
 0x45d   :  { %v1271_v39 = vpop.permute.xlu1 %1270  ;;  %v1249_v4 = vpop.permute.xlu0 %1248 }
 0x45e   :  { %v1277_v34 = vsel %vm13806_vm0, %v1269_v50, %v1271_v39  ;;  %v1278_v16 = vsel %vm13807_vm6, %v1271_v39, %v1273_v46  ;;  %vm13818_vm0 = vcmask 670720  }
 0x45f   :  { %1399 = vmatprep.subr.mxu0 %v1277_v34  ;;  %8730 = vmatprep.subr.mxu1 %v1278_v16  ;;  %vm13819_vm6 = vmmov %vm13818_vm0 }
 0x460   :  { %1400 = vmatpush1.msra.mxu0 %v1276_v42  ;;  %8731 = vmatpush3.msra.mxu1 %v1278_v16  ;;  %vm13820_vm5 = vmmov %vm13818_vm0 }
 0x461   :  { %v1247_v27 = vpop.permute.xlu1 %1246  ;;  %v1225_v44 = vpop.permute.xlu0 %1224 }
 0x462   :  { %v1255_v22 = vsel %vm13809_vm8, %v1247_v27, %v1249_v4  ;;  %v1254_v23 = vsel %vm13810_vm10, %v10281_v30, %v1247_v27  ;;  %v1232_v37 = vsel %vm13814_vm2, %v10283_v63, %v1225_v44  ;;  %vm13821_vm8 = vcmask 678912  }
 0x463   :  { %1401 = vmatprep.subr.mxu0 %v1255_v22  ;;  %vm13822_vm10 = vmmov %vm13821_vm8 }
 0x464   :  { %1402 = vmatpush1.msra.mxu0 %v1254_v23 }
 0x465   :  { %v1251_v52 = vpop.permute.xlu1 %1250  ;;  %v1229_v24 = vpop.permute.xlu0 %1228 }
 0x466   :  { %v1256_v56 = vsel %vm13811_vm11, %v1249_v4, %v1251_v52  ;;  %vm13823_vm11 = vmmov %vm13821_vm8 }
 0x467   :  { %8732 = vmatprep.subr.mxu1 %v1256_v56 }
 0x468   :  { %8733 = vmatpush3.msra.mxu1 %v1256_v56 }
 0x469   :  { %v1227_v40 = vpop.permute.xlu1 %1226  ;;  %v1205_v0 = vpop.permute.xlu0 %1204 }
 0x46a   :  { %v1233_v31 = vsel %vm13812_vm13, %v1225_v44, %v1227_v40  ;;  %v1234_v13 = vsel %vm13813_vm14, %v1227_v40, %v1229_v24  ;;  %vm13824_vm13 = vcmask 687104  }
 0x46b   :  { %1403 = vmatprep.subr.mxu0 %v1233_v31  ;;  %8734 = vmatprep.subr.mxu1 %v1234_v13  ;;  %vm13825_vm14 = vmmov %vm13824_vm13 }
 0x46c   :  { %1404 = vmatpush1.msra.mxu0 %v1232_v37  ;;  %8735 = vmatpush3.msra.mxu1 %v1234_v13  ;;  %vm13826_vm2 = vmmov %vm13824_vm13 }
 0x46d   :  { %v1203_v30 = vpop.permute.xlu1 %1202  ;;  %v1181_v26 = vpop.permute.xlu0 %1180 }
 0x46e   :  { %v1211_v9 = vsel %vm13815_vm12, %v1203_v30, %v1205_v0  ;;  %v1210_v33 = vsel %vm13816_vm7, %v10301_v14, %v1203_v30  ;;  %v1188_v10 = vsel %vm13820_vm5, %v10303_v60, %v1181_v26  ;;  %vm13827_vm12 = vcmask 842752  }
 0x46f   :  { %1405 = vmatprep.subr.mxu0 %v1211_v9  ;;  %vm13828_vm7 = vmmov %vm13827_vm12  ;;  %vm13832_vm5 = vcmask 867328  }
 0x470   :  { %1406 = vmatpush1.msra.mxu0 %v1210_v33 }
 0x471   :  { %v1207_v8 = vpop.permute.xlu1 %1206 }
 0x472   :  { %v1185_v48 = vpop.permute.xlu0 %1184  ;;  %v1212_v5 = vsel %vm13817_vm4, %v1205_v0, %v1207_v8  ;;  %vm13829_vm4 = vmmov %vm13828_vm7 }
 0x473   :  { %8736 = vmatprep.subr.mxu1 %v1212_v5 }
 0x474   :  { %8737 = vmatpush3.msra.mxu1 %v1212_v5 }
 0x475   :  { %v1183_v45 = vpop.permute.xlu1 %1182 }
 0x476   :  { %v1161_v36 = vpop.permute.xlu0 %1160  ;;  %v1189_v63 = vsel %vm13818_vm0, %v1181_v26, %v1183_v45  ;;  %v1190_v25 = vsel %vm13819_vm6, %v1183_v45, %v1185_v48  ;;  %vm13830_vm0 = vcmask 850944   ;;  %v1549_v48 = vld [vmem:[%s9318_s19] sm:$0x1f]  ;;  %s9234_s19 = smov 98  }
 0x477   :  { %1407 = vmatprep.subr.mxu0 %v1189_v63  ;;  %8738 = vmatprep.subr.mxu1 %v1190_v25  ;;  %vm13831_vm6 = vmmov %vm13830_vm0 }
 0x478   :  { %1408 = vmatpush1.msra.mxu0 %v1188_v10  ;;  %8739 = vmatpush3.msra.mxu1 %v1190_v25 }
 0x479   :  { %v1159_v14 = vpop.permute.xlu1 %1158 }
 0x47a   :  { %v1137_v28 = vpop.permute.xlu0 %1136  ;;  %v1167_v29 = vsel %vm13821_vm8, %v1159_v14, %v1161_v36  ;;  %v1166_v38 = vsel %vm13822_vm10, %v10322_v57, %v1159_v14  ;;  %vm13833_vm8 = vmmov %vm13832_vm5 }
 0x47b   :  { %1409 = vmatprep.subr.mxu0 %v1167_v29  ;;  %v1144_v15 = vsel %vm13826_vm2, %v10324_v41, %v1137_v28  ;;  %vm13835_vm10 = vmmov %vm13830_vm0 }
 0x47c   :  { %1410 = vmatpush1.msra.mxu0 %v1166_v38  ;;  %v10470_v38 = vrot.slane %v1549_v48, %v13779_v51 }
 0x47d   :  { %v1163_v47 = vpop.permute.xlu1 %1162 }
 0x47e   :  { %v1141_v20 = vpop.permute.xlu0 %1140  ;;  %v1168_v58 = vsel %vm13823_vm11, %v1161_v36, %v1163_v47  ;;  %v10473_v47 = vrot.slane %v1549_v48, %v13780_v19  ;;  %vm13836_vm11 = vmmov %vm13830_vm0 }
 0x47f   :  { %8740 = vmatprep.subr.mxu1 %v1168_v58 }
 0x480   :  { %8741 = vmatpush3.msra.mxu1 %v1168_v58 }
 0x481   :  { %v1139_v50 = vpop.permute.xlu1 %1138 }
 0x482   :  { %v1117_v1 = vpop.permute.xlu0 %1116  ;;  %v1145_v60 = vsel %vm13824_vm13, %v1137_v28, %v1139_v50  ;;  %v1146_v11 = vsel %vm13825_vm14, %v1139_v50, %v1141_v20  ;;  %vm13837_vm13 = vmmov %vm13830_vm0 }
 0x483   :  { %1411 = vmatprep.subr.mxu0 %v1145_v60  ;;  %8742 = vmatprep.subr.mxu1 %v1146_v11 }
 0x484   :  { %1412 = vmatpush1.msra.mxu0 %v1144_v15  ;;  %8743 = vmatpush3.msra.mxu1 %v1146_v11 }
 0x485   :  { %v1115_v57 = vpop.permute.xlu1 %1114 }
 0x486   :  { %v1095_v46 = vpop.permute.xlu0 %1094  ;;  %v1123_v2 = vsel %vm13827_vm12, %v1115_v57, %v1117_v1  ;;  %v1122_v39 = vsel %vm13828_vm7, %v10343_v59, %v1115_v57 }
 0x487   :  { %1413 = vmatprep.subr.mxu0 %v1123_v2  ;;  %v1100_v44 = vsel %vm13831_vm6, %v10345_v18, %v1095_v46 }
 0x488   :  { %1414 = vmatpush1.msra.mxu0 %v1122_v39 }
 0x489   :  { %v1119_v4 = vpop.permute.xlu1 %1118 }
 0x48a   :  { %v1076_v34 = vpop.permute.xlu0 %1075  ;;  %v1124_v16 = vsel %vm13829_vm4, %v1117_v1, %v1119_v4 }
 0x48b   :  { %8744 = vmatprep.subr.mxu1 %v1124_v16  ;;  %v1081_v23 = vsel %vm296_vm9, %v10356_v12, %v1076_v34 }
 0x48c   :  { %8745 = vmatpush3.msra.mxu1 %v1124_v16 }
 0x48d   :  { %v1097_v42 = vpop.permute.xlu1 %1096 }
 0x48e   :  { %v1057_v27 = vpop.permute.xlu0 %1056  ;;  %8746 = vmatprep.subr.mxu1 %v1097_v42  ;;  %v1101_v41 = vsel %vm13830_vm0, %v1095_v46, %v1097_v42 }
 0x48f   :  { %1415 = vmatprep.subr.mxu0 %v1101_v41  ;;  %8747 = vmatpush3.msra.mxu1 %v1097_v42  ;;  %v1062_v18 = vsel %vm13833_vm8, %v10358_v17, %v1057_v27  ;;  %vm1772_vm8 = vcmask 261120  }
 0x490   :  { %1416 = vmatpush1.msra.mxu0 %v1100_v44 }
 0x491   :  { %v1078_v59 = vpop.permute.xlu1 %1077 }
 0x492   :  { %8748 = vmatprep.subr.mxu1 %v1078_v59  ;;  %v1082_v22 = vsel %vm296_vm9, %v1076_v34, %v1078_v59  ;;  %v1038_v52 = vpop.permute.xlu0 %1037  ;;  %vm13834_vm9 = vmmov %vm13830_vm0 }
 0x493   :  { %1417 = vmatprep.subr.mxu0 %v1082_v22  ;;  %8749 = vmatpush3.msra.mxu1 %v1078_v59  ;;  %v1043_v12 = vsel %vm13610_vm1, %v10366_v53, %v1038_v52 }
 0x494   :  { %1418 = vmatpush1.msra.mxu0 %v1081_v23 }
 0x495   :  { %v1059_v24 = vpop.permute.xlu1 %1058 }
 0x496   :  { %8750 = vmatprep.subr.mxu1 %v1059_v24  ;;  %v1063_v56 = vsel %vm13832_vm5, %v1057_v27, %v1059_v24  ;;  %v1019_v0 = vpop.permute.xlu0 %1018 }
 0x497   :  { %1419 = vmatprep.subr.mxu0 %v1063_v56  ;;  %8751 = vmatpush3.msra.mxu1 %v1059_v24  ;;  %v1024_v17 = vsel %vm13609_vm3, %v10368_v54, %v1019_v0 }
 0x498   :  { %1420 = vmatpush1.msra.mxu0 %v1062_v18 }
 0x499   :  { %v1040_v40 = vpop.permute.xlu1 %1039 }
 0x49a   :  { %8752 = vmatprep.subr.mxu1 %v1040_v40  ;;  %v1044_v31 = vsel %vm13610_vm1, %v1038_v52, %v1040_v40  ;;  %v1000_v30 = vpop.permute.xlu0 %999  ;;  %vm5274_vm1 = vcmask 999248  }
 0x49b   :  { %1421 = vmatprep.subr.mxu0 %v1044_v31  ;;  %8753 = vmatpush3.msra.mxu1 %v1040_v40  ;;  %v1005_v53 = vsel %vm13608_vm15, %v10376_v35, %v1000_v30 }
 0x49c   :  { %1422 = vmatpush1.msra.mxu0 %v1043_v12 }
 0x49d   :  { %v1021_v13 = vpop.permute.xlu1 %1020 }
 0x49e   :  { %8754 = vmatprep.subr.mxu1 %v1021_v13  ;;  %v1025_v37 = vsel %vm13609_vm3, %v1019_v0, %v1021_v13  ;;  %v1552_v0 = vld [vmem:[%s9313_s14] sm:$0xff]  ;;  %vm5265_vm3 = vcmask 769648  }
 0x49f   :  { %1423 = vmatprep.subr.mxu0 %v1025_v37  ;;  %8755 = vmatpush3.msra.mxu1 %v1021_v13 }
 0x4a0   :  { %1424 = vmatpush1.msra.mxu0 %v1024_v17 }
 0x4a1   :  { %v1002_v26 = vpop.permute.xlu1 %1001 }
 0x4a2   :  { %8756 = vmatprep.subr.mxu1 %v1002_v26  ;;  %v1006_v9 = vsel %vm13608_vm15, %v1000_v30, %v1002_v26  ;;  %vm5256_vm15 = vcmask 540048  }
 0x4a3   :  { %1425 = vmatprep.subr.mxu0 %v1006_v9  ;;  %8757 = vmatpush3.msra.mxu1 %v1002_v26 }
 0x4a4   :  { %1426 = vmatpush1.msra.mxu0 %v1005_v53  ;;  %8758 = vmatprep.subr.mxu1 %v10229_v55 }
 0x4a5   :  { %1427 = vmatprep.subr.mxu0 %v10235_v6  ;;  %8759 = vmatpush3.msra.mxu1 %v10229_v55  ;;  %v10459_v6 = vrot.slane %v1549_v48, %v13777_v21 }
 0x4a6   :  { %1428 = vmatpush1.msra.mxu0 %v10131_v62  ;;  %8761 = vmatmul.mubr.f32.vlgmr.msra.gmra.mxu1 %v10394_v61  ;;  %v10462_v62 = vrot.slane %v1549_v48, %v13776_v32 }
 0x4a7   :  { %1462 = vmatmul.mubr.f32.vlgmr.msra.gmra.mxu0 %v10382_v49  ;;  %v1313_v8 = vpop.permute.xlu0 %1312 }
 0x4a8   :  { %1467 = vmatprep.mubr.f32.mxu0 %v10390_v7 }
 0x4ab   :  { %1468 = vmatmul.mubr.f32.gmra.mxu0 %v10394_v61  ;;  %v10466_v61 = vrot.slane %v1549_v48, %v13778_v43 }
 0x4ae   :  { %v1318_v36 = vpop.permute.xlu1 %1317 }
 0x517   :  { %v1386_v54 = vpop.f32.mrf.mxu1 }
 0x518   :  { %v1387_v45 = vadd.f32 %v1386_v54, %v1313_v8 }
 0x519   :  { %v1388_v33 = vpop.f32.mrf.mxu1 }
 0x51a   :  { %v1389_v5 = vadd.f32 %v1388_v33, %v1313_v8  ;;  %v1580_v10 = vmul.f32 %v10462_v62, %v1387_v45 }
 0x51b   :  { %v1392_v35 = vpop.f32.mrf.mxu1 }
 0x51c   :  { %v1581_v49 = vmul.f32 %v10459_v6, %v1389_v5  ;;  %v1393_v14 = vadd.f32 %v1392_v35, %v1318_v36 }
 0x51d   :  { %v1394_v55 = vpop.f32.mrf.mxu1 }
 0x51e   :  { %v1395_v7 = vadd.f32 %v1394_v55, %v1318_v36  ;;  %v1590_v50 = vadd.f32 %v1581_v49, %v1580_v10  ;;  %v1585_v2 = vmul.f32 %v10462_v62, %v1393_v14 }
 0x520   :  { %v1586_v1 = vmul.f32 %v10459_v6, %v1395_v7 }
 0x522   :  { %v1597_v42 = vadd.f32 %v1586_v1, %v1585_v2 }
 0x566   :  { %v8762_v63 = vpop.f32.mrf.mxu1 }
 0x567   :  { %v1463_v25 = vpop.f32.mrf.mxu0  ;;  %v1546_v15 = vadd.f32 %v8762_v63, %v1318_v36 }
 0x568   :  { %v1464_v28 = vadd.f32 %v1463_v25, %v1313_v8  ;;  %v1540_v29 = vpop.f32.mrf.mxu1 }
 0x569   :  { %v1541_v20 = vadd.f32 %v1540_v29, %v1313_v8  ;;  %v1465_v58 = vpop.f32.mrf.mxu0  ;;  %v1589_v59 = vmul.f32 %v10473_v47, %v1546_v15 }
 0x56a   :  { %v1582_v60 = vmul.f32 %v10466_v61, %v1464_v28  ;;  %v1466_v11 = vadd.f32 %v1465_v58, %v1313_v8 }
 0x56b   :  { %v1584_v57 = vmul.f32 %v10473_v47, %v1541_v20  ;;  %v1469_v46 = vpop.f32.mrf.mxu0  ;;  %v1600_v18 = vsel %vm13835_vm10, %v1589_v59, 0.0  ;;  %v1553_v59 = vld [vmem:[%s9313_s14 + $0x8] sm:$0xff]  ;;  %s9233_s14 = smov 52   ;;  %vm1775_vm10 = vcmask 392192  }
 0x56c   :  { %v1591_v39 = vadd.f32 %v1590_v50, %v1582_v60  ;;  %v1583_v4 = vmul.f32 %v10470_v38, %v1466_v11  ;;  %v1470_v34 = vadd.f32 %v1469_v46, %v1318_v36 }
 0x56d   :  { %v1471_v16 = vpop.f32.mrf.mxu0  ;;  %v1593_v22 = vsel %vm13834_vm9, %v1584_v57, 0.0  ;;  %vm13838_vm9 = vcmask 130048  }
 0x56e   :  { %v1592_v27 = vadd.f32 %v1591_v39, %v1583_v4  ;;  %v1587_v41 = vmul.f32 %v10466_v61, %v1470_v34  ;;  %v1472_v44 = vadd.f32 %v1471_v16, %v1318_v36 }
 0x570   :  { %v1598_v23 = vadd.f32 %v1597_v42, %v1587_v41  ;;  %v1588_v52 = vmul.f32 %v10470_v38, %v1472_v44  ;;  %v1594_v24 = vadd.f32 %v1593_v22, %v1592_v27 }
 0x572   :  { %v1599_v56 = vadd.f32 %v1598_v23, %v1588_v52  ;;  %1595 = vadd.xlane.f32.xlu0 %v1594_v24 }
 0x574   :  { %v1601_v40 = vadd.f32 %v1600_v18, %v1599_v56 }
 0x576   :  { %1602 = vadd.xlane.f32.xlu1 %v1601_v40 }
 0x587   :  { %1684 = vperm.xlu1 %8932, %v1552_v0  }
 0x5fb   :  { %v1596_v31 = vpop.xlane.xlu0 %1595 }
 0x5fc   :  { %v1604_v12 = vmul.f32 0.00390625, %v1596_v31 }
 0x5fe   :  { %v1606_v13 = vsub.f32 %v1387_v45, %v1604_v12  ;;  %v1607_v37 = vsub.f32 %v1389_v5, %v1604_v12  ;;  %v1608_v17 = vsub.f32 %v1464_v28, %v1604_v12  ;;  %v10486_v30 = vsub.f32 %v1466_v11, %v1604_v12 }
 0x5ff   :  { %v1603_v26 = vpop.xlane.xlu1 %1602  ;;  %v1610_v9 = vsub.f32 %v1541_v20, %v1604_v12 }
 0x600   :  { %v1605_v53 = vmul.f32 0.00390625, %v1603_v26  ;;  %v1616_v54 = vmul.f32 %v1606_v13, %v1606_v13  ;;  %v1617_v33 = vmul.f32 %v1607_v37, %v1607_v37  ;;  %v1618_v35 = vmul.f32 %v1608_v17, %v1608_v17 }
 0x601   :  { %v1619_v8 = vmul.f32 %v10486_v30, %v10486_v30  ;;  %v1620_v48 = vmul.f32 %v1610_v9, %v1610_v9 }
 0x602   :  { %v1611_v55 = vsub.f32 %v1393_v14, %v1605_v53  ;;  %v10490_v36 = vsub.f32 %v1395_v7, %v1605_v53  ;;  %v1626_v49 = vmul.f32 %v1616_v54, %v10462_v62  ;;  %v1627_v5 = vmul.f32 %v1617_v33, %v10459_v6 }
 0x603   :  { %v1628_v45 = vmul.f32 %v1618_v35, %v10466_v61  ;;  %v1613_v63 = vsub.f32 %v1470_v34, %v1605_v53  ;;  %v10495_v10 = vsub.f32 %v1472_v44, %v1605_v53  ;;  %v1615_v28 = vsub.f32 %v1546_v15, %v1605_v53  ;;  %v1551_v44 = vld [vmem:[%s9308_s8 + $0x8] sm:$0xff]  ;;  %v10513_v22 = vpop.permute.xlu1 %1684 }
 0x604   :  { %v1636_v25 = vadd.f32 %v1627_v5, %v1626_v49  ;;  %v1621_v29 = vmul.f32 %v1611_v55, %v1611_v55  ;;  %v1630_v20 = vmul.f32 %v1620_v48, %v10473_v47  ;;  %v1622_v58 = vmul.f32 %v10490_v36, %v10490_v36 }
 0x605   :  { %v1623_v14 = vmul.f32 %v1613_v63, %v1613_v63  ;;  %v1629_v7 = vmul.f32 %v1619_v8, %v10470_v38  ;;  %v1625_v1 = vmul.f32 %v1615_v28, %v1615_v28  ;;  %v1624_v11 = vmul.f32 %v10495_v10, %v10495_v10 }
 0x606   :  { %v1637_v50 = vadd.f32 %v1636_v25, %v1628_v45  ;;  %v1631_v60 = vmul.f32 %v1621_v29, %v10462_v62  ;;  %v1632_v57 = vmul.f32 %v1622_v58, %v10459_v6  ;;  %v1639_v46 = vsel %vm13836_vm11, %v1630_v20, 0.0  ;;  %v1550_v6 = vld [vmem:[%s9308_s8] sm:$0xff]  ;;  %s9232_s8 = smov 58  }
 0x607   :  { %v1633_v2 = vmul.f32 %v1623_v14, %v10466_v61  ;;  %v1635_v34 = vmul.f32 %v1625_v1, %v10473_v47  ;;  %v1634_v16 = vmul.f32 %v1624_v11, %v10470_v38  ;;  %vm13606_vm11 = vcmask 523264  }
 0x608   :  { %v1638_v15 = vadd.f32 %v1637_v50, %v1629_v7  ;;  %v1643_v39 = vadd.f32 %v1632_v57, %v1631_v60 }
 0x609   :  { %v1646_v27 = vsel %vm13837_vm13, %v1635_v34, 0.0  ;;  %vm1781_vm13 = vcmask 654336  }
 0x60a   :  { %v1640_v4 = vadd.f32 %v1639_v46, %v1638_v15  ;;  %v1644_v62 = vadd.f32 %v1643_v39, %v1633_v2 }
 0x60c   :  { %1641 = vadd.xlane.f32.xlu0 %v1640_v4  ;;  %v1645_v42 = vadd.f32 %v1644_v62, %v1634_v16  ;;  %v8934_v16 = vld [vmem:[#allocation6 + $0x38] sm:$0xff]  }
 0x60d   :  { %v8935_v62 = vld [vmem:[#allocation6 + $0xf8] sm:$0xff]  }
 0x60e   :  { %v1647_v41 = vadd.f32 %v1646_v27, %v1645_v42  ;;  %8535 = vmatprep.subr.bf16.mxu1 %v8935_v62  ;;  %v8936_v27 = vld [vmem:[#allocation6 + $0xb8] sm:$0xff]  }
 0x60f   :  { %8536 = vmatpush3.bf16.msra.mxu1 %v8936_v27 }
 0x610   :  { %1648 = vadd.xlane.f32.xlu1 %v1647_v41  ;;  %v8937_v41 = vld [vmem:[#allocation6 + $0x70] sm:$0xff]  }
 0x622   :  { %1666 = vperm.xlu0 %8931, %v1550_v6   ;;  %v8938_v6 = vld [vmem:[#allocation6 + $0x30] sm:$0xff]  }
 0x626   :  { %1671 = vperm.xlu0 %8931, %v1551_v44   ;;  %v8939_v44 = vld [vmem:[#allocation6 + $0xf0] sm:$0xff]  }
 0x627   :  { %8537 = vmatprep.subr.bf16.mxu1 %v8939_v44 }
 0x62a   :  { %1689 = vperm.xlu0 %8931, %v1553_v59  }
 0x695   :  { %v1642_v61 = vpop.xlane.xlu0 %1641 }
 0x696   :  { %v1650_v23 = vmul.f32 0.00390625, %v1642_v61  ;;  %v8940_v61 = vld [vmem:[#allocation6 + $0xb0] sm:$0xff]  }
 0x697   :  { %8538 = vmatpush3.bf16.msra.mxu1 %v8940_v61 }
 0x698   :  { %v1652_v47 = vadd.f32 1e-05, %v1650_v23  ;;  %v8942_v23 = vld [vmem:[#allocation6 + $0x28] sm:$0xff]  }
 0x699   :  { %v1649_v38 = vpop.xlane.xlu1 %1648 }
 0x69a   :  { %9071 = vrsqrt.f32 %v1652_v47  ;;  %v1651_v52 = vmul.f32 0.00390625, %v1649_v38  ;;  %v8943_v47 = vld [vmem:[#allocation6 + $0xe8] sm:$0xff]  }
 0x69b   :  { %8539 = vmatprep.subr.bf16.mxu1 %v8943_v47 }
 0x69c   :  { %v1653_v24 = vadd.f32 1e-05, %v1651_v52  ;;  %v8944_v52 = vld [vmem:[#allocation6 + $0xa8] sm:$0xff]  }
 0x69d   :  { %v1667_v18 = vpop.permute.xlu0 %1666  ;;  %8540 = vmatpush3.bf16.msra.mxu1 %v8944_v52 }
 0x69e   :  { %9073 = vrsqrt.f32 %v1653_v24  ;;  %v8945_v24 = vld [vmem:[#allocation6 + $0x60] sm:$0xff]  }
 0x6a1   :  { %v1672_v48 = vpop.permute.xlu0 %1671 }
 0x6a7   :  { %v9072_v56 = vpop.eup %9071 }
 0x6a8   :  { %v1656_v40 = vmul.f32 %v9072_v56, %v1606_v13  ;;  %v1657_v0 = vmul.f32 %v9072_v56, %v1607_v37  ;;  %v1658_v31 = vmul.f32 %v9072_v56, %v1608_v17  ;;  %v1690_v17 = vpop.permute.xlu0 %1689 }
 0x6aa   :  { %v1674_v12 = vmul.f32 %v1667_v18, %v1656_v40  ;;  %v1675_v26 = vmul.f32 %v1667_v18, %v1657_v0  ;;  %v1676_v9 = vmul.f32 %v1667_v18, %v1658_v31  ;;  %v8948_v40 = vld [vmem:[#allocation6 + $0xa0] sm:$0xff]   ;;  %v8949_v0 = vld [vmem:[#allocation6 + $0x58] sm:$0xff]  }
 0x6ab   :  { %v9074_v53 = vpop.eup %9073  ;;  %v8950_v31 = vld [vmem:[#allocation6 + $0x18] sm:$0xff]  }
 0x6ac   :  { %v1692_v54 = vadd.f32 %v10513_v22, %v1674_v12  ;;  %v1693_v33 = vadd.f32 %v10513_v22, %v1675_v26  ;;  %v1694_v35 = vadd.f32 %v10513_v22, %v1676_v9  ;;  %v1660_v8 = vmul.f32 %v9074_v53, %v1611_v55  ;;  %v8951_v12 = vld [vmem:[#allocation6 + $0xd8] sm:$0xff]   ;;  %v8953_v9 = vld [vmem:[#allocation6 + $0x50] sm:$0xff]  }
 0x6ad   :  { %v1662_v5 = vmul.f32 %v9074_v53, %v1613_v63  ;;  %v1659_v63 = vmul.f32 %v9072_v56, %v10486_v30  ;;  %v1663_v58 = vmul.f32 %v9074_v53, %v10495_v10  ;;  %v1661_v15 = vmul.f32 %v9074_v53, %v10490_v36  ;;  %v8933_v36 = vld [vmem:[#allocation6 + $0x78] sm:$0xff]   ;;  %v8946_v56 = vld [vmem:[#allocation6 + $0x20] sm:$0xff]   ;;  %v8955_v53 = vld [vmem:[#allocation6 + $0xd0] sm:$0xff]  }
 0x6ae   :  { %vm1700_vm14 = vcmp.ge.f32.partialorder %v1692_v54, 0.0  ;;  %v1708_v49 = vmul.f32 0.01, %v1692_v54  ;;  %v1678_v45 = vmul.f32 %v1672_v48, %v1660_v8  ;;  %v1709_v13 = vmul.f32 0.01, %v1693_v33  ;;  %8513 = vmatprep.subr.bf16.mxu0 %v8933_v36  ;;  %v8952_v26 = vld [vmem:[#allocation6 + $0x98] sm:$0xff]  }
 0x6af   :  { %v1710_v37 = vmul.f32 0.01, %v1694_v35  ;;  %vm1701_vm2 = vcmp.ge.f32.partialorder %v1693_v33, 0.0  ;;  %vm1702_vm12 = vcmp.ge.f32.partialorder %v1694_v35, 0.0  ;;  %v1680_v55 = vmul.f32 %v1672_v48, %v1662_v5  ;;  %8514 = vmatpush3.bf16.msra.mxu0 %v8934_v16  ;;  %v8959_v8 = vld [vmem:[#allocation6 + $0xc8] sm:$0xff]   ;;  %v8961_v5 = vld [vmem:[#allocation6 + $0x40] sm:$0xff]  }
 0x6b0   :  { %v10518_v25 = vsel %vm1700_vm14, %v1692_v54, %v1708_v49  ;;  %v1696_v28 = vadd.f32 %v1690_v17, %v1678_v45  ;;  %v1717_v29 = vsel %vm1701_vm2, %v1693_v33, %v1709_v13  ;;  %v1677_v50 = vmul.f32 %v1667_v18, %v1659_v63  ;;  %8515 = vmatprep.subr.bf16.mxu0 %v8937_v41  ;;  %v8947_v18 = vld [vmem:[#allocation6 + $0xe0] sm:$0xff]   ;;  %v8954_v54 = vld [vmem:[#allocation6 + $0x10] sm:$0xff]   ;;  %v8960_v49 = vld [vmem:[#allocation6 + $0x88] sm:$0xff]  }
 0x6b1   :  { %1738 = vrot.lane.b32.xlu1 %v10518_v25, %s9225_s9  ;;  %1726 = vrot.lane.b32.xlu0 %v10518_v25, %s9226_s13  ;;  %v1718_v20 = vsel %vm1702_vm12, %v1694_v35, %v1710_v37  ;;  %v1698_v7 = vadd.f32 %v1690_v17, %v1680_v55  ;;  %v1681_v1 = vmul.f32 %v1672_v48, %v1663_v58  ;;  %v8956_v33 = vld [vmem:[#allocation6 + $0x90] sm:$0xff]   ;;  %v8957_v35 = vld [vmem:[#allocation6 + $0x48] sm:$0xff]   ;;  %v8962_v45 = vld [vmem:[#allocation6] sm:$0xff]   ;;  %vm13605_vm14 = vcmask 785408  }
 0x6b2   :  { %v1712_v14 = vmul.f32 0.01, %v1696_v28  ;;  %vm1704_vm7 = vcmp.ge.f32.partialorder %v1696_v28, 0.0  ;;  %v1695_v57 = vadd.f32 %v10513_v22, %v1677_v50  ;;  %v1679_v39 = vmul.f32 %v1672_v48, %v1661_v15  ;;  %v8941_v22 = vld [vmem:[#allocation6 + $0x68] sm:$0xff]   ;;  %8541 = vmatprep.subr.bf16.mxu1 %v8947_v18  ;;  %v8963_v13 = vld [vmem:[#allocation6 + $0xc0] sm:$0xff]   ;;  %v8968_v55 = vld [vmem:[#allocation6 + $0x1f8] sm:$0xff]  }
 0x6b3   :  { %v1714_v11 = vmul.f32 0.01, %v1698_v7  ;;  %vm1706_vm4 = vcmp.ge.f32.partialorder %v1698_v7, 0.0  ;;  %v1699_v30 = vadd.f32 %v1690_v17, %v1681_v1  ;;  %8516 = vmatpush3.bf16.msra.mxu0 %v8938_v6  ;;  %8542 = vmatpush3.bf16.msra.mxu1 %v8948_v40  ;;  %v8958_v48 = vld [vmem:[#allocation6 + $0x8] sm:$0xff]   ;;  %v8964_v37 = vld [vmem:[#allocation6 + $0x80] sm:$0xff]   ;;  %vm1787_vm2 = vcmask 916480  }
 0x6b4   :  { %v10529_v60 = vsel %vm1704_vm7, %v1696_v28, %v1712_v14  ;;  %v1711_v46 = vmul.f32 0.01, %v1695_v57  ;;  %vm1703_vm0 = vcmp.ge.f32.partialorder %v1695_v57, 0.0  ;;  %v1697_v42 = vadd.f32 %v1690_v17, %v1679_v39  ;;  %8517 = vmatprep.subr.bf16.mxu0 %v8941_v22  ;;  %8543 = vmatprep.subr.bf16.mxu1 %v8951_v12  ;;  %v8965_v17 = vld [vmem:[#allocation6 + $0x178] sm:$0xff]   ;;  %v13839_v16 = vld [vmem:[#allocation25_spill] sm:$0xff]  ;;  %vm13840_vm7 = vmmov %vm13838_vm9 }
 0x6b5   :  { %1758 = vrot.lane.b32.xlu1 %v1717_v29, %s9227_s17  ;;  %1874 = vrot.lane.b32.xlu0 %v1718_v20, %s9228_s21  ;;  %v10534_v10 = vsel %vm1706_vm4, %v1698_v7, %v1714_v11  ;;  %v1715_v2 = vmul.f32 0.01, %v1699_v30  ;;  %vm1707_vm6 = vcmp.ge.f32.partialorder %v1699_v30, 0.0  ;;  %vm1902_vm12 = vcmask 474112   ;;  %vm13841_vm4 = vmmov %vm13840_vm7 }
 0x6b6   :  { %v10544_v4 = vsel %vm1703_vm0, %v1695_v57, %v1711_v46  ;;  %v1713_v59 = vmul.f32 0.01, %v1697_v42  ;;  %vm1705_vm5 = vcmp.ge.f32.partialorder %v1697_v42, 0.0  ;;  %vm13842_vm0 = vmmov %vm13841_vm4 }
 0x6b7   :  { %v10546_v34 = vsel %vm1707_vm6, %v1699_v30, %v1715_v2  ;;  %8518 = vmatpush3.bf16.msra.mxu0 %v8942_v23  ;;  %8544 = vmatpush3.bf16.msra.mxu1 %v8952_v26  ;;  %vm13607_vm6 = vmmov 0  }
 0x6b8   :  { %v1721_v38 = vsel %vm1705_vm5, %v1697_v42, %v1713_v59  ;;  %8519 = vmatprep.subr.bf16.mxu0 %v8945_v24  ;;  %8545 = vmatprep.subr.bf16.mxu1 %v8955_v53 }
 0x6b9   :  { %1764 = vrot.lane.b32.xlu1 %v1717_v29, %s9229_s25  ;;  %1880 = vrot.lane.b32.xlu0 %v1718_v20, %s9230_s29 }
 0x6bb   :  { %8520 = vmatpush3.bf16.msra.mxu0 %v8946_v56  ;;  %8546 = vmatpush3.bf16.msra.mxu1 %v8956_v33 }
 0x6bc   :  { %8521 = vmatprep.subr.bf16.mxu0 %v8949_v0  ;;  %8547 = vmatprep.subr.bf16.mxu1 %v8959_v8 }
 0x6bd   :  { %1732 = vrot.lane.b32.xlu0 %v10518_v25, %s9231_s3  ;;  %1728 = vrot.lane.b32.xlu1 %v10529_v60, %s9226_s13  ;;  %s9245_s13 = smov 41  }
 0x6bf   :  { %8522 = vmatpush3.bf16.msra.mxu0 %v8950_v31  ;;  %8548 = vmatpush3.bf16.msra.mxu1 %v8960_v49 }
 0x6c0   :  { %8523 = vmatprep.subr.bf16.mxu0 %v8953_v9  ;;  %8549 = vmatprep.subr.bf16.mxu1 %v8963_v13 }
 0x6c1   :  { %1886 = vrot.lane.b32.xlu0 %v1718_v20, %s9204_s22  ;;  %1882 = vrot.lane.b32.xlu1 %v10534_v10, %s9230_s29 }
 0x6c3   :  { %8524 = vmatpush3.bf16.msra.mxu0 %v8954_v54  ;;  %8550 = vmatpush3.bf16.msra.mxu1 %v8964_v37 }
 0x6c4   :  { %8525 = vmatprep.subr.bf16.mxu0 %v8957_v35  ;;  %8579 = vmatprep.subr.bf16.mxu1 %v8968_v55 }
 0x6c5   :  { %1894 = vrot.lane.b32.xlu0 %v1718_v20, %s9232_s8  ;;  %1888 = vrot.lane.b32.xlu1 %v10534_v10, %s9204_s22 }
 0x6c7   :  { %8526 = vmatpush3.bf16.msra.mxu0 %v8958_v48 }
 0x6c8   :  { %8527 = vmatprep.subr.bf16.mxu0 %v8961_v5 }
 0x6c9   :  { %1896 = vrot.lane.b32.xlu0 %v10544_v4, %s9232_s8  ;;  %1900 = vrot.lane.b32.xlu1 %v10546_v34, %s9232_s8 }
 0x6cb   :  { %8528 = vmatpush3.bf16.msra.mxu0 %v8962_v45 }
 0x6cc   :  { %8557 = vmatprep.subr.bf16.mxu0 %v8965_v17 }
 0x6cd   :  { %1744 = vrot.lane.b32.xlu0 %v10518_v25, %s9221_s30  ;;  %1746 = vrot.lane.b32.xlu1 %v10529_v60, %s9221_s30  ;;  %s9242_s30 = smov 97  }
 0x6d1   :  { %1907 = vrot.lane.b32.xlu0 %v10544_v4, %s9233_s14  ;;  %1752 = vrot.lane.b32.xlu1 %v10529_v60, %s9234_s19 }
 0x6d5   :  { %1750 = vrot.lane.b32.xlu0 %v10518_v25, %s9234_s19  ;;  %1760 = vrot.lane.b32.xlu1 %v1721_v38, %s9227_s17  ;;  %s9246_s17 = smov 42  }
 0x6d9   :  { %1913 = vrot.lane.b32.xlu0 %v10544_v4, %s9235_s1  ;;  %1766 = vrot.lane.b32.xlu1 %v1721_v38, %s9229_s25  ;;  %s9248_s25 = smov 44  }
 0x6dd   :  { %1919 = vrot.lane.b32.xlu0 %v10544_v4, %s9236_s24 }
 0x6e1   :  { %1925 = vrot.lane.b32.xlu0 %v10544_v4, %s9237_s20 }
 0x6e5   :  { %1876 = vrot.lane.b32.xlu0 %v10534_v10, %s9228_s21  ;;  %s9247_s21 = smov 43  }
 0x6e9   :  { %1734 = vrot.lane.b32.xlu0 %v10529_v60, %s9231_s3  ;;  %s9249_s3 = smov 69  }
 0x6ed   :  { %1898 = vrot.lane.b32.xlu0 %v10534_v10, %s9232_s8  ;;  %v9238_v10 = vmov 1983009808  }
 0x6ee   :  { %v1793_v57 = vunpack.c.l.s4 %v9238_v10 }
 0x6f0   :  { %v1794_v2 = vunpack.c.0.s8 %v1793_v57 }
 0x6f1   :  { %1740 = vrot.lane.b32.xlu0 %v10529_v60, %s9225_s9  ;;  %s9244_s9 = smov 100  }
 0x6f2   :  { %v10595_v62 = vsub.s32 %v1794_v2, %v13839_v16 }
 0x6f5   :  { %1909 = vrot.lane.b32.xlu0 %v10546_v34, %s9233_s14  ;;  %s9250_s14 = smov 71  }
 0x6f9   :  { %1915 = vrot.lane.b32.xlu0 %v10546_v34, %s9235_s1 }
 0x6fd   :  { %1921 = vrot.lane.b32.xlu0 %v10546_v34, %s9236_s24  ;;  %s9251_s24 = smov 72  }
 0x701   :  { %1927 = vrot.lane.b32.xlu0 %v10546_v34, %s9237_s20  ;;  %s13851_s20 = sld [smem:[#allocation17_spill]] }
 0x723   :  { %v1727_v28 = vpop.permute.xlu0 %1726  ;;  %v1739_v20 = vpop.permute.xlu1 %1738 }
 0x724   :  { %v1770_v46 = vsel %vm13838_vm9, %v10518_v25, %v1727_v28 }
 0x727   :  { %v1875_v29 = vpop.permute.xlu0 %1874  ;;  %v1759_v14 = vpop.permute.xlu1 %1758 }
 0x72b   :  { %v1881_v63 = vpop.permute.xlu0 %1880  ;;  %v1765_v50 = vpop.permute.xlu1 %1764 }
 0x72c   :  { %v1931_v24 = vsel %vm13840_vm7, %v1875_v29, %v1881_v63 }
 0x72f   :  { %v1733_v58 = vpop.permute.xlu0 %1732  ;;  %v10586_v30 = vpop.permute.xlu1 %1728 }
 0x730   :  { %v1773_v39 = vsel %vm1772_vm8, %v1770_v46, %v1733_v58 }
 0x731   :  { %v1776_v36 = vsel %vm1775_vm10, %v1773_v39, %v1739_v20 }
 0x733   :  { %v1887_v7 = vpop.permute.xlu0 %1886  ;;  %v10591_v4 = vpop.permute.xlu1 %1882 }
 0x734   :  { %v1933_v56 = vsel %vm1772_vm8, %v1931_v24, %v1887_v7 }
 0x737   :  { %v1895_v1 = vpop.permute.xlu0 %1894  ;;  %v10599_v41 = vpop.permute.xlu1 %1888 }
 0x73b   :  { %v1897_v11 = vpop.permute.xlu0 %1896  ;;  %v10608_v18 = vpop.permute.xlu1 %1900 }
 0x73c   :  { %v1903_v23 = vsel %vm1902_vm12, %v1895_v1, %v1897_v11 }
 0x73d   :  { %v1935_v26 = vsel %vm1775_vm10, %v1933_v56, %v1903_v23 }
 0x73f   :  { %v1745_v15 = vpop.permute.xlu0 %1744  ;;  %v1747_v48 = vpop.permute.xlu1 %1746 }
 0x740   :  { %v1779_v42 = vsel %vm13606_vm11, %v1776_v36, %v1745_v15 }
 0x743   :  { %v1908_v34 = vpop.permute.xlu0 %1907  ;;  %v1753_v20 = vpop.permute.xlu1 %1752 }
 0x744   :  { %v1937_v9 = vsel %vm13606_vm11, %v1935_v26, %v1908_v34 }
 0x747   :  { %v1751_v27 = vpop.permute.xlu0 %1750  ;;  %v1761_v7 = vpop.permute.xlu1 %1760 }
 0x748   :  { %v1782_v25 = vsel %vm1781_vm13, %v1779_v42, %v1751_v27 }
 0x749   :  { %v1785_v6 = vsel %vm13605_vm14, %v1782_v25, %v1759_v14 }
 0x74a   :  { %v1788_v44 = vsel %vm1787_vm2, %v1785_v6, %v1765_v50  ;;  %v1771_v50 = vsel %vm13841_vm4, %v10529_v60, %v10586_v30 }
 0x74b   :  { %v1914_v59 = vpop.permute.xlu0 %1913  ;;  %1790 = vst [vmem:[#allocation2] sm:$0x1] %v1788_v44  ;;  %v1798_v61 = vrot.slane %v1788_v44, %v10595_v62  ;;  %v1810_v22 = vcombine.high %v1788_v44, %v1788_v44  ;;  %v1767_v30 = vpop.permute.xlu1 %1766 }
 0x74c   :  { %v1939_v54 = vsel %vm1781_vm13, %v1937_v9, %v1914_v59  ;;  %v8966_v59 = vld [vmem:[#allocation6 + $0x138] sm:$0xff]   ;;  %v8973_v9 = vld [vmem:[#allocation6 + $0x1f0] sm:$0xff]  }
 0x74d   :  { %v8215_v47 = vrot.slane %v1798_v61, 9  ;;  %v1803_v38 = vcombine.high %v1798_v61, %v1798_v61  ;;  %v1817_v52 = vrot.slane %v1810_v22, %v10595_v62  ;;  %8217 = vst.sshfl [vmem:[#allocation2 + $0x8] sm:$0x1 pattern:$0x76325410] %v1810_v22 }
 0x74f   :  { %v1920_v40 = vpop.permute.xlu0 %1919  ;;  %1802 = vst [vmem:[#allocation2 + $0x2] sm:$0x1] %v8215_v47  ;;  %1805 = vst [vmem:[#allocation2 + $0x4] sm:$0x1] %v1803_v38  ;;  %v8216_v0 = vrot.slane %v1803_v38, 9  ;;  %v8218_v31 = vrot.slane %v1817_v52, 9  ;;  %v1824_v12 = vcombine.high %v1817_v52, %v1817_v52 }
 0x750   :  { %v1941_v33 = vsel %vm13605_vm14, %v1939_v54, %v1920_v40  ;;  %v8969_v40 = vld [vmem:[#allocation6 + $0x1b8] sm:$0xff]  }
 0x751   :  { %1809 = vst [vmem:[#allocation2 + $0x6] sm:$0x1] %v8216_v0  ;;  %1823 = vst [vmem:[#allocation2 + $0xa] sm:$0x1] %v8218_v31  ;;  %v8219_v53 = vrot.slane %v1824_v12, 9  ;;  %v8970_v0 = vld [vmem:[#allocation6 + $0x170] sm:$0xff]  }
 0x752   :  { %1826 = vst [vmem:[#allocation2 + $0xc] sm:$0x1] %v1824_v12 }
 0x753   :  { %1830 = vst [vmem:[#allocation2 + $0xe] sm:$0x1] %v8219_v53  ;;  %v1926_v35 = vpop.permute.xlu0 %1925 }
 0x754   :  { %v1943_v8 = vsel %vm1787_vm2, %v1941_v33, %v1926_v35 }
 0x755   :  { %1945 = vst [vmem:[#allocation2 + $0x1] sm:$0x1] %v1943_v8  ;;  %v1953_v49 = vrot.slane %v1943_v8, %v10595_v62  ;;  %v1965_v5 = vcombine.high %v1943_v8, %v1943_v8  ;;  %v8972_v8 = vld [vmem:[#allocation6 + $0x130] sm:$0xff]  }
 0x757   :  { %v8225_v45 = vrot.slane %v1953_v49, 9  ;;  %v1958_v13 = vcombine.high %v1953_v49, %v1953_v49  ;;  %v1972_v37 = vrot.slane %v1965_v5, %v10595_v62  ;;  %8227 = vst.sshfl [vmem:[#allocation2 + $0x9] sm:$0x1 pattern:$0x76325410] %v1965_v5  ;;  %v1877_v17 = vpop.permute.xlu0 %1876  ;;  %v8975_v5 = vld [vmem:[#allocation6 + $0x168] sm:$0xff]  }
 0x759   :  { %1957 = vst [vmem:[#allocation2 + $0x3] sm:$0x1] %v8225_v45  ;;  %1960 = vst [vmem:[#allocation2 + $0x5] sm:$0x1] %v1958_v13  ;;  %v8226_v55 = vrot.slane %v1958_v13, 9  ;;  %v8228_v28 = vrot.slane %v1972_v37, 9  ;;  %v1979_v29 = vcombine.high %v1972_v37, %v1972_v37 }
 0x75b   :  { %1964 = vst [vmem:[#allocation2 + $0x7] sm:$0x1] %v8226_v55  ;;  %1978 = vst [vmem:[#allocation2 + $0xb] sm:$0x1] %v8228_v28  ;;  %v8229_v63 = vrot.slane %v1979_v29, 9  ;;  %v1735_v58 = vpop.permute.xlu0 %1734  ;;  %v8974_v28 = vld [vmem:[#allocation6 + $0x1b0] sm:$0xff]  }
 0x75c   :  { %1981 = vst [vmem:[#allocation2 + $0xd] sm:$0x1] %v1979_v29  ;;  %v1774_v11 = vsel %vm1772_vm8, %v1771_v50, %v1735_v58  ;;  %v8977_v29 = vld [vmem:[#allocation6 + $0x1e8] sm:$0xff]   ;;  %v8979_v58 = vld [vmem:[#allocation6 + $0x160] sm:$0xff]  }
 0x75d   :  { %1985 = vst [vmem:[#allocation2 + $0xf] sm:$0x1] %v8229_v63 }
 0x75f   :  { %v1899_v14 = vpop.permute.xlu0 %1898 }
 0x760   :  { %v1904_v45 = vsel %vm1902_vm12, %v1899_v14, %v10608_v18 }
 0x762   :  { %v2027_v1 = vld [vmem:[#allocation2] sm:$0xff] }
 0x763   :  { %v1741_v10 = vpop.permute.xlu0 %1740  ;;  %v2042_v57 = vrot.slane %v2027_v1, %v10595_v62  ;;  %v2035_v15 = vcombine.high %v2027_v1, %v2027_v1 }
 0x764   :  { %v1777_v46 = vsel %vm1775_vm10, %v1774_v11, %v1741_v10  ;;  %v2028_v2 = vld [vmem:[#allocation2 + $0x8] sm:$0xff]  ;;  %v8980_v10 = vld [vmem:[#allocation6 + $0x120] sm:$0xff]  }
 0x765   :  { %v1780_v39 = vsel %vm13606_vm11, %v1777_v46, %v1747_v48  ;;  %v2050_v34 = vcombine.high %v2042_v57, %v2042_v57  ;;  %v2049_v36 = vrot.slane %v2035_v15, %v10595_v62  ;;  %v10627_v27 = vrot.slane %v2028_v2, %v10595_v62  ;;  %v8983_v15 = vld [vmem:[#allocation6 + $0x158] sm:$0xff]  }
 0x766   :  { %v1783_v42 = vsel %vm1781_vm13, %v1780_v39, %v1753_v20  ;;  %v2052_v60 = vcombine.high %v2028_v2, %v2028_v2  ;;  %v2119_v23 = vpack.c.bf16 %v2042_v57, %v2042_v57  ;;  %v1932_v48 = vsel %vm13842_vm0, %v1877_v17, %v10591_v4  ;;  %v8976_v20 = vld [vmem:[#allocation6 + $0x128] sm:$0xff]   ;;  %v8982_v39 = vld [vmem:[#allocation6 + $0x1a0] sm:$0xff]  }
 0x767   :  { %v1786_v25 = vsel %vm13605_vm14, %v1783_v42, %v1761_v7  ;;  %v1910_v6 = vpop.permute.xlu0 %1909  ;;  %v2120_v44 = vpack.c.bf16 %v2050_v34, %v2050_v34  ;;  %v2051_v61 = vcombine.high %v2049_v36, %v2049_v36  ;;  %v2067_v47 = vcombine.high %v10627_v27, %v10627_v27  ;;  %v8978_v7 = vld [vmem:[#allocation6 + $0x1a8] sm:$0xff]   ;;  %v8985_v34 = vld [vmem:[#allocation6 + $0x1d8] sm:$0xff]  }
 0x768   :  { %v1789_v22 = vsel %vm1787_vm2, %v1786_v25, %v1767_v30  ;;  %v10634_v38 = vrot.slane %v2052_v60, %v10595_v62  ;;  %v2121_v12 = vpack.c.bf16 %v2049_v36, %v2049_v36  ;;  %v1934_v4 = vsel %vm1772_vm8, %v1932_v48, %v10599_v41  ;;  %v8981_v41 = vld [vmem:[#allocation6 + $0x1e0] sm:$0xff]   ;;  %v8984_v30 = vld [vmem:[#allocation6 + $0x118] sm:$0xff]   ;;  %v8987_v25 = vld [vmem:[#allocation6 + $0x150] sm:$0xff]  }
 0x769   :  { %1831 = vst [vmem:[#allocation2 + $0x10] sm:$0x1] %v1789_v22  ;;  %v1839_v52 = vrot.slane %v1789_v22, %v10595_v62  ;;  %v1851_v24 = vcombine.high %v1789_v22, %v1789_v22  ;;  %3198 = vmatprep.mubr.bf16.mxu0 %v2120_v44  ;;  %v2122_v56 = vpack.c.bf16 %v2051_v61, %v2051_v61  ;;  %v8986_v61 = vld [vmem:[#allocation6 + $0x198] sm:$0xff]   ;;  %v8989_v22 = vld [vmem:[#allocation6 + $0x1d0] sm:$0xff]  }
 0x76a   :  { %3199 = vmatmul.mubr.bf16.vlgmr.msra.gmra.mxu0 %v2119_v23  ;;  %v2124_v31 = vpack.c.bf16 %v2067_v47, %v2067_v47  ;;  %v2068_v26 = vcombine.high %v10634_v38, %v10634_v38  ;;  %v1936_v63 = vsel %vm1775_vm10, %v1934_v4, %v1904_v45  ;;  %v8988_v47 = vld [vmem:[#allocation6 + $0x110] sm:$0xff]   ;;  %v2125_v4 = vpack.c.bf16 %v10634_v38, %v10634_v38  ;;  %v9014_v38 = vld [vmem:[#allocation6 + $0x2e0] sm:$0xff]  }
 0x76b   :  { %v8220_v53 = vrot.slane %v1839_v52, 9  ;;  %v1844_v54 = vcombine.high %v1839_v52, %v1839_v52  ;;  %v1858_v33 = vrot.slane %v1851_v24, %v10595_v62  ;;  %8222 = vst.sshfl [vmem:[#allocation2 + $0x18] sm:$0x1 pattern:$0x76325410] %v1851_v24  ;;  %8558 = vmatpush3.bf16.msra.mxu0 %v8966_v59  ;;  %3238 = vmatprep.mubr.bf16.mxu1 %v2122_v56  ;;  %v1916_v35 = vpop.permute.xlu0 %1915  ;;  %v8991_v52 = vld [vmem:[#allocation6 + $0x148] sm:$0xff]  }
 0x76c   :  { %3278 = vmatprep.mubr.bf16.mxu0 %v2124_v31  ;;  %3239 = vmatmul.mubr.bf16.vlgmr.msra.gmra.mxu1 %v2121_v12  ;;  %v2126_v49 = vpack.c.bf16 %v2068_v26, %v2068_v26  ;;  %v1938_v14 = vsel %vm13606_vm11, %v1936_v63, %v1910_v6  ;;  %v8990_v24 = vld [vmem:[#allocation6 + $0x190] sm:$0xff]   ;;  %v8993_v56 = vld [vmem:[#allocation6 + $0x1c8] sm:$0xff]   ;;  %v8997_v12 = vld [vmem:[#allocation6 + $0x1c0] sm:$0xff]   ;;  %vm13612_vm11 = vcmask 310448  }
 0x76d   :  { %1843 = vst [vmem:[#allocation2 + $0x12] sm:$0x1] %v8220_v53  ;;  %1846 = vst [vmem:[#allocation2 + $0x14] sm:$0x1] %v1844_v54  ;;  %v8221_v13 = vrot.slane %v1844_v54, 9  ;;  %v8223_v37 = vrot.slane %v1858_v33, 9  ;;  %v1865_v55 = vcombine.high %v1858_v33, %v1858_v33  ;;  %8580 = vmatpush3.bf16.msra.mxu1 %v8969_v40  ;;  %8559 = vmatprep.subr.bf16.mxu0 %v8970_v0 }
 0x76e   :  { %3318 = vmatprep.mubr.bf16.mxu1 %v2126_v49  ;;  %8581 = vmatprep.subr.bf16.mxu1 %v8973_v9  ;;  %v1940_v50 = vsel %vm1781_vm13, %v1938_v14, %v1916_v35  ;;  %v8992_v40 = vld [vmem:[#allocation6 + $0x108] sm:$0xff]   ;;  %v8995_v0 = vld [vmem:[#allocation6 + $0x140] sm:$0xff]   ;;  %v8999_v33 = vld [vmem:[#allocation6 + $0x278] sm:$0xff]  }
 0x76f   :  { %1850 = vst [vmem:[#allocation2 + $0x16] sm:$0x1] %v8221_v13  ;;  %1864 = vst [vmem:[#allocation2 + $0x1a] sm:$0x1] %v8223_v37  ;;  %v8224_v17 = vrot.slane %v1865_v55, 9  ;;  %8560 = vmatpush3.bf16.msra.mxu0 %v8972_v8  ;;  %v1922_v18 = vpop.permute.xlu0 %1921  ;;  %v8994_v31 = vld [vmem:[#allocation6 + $0x188] sm:$0xff]   ;;  %v2123_v37 = vpack.c.bf16 %v10627_v27, %v10627_v27 }
 0x770   :  { %1867 = vst [vmem:[#allocation2 + $0x1c] sm:$0x1] %v1865_v55  ;;  %8561 = vmatprep.subr.bf16.mxu0 %v8975_v5  ;;  %v1942_v1 = vsel %vm13605_vm14, %v1940_v50, %v1922_v18  ;;  %v8996_v9 = vld [vmem:[#allocation6 + $0x100] sm:$0xff]   ;;  %v9001_v49 = vld [vmem:[#allocation6 + $0x2f8] sm:$0xff]   ;;  %v9004_v55 = vld [vmem:[#allocation6 + $0x270] sm:$0xff]   ;;  %vm5226_vm14 = vcmask 900848  }
 0x771   :  { %1871 = vst [vmem:[#allocation2 + $0x1e] sm:$0x1] %v8224_v17  ;;  %8582 = vmatpush3.bf16.msra.mxu1 %v8974_v28  ;;  %v8998_v35 = vld [vmem:[#allocation6 + $0x180] sm:$0xff]   ;;  %v9000_v5 = vld [vmem:[#allocation6 + $0x238] sm:$0xff]   ;;  %v9006_v17 = vld [vmem:[#allocation6 + $0x2f0] sm:$0xff]  }
 0x772   :  { %8583 = vmatprep.subr.bf16.mxu1 %v8977_v29  ;;  %v9002_v28 = vld [vmem:[#allocation6 + $0x2b8] sm:$0xff]   ;;  %v9005_v18 = vld [vmem:[#allocation6 + $0x230] sm:$0xff]   ;;  %v9010_v63 = vld [vmem:[#allocation6 + $0x2e8] sm:$0xff]  }
 0x773   :  { %8562 = vmatpush3.bf16.msra.mxu0 %v8976_v20  ;;  %v1928_v11 = vpop.permute.xlu0 %1927  ;;  %v9008_v20 = vld [vmem:[#allocation6 + $0x268] sm:$0xff]   ;;  %v9007_v27 = vld [vmem:[#allocation6 + $0x2b0] sm:$0xff]   ;;  %v9012_v14 = vld [vmem:[#allocation6 + $0x260] sm:$0xff]  }
 0x774   :  { %v1944_v57 = vsel %vm1787_vm2, %v1942_v1, %v1928_v11  ;;  %8563 = vmatprep.subr.bf16.mxu0 %v8979_v58  ;;  %v9009_v58 = vld [vmem:[#allocation6 + $0x228] sm:$0xff]   ;;  %v9013_v50 = vld [vmem:[#allocation6 + $0x220] sm:$0xff]   ;;  %v9018_v11 = vld [vmem:[#allocation6 + $0x2d8] sm:$0xff]  }
 0x775   :  { %1986 = vst [vmem:[#allocation2 + $0x11] sm:$0x1] %v1944_v57  ;;  %v1994_v46 = vrot.slane %v1944_v57, %v10595_v62  ;;  %v2006_v2 = vcombine.high %v1944_v57, %v1944_v57  ;;  %8584 = vmatpush3.bf16.msra.mxu1 %v8978_v7  ;;  %v9011_v7 = vld [vmem:[#allocation6 + $0x2a8] sm:$0xff]   ;;  %v9015_v1 = vld [vmem:[#allocation6 + $0x2a0] sm:$0xff]   ;;  %v9020_v57 = vld [vmem:[#allocation6 + $0x250] sm:$0xff]  }
 0x776   :  { %8585 = vmatprep.subr.bf16.mxu1 %v8981_v41  ;;  %v9016_v41 = vld [vmem:[#allocation6 + $0x258] sm:$0xff]  }
 0x777   :  { %v8230_v36 = vrot.slane %v1994_v46, 9  ;;  %v1999_v42 = vcombine.high %v1994_v46, %v1994_v46  ;;  %v2013_v60 = vrot.slane %v2006_v2, %v10595_v62  ;;  %8232 = vst.sshfl [vmem:[#allocation2 + $0x19] sm:$0x1 pattern:$0x76325410] %v2006_v2  ;;  %8564 = vmatpush3.bf16.msra.mxu0 %v8980_v10  ;;  %v9017_v10 = vld [vmem:[#allocation6 + $0x218] sm:$0xff]  }
 0x778   :  { %8565 = vmatprep.subr.bf16.mxu0 %v8983_v15  ;;  %v9019_v15 = vld [vmem:[#allocation6 + $0x298] sm:$0xff]   ;;  %v9022_v46 = vld [vmem:[#allocation6 + $0x2d0] sm:$0xff]  }
 0x779   :  { %1998 = vst [vmem:[#allocation2 + $0x13] sm:$0x1] %v8230_v36  ;;  %2001 = vst [vmem:[#allocation2 + $0x15] sm:$0x1] %v1999_v42  ;;  %v8231_v6 = vrot.slane %v1999_v42, 9  ;;  %v8233_v44 = vrot.slane %v2013_v60, 9  ;;  %v2020_v59 = vcombine.high %v2013_v60, %v2013_v60  ;;  %8586 = vmatpush3.bf16.msra.mxu1 %v8982_v39 }
 0x77a   :  { %8587 = vmatprep.subr.bf16.mxu1 %v8985_v34  ;;  %v9021_v2 = vld [vmem:[#allocation6 + $0x210] sm:$0xff]   ;;  %v9024_v39 = vld [vmem:[#allocation6 + $0x248] sm:$0xff]  }
 0x77b   :  { %2005 = vst [vmem:[#allocation2 + $0x17] sm:$0x1] %v8231_v6  ;;  %2019 = vst [vmem:[#allocation2 + $0x1b] sm:$0x1] %v8233_v44  ;;  %v8234_v23 = vrot.slane %v2020_v59, 9  ;;  %8566 = vmatpush3.bf16.msra.mxu0 %v8984_v30  ;;  %v9023_v36 = vld [vmem:[#allocation6 + $0x290] sm:$0xff]  }
 0x77c   :  { %2022 = vst [vmem:[#allocation2 + $0x1d] sm:$0x1] %v2020_v59  ;;  %8567 = vmatprep.subr.bf16.mxu0 %v8987_v25  ;;  %v9026_v42 = vld [vmem:[#allocation6 + $0x2c8] sm:$0xff]   ;;  %v9028_v25 = vld [vmem:[#allocation6 + $0x240] sm:$0xff]  }
 0x77d   :  { %2026 = vst [vmem:[#allocation2 + $0x1f] sm:$0x1] %v8234_v23  ;;  %8588 = vmatpush3.bf16.msra.mxu1 %v8986_v61  ;;  %v9025_v60 = vld [vmem:[#allocation6 + $0x208] sm:$0xff]   ;;  %v9030_v59 = vld [vmem:[#allocation6 + $0x2c0] sm:$0xff]   ;;  %v9032_v23 = vld [vmem:[#allocation6 + $0x378] sm:$0xff]  }
 0x77e   :  { %8589 = vmatprep.subr.bf16.mxu1 %v8989_v22  ;;  %v9027_v6 = vld [vmem:[#allocation6 + $0x288] sm:$0xff]   ;;  %v9029_v61 = vld [vmem:[#allocation6 + $0x200] sm:$0xff]  }
 0x77f   :  { %8568 = vmatpush3.bf16.msra.mxu0 %v8988_v47  ;;  %v9031_v47 = vld [vmem:[#allocation6 + $0x280] sm:$0xff]  }
 0x780   :  { %8569 = vmatprep.subr.bf16.mxu0 %v8991_v52 }
 0x781   :  { %8590 = vmatpush3.bf16.msra.mxu1 %v8990_v24  ;;  %v9034_v24 = vld [vmem:[#allocation6 + $0x3f8] sm:$0xff]  }
 0x782   :  { %8591 = vmatprep.subr.bf16.mxu1 %v8993_v56  ;;  %v2029_v26 = vld [vmem:[#allocation2 + $0x10] sm:$0xff] }
 0x783   :  { %8570 = vmatpush3.bf16.msra.mxu0 %v8992_v40  ;;  %v10654_v53 = vrot.slane %v2029_v26, %v10595_v62  ;;  %v2069_v54 = vcombine.high %v2029_v26, %v2029_v26  ;;  %v9033_v56 = vld [vmem:[#allocation6 + $0x338] sm:$0xff]  }
 0x784   :  { %8571 = vmatprep.subr.bf16.mxu0 %v8995_v0  ;;  %v2030_v34 = vld [vmem:[#allocation2 + $0x18] sm:$0xff]  ;;  %v9035_v26 = vld [vmem:[#allocation6 + $0x3b8] sm:$0xff]  }
 0x785   :  { %8592 = vmatpush3.bf16.msra.mxu1 %v8994_v31  ;;  %v2084_v8 = vcombine.high %v10654_v53, %v10654_v53  ;;  %v10659_v48 = vrot.slane %v2069_v54, %v10595_v62  ;;  %v2086_v30 = vcombine.high %v2030_v34, %v2030_v34  ;;  %v10668_v44 = vrot.slane %v2030_v34, %v10595_v62  ;;  %v9037_v31 = vld [vmem:[#allocation6 + $0x370] sm:$0xff]  }
 0x786   :  { %8593 = vmatprep.subr.bf16.mxu1 %v8997_v12  ;;  %v2127_v0 = vpack.c.bf16 %v10654_v53, %v10654_v53  ;;  %v9039_v54 = vld [vmem:[#allocation6 + $0x3f0] sm:$0xff]  }
 0x787   :  { %8572 = vmatpush3.bf16.msra.mxu0 %v8996_v9  ;;  %v2128_v45 = vpack.c.bf16 %v2084_v8, %v2084_v8  ;;  %v2085_v13 = vcombine.high %v10659_v48, %v10659_v48  ;;  %v10671_v22 = vrot.slane %v2086_v30, %v10595_v62  ;;  %v2101_v52 = vcombine.high %v10668_v44, %v10668_v44  ;;  %v9041_v8 = vld [vmem:[#allocation6 + $0x368] sm:$0xff]   ;;  %v9040_v53 = vld [vmem:[#allocation6 + $0x3b0] sm:$0xff]  }
 0x788   :  { %8601 = vmatprep.subr.bf16.mxu0 %v8999_v33  ;;  %v2129_v9 = vpack.c.bf16 %v10659_v48, %v10659_v48  ;;  %v9044_v48 = vld [vmem:[#allocation6 + $0x3a8] sm:$0xff]  }
 0x789   :  { %8594 = vmatpush3.bf16.msra.mxu1 %v8998_v35  ;;  %v2130_v29 = vpack.c.bf16 %v2085_v13, %v2085_v13  ;;  %v2102_v40 = vcombine.high %v10671_v22, %v10671_v22  ;;  %v2132_v12 = vpack.c.bf16 %v2101_v52, %v2101_v52  ;;  %v9038_v35 = vld [vmem:[#allocation6 + $0x330] sm:$0xff]   ;;  %v9047_v13 = vld [vmem:[#allocation6 + $0x3e0] sm:$0xff]  }
 0x78a   :  { %3279 = vmatmul.mubr.bf16.vlgmr.msra.gmra.mxu0 %v2123_v37  ;;  %8623 = vmatprep.subr.bf16.mxu1 %v9001_v49  ;;  %v9043_v49 = vld [vmem:[#allocation6 + $0x3e8] sm:$0xff]   ;;  %v9046_v37 = vld [vmem:[#allocation6 + $0x320] sm:$0xff]  }
 0x78b   :  { %8602 = vmatpush3.bf16.msra.mxu0 %v9000_v5  ;;  %3358 = vmatprep.mubr.bf16.mxu0 %v2128_v45  ;;  %v2134_v33 = vpack.c.bf16 %v2102_v40, %v2102_v40  ;;  %v9042_v5 = vld [vmem:[#allocation6 + $0x328] sm:$0xff]   ;;  %v9045_v45 = vld [vmem:[#allocation6 + $0x360] sm:$0xff]  }
 0x78c   :  { %3319 = vmatmul.mubr.bf16.vlgmr.msra.gmra.mxu1 %v2125_v4  ;;  %8603 = vmatprep.subr.bf16.mxu0 %v9004_v55  ;;  %v9049_v55 = vld [vmem:[#allocation6 + $0x358] sm:$0xff]   ;;  %v3503_v34 = vld [vmem:[%s9338_s12 + $0x60] sm:$0xff] }
 0x78d   :  { %8624 = vmatpush3.bf16.msra.mxu1 %v9002_v28  ;;  %3398 = vmatprep.mubr.bf16.mxu1 %v2130_v29  ;;  %v9048_v28 = vld [vmem:[#allocation6 + $0x3a0] sm:$0xff]   ;;  %v9051_v29 = vld [vmem:[#allocation6 + $0x3d8] sm:$0xff]   ;;  %v3499_v30 = vld [vmem:[%s9338_s12 + $0x40] sm:$0xff] }
 0x78e   :  { %8625 = vmatprep.subr.bf16.mxu1 %v9006_v17  ;;  %v9050_v4 = vld [vmem:[#allocation6 + $0x318] sm:$0xff]   ;;  %v9053_v17 = vld [vmem:[#allocation6 + $0x350] sm:$0xff]  }
 0x78f   :  { %8604 = vmatpush3.bf16.msra.mxu0 %v9005_v18  ;;  %v9052_v18 = vld [vmem:[#allocation6 + $0x398] sm:$0xff]   ;;  %v3593_v52 = vld [vmem:[%s13843_s2] sm:$0x3]  ;;  %s13865_s2 = sld [smem:[#allocation19_spill]] }
 0x790   :  { %8605 = vmatprep.subr.bf16.mxu0 %v9008_v20  ;;  %v9055_v20 = vld [vmem:[#allocation6 + $0x3d0] sm:$0xff]   ;;  %3595 = vrot.lane.b32.xlu1 %v3593_v52, %s9240_s15  ;;  %v3614_v52 = vld [vmem:[%s13846_s18 + $0x18] sm:$0xff]  ;;  %s9252_s15 = smov 94  }
 0x791   :  { %8626 = vmatpush3.bf16.msra.mxu1 %v9007_v27  ;;  %v9054_v27 = vld [vmem:[#allocation6 + $0x310] sm:$0xff]  }
 0x792   :  { %8627 = vmatprep.subr.bf16.mxu1 %v9010_v63  ;;  %v9057_v63 = vld [vmem:[#allocation6 + $0x348] sm:$0xff]  }
 0x793   :  { %8606 = vmatpush3.bf16.msra.mxu0 %v9009_v58  ;;  %v9056_v58 = vld [vmem:[#allocation6 + $0x390] sm:$0xff]  }
 0x794   :  { %8607 = vmatprep.subr.bf16.mxu0 %v9012_v14  ;;  %v9059_v14 = vld [vmem:[#allocation6 + $0x3c8] sm:$0xff]  }
 0x795   :  { %8628 = vmatpush3.bf16.msra.mxu1 %v9011_v7  ;;  %v9058_v7 = vld [vmem:[#allocation6 + $0x308] sm:$0xff]  }
 0x796   :  { %8629 = vmatprep.subr.bf16.mxu1 %v9014_v38  ;;  %v9061_v38 = vld [vmem:[#allocation6 + $0x340] sm:$0xff]  }
 0x797   :  { %8608 = vmatpush3.bf16.msra.mxu0 %v9013_v50  ;;  %v9060_v50 = vld [vmem:[#allocation6 + $0x388] sm:$0xff]  }
 0x798   :  { %8609 = vmatprep.subr.bf16.mxu0 %v9016_v41  ;;  %v9063_v41 = vld [vmem:[#allocation6 + $0x3c0] sm:$0xff]  }
 0x799   :  { %8630 = vmatpush3.bf16.msra.mxu1 %v9015_v1  ;;  %v9062_v1 = vld [vmem:[#allocation6 + $0x300] sm:$0xff]  }
 0x79a   :  { %8631 = vmatprep.subr.bf16.mxu1 %v9018_v11  ;;  %v9064_v11 = vld [vmem:[#allocation6 + $0x380] sm:$0xff]  }
 0x79b   :  { %8610 = vmatpush3.bf16.msra.mxu0 %v9017_v10  ;;  %v2131_v10 = vpack.c.bf16 %v10668_v44, %v10668_v44  ;;  %v3496_v44 = vld [vmem:[%s9338_s12 + $0x28] sm:$0xff] }
 0x79c   :  { %8611 = vmatprep.subr.bf16.mxu0 %v9020_v57  ;;  %v10683_v57 = vld [vmem:[#allocation4] sm:$0xff] }
 0x79d   :  { %8632 = vmatpush3.bf16.msra.mxu1 %v9019_v15  ;;  %v2133_v15 = vpack.c.bf16 %v10671_v22, %v10671_v22  ;;  %v3493_v22 = vld [vmem:[%s9338_s12 + $0x10] sm:$0xff]  ;;  %5828 = vrot.lane.b32.xlu1 %v10683_v57, %s9242_s30 }
 0x79e   :  { %8633 = vmatprep.subr.bf16.mxu1 %v9022_v46  ;;  %v3506_v46 = vld [vmem:[%s9338_s12 + $0x78] sm:$0xff] }
 0x79f   :  { %8612 = vmatpush3.bf16.msra.mxu0 %v9021_v2  ;;  %v3505_v2 = vld [vmem:[%s9338_s12 + $0x70] sm:$0xff] }
 0x7a0   :  { %8613 = vmatprep.subr.bf16.mxu0 %v9024_v39  ;;  %v3504_v39 = vld [vmem:[%s9338_s12 + $0x68] sm:$0xff] }
 0x7a1   :  { %8634 = vmatpush3.bf16.msra.mxu1 %v9023_v36  ;;  %v3502_v36 = vld [vmem:[%s9338_s12 + $0x58] sm:$0xff]  ;;  %5749 = vrot.lane.b32.xlu1 %v10683_v57, %s9234_s19 }
 0x7a2   :  { %8635 = vmatprep.subr.bf16.mxu1 %v9026_v42  ;;  %v3501_v42 = vld [vmem:[%s9338_s12 + $0x50] sm:$0xff] }
 0x7a3   :  { %8614 = vmatpush3.bf16.msra.mxu0 %v9025_v60  ;;  %v3500_v60 = vld [vmem:[%s9338_s12 + $0x48] sm:$0xff] }
 0x7a4   :  { %8615 = vmatprep.subr.bf16.mxu0 %v9028_v25  ;;  %v3498_v25 = vld [vmem:[%s9338_s12 + $0x38] sm:$0xff] }
 0x7a5   :  { %8636 = vmatpush3.bf16.msra.mxu1 %v9027_v6  ;;  %v3497_v6 = vld [vmem:[%s9338_s12 + $0x30] sm:$0xff]  ;;  %5670 = vrot.lane.b32.xlu1 %v10683_v57, %s9243_s26 }
 0x7a6   :  { %8637 = vmatprep.subr.bf16.mxu1 %v9030_v59  ;;  %v3495_v59 = vld [vmem:[%s9338_s12 + $0x20] sm:$0xff] }
 0x7a7   :  { %8616 = vmatpush3.bf16.msra.mxu0 %v9029_v61  ;;  %v3494_v61 = vld [vmem:[%s9338_s12 + $0x18] sm:$0xff] }
 0x7a8   :  { %8645 = vmatprep.subr.bf16.mxu0 %v9032_v23  ;;  %v3492_v23 = vld [vmem:[%s9338_s12 + $0x8] sm:$0xff] }
 0x7a9   :  { %8638 = vmatpush3.bf16.msra.mxu1 %v9031_v47  ;;  %v3491_v47 = vld [vmem:[%s9338_s12] sm:$0xff]  ;;  %s13845_s12 = sld [smem:[#allocation13_spill]]  ;;  %5591 = vrot.lane.b32.xlu1 %v10683_v57, %s9244_s9 }
 0x7aa   :  { %3359 = vmatmul.mubr.bf16.vlgmr.msra.gmra.mxu0 %v2127_v0  ;;  %8667 = vmatprep.subr.bf16.mxu1 %v9034_v24 }
 0x7ab   :  { %8646 = vmatpush3.bf16.msra.mxu0 %v9033_v56  ;;  %3438 = vmatprep.mubr.bf16.mxu0 %v2132_v12  ;;  %v8235_v56 = vld [vmem:[%s13844_s7] ss:$0 sm:$0xff]  ;;  %s13867_s7 = sld [smem:[#allocation18_spill]] }
 0x7ac   :  { %3399 = vmatmul.mubr.bf16.vlgmr.msra.gmra.mxu1 %v2129_v9  ;;  %8647 = vmatprep.subr.bf16.mxu0 %v9037_v31 }
 0x7ad   :  { %8668 = vmatpush3.bf16.msra.mxu1 %v9035_v26  ;;  %3478 = vmatprep.mubr.bf16.mxu1 %v2134_v33 }
 0x7ae   :  { %8669 = vmatprep.subr.bf16.mxu1 %v9039_v54  ;;  %5513 = vrot.lane.b32.xlu1 %v10683_v57, %s9215_s11 }
 0x7af   :  { %8648 = vmatpush3.bf16.msra.mxu0 %v9038_v35 }
 0x7b0   :  { %8649 = vmatprep.subr.bf16.mxu0 %v9041_v8 }
 0x7b1   :  { %8670 = vmatpush3.bf16.msra.mxu1 %v9040_v53 }
 0x7b2   :  { %8671 = vmatprep.subr.bf16.mxu1 %v9043_v49  ;;  %5435 = vrot.lane.b32.xlu1 %v10683_v57, %s9213_s10 }
 0x7b3   :  { %8650 = vmatpush3.bf16.msra.mxu0 %v9042_v5 }
 0x7b4   :  { %8651 = vmatprep.subr.bf16.mxu0 %v9045_v45 }
 0x7b5   :  { %8672 = vmatpush3.bf16.msra.mxu1 %v9044_v48 }
 0x7b6   :  { %8673 = vmatprep.subr.bf16.mxu1 %v9047_v13  ;;  %5357 = vrot.lane.b32.xlu1 %v10683_v57, %s9211_s28 }
 0x7b7   :  { %8652 = vmatpush3.bf16.msra.mxu0 %v9046_v37 }
 0x7b8   :  { %8653 = vmatprep.subr.bf16.mxu0 %v9049_v55 }
 0x7b9   :  { %8674 = vmatpush3.bf16.msra.mxu1 %v9048_v28 }
 0x7ba   :  { %8675 = vmatprep.subr.bf16.mxu1 %v9051_v29  ;;  %6482 = vrot.lane.b32.xlu1 %v10683_v57, %s9245_s13 }
 0x7bb   :  { %8654 = vmatpush3.bf16.msra.mxu0 %v9050_v4 }
 0x7bc   :  { %8655 = vmatprep.subr.bf16.mxu0 %v9053_v17 }
 0x7bd   :  { %8676 = vmatpush3.bf16.msra.mxu1 %v9052_v18 }
 0x7be   :  { %8677 = vmatprep.subr.bf16.mxu1 %v9055_v20  ;;  %6397 = vrot.lane.b32.xlu1 %v10683_v57, %s9246_s17 }
 0x7bf   :  { %8656 = vmatpush3.bf16.msra.mxu0 %v9054_v27 }
 0x7c0   :  { %8657 = vmatprep.subr.bf16.mxu0 %v9057_v63 }
 0x7c1   :  { %8678 = vmatpush3.bf16.msra.mxu1 %v9056_v58 }
 0x7c2   :  { %8679 = vmatprep.subr.bf16.mxu1 %v9059_v14  ;;  %6312 = vrot.lane.b32.xlu1 %v10683_v57, %s9247_s21 }
 0x7c3   :  { %8658 = vmatpush3.bf16.msra.mxu0 %v9058_v7 }
 0x7c4   :  { %8659 = vmatprep.subr.bf16.mxu0 %v9061_v38 }
 0x7c5   :  { %8680 = vmatpush3.bf16.msra.mxu1 %v9060_v50 }
 0x7c6   :  { %8681 = vmatprep.subr.bf16.mxu1 %v9063_v41  ;;  %6227 = vrot.lane.b32.xlu1 %v10683_v57, %s9248_s25 }
 0x7c7   :  { %8660 = vmatpush3.bf16.msra.mxu0 %v9062_v1 }
 0x7c8   :  { %8763 = vmatprep.subr.mxu0 %v10683_v57 }
 0x7c9   :  { %8682 = vmatpush3.bf16.msra.mxu1 %v9064_v11 }
 0x7ca   :  { %3439 = vmatmul.mubr.bf16.vlgmr.msra.gmra.mxu0 %v2131_v10  ;;  %8798 = vmatprep.subr.mxu1 %v10683_v57 }
 0x7cb   :  { %8764 = vmatpush3.msra.mxu0 %v3506_v46  ;;  %8795 = vmatprep.mubr.msk.f32.mxu0 %vm13607_vm6, %v10683_v57 }
 0x7cc   :  { %3479 = vmatmul.mubr.bf16.vlgmr.msra.gmra.mxu1 %v2133_v15  ;;  %8765 = vmatprep.subr.mxu0 %v10683_v57 }
 0x7cd   :  { %8766 = vmatpush3.msra.mxu0 %v3505_v2  ;;  %8806 = vmatprep.mubr.msk.f32.mxu1 %vm13607_vm6, %v10683_v57  ;;  %vm5235_vm6 = vcmask 1048528  }
 0x7ce   :  { %8767 = vmatprep.subr.mxu0 %v10683_v57  ;;  %8799 = vmatpush3.msra.mxu1 %v3614_v52 }
 0x7cf   :  { %8768 = vmatpush3.msra.mxu0 %v3504_v39  ;;  %8800 = vmatprep.subr.mxu1 %v10683_v57 }
 0x7d0   :  { %8769 = vmatprep.subr.mxu0 %v10683_v57  ;;  %6144 = vrot.lane.b32.xlu1 %v10683_v57, %s9249_s3 }
 0x7d1   :  { %8770 = vmatpush3.msra.mxu0 %v3503_v34 }
 0x7d2   :  { %8771 = vmatprep.subr.mxu0 %v10683_v57 }
 0x7d3   :  { %8772 = vmatpush3.msra.mxu0 %v3502_v36 }
 0x7d4   :  { %8773 = vmatprep.subr.mxu0 %v10683_v57  ;;  %6065 = vrot.lane.b32.xlu1 %v10683_v57, %s9230_s29 }
 0x7d5   :  { %8774 = vmatpush3.msra.mxu0 %v3501_v42 }
 0x7d6   :  { %8775 = vmatprep.subr.mxu0 %v10683_v57 }
 0x7d7   :  { %8776 = vmatpush3.msra.mxu0 %v3500_v60 }
 0x7d8   :  { %8777 = vmatprep.subr.mxu0 %v10683_v57  ;;  %5986 = vrot.lane.b32.xlu1 %v10683_v57, %s9250_s14 }
 0x7d9   :  { %8778 = vmatpush3.msra.mxu0 %v3499_v30  ;;  %v3486_v30 = vld [vmem:[%s13845_s12] sm:$0x3]  ;;  %s9253_s12 = smov 118  }
 0x7da   :  { %8779 = vmatprep.subr.mxu0 %v10683_v57 }
 0x7db   :  { %8780 = vmatpush3.msra.mxu0 %v3498_v25 }
 0x7dc   :  { %8781 = vmatprep.subr.mxu0 %v10683_v57  ;;  %5907 = vrot.lane.b32.xlu1 %v10683_v57, %s9251_s24 }
 0x7dd   :  { %8782 = vmatpush3.msra.mxu0 %v3497_v6 }
 0x7de   :  { %8783 = vmatprep.subr.mxu0 %v10683_v57 }
 0x7df   :  { %8784 = vmatpush3.msra.mxu0 %v3496_v44 }
 0x7e0   :  { %8785 = vmatprep.subr.mxu0 %v10683_v57  ;;  %5816 = vrot.lane.b32.xlu1 %v10683_v57, %s9242_s30 }
 0x7e1   :  { %8786 = vmatpush3.msra.mxu0 %v3495_v59 }
 0x7e2   :  { %8787 = vmatprep.subr.mxu0 %v10683_v57 }
 0x7e3   :  { %8788 = vmatpush3.msra.mxu0 %v3494_v61 }
 0x7e4   :  { %8789 = vmatprep.subr.mxu0 %v10683_v57  ;;  %5846 = vrot.lane.b32.xlu1 %v10683_v57, %s9242_s30 }
 0x7e5   :  { %8790 = vmatpush3.msra.mxu0 %v3493_v22 }
 0x7e6   :  { %8791 = vmatprep.subr.mxu0 %v10683_v57 }
 0x7e7   :  { %8792 = vmatpush3.msra.mxu0 %v3492_v23 }
 0x7e8   :  { %8793 = vmatprep.subr.mxu0 %v10683_v57  ;;  %5745 = vrot.lane.b32.xlu1 %v10683_v57, %s9234_s19 }
 0x7e9   :  { %8794 = vmatpush3.msra.mxu0 %v3491_v47  ;;  %v13848_v47 = vmov 0  }
 0x7ec   :  { %5767 = vrot.lane.b32.xlu1 %v10683_v57, %s9234_s19 }
 0x7f0   :  { %5666 = vrot.lane.b32.xlu1 %v10683_v57, %s9243_s26 }
 0x7f4   :  { %5688 = vrot.lane.b32.xlu1 %v10683_v57, %s9243_s26 }
 0x7f8   :  { %5587 = vrot.lane.b32.xlu1 %v10683_v57, %s9244_s9 }
 0x7fc   :  { %5609 = vrot.lane.b32.xlu1 %v10683_v57, %s9244_s9 }
 0x800   :  { %5509 = vrot.lane.b32.xlu1 %v10683_v57, %s9215_s11 }
 0x804   :  { %5531 = vrot.lane.b32.xlu1 %v10683_v57, %s9215_s11 }
 0x82a   :  { %v8529_v24 = vpop.f32.mrf.mxu0 }
 0x82c   :  { %v8530_v40 = vpop.f32.mrf.mxu0  ;;  %v8551_v0 = vpop.f32.mrf.mxu1 }
 0x82d   :  { %v8531_v31 = vadd.f32 %v8530_v40, %v8529_v24  ;;  %v3613_v24 = vld [vmem:[%s13846_s18 + $0x10] sm:$0xff]  ;;  %v8364_v40 = vld [vmem:[%s13847_s23] ss:$0 sm:$0xff]  ;;  %s9255_s23 = smov 14  }
 0x82e   :  { %v8532_v12 = vpop.f32.mrf.mxu0  ;;  %v8552_v26 = vpop.f32.mrf.mxu1  ;;  %8801 = vmatpush3.msra.mxu1 %v3613_v24 }
 0x82f   :  { %v3201_v9 = vadd.f32 %v8531_v31, %v8235_v56  ;;  %v8553_v54 = vadd.f32 %v8552_v26, %v8551_v0  ;;  %v3612_v56 = vld [vmem:[%s13846_s18 + $0x8] sm:$0xff]  ;;  %8802 = vmatprep.subr.mxu1 %v10683_v57 }
 0x830   :  { %v8533_v33 = vpop.f32.mrf.mxu0  ;;  %v8554_v35 = vpop.f32.mrf.mxu1  ;;  %8803 = vmatpush3.msra.mxu1 %v3612_v56  ;;  %v3779_v56 = vld [vmem:[#allocation8 + $0x288] sm:$0xff] }
 0x831   :  { %v3241_v8 = vadd.f32 %v8553_v54, %v3201_v9  ;;  %8804 = vmatprep.subr.mxu1 %v10683_v57 }
 0x832   :  { %v8555_v53 = vpop.f32.mrf.mxu1 }
 0x833   :  { %v3810_v53 = vld [vmem:[#allocation8 + $0x380] sm:$0xff] }
 0x84a   :  { %v8573_v49 = vpop.f32.mrf.mxu0 }
 0x84c   :  { %v8574_v5 = vpop.f32.mrf.mxu0  ;;  %v8595_v45 = vpop.f32.mrf.mxu1 }
 0x84d   :  { %v8575_v14 = vadd.f32 %v8574_v5, %v8573_v49  ;;  %v3818_v49 = vld [vmem:[#allocation8 + $0x3c0] sm:$0xff]  ;;  %v3811_v5 = vld [vmem:[#allocation8 + $0x388] sm:$0xff] }
 0x84e   :  { %v8576_v48 = vpop.f32.mrf.mxu0  ;;  %v8596_v13 = vpop.f32.mrf.mxu1 }
 0x84f   :  { %v3281_v7 = vadd.f32 %v8575_v14, %v3241_v8  ;;  %v8597_v38 = vadd.f32 %v8596_v13, %v8595_v45  ;;  %v3611_v8 = vld [vmem:[%s13846_s18] sm:$0xff]  ;;  %v8479_v45 = vcombine.low %v3810_v53, %v3818_v49  ;;  %v8480_v48 = vcombine.high %v3810_v53, %v3818_v49  ;;  %v3596_v14 = vpop.permute.xlu1 %3595  ;;  %s9254_s18 = smov 2  }
 0x850   :  { %v8577_v37 = vpop.f32.mrf.mxu0  ;;  %v8598_v55 = vpop.f32.mrf.mxu1  ;;  %8805 = vmatpush3.msra.mxu1 %v3611_v8  ;;  %v3819_v13 = vld [vmem:[#allocation8 + $0x3c8] sm:$0xff] }
 0x851   :  { %v3321_v41 = vadd.f32 %v8597_v38, %v3281_v7  ;;  %v3794_v37 = vld [vmem:[#allocation8 + $0x300] sm:$0xff]  ;;  %4550 = vmatprep.subr.bf16.mxu0 %v8480_v48  ;;  %v3755_v8 = vld [vmem:[#allocation8 + $0x1c8] sm:$0xff] }
 0x852   :  { %v8599_v28 = vpop.f32.mrf.mxu1  ;;  %v3802_v55 = vld [vmem:[#allocation8 + $0x340] sm:$0xff] }
 0x853   :  { %v8481_v28 = vcombine.low %v3811_v5, %v3819_v13 }
 0x86a   :  { %v8617_v29 = vpop.f32.mrf.mxu0 }
 0x86c   :  { %v8618_v4 = vpop.f32.mrf.mxu0  ;;  %v8639_v17 = vpop.f32.mrf.mxu1 }
 0x86d   :  { %v8619_v50 = vadd.f32 %v8618_v4, %v8617_v29  ;;  %v8482_v29 = vcombine.high %v3811_v5, %v3819_v13  ;;  %v8464_v4 = vcombine.high %v3794_v37, %v3802_v55  ;;  %v3731_v5 = vld [vmem:[#allocation8 + $0x108] sm:$0xff] }
 0x86e   :  { %v8620_v18 = vpop.f32.mrf.mxu0  ;;  %v8640_v20 = vpop.f32.mrf.mxu1 }
 0x86f   :  { %v3361_v1 = vadd.f32 %v8619_v50, %v3321_v41  ;;  %v8641_v11 = vadd.f32 %v8640_v20, %v8639_v17  ;;  %4591 = vmatprep.subr.bf16.mxu1 %v8482_v29  ;;  %v8463_v18 = vcombine.low %v3794_v37, %v3802_v55  ;;  %v3715_v37 = vld [vmem:[#allocation8 + $0x88] sm:$0xff] }
 0x870   :  { %v8621_v27 = vpop.f32.mrf.mxu0  ;;  %v8642_v63 = vpop.f32.mrf.mxu1  ;;  %v3723_v55 = vld [vmem:[#allocation8 + $0xc8] sm:$0xff] }
 0x871   :  { %v3401_v2 = vadd.f32 %v8641_v11, %v3361_v1  ;;  %v3778_v63 = vld [vmem:[#allocation8 + $0x280] sm:$0xff]  ;;  %v8386_v29 = vcombine.high %v3715_v37, %v3723_v55 }
 0x872   :  { %v8643_v58 = vpop.f32.mrf.mxu1  ;;  %v3762_v1 = vld [vmem:[#allocation8 + $0x200] sm:$0xff] }
 0x873   :  { %v3786_v58 = vld [vmem:[#allocation8 + $0x2c0] sm:$0xff] }
 0x874   :  { %v8448_v7 = vcombine.high %v3778_v63, %v3786_v58  ;;  %v8447_v50 = vcombine.low %v3778_v63, %v3786_v58  ;;  %v3770_v11 = vld [vmem:[#allocation8 + $0x240] sm:$0xff]  ;;  %v3707_v63 = vld [vmem:[#allocation8 + $0x48] sm:$0xff] }
 0x88a   :  { %v8661_v10 = vpop.f32.mrf.mxu0 }
 0x88c   :  { %v8662_v15 = vpop.f32.mrf.mxu0  ;;  %v8683_v46 = vpop.f32.mrf.mxu1 }
 0x88d   :  { %v8663_v39 = vadd.f32 %v8662_v15, %v8661_v10  ;;  %v8432_v10 = vcombine.high %v3762_v1, %v3770_v11  ;;  %v8431_v15 = vcombine.low %v3762_v1, %v3770_v11 }
 0x88e   :  { %v8664_v34 = vpop.f32.mrf.mxu0  ;;  %v8684_v36 = vpop.f32.mrf.mxu1 }
 0x88f   :  { %v3441_v42 = vadd.f32 %v8663_v39, %v3401_v2  ;;  %v8685_v60 = vadd.f32 %v8684_v36, %v8683_v46  ;;  %v3746_v46 = vld [vmem:[#allocation8 + $0x180] sm:$0xff] }
 0x890   :  { %v8665_v25 = vpop.f32.mrf.mxu0  ;;  %v8686_v6 = vpop.f32.mrf.mxu1  ;;  %v3754_v2 = vld [vmem:[#allocation8 + $0x1c0] sm:$0xff] }
 0x891   :  { %v3481_v44 = vadd.f32 %v8685_v60, %v3441_v42  ;;  %v8416_v39 = vcombine.high %v3746_v46, %v3754_v2  ;;  %v8415_v34 = vcombine.low %v3746_v46, %v3754_v2  ;;  %v3730_v36 = vld [vmem:[#allocation8 + $0x100] sm:$0xff]  ;;  %v8365_v2 = vld [vmem:[%s13851_s20] ss:$0 sm:$0xff]  ;;  %s9257_s20 = smov 38  }
 0x892   :  { %v8687_v59 = vpop.f32.mrf.mxu1  ;;  %v3738_v42 = vld [vmem:[#allocation8 + $0x140] sm:$0xff] }
 0x893   :  { %v3487_v61 = vmul.f32 %v3486_v30, %v3481_v44  ;;  %v8400_v60 = vcombine.high %v3730_v36, %v3738_v42  ;;  %v8399_v30 = vcombine.low %v3730_v36, %v3738_v42  ;;  %v3714_v25 = vld [vmem:[#allocation8 + $0x80] sm:$0xff]  ;;  %v3796_v42 = vld [vmem:[#allocation8 + $0x310] sm:$0xff] }
 0x894   :  { %v3722_v6 = vld [vmem:[#allocation8 + $0xc0] sm:$0xff] }
 0x895   :  { %vm3488_vm5 = vcmp.ge.f32.partialorder %v3487_v61, 0.0  ;;  %v3489_v22 = vmul.f32 0.01, %v3487_v61  ;;  %v8384_v44 = vcombine.high %v3714_v25, %v3722_v6  ;;  %v8383_v59 = vcombine.low %v3714_v25, %v3722_v6  ;;  %v3797_v25 = vld [vmem:[#allocation8 + $0x318] sm:$0xff] }
 0x896   :  { %v3805_v6 = vld [vmem:[#allocation8 + $0x358] sm:$0xff] }
 0x897   :  { %v3490_v23 = vsel %vm3488_vm5, %v3487_v61, %v3489_v22  ;;  %v3795_v61 = vld [vmem:[#allocation8 + $0x308] sm:$0xff] }
 0x898   :  { %8796 = vmatmul.mubr.f32.vlgmr.msra.gmra.mxu0 %v3490_v23  ;;  %v3803_v22 = vld [vmem:[#allocation8 + $0x348] sm:$0xff] }
 0x899   :  { %4582 = vmatprep.mubr.bf16.mxu0 %v13848_v47  ;;  %4551 = vmatpush1.bf16.msra.mxu0 %v8479_v45  ;;  %v8466_v24 = vcombine.high %v3795_v61, %v3803_v22  ;;  %v3739_v45 = vld [vmem:[#allocation8 + $0x148] sm:$0xff] }
 0x89a   :  { %4552 = vmatprep.subr.bf16.mxu0 %v8464_v4  ;;  %v8402_v13 = vcombine.high %v3731_v5, %v3739_v45  ;;  %v8385_v4 = vcombine.low %v3715_v37, %v3723_v55  ;;  %v3749_v37 = vld [vmem:[#allocation8 + $0x198] sm:$0xff] }
 0x89b   :  { %v3757_v55 = vld [vmem:[#allocation8 + $0x1d8] sm:$0xff] }
 0x89d   :  { %4553 = vmatpush1.bf16.msra.mxu0 %v8463_v18  ;;  %v3706_v18 = vld [vmem:[#allocation8 + $0x40] sm:$0xff] }
 0x89e   :  { %4554 = vmatprep.subr.bf16.mxu0 %v8448_v7 }
 0x8a1   :  { %4555 = vmatpush1.bf16.msra.mxu0 %v8447_v50  ;;  %v10748_v50 = vld [vmem:[#allocation8 + $0x3d0] sm:$0xff] }
 0x8a2   :  { %4556 = vmatprep.subr.bf16.mxu0 %v8432_v10  ;;  %v10756_v10 = vld [vmem:[#allocation8 + $0x3d8] sm:$0xff] }
 0x8a5   :  { %4557 = vmatpush1.bf16.msra.mxu0 %v8431_v15 }
 0x8a6   :  { %4558 = vmatprep.subr.bf16.mxu0 %v8416_v39 }
 0x8a9   :  { %4559 = vmatpush1.bf16.msra.mxu0 %v8415_v34 }
 0x8aa   :  { %4560 = vmatprep.subr.bf16.mxu0 %v8400_v60 }
 0x8ad   :  { %4561 = vmatpush1.bf16.msra.mxu0 %v8399_v30  ;;  %v3804_v30 = vld [vmem:[#allocation8 + $0x350] sm:$0xff] }
 0x8ae   :  { %4562 = vmatprep.subr.bf16.mxu0 %v8384_v44 }
 0x8b1   :  { %4563 = vmatpush1.bf16.msra.mxu0 %v8383_v59 }
 0x958   :  { %v3580_v0 = vpop.f32.mrf.mxu0 }
 0x959   :  { %v10735_v31 = vadd.f32 %v8364_v40, %v3580_v0  ;;  %v3787_v40 = vld [vmem:[#allocation8 + $0x2c8] sm:$0xff]  ;;  %v8465_v0 = vcombine.low %v3795_v61, %v3803_v22  ;;  %v8468_v61 = vcombine.high %v3796_v42, %v3804_v30  ;;  %v8470_v22 = vcombine.high %v3797_v25, %v3805_v6 }
 0x95a   :  { %v8797_v12 = vpop.f32.mrf.mxu0 }
 0x95b   :  { %13849 = vst [vmem:[#allocation33_spill] sm:$0xff] %v10735_v31  ;;  %v3585_v26 = vand.u32 2147483647, %v10735_v31  ;;  %v3584_v20 = vmax.f32 %v10735_v31, 0.0  ;;  %v8450_v12 = vcombine.high %v3779_v56, %v3787_v40 }
 0x95d   :  { %v3586_v9 = vsub.f32 0.0, %v3585_v26  ;;  %v3763_v26 = vld [vmem:[#allocation8 + $0x208] sm:$0xff] }
 0x95f   :  { %v3587_v54 = vmul.f32 1.442695, %v3586_v9  ;;  %v3771_v9 = vld [vmem:[#allocation8 + $0x248] sm:$0xff] }
 0x960   :  { %v8433_v53 = vcombine.low %v3763_v26, %v3771_v9 }
 0x961   :  { %9075 = vpow2.f32 %v3587_v54  ;;  %v8449_v54 = vcombine.low %v3779_v56, %v3787_v40  ;;  %v3781_v56 = vld [vmem:[#allocation8 + $0x298] sm:$0xff] }
 0x962   :  { %v3789_v40 = vld [vmem:[#allocation8 + $0x2d8] sm:$0xff] }
 0x96e   :  { %v9076_v33 = vpop.eup %9075 }
 0x96f   :  { %v3589_v35 = vadd.f32 1.0, %v9076_v33  ;;  %v8434_v33 = vcombine.high %v3763_v26, %v3771_v9  ;;  %v8454_v9 = vcombine.high %v3781_v56, %v3789_v40 }
 0x971   :  { %9077 = vlog2.f32 %v3589_v35  ;;  %v3747_v35 = vld [vmem:[#allocation8 + $0x188] sm:$0xff] }
 0x972   :  { %v8418_v49 = vcombine.high %v3747_v35, %v3755_v8  ;;  %v8417_v48 = vcombine.low %v3747_v35, %v3755_v8  ;;  %v3765_v35 = vld [vmem:[#allocation8 + $0x218] sm:$0xff] }
 0x973   :  { %v3773_v8 = vld [vmem:[#allocation8 + $0x258] sm:$0xff] }
 0x97e   :  { %v9078_v17 = vpop.eup %9077 }
 0x97f   :  { %v3591_v27 = vmul.f32 0.6931472, %v9078_v17  ;;  %v3698_v17 = vld [vmem:[#allocation8] sm:$0xff] }
 0x980   :  { %v8367_v58 = vcombine.low %v3698_v17, %v3706_v18 }
 0x981   :  { %v3592_v38 = vadd.f32 %v3591_v27, %v3584_v20  ;;  %v3699_v20 = vld [vmem:[#allocation8 + $0x8] sm:$0xff]  ;;  %v8368_v27 = vcombine.high %v3698_v17, %v3706_v18  ;;  %v8422_v17 = vcombine.high %v3749_v37, %v3757_v55  ;;  %v3732_v18 = vld [vmem:[#allocation8 + $0x110] sm:$0xff] }
 0x982   :  { %v8370_v7 = vcombine.high %v3699_v20, %v3707_v63 }
 0x983   :  { %v3598_v41 = vmul.f32 %v3596_v14, %v3592_v38  ;;  %v8369_v14 = vcombine.low %v3699_v20, %v3707_v63  ;;  %4564 = vmatprep.subr.bf16.mxu0 %v8368_v27  ;;  %v10746_v38 = vld [vmem:[#allocation8 + $0x390] sm:$0xff]  ;;  %v3733_v27 = vld [vmem:[#allocation8 + $0x118] sm:$0xff] }
 0x984   :  { %4565 = vmatpush1.bf16.msra.mxu0 %v8367_v58  ;;  %v8483_v1 = vcombine.low %v10746_v38, %v10748_v50  ;;  %v8484_v11 = vcombine.high %v10746_v38, %v10748_v50  ;;  %v3740_v20 = vld [vmem:[#allocation8 + $0x150] sm:$0xff]  ;;  %v3741_v63 = vld [vmem:[#allocation8 + $0x158] sm:$0xff] }
 0x985   :  { %3600 = vrot.lane.b32.xlu0 %v3598_v41, %s9241_s0  ;;  %v10750_v41 = vld [vmem:[#allocation8 + $0x398] sm:$0xff]  ;;  %v8406_v38 = vcombine.high %v3733_v27, %v3741_v63  ;;  %v3716_v50 = vld [vmem:[#allocation8 + $0x90] sm:$0xff]  ;;  %s9256_s0 = smov 26  }
 0x986   :  { %v8485_v15 = vcombine.low %v10750_v41, %v10756_v10  ;;  %v8486_v46 = vcombine.high %v10750_v41, %v10756_v10  ;;  %4632 = vmatprep.subr.bf16.mxu0 %v8484_v11  ;;  %v3724_v41 = vld [vmem:[#allocation8 + $0xd0] sm:$0xff]  ;;  %v3725_v11 = vld [vmem:[#allocation8 + $0xd8] sm:$0xff]  ;;  %v8403_v10 = vcombine.low %v3732_v18, %v3740_v20 }
 0x989   :  { %5808 = vrot.lane.b32.xlu0 %v10683_v57, %s9242_s30 }
 0x98d   :  { %5729 = vrot.lane.b32.xlu0 %v10683_v57, %s9234_s19 }
 0x991   :  { %5650 = vrot.lane.b32.xlu0 %v10683_v57, %s9243_s26 }
 0x995   :  { %5571 = vrot.lane.b32.xlu0 %v10683_v57, %s9244_s9 }
 0x999   :  { %5493 = vrot.lane.b32.xlu0 %v10683_v57, %s9215_s11 }
 0x99d   :  { %5415 = vrot.lane.b32.xlu0 %v10683_v57, %s9213_s10 }
 0x9a1   :  { %5337 = vrot.lane.b32.xlu0 %v10683_v57, %s9211_s28 }
 0x9a5   :  { %6460 = vrot.lane.b32.xlu0 %v10683_v57, %s9245_s13 }
 0x9a9   :  { %6375 = vrot.lane.b32.xlu0 %v10683_v57, %s9246_s17 }
 0x9ad   :  { %6290 = vrot.lane.b32.xlu0 %v10683_v57, %s9247_s21 }
 0x9b1   :  { %6205 = vrot.lane.b32.xlu0 %v10683_v57, %s9248_s25 }
 0x9b5   :  { %6124 = vrot.lane.b32.xlu0 %v10683_v57, %s9249_s3 }
 0x9b9   :  { %6045 = vrot.lane.b32.xlu0 %v10683_v57, %s9230_s29 }
 0x9bd   :  { %5966 = vrot.lane.b32.xlu0 %v10683_v57, %s9250_s14 }
 0x9c1   :  { %5836 = vrot.lane.b32.xlu0 %v10683_v57, %s9242_s30 }
 0x9c5   :  { %5887 = vrot.lane.b32.xlu0 %v10683_v57, %s9251_s24 }
 0x9c9   :  { %5757 = vrot.lane.b32.xlu0 %v10683_v57, %s9234_s19 }
 0x9cd   :  { %5737 = vrot.lane.b32.xlu0 %v10683_v57, %s9234_s19 }
 0x9d1   :  { %5678 = vrot.lane.b32.xlu0 %v10683_v57, %s9243_s26 }
 0x9d5   :  { %5658 = vrot.lane.b32.xlu0 %v10683_v57, %s9243_s26 }
 0x9d9   :  { %5599 = vrot.lane.b32.xlu0 %v10683_v57, %s9244_s9 }
 0x9dd   :  { %5579 = vrot.lane.b32.xlu0 %v10683_v57, %s9244_s9 }
 0x9e1   :  { %5521 = vrot.lane.b32.xlu0 %v10683_v57, %s9215_s11 }
 0x9e5   :  { %5501 = vrot.lane.b32.xlu0 %v10683_v57, %s9215_s11 }
 0x9e9   :  { %5443 = vrot.lane.b32.xlu0 %v10683_v57, %s9213_s10 }
 0x9ed   :  { %5423 = vrot.lane.b32.xlu0 %v10683_v57, %s9213_s10 }
 0x9f1   :  { %5365 = vrot.lane.b32.xlu0 %v10683_v57, %s9211_s28 }
 0x9f5   :  { %5345 = vrot.lane.b32.xlu0 %v10683_v57, %s9211_s28 }
 0x9f7   :  { %v3601_v23 = vpop.permute.xlu0 %3600 }
 0x9f8   :  { %v10741_v52 = vadd.f32 %v3601_v23, %v10735_v31  ;;  %v3780_v23 = vld [vmem:[#allocation8 + $0x290] sm:$0xff] }
 0x9f9   :  { %6490 = vrot.lane.b32.xlu0 %v10683_v57, %s9245_s13 }
 0x9fa   :  { %13850 = vst [vmem:[#allocation31_spill] sm:$0xff] %v10741_v52  ;;  %8807 = vmatmul.mubr.msk.f32.vlgmr.msra.gmra.mxu1 %vm1772_vm8, %v10741_v52 }
 0x9fb   :  { %4592 = vmatpush1.bf16.msra.mxu1 %v8481_v28  ;;  %4623 = vmatprep.mubr.bf16.mxu1 %v13848_v47  ;;  %v8401_v28 = vcombine.low %v3731_v5, %v3739_v45  ;;  %v8438_v45 = vcombine.high %v3765_v35, %v3773_v8 }
 0x9fc   :  { %4593 = vmatprep.subr.bf16.mxu1 %v8466_v24  ;;  %v3788_v24 = vld [vmem:[#allocation8 + $0x2d0] sm:$0xff] }
 0x9fd   :  { %v8452_v26 = vcombine.high %v3780_v23, %v3788_v24  ;;  %6468 = vrot.lane.b32.xlu0 %v10683_v57, %s9245_s13 }
 0x9ff   :  { %4594 = vmatpush1.bf16.msra.mxu1 %v8465_v0  ;;  %v8467_v0 = vcombine.low %v3796_v42, %v3804_v30  ;;  %v3709_v42 = vld [vmem:[#allocation8 + $0x58] sm:$0xff] }
 0xa00   :  { %4595 = vmatprep.subr.bf16.mxu1 %v8450_v12  ;;  %v8469_v12 = vcombine.low %v3797_v25, %v3805_v6 }
 0xa01   :  { %6405 = vrot.lane.b32.xlu0 %v10683_v57, %s9246_s17 }
 0xa03   :  { %4596 = vmatpush1.bf16.msra.mxu1 %v8449_v54  ;;  %v3764_v54 = vld [vmem:[#allocation8 + $0x210] sm:$0xff] }
 0xa04   :  { %4597 = vmatprep.subr.bf16.mxu1 %v8434_v33  ;;  %v3772_v33 = vld [vmem:[#allocation8 + $0x250] sm:$0xff] }
 0xa05   :  { %v8436_v5 = vcombine.high %v3764_v54, %v3772_v33  ;;  %6383 = vrot.lane.b32.xlu0 %v10683_v57, %s9246_s17 }
 0xa07   :  { %4598 = vmatpush1.bf16.msra.mxu1 %v8433_v53  ;;  %v8451_v53 = vcombine.low %v3780_v23, %v3788_v24  ;;  %v3823_v23 = vld [vmem:[#allocation8 + $0x3e8] sm:$0xff] }
 0xa08   :  { %4599 = vmatprep.subr.bf16.mxu1 %v8418_v49  ;;  %v8453_v49 = vcombine.low %v3781_v56, %v3789_v40 }
 0xa09   :  { %6320 = vrot.lane.b32.xlu0 %v10683_v57, %s9247_s21 }
 0xa0b   :  { %4600 = vmatpush1.bf16.msra.mxu1 %v8417_v48  ;;  %v3748_v48 = vld [vmem:[#allocation8 + $0x190] sm:$0xff] }
 0xa0c   :  { %4601 = vmatprep.subr.bf16.mxu1 %v8402_v13  ;;  %v3756_v13 = vld [vmem:[#allocation8 + $0x1d0] sm:$0xff] }
 0xa0d   :  { %v8419_v58 = vcombine.low %v3748_v48, %v3756_v13  ;;  %6298 = vrot.lane.b32.xlu0 %v10683_v57, %s9247_s21 }
 0xa0f   :  { %4602 = vmatpush1.bf16.msra.mxu1 %v8401_v28  ;;  %v8435_v28 = vcombine.low %v3764_v54, %v3772_v33  ;;  %v3807_v54 = vld [vmem:[#allocation8 + $0x368] sm:$0xff] }
 0xa10   :  { %4603 = vmatprep.subr.bf16.mxu1 %v8386_v29  ;;  %v8437_v29 = vcombine.low %v3765_v35, %v3773_v8  ;;  %v10897_v8 = vpop.permute.xlu0 %5808 }
 0xa11   :  { %6235 = vrot.lane.b32.xlu0 %v10683_v57, %s9248_s25  ;;  %13852 = vst [vmem:[#allocation34_spill] sm:$0xff] %v10897_v8 }
 0xa13   :  { %4604 = vmatpush1.bf16.msra.mxu1 %v8385_v4  ;;  %v8420_v4 = vcombine.high %v3748_v48, %v3756_v13  ;;  %v3783_v48 = vld [vmem:[#allocation8 + $0x2a8] sm:$0xff] }
 0xa14   :  { %4605 = vmatprep.subr.bf16.mxu1 %v8370_v7  ;;  %v8404_v7 = vcombine.high %v3732_v18, %v3740_v20  ;;  %v3791_v13 = vld [vmem:[#allocation8 + $0x2e8] sm:$0xff] }
 0xa15   :  { %6213 = vrot.lane.b32.xlu0 %v10683_v57, %s9248_s25  ;;  %v3767_v18 = vld [vmem:[#allocation8 + $0x228] sm:$0xff] }
 0xa16   :  { %v3775_v20 = vld [vmem:[#allocation8 + $0x268] sm:$0xff] }
 0xa17   :  { %4606 = vmatpush1.bf16.msra.mxu1 %v8369_v14  ;;  %v8421_v14 = vcombine.low %v3749_v37, %v3757_v55 }
 0xa18   :  { %4673 = vmatprep.subr.bf16.mxu1 %v8486_v46  ;;  %v8388_v46 = vcombine.high %v3716_v50, %v3724_v41 }
 0xa19   :  { %6152 = vrot.lane.b32.xlu0 %v10683_v57, %s9249_s3 }
 0xa1d   :  { %6132 = vrot.lane.b32.xlu0 %v10683_v57, %s9249_s3 }
 0xa21   :  { %6073 = vrot.lane.b32.xlu0 %v10683_v57, %s9230_s29 }
 0xa25   :  { %6053 = vrot.lane.b32.xlu0 %v10683_v57, %s9230_s29 }
 0xaba   :  { %v3690_v39 = vpop.f32.mrf.mxu1 }
 0xabb   :  { %v3691_v34 = vadd.f32 %v8365_v2, %v3690_v39  ;;  %v3700_v39 = vld [vmem:[#allocation8 + $0x10] sm:$0xff] }
 0xabc   :  { %v8808_v36 = vpop.f32.mrf.mxu1 }
 0xabd   :  { %vm3694_vm8 = vcmp.ge.f32.partialorder %v3691_v34, 0.0  ;;  %v3695_v60 = vmul.f32 0.01, %v3691_v34  ;;  %v3701_v36 = vld [vmem:[#allocation8 + $0x18] sm:$0xff] }
 0xabe   :  { %v8374_v6 = vcombine.high %v3701_v36, %v3709_v42  ;;  %v8373_v56 = vcombine.low %v3701_v36, %v3709_v42  ;;  %v3735_v36 = vld [vmem:[#allocation8 + $0x128] sm:$0xff] }
 0xabf   :  { %v3696_v44 = vsel %vm3694_vm8, %v3691_v34, %v3695_v60  ;;  %v3708_v34 = vld [vmem:[#allocation8 + $0x50] sm:$0xff]  ;;  %v8387_v60 = vcombine.low %v3716_v50, %v3724_v41  ;;  %v3758_v50 = vld [vmem:[#allocation8 + $0x1e0] sm:$0xff]  ;;  %v3751_v41 = vld [vmem:[#allocation8 + $0x1a8] sm:$0xff] }
 0xac0   :  { %v10869_v59 = vpack.c.bf16 %v3696_v44, %v3696_v44  ;;  %v8372_v25 = vcombine.high %v3700_v39, %v3708_v34  ;;  %v3814_v44 = vld [vmem:[#allocation8 + $0x3a0] sm:$0xff]  ;;  %v8371_v24 = vcombine.low %v3700_v39, %v3708_v34  ;;  %v3743_v42 = vld [vmem:[#allocation8 + $0x168] sm:$0xff] }
 0xac1   :  { %v3734_v39 = vld [vmem:[#allocation8 + $0x120] sm:$0xff] }
 0xac2   :  { %4583 = vmatmul.mubr.bf16.vlgmr.msra.gmra.mxu0 %v10869_v59  ;;  %4624 = vmatmul.mubr.bf16.vlgmr.msra.gmra.mxu1 %v10869_v59  ;;  %v3742_v34 = vld [vmem:[#allocation8 + $0x160] sm:$0xff] }
 0xac3   :  { %4633 = vmatpush1.bf16.msra.mxu0 %v8483_v1  ;;  %4674 = vmatpush1.bf16.msra.mxu1 %v8485_v15  ;;  %v3717_v1 = vld [vmem:[#allocation8 + $0x98] sm:$0xff]  ;;  %v8405_v15 = vcombine.low %v3733_v27, %v3741_v63  ;;  %v10903_v27 = vpop.permute.xlu0 %5729 }
 0xac4   :  { %4634 = vmatprep.subr.bf16.mxu0 %v8468_v61  ;;  %4675 = vmatprep.subr.bf16.mxu1 %v8470_v22  ;;  %v8390_v2 = vcombine.high %v3717_v1, %v3725_v11  ;;  %v8389_v30 = vcombine.low %v3717_v1, %v3725_v11  ;;  %v3822_v61 = vld [vmem:[#allocation8 + $0x3e0] sm:$0xff]  ;;  %v3815_v22 = vld [vmem:[#allocation8 + $0x3a8] sm:$0xff]  ;;  %13853 = vst [vmem:[#allocation35_spill] sm:$0xff] %v10903_v27 }
 0xac5   :  { %4664 = vmatprep.mubr.bf16.mxu0 %v13848_v47  ;;  %4705 = vmatprep.mubr.bf16.mxu1 %v13848_v47  ;;  %v8488_v40 = vcombine.high %v3814_v44, %v3822_v61  ;;  %v8487_v33 = vcombine.low %v3814_v44, %v3822_v61  ;;  %v8489_v35 = vcombine.low %v3815_v22, %v3823_v23  ;;  %v3759_v1 = vld [vmem:[#allocation8 + $0x1e8] sm:$0xff]  ;;  %v3718_v44 = vld [vmem:[#allocation8 + $0xa0] sm:$0xff] }
 0xac6   :  { %v3726_v61 = vld [vmem:[#allocation8 + $0xe0] sm:$0xff] }
 0xac7   :  { %4635 = vmatpush1.bf16.msra.mxu0 %v8467_v0  ;;  %4676 = vmatpush1.bf16.msra.mxu1 %v8469_v12  ;;  %v8490_v0 = vcombine.high %v3815_v22, %v3823_v23  ;;  %v3798_v12 = vld [vmem:[#allocation8 + $0x320] sm:$0xff]  ;;  %v3719_v22 = vld [vmem:[#allocation8 + $0xa8] sm:$0xff]  ;;  %v8391_v57 = vcombine.low %v3718_v44, %v3726_v61 }
 0xac8   :  { %4636 = vmatprep.subr.bf16.mxu0 %v8452_v26  ;;  %4677 = vmatprep.subr.bf16.mxu1 %v8454_v9  ;;  %v3806_v26 = vld [vmem:[#allocation8 + $0x360] sm:$0xff]  ;;  %v3799_v9 = vld [vmem:[#allocation8 + $0x328] sm:$0xff] }
 0xac9   :  { %v8471_v37 = vcombine.low %v3798_v12, %v3806_v26  ;;  %v8473_v55 = vcombine.low %v3799_v9, %v3807_v54  ;;  %v3727_v23 = vld [vmem:[#allocation8 + $0xe8] sm:$0xff] }
 0xacb   :  { %4637 = vmatpush1.bf16.msra.mxu0 %v8451_v53  ;;  %4678 = vmatpush1.bf16.msra.mxu1 %v8453_v49  ;;  %v8472_v53 = vcombine.high %v3798_v12, %v3806_v26  ;;  %v8474_v49 = vcombine.high %v3799_v9, %v3807_v54  ;;  %v8394_v12 = vcombine.high %v3719_v22, %v3727_v23  ;;  %v3702_v26 = vld [vmem:[#allocation8 + $0x20] sm:$0xff]  ;;  %v3703_v54 = vld [vmem:[#allocation8 + $0x28] sm:$0xff] }
 0xacc   :  { %4638 = vmatprep.subr.bf16.mxu0 %v8436_v5  ;;  %4679 = vmatprep.subr.bf16.mxu1 %v8438_v45  ;;  %v3782_v5 = vld [vmem:[#allocation8 + $0x2a0] sm:$0xff] }
 0xacd   :  { %v3790_v45 = vld [vmem:[#allocation8 + $0x2e0] sm:$0xff] }
 0xace   :  { %v8455_v63 = vcombine.low %v3782_v5, %v3790_v45  ;;  %v3710_v9 = vld [vmem:[#allocation8 + $0x60] sm:$0xff] }
 0xacf   :  { %4639 = vmatpush1.bf16.msra.mxu0 %v8435_v28  ;;  %4680 = vmatpush1.bf16.msra.mxu1 %v8437_v29  ;;  %v8456_v28 = vcombine.high %v3782_v5, %v3790_v45  ;;  %v8458_v29 = vcombine.high %v3783_v48, %v3791_v13  ;;  %v8376_v5 = vcombine.high %v3702_v26, %v3710_v9 }
 0xad0   :  { %4640 = vmatprep.subr.bf16.mxu0 %v8420_v4  ;;  %4681 = vmatprep.subr.bf16.mxu1 %v8422_v17  ;;  %v3766_v4 = vld [vmem:[#allocation8 + $0x220] sm:$0xff] }
 0xad1   :  { %v3774_v17 = vld [vmem:[#allocation8 + $0x260] sm:$0xff] }
 0xad2   :  { %v8439_v11 = vcombine.low %v3766_v4, %v3774_v17 }
 0xad3   :  { %4641 = vmatpush1.bf16.msra.mxu0 %v8419_v58  ;;  %4682 = vmatpush1.bf16.msra.mxu1 %v8421_v14  ;;  %v8457_v58 = vcombine.low %v3783_v48, %v3791_v13  ;;  %v8440_v14 = vcombine.high %v3766_v4, %v3774_v17  ;;  %v3816_v48 = vld [vmem:[#allocation8 + $0x3b0] sm:$0xff] }
 0xad4   :  { %4642 = vmatprep.subr.bf16.mxu0 %v8404_v7  ;;  %4683 = vmatprep.subr.bf16.mxu1 %v8406_v38  ;;  %v8442_v7 = vcombine.high %v3767_v18, %v3775_v20  ;;  %v3750_v38 = vld [vmem:[#allocation8 + $0x1a0] sm:$0xff]  ;;  %v3824_v13 = vld [vmem:[#allocation8 + $0x3f0] sm:$0xff] }
 0xad5   :  { %v8492_v4 = vcombine.high %v3816_v48, %v3824_v13 }
 0xad7   :  { %4643 = vmatpush1.bf16.msra.mxu0 %v8403_v10  ;;  %4684 = vmatpush1.bf16.msra.mxu1 %v8405_v15  ;;  %v8441_v10 = vcombine.low %v3767_v18, %v3775_v20  ;;  %v10909_v15 = vpop.permute.xlu0 %5650  ;;  %v3800_v18 = vld [vmem:[#allocation8 + $0x330] sm:$0xff] }
 0xad8   :  { %4644 = vmatprep.subr.bf16.mxu0 %v8388_v46  ;;  %4685 = vmatprep.subr.bf16.mxu1 %v8390_v2  ;;  %13854 = vst [vmem:[#allocation36_spill] sm:$0xff] %v10909_v15  ;;  %v8424_v46 = vcombine.high %v3750_v38, %v3758_v50  ;;  %v8426_v2 = vcombine.high %v3751_v41, %v3759_v1  ;;  %v3808_v20 = vld [vmem:[#allocation8 + $0x370] sm:$0xff] }
 0xadb   :  { %4645 = vmatpush1.bf16.msra.mxu0 %v8387_v60  ;;  %4686 = vmatpush1.bf16.msra.mxu1 %v8389_v30  ;;  %v8423_v60 = vcombine.low %v3750_v38, %v3758_v50  ;;  %v8425_v30 = vcombine.low %v3751_v41, %v3759_v1  ;;  %v8476_v50 = vcombine.high %v3800_v18, %v3808_v20  ;;  %v3784_v1 = vld [vmem:[#allocation8 + $0x2b0] sm:$0xff] }
 0xadc   :  { %4646 = vmatprep.subr.bf16.mxu0 %v8372_v25  ;;  %4687 = vmatprep.subr.bf16.mxu1 %v8374_v6  ;;  %v8408_v25 = vcombine.high %v3734_v39, %v3742_v34  ;;  %v8410_v6 = vcombine.high %v3735_v36, %v3743_v42 }
 0xadf   :  { %4647 = vmatpush1.bf16.msra.mxu0 %v8371_v24  ;;  %4688 = vmatpush1.bf16.msra.mxu1 %v8373_v56  ;;  %v10913_v24 = vpop.permute.xlu0 %5571  ;;  %v8407_v56 = vcombine.low %v3734_v39, %v3742_v34 }
 0xae0   :  { %4714 = vmatprep.subr.bf16.mxu0 %v8488_v40  ;;  %4755 = vmatprep.subr.bf16.mxu1 %v8490_v0  ;;  %13855 = vst [vmem:[#allocation37_spill] sm:$0xff] %v10913_v24  ;;  %v8409_v40 = vcombine.low %v3735_v36, %v3743_v42  ;;  %v8392_v0 = vcombine.high %v3718_v44, %v3726_v61 }
 0xae2   :  { %4665 = vmatmul.mubr.bf16.vlgmr.msra.gmra.mxu0 %v10869_v59  ;;  %4706 = vmatmul.mubr.bf16.vlgmr.msra.gmra.mxu1 %v10869_v59 }
 0xae3   :  { %4715 = vmatpush1.bf16.msra.mxu0 %v8487_v33  ;;  %4756 = vmatpush1.bf16.msra.mxu1 %v8489_v35  ;;  %v3711_v33 = vld [vmem:[#allocation8 + $0x68] sm:$0xff] }
 0xae4   :  { %4716 = vmatprep.subr.bf16.mxu0 %v8472_v53  ;;  %4757 = vmatprep.subr.bf16.mxu1 %v8474_v49  ;;  %v10917_v35 = vld [vmem:[#allocation4] sm:$0xff]  ;;  %v8393_v53 = vcombine.low %v3719_v22, %v3727_v23  ;;  %v10921_v49 = vpop.permute.xlu0 %5493  ;;  %v8378_v45 = vcombine.high %v3703_v54, %v3711_v33 }
 0xae5   :  { %4746 = vmatprep.mubr.bf16.mxu0 %v13848_v47  ;;  %4787 = vmatprep.mubr.bf16.mxu1 %v13848_v47  ;;  %13856 = vst [vmem:[#allocation38_spill] sm:$0xff] %v10921_v49 }
 0xae6   :  { %5994 = vrot.lane.b32.xlu0 %v10917_v35, %s9250_s14 }
 0xae7   :  { %4717 = vmatpush1.bf16.msra.mxu0 %v8471_v37  ;;  %4758 = vmatpush1.bf16.msra.mxu1 %v8473_v55  ;;  %v3817_v37 = vld [vmem:[#allocation8 + $0x3b8] sm:$0xff] }
 0xae8   :  { %4718 = vmatprep.subr.bf16.mxu0 %v8456_v28  ;;  %4759 = vmatprep.subr.bf16.mxu1 %v8458_v29  ;;  %v3825_v55 = vld [vmem:[#allocation8 + $0x3f8] sm:$0xff]  ;;  %v8375_v28 = vcombine.low %v3702_v26, %v3710_v9  ;;  %v8377_v29 = vcombine.low %v3703_v54, %v3711_v33 }
 0xae9   :  { %v8494_v17 = vcombine.high %v3817_v37, %v3825_v55  ;;  %v8493_v38 = vcombine.low %v3817_v37, %v3825_v55 }
 0xaea   :  { %5974 = vrot.lane.b32.xlu0 %v10917_v35, %s9250_s14 }
 0xaeb   :  { %4719 = vmatpush1.bf16.msra.mxu0 %v8455_v63  ;;  %4760 = vmatpush1.bf16.msra.mxu1 %v8457_v58  ;;  %v3801_v63 = vld [vmem:[#allocation8 + $0x338] sm:$0xff] }
 0xaec   :  { %4720 = vmatprep.subr.bf16.mxu0 %v8440_v14  ;;  %4761 = vmatprep.subr.bf16.mxu1 %v8442_v7  ;;  %v3809_v58 = vld [vmem:[#allocation8 + $0x378] sm:$0xff]  ;;  %v10925_v14 = vpop.permute.xlu0 %5415  ;;  %v8491_v7 = vcombine.low %v3816_v48, %v3824_v13 }
 0xaed   :  { %13857 = vst [vmem:[#allocation39_spill] sm:$0xff] %v10925_v14  ;;  %v8478_v41 = vcombine.high %v3801_v63, %v3809_v58  ;;  %v8477_v39 = vcombine.low %v3801_v63, %v3809_v58 }
 0xaee   :  { %5915 = vrot.lane.b32.xlu0 %v10917_v35, %s9251_s24 }
 0xaef   :  { %4721 = vmatpush1.bf16.msra.mxu0 %v8439_v11  ;;  %4762 = vmatpush1.bf16.msra.mxu1 %v8441_v10  ;;  %v3792_v11 = vld [vmem:[#allocation8 + $0x2f0] sm:$0xff]  ;;  %v3785_v10 = vld [vmem:[#allocation8 + $0x2b8] sm:$0xff] }
 0xaf0   :  { %4722 = vmatprep.subr.bf16.mxu0 %v8424_v46  ;;  %4763 = vmatprep.subr.bf16.mxu1 %v8426_v2  ;;  %v3793_v46 = vld [vmem:[#allocation8 + $0x2f8] sm:$0xff]  ;;  %v8475_v2 = vcombine.low %v3800_v18, %v3808_v20  ;;  %v10931_v34 = vpop.permute.xlu0 %5337  ;;  %v8460_v36 = vcombine.high %v3784_v1, %v3792_v11  ;;  %v8459_v44 = vcombine.low %v3784_v1, %v3792_v11 }
 0xaf1   :  { %13858 = vst [vmem:[#allocation40_spill] sm:$0xff] %v10931_v34  ;;  %v8462_v42 = vcombine.high %v3785_v10, %v3793_v46  ;;  %v8461_v61 = vcombine.low %v3785_v10, %v3793_v46  ;;  %v3729_v18 = vld [vmem:[#allocation8 + $0xf8] sm:$0xff] }
 0xaf2   :  { %5895 = vrot.lane.b32.xlu0 %v10917_v35, %s9251_s24  ;;  %v3713_v1 = vld [vmem:[#allocation8 + $0x78] sm:$0xff] }
 0xaf3   :  { %4723 = vmatpush1.bf16.msra.mxu0 %v8423_v60  ;;  %4764 = vmatpush1.bf16.msra.mxu1 %v8425_v30  ;;  %v3768_v60 = vld [vmem:[#allocation8 + $0x230] sm:$0xff] }
 0xaf4   :  { %4724 = vmatprep.subr.bf16.mxu0 %v8408_v25  ;;  %4765 = vmatprep.subr.bf16.mxu1 %v8410_v6  ;;  %v3776_v30 = vld [vmem:[#allocation8 + $0x270] sm:$0xff]  ;;  %v3769_v25 = vld [vmem:[#allocation8 + $0x238] sm:$0xff]  ;;  %v10937_v26 = vpop.permute.xlu0 %6460 }
 0xaf5   :  { %v3777_v6 = vld [vmem:[#allocation8 + $0x278] sm:$0xff]  ;;  %v8444_v22 = vcombine.high %v3768_v60, %v3776_v30  ;;  %13859 = vst [vmem:[#allocation41_spill] sm:$0xff] %v10937_v26 }
 0xaf6   :  { %v8446_v23 = vcombine.high %v3769_v25, %v3777_v6  ;;  %5844 = vrot.lane.b32.xlu0 %v10917_v35, %s9242_s30  ;;  %v8445_v9 = vcombine.low %v3769_v25, %v3777_v6 }
 0xaf7   :  { %4725 = vmatpush1.bf16.msra.mxu0 %v8407_v56  ;;  %4766 = vmatpush1.bf16.msra.mxu1 %v8409_v40  ;;  %v3752_v56 = vld [vmem:[#allocation8 + $0x1b0] sm:$0xff] }
 0xaf8   :  { %4726 = vmatprep.subr.bf16.mxu0 %v8392_v0  ;;  %4767 = vmatprep.subr.bf16.mxu1 %v8394_v12  ;;  %v3760_v40 = vld [vmem:[#allocation8 + $0x1f0] sm:$0xff]  ;;  %v3753_v0 = vld [vmem:[#allocation8 + $0x1b8] sm:$0xff]  ;;  %v10943_v37 = vpop.permute.xlu0 %6375 }
 0xaf9   :  { %v3761_v12 = vld [vmem:[#allocation8 + $0x1f8] sm:$0xff]  ;;  %v8428_v54 = vcombine.high %v3752_v56, %v3760_v40  ;;  %v8427_v48 = vcombine.low %v3752_v56, %v3760_v40  ;;  %13860 = vst [vmem:[#allocation42_spill] sm:$0xff] %v10943_v37 }
 0xafa   :  { %v8430_v33 = vcombine.high %v3753_v0, %v3761_v12  ;;  %5824 = vrot.lane.b32.xlu0 %v10917_v35, %s9242_s30  ;;  %v8429_v13 = vcombine.low %v3753_v0, %v3761_v12 }
 0xafb   :  { %4727 = vmatpush1.bf16.msra.mxu0 %v8391_v57  ;;  %4768 = vmatpush1.bf16.msra.mxu1 %v8393_v53  ;;  %v3736_v57 = vld [vmem:[#allocation8 + $0x130] sm:$0xff] }
 0xafc   :  { %4728 = vmatprep.subr.bf16.mxu0 %v8376_v5  ;;  %4769 = vmatprep.subr.bf16.mxu1 %v8378_v45  ;;  %v3744_v53 = vld [vmem:[#allocation8 + $0x170] sm:$0xff]  ;;  %v3737_v5 = vld [vmem:[#allocation8 + $0x138] sm:$0xff]  ;;  %v10947_v11 = vpop.permute.xlu0 %6290 }
 0xafd   :  { %v3745_v45 = vld [vmem:[#allocation8 + $0x178] sm:$0xff]  ;;  %v8412_v55 = vcombine.high %v3736_v57, %v3744_v53  ;;  %v8411_v20 = vcombine.low %v3736_v57, %v3744_v53  ;;  %13861 = vst [vmem:[#allocation43_spill] sm:$0xff] %v10947_v11  ;;  %v11003_v57 = vld [vmem:[%s13867_s7] sm:$0xff] }
 0xafe   :  { %5765 = vrot.lane.b32.xlu0 %v10917_v35, %s9234_s19  ;;  %v8413_v63 = vcombine.low %v3737_v5, %v3745_v45 }
 0xaff   :  { %4729 = vmatpush1.bf16.msra.mxu0 %v8375_v28  ;;  %4770 = vmatpush1.bf16.msra.mxu1 %v8377_v29  ;;  %v8414_v28 = vcombine.high %v3737_v5, %v3745_v45  ;;  %v3720_v29 = vld [vmem:[#allocation8 + $0xb0] sm:$0xff]  ;;  %v3841_v5 = vrot.slane %v11003_v57, %v13778_v43  ;;  %v3833_v45 = vrot.slane %v11003_v57, %v13776_v32 }
 0xb00   :  { %4796 = vmatprep.subr.bf16.mxu0 %v8492_v4  ;;  %4837 = vmatprep.subr.bf16.mxu1 %v8494_v17  ;;  %v3728_v4 = vld [vmem:[#allocation8 + $0xf0] sm:$0xff]  ;;  %v3721_v17 = vld [vmem:[#allocation8 + $0xb8] sm:$0xff] }
 0xb01   :  { %v8396_v58 = vcombine.high %v3720_v29, %v3728_v4  ;;  %v8395_v10 = vcombine.low %v3720_v29, %v3728_v4  ;;  %v8397_v46 = vcombine.low %v3721_v17, %v3729_v18 }
 0xb02   :  { %4747 = vmatmul.mubr.bf16.vlgmr.msra.gmra.mxu0 %v10869_v59  ;;  %4788 = vmatmul.mubr.bf16.vlgmr.msra.gmra.mxu1 %v10869_v59 }
 0xb03   :  { %4797 = vmatpush1.bf16.msra.mxu0 %v8491_v7  ;;  %4838 = vmatpush1.bf16.msra.mxu1 %v8493_v38  ;;  %v8398_v7 = vcombine.high %v3721_v17, %v3729_v18  ;;  %v3704_v38 = vld [vmem:[#allocation8 + $0x30] sm:$0xff] }
 0xb04   :  { %4798 = vmatprep.subr.bf16.mxu0 %v8476_v50  ;;  %4839 = vmatprep.subr.bf16.mxu1 %v8478_v41  ;;  %v3712_v50 = vld [vmem:[#allocation8 + $0x70] sm:$0xff]  ;;  %v3705_v41 = vld [vmem:[#allocation8 + $0x38] sm:$0xff] }
 0xb05   :  { %4828 = vmatprep.mubr.bf16.mxu0 %v13848_v47  ;;  %4869 = vmatprep.mubr.bf16.mxu1 %v13848_v47  ;;  %v8443_v47 = vcombine.low %v3768_v60, %v3776_v30  ;;  %v10953_v60 = vpop.permute.xlu0 %6205 }
 0xb06   :  { %5826 = vrot.lane.b32.xlu0 %v10917_v35, %s9242_s30  ;;  %13862 = vst [vmem:[#allocation44_spill] sm:$0xff] %v10953_v60 }
 0xb07   :  { %4799 = vmatpush1.bf16.msra.mxu0 %v8475_v2  ;;  %4840 = vmatpush1.bf16.msra.mxu1 %v8477_v39  ;;  %v8380_v2 = vcombine.high %v3704_v38, %v3712_v50  ;;  %v8382_v39 = vcombine.high %v3705_v41, %v3713_v1 }
 0xb08   :  { %4800 = vmatprep.subr.bf16.mxu0 %v8460_v36  ;;  %4841 = vmatprep.subr.bf16.mxu1 %v8462_v42  ;;  %v8379_v36 = vcombine.low %v3704_v38, %v3712_v50  ;;  %v8381_v42 = vcombine.low %v3705_v41, %v3713_v1 }
 0xb09   :  { %v10957_v30 = vpop.permute.xlu0 %6124 }
 0xb0a   :  { %5686 = vrot.lane.b32.xlu0 %v10917_v35, %s9243_s26  ;;  %13863 = vst [vmem:[#allocation45_spill] sm:$0xff] %v10957_v30 }
 0xb0b   :  { %4801 = vmatpush1.bf16.msra.mxu0 %v8459_v44  ;;  %4842 = vmatpush1.bf16.msra.mxu1 %v8461_v61 }
 0xb0c   :  { %4802 = vmatprep.subr.bf16.mxu0 %v8444_v22  ;;  %4843 = vmatprep.subr.bf16.mxu1 %v8446_v23 }
 0xb0d   :  { %v10963_v25 = vpop.permute.xlu0 %6045 }
 0xb0e   :  { %5747 = vrot.lane.b32.xlu0 %v10917_v35, %s9234_s19  ;;  %13864 = vst [vmem:[#allocation46_spill] sm:$0xff] %v10963_v25 }
 0xb0f   :  { %4803 = vmatpush1.bf16.msra.mxu0 %v8443_v47  ;;  %4844 = vmatpush1.bf16.msra.mxu1 %v8445_v9 }
 0xb10   :  { %4804 = vmatprep.subr.bf16.mxu0 %v8428_v54  ;;  %4845 = vmatprep.subr.bf16.mxu1 %v8430_v33  ;;  %v4878_v54 = vld [vmem:[%s13865_s2] sm:$0xff] }
 0xb11   :  { %v10969_v6 = vpop.permute.xlu0 %5966  ;;  %v4886_v53 = vcombine.high %v4878_v54, %v4878_v54 }
 0xb12   :  { %5607 = vrot.lane.b32.xlu0 %v10917_v35, %s9244_s9  ;;  %13866 = vst [vmem:[#allocation47_spill] sm:$0xff] %v10969_v6 }
 0xb13   :  { %4805 = vmatpush1.bf16.msra.mxu0 %v8427_v48  ;;  %4846 = vmatpush1.bf16.msra.mxu1 %v8429_v13  ;;  %v4900_v48 = vrot.slane %v4886_v53, %v10595_v62  ;;  %v4893_v13 = vrot.slane %v4878_v54, %v10595_v62 }
 0xb14   :  { %4806 = vmatprep.subr.bf16.mxu0 %v8412_v55  ;;  %4847 = vmatprep.subr.bf16.mxu1 %v8414_v28  ;;  %v3837_v55 = vrot.slane %v11003_v57, %v13777_v21  ;;  %v3845_v28 = vrot.slane %v11003_v57, %v13779_v51 }
 0xb15   :  { %v10973_v44 = vpop.permute.xlu0 %5836  ;;  %v4902_v38 = vcombine.high %v4900_v48, %v4900_v48 }
 0xb16   :  { %5668 = vrot.lane.b32.xlu0 %v10917_v35, %s9243_s26  ;;  %13868 = vst [vmem:[#allocation48_spill] sm:$0xff] %v10973_v44 }
 0xb17   :  { %4807 = vmatpush1.bf16.msra.mxu0 %v8411_v20  ;;  %4848 = vmatpush1.bf16.msra.mxu1 %v8413_v63 }
 0xb18   :  { %4808 = vmatprep.subr.bf16.mxu0 %v8396_v58  ;;  %4849 = vmatprep.subr.bf16.mxu1 %v8398_v7  ;;  %v4901_v58 = vcombine.high %v4893_v13, %v4893_v13 }
 0xb1a   :  { %5529 = vrot.lane.b32.xlu0 %v10917_v35, %s9215_s11 }
 0xb1b   :  { %4809 = vmatpush1.bf16.msra.mxu0 %v8395_v10  ;;  %4850 = vmatpush1.bf16.msra.mxu1 %v8397_v46 }
 0xb1c   :  { %4810 = vmatprep.subr.bf16.mxu0 %v8380_v2  ;;  %4851 = vmatprep.subr.bf16.mxu1 %v8382_v39 }
 0xb1e   :  { %5589 = vrot.lane.b32.xlu0 %v10917_v35, %s9244_s9 }
 0xb1f   :  { %4811 = vmatpush1.bf16.msra.mxu0 %v8379_v36  ;;  %4852 = vmatpush1.bf16.msra.mxu1 %v8381_v42 }
 0xb22   :  { %4829 = vmatmul.mubr.bf16.vlgmr.msra.gmra.mxu0 %v10869_v59  ;;  %4870 = vmatmul.mubr.bf16.vlgmr.msra.gmra.mxu1 %v10869_v59  ;;  %v10977_v59 = vpop.permute.xlu0 %5887 }
 0xb23   :  { %5451 = vrot.lane.b32.xlu0 %v10917_v35, %s9213_s10  ;;  %13869 = vst [vmem:[#allocation49_spill] sm:$0xff] %v10977_v59 }
 0xb26   :  { %v10979_v61 = vpop.permute.xlu0 %5757 }
 0xb2a   :  { %v10981_v22 = vpop.permute.xlu0 %5737 }
 0xb2e   :  { %v10983_v23 = vpop.permute.xlu0 %5678 }
 0xb32   :  { %v10985_v56 = vpop.permute.xlu0 %5658 }
 0xb36   :  { %v10987_v40 = vpop.permute.xlu0 %5599 }
 0xb3a   :  { %v10989_v0 = vpop.permute.xlu0 %5579 }
 0xb3e   :  { %v10991_v12 = vpop.permute.xlu0 %5521 }
 0xb42   :  { %v10993_v47 = vpop.permute.xlu0 %5501 }
 0xb46   :  { %v10995_v9 = vpop.permute.xlu0 %5443 }
 0xb4a   :  { %v10997_v35 = vpop.permute.xlu0 %5423 }
 0xb4e   :  { %v11000_v33 = vpop.permute.xlu0 %5365 }
 0xb52   :  { %v11015_v29 = vpop.permute.xlu0 %5345 }
 0xb56   :  { %v11017_v42 = vpop.permute.xlu0 %6490 }
 0xb82   :  { %v4625_v4 = vpop.f32.mrf.mxu1  ;;  %v4584_v17 = vpop.f32.mrf.mxu0 }
 0xb83   :  { %v4626_v18 = vadd.f32 %v4625_v4, %v3841_v5  ;;  %v4585_v20 = vadd.f32 %v4584_v17, %v3833_v45 }
 0xb84   :  { %v4586_v63 = vpop.f32.mrf.mxu0  ;;  %v4627_v7 = vpop.f32.mrf.mxu1 }
 0xb85   :  { %v4972_v50 = vmul.f32 %v4900_v48, %v4626_v18  ;;  %v4970_v41 = vmul.f32 %v4893_v13, %v4585_v20  ;;  %v4587_v1 = vadd.f32 %v4586_v63, %v3837_v55  ;;  %v4628_v10 = vadd.f32 %v4627_v7, %v3845_v28  ;;  %v11019_v63 = vpop.permute.xlu0 %6468  ;;  %v11021_v7 = vpop.permute.xlu1 %5828 }
 0xb86   :  { %v4629_v46 = vpop.f32.mrf.mxu1  ;;  %v4588_v2 = vpop.f32.mrf.mxu0  ;;  %13870 = vst [vmem:[#allocation50_spill] sm:$0xff] %v11021_v7 }
 0xb87   :  { %vm4988_vm9 = vcmp.ge.f32.partialorder %v4972_v50, 0.0  ;;  %v5004_v39 = vmul.f32 0.01, %v4972_v50  ;;  %vm4986_vm10 = vcmp.ge.f32.partialorder %v4970_v41, 0.0  ;;  %v5002_v36 = vmul.f32 0.01, %v4970_v41 }
 0xb88   :  { %v4971_v54 = vmul.f32 %v4901_v58, %v4587_v1  ;;  %v4973_v53 = vmul.f32 %v4902_v38, %v4628_v10  ;;  %v4589_v5 = vpop.f32.mrf.mxu0  ;;  %v4630_v45 = vpop.f32.mrf.mxu1  ;;  %v11034_v46 = vsub.s32 7, %v13839_v16  ;;  %v3849_v2 = vrot.slane %v11003_v57, %v13780_v19 }
 0xb89   :  { %v5020_v4 = vsel %vm4988_vm9, %v4972_v50, %v5004_v39  ;;  %v5018_v17 = vsel %vm4986_vm10, %v4970_v41, %v5002_v36  ;;  %v11023_v38 = vpop.permute.xlu0 %6405  ;;  %v4879_v50 = vld [vmem:[%s13865_s2 + $0x8] sm:$0xff]  ;;  %v11026_v41 = vpop.permute.xlu1 %5749 }
 0xb8a   :  { %5036 = vst [vmem:[#allocation3 + $0x2] sm:$0x1] %v5020_v4  ;;  %v5059_v31 = vrot.slane %v5020_v4, 1  ;;  %5034 = vst [vmem:[#allocation3] sm:$0x1] %v5018_v17  ;;  %v5051_v48 = vrot.slane %v5018_v17, 1  ;;  %v4903_v10 = vcombine.high %v4879_v50, %v4879_v50  ;;  %v3861_v45 = vrot.slane %v11003_v57, %v11034_v46 }
 0xb8b   :  { %vm4987_vm13 = vcmp.ge.f32.partialorder %v4971_v54, 0.0  ;;  %v5003_v13 = vmul.f32 0.01, %v4971_v54  ;;  %vm4989_vm2 = vcmp.ge.f32.partialorder %v4973_v53, 0.0  ;;  %v5005_v55 = vmul.f32 0.01, %v4973_v53 }
 0xb8c   :  { %5061 = vst [vmem:[#allocation3 + $0xa] sm:$0x1] %v5059_v31  ;;  %5053 = vst [vmem:[#allocation3 + $0x8] sm:$0x1] %v5051_v48  ;;  %v11031_v31 = vsub.s32 6, %v13839_v16  ;;  %v4917_v5 = vrot.slane %v4903_v10, %v10595_v62  ;;  %v3853_v4 = vrot.slane %v11003_v57, %v13781_v3 }
 0xb8d   :  { %v5019_v28 = vsel %vm4987_vm13, %v4971_v54, %v5003_v13  ;;  %v5021_v20 = vsel %vm4989_vm2, %v4973_v53, %v5005_v55  ;;  %13871 = vst [vmem:[#allocation51_spill] sm:$0xff] %v11026_v41  ;;  %v11028_v1 = vpop.permute.xlu0 %6383  ;;  %13873 = vst [vmem:[#allocation53_spill] sm:$0xff] %v11034_v46  ;;  %v11040_v36 = vpop.permute.xlu1 %5670  ;;  %v4910_v53 = vrot.slane %v4879_v50, %v10595_v62 }
 0xb8e   :  { %5035 = vst [vmem:[#allocation3 + $0x1] sm:$0x1] %v5019_v28  ;;  %v5055_v18 = vrot.slane %v5019_v28, 1  ;;  %5037 = vst [vmem:[#allocation3 + $0x3] sm:$0x1] %v5021_v20  ;;  %v5063_v58 = vrot.slane %v5021_v20, 1  ;;  %v3857_v39 = vrot.slane %v11003_v57, %v11031_v31 }
 0xb8f   :  { %13872 = vst [vmem:[#allocation52_spill] sm:$0xff] %v11031_v31  ;;  %13874 = vst [vmem:[#allocation54_spill] sm:$0xff] %v11040_v36 }
 0xb90   :  { %5057 = vst [vmem:[#allocation3 + $0x9] sm:$0x1] %v5055_v18  ;;  %5065 = vst [vmem:[#allocation3 + $0xb] sm:$0x1] %v5063_v58  ;;  %v4919_v18 = vcombine.high %v4917_v5, %v4917_v5  ;;  %v4918_v58 = vcombine.high %v4910_v53, %v4910_v53 }
 0xb91   :  { %v11042_v54 = vpop.permute.xlu0 %6320  ;;  %v11050_v6 = vpop.permute.xlu1 %5591 }
 0xb92   :  { %13875 = vst [vmem:[#allocation55_spill] sm:$0xff] %v11042_v54  ;;  %13876 = vst [vmem:[#allocation56_spill] sm:$0xff] %v11050_v6 }
 0xb95   :  { %v11052_v10 = vpop.permute.xlu0 %6298 }
 0xb96   :  { %13877 = vst [vmem:[#allocation57_spill] sm:$0xff] %v11052_v10 }
 0xba2   :  { %v4666_v17 = vpop.f32.mrf.mxu0  ;;  %v4707_v48 = vpop.f32.mrf.mxu1 }
 0xba3   :  { %v4667_v13 = vadd.f32 %v4666_v17, %v3849_v2  ;;  %v4708_v55 = vadd.f32 %v4707_v48, %v3857_v39 }
 0xba4   :  { %v4709_v28 = vpop.f32.mrf.mxu1  ;;  %v4668_v20 = vpop.f32.mrf.mxu0 }
 0xba5   :  { %v4974_v16 = vmul.f32 %v4910_v53, %v4667_v13  ;;  %v4976_v52 = vmul.f32 %v4917_v5, %v4708_v55  ;;  %v4710_v59 = vadd.f32 %v4709_v28, %v3861_v45  ;;  %v4669_v50 = vadd.f32 %v4668_v20, %v3853_v4  ;;  %v11072_v20 = vld [vmem:[%s13867_s7 + $0x8] sm:$0xff]  ;;  %s9258_s7 = smov 50  }
 0xba6   :  { %v4670_v25 = vpop.f32.mrf.mxu0  ;;  %v4711_v30 = vpop.f32.mrf.mxu1 }
 0xba7   :  { %vm4990_vm12 = vcmp.ge.f32.partialorder %v4974_v16, 0.0  ;;  %v5006_v57 = vmul.f32 0.01, %v4974_v16  ;;  %vm4992_vm7 = vcmp.ge.f32.partialorder %v4976_v52, 0.0  ;;  %v5008_v60 = vmul.f32 0.01, %v4976_v52  ;;  %v11054_v25 = vpop.permute.xlu1 %5513  ;;  %v11056_v30 = vpop.permute.xlu0 %6235 }
 0xba8   :  { %v4977_v2 = vmul.f32 %v4919_v18, %v4710_v59  ;;  %v4975_v39 = vmul.f32 %v4918_v58, %v4669_v50  ;;  %v4712_v17 = vpop.f32.mrf.mxu1  ;;  %v4671_v48 = vpop.f32.mrf.mxu0  ;;  %13878 = vst [vmem:[#allocation58_spill] sm:$0xff] %v11054_v25  ;;  %13879 = vst [vmem:[#allocation59_spill] sm:$0xff] %v11056_v30  ;;  %v4880_v18 = vld [vmem:[%s13865_s2 + $0x10] sm:$0xff] }
 0xba9   :  { %v5022_v11 = vsel %vm4990_vm12, %v4974_v16, %v5006_v57  ;;  %v5024_v37 = vsel %vm4992_vm7, %v4976_v52, %v5008_v60  ;;  %v4920_v58 = vcombine.high %v4880_v18, %v4880_v18  ;;  %v4927_v17 = vrot.slane %v4880_v18, %v10595_v62 }
 0xbaa   :  { %5038 = vst [vmem:[#allocation3 + $0x4] sm:$0x1] %v5022_v11  ;;  %v5067_v53 = vrot.slane %v5022_v11, 1  ;;  %5040 = vst [vmem:[#allocation3 + $0x6] sm:$0x1] %v5024_v37  ;;  %v5075_v5 = vrot.slane %v5024_v37, 1 }
 0xbab   :  { %vm4993_vm4 = vcmp.ge.f32.partialorder %v4977_v2, 0.0  ;;  %v5009_v45 = vmul.f32 0.01, %v4977_v2  ;;  %vm4991_vm0 = vcmp.ge.f32.partialorder %v4975_v39, 0.0  ;;  %v5007_v4 = vmul.f32 0.01, %v4975_v39  ;;  %v11058_v37 = vpop.permute.xlu1 %5435  ;;  %v11060_v11 = vpop.permute.xlu0 %6213 }
 0xbac   :  { %5069 = vst [vmem:[#allocation3 + $0xc] sm:$0x1] %v5067_v53  ;;  %5077 = vst [vmem:[#allocation3 + $0xe] sm:$0x1] %v5075_v5  ;;  %v4934_v48 = vrot.slane %v4920_v58, %v10595_v62  ;;  %v3869_v5 = vrot.slane %v11072_v20, %v13777_v21 }
 0xbad   :  { %v5025_v59 = vsel %vm4993_vm4, %v4977_v2, %v5009_v45  ;;  %v5023_v16 = vsel %vm4991_vm0, %v4975_v39, %v5007_v4  ;;  %13880 = vst [vmem:[#allocation60_spill] sm:$0xff] %v11058_v37  ;;  %13881 = vst [vmem:[#allocation61_spill] sm:$0xff] %v11060_v11  ;;  %v3865_v2 = vrot.slane %v11072_v20, %v13776_v32  ;;  %vm5176_vm4 = vcmask 146448  }
 0xbae   :  { %5041 = vst [vmem:[#allocation3 + $0x7] sm:$0x1] %v5025_v59  ;;  %v5079_v13 = vrot.slane %v5025_v59, 1  ;;  %5039 = vst [vmem:[#allocation3 + $0x5] sm:$0x1] %v5023_v16  ;;  %v5071_v52 = vrot.slane %v5023_v16, 1  ;;  %v3873_v39 = vrot.slane %v11072_v20, %v13778_v43  ;;  %v3877_v45 = vrot.slane %v11072_v20, %v13779_v51 }
 0xbaf   :  { %v11064_v55 = vpop.permute.xlu1 %5357  ;;  %v11066_v28 = vpop.permute.xlu0 %6152  ;;  %v4935_v43 = vcombine.high %v4927_v17, %v4927_v17  ;;  %v4936_v21 = vcombine.high %v4934_v48, %v4934_v48  ;;  %vm5185_vm0 = vcmask 376048  }
 0xbb0   :  { %5081 = vst [vmem:[#allocation3 + $0xf] sm:$0x1] %v5079_v13  ;;  %5073 = vst [vmem:[#allocation3 + $0xd] sm:$0x1] %v5071_v52 }
 0xbb1   :  { %13882 = vst [vmem:[#allocation62_spill] sm:$0xff] %v11064_v55  ;;  %13883 = vst [vmem:[#allocation63_spill] sm:$0xff] %v11066_v28 }
 0xbb3   :  { %v11074_v50 = vpop.permute.xlu1 %6482  ;;  %v11076_v57 = vpop.permute.xlu0 %6132 }
 0xbb4   :  { %13884 = vst [vmem:[#allocation64_spill] sm:$0xff] %v11074_v50  ;;  %13885 = vst [vmem:[#allocation65_spill] sm:$0xff] %v11076_v57 }
 0xbb5   :  { %v5137_v60 = vld [vmem:[#allocation3] sm:$0xff] }
 0xbb6   :  { %5179 = vrot.lane.b32.xlu1 %v5137_v60, %s9252_s15  ;;  %5170 = vrot.lane.b32.xlu0 %v5137_v60, %s9210_s5 }
 0xbb7   :  { %v11086_v53 = vld [vmem:[#allocation3 + $0x8] sm:$0xff]  ;;  %v11095_v52 = vpop.permute.xlu1 %6397  ;;  %v11097_v18 = vpop.permute.xlu0 %6073 }
 0xbb8   :  { %13886 = vst [vmem:[#allocation66_spill] sm:$0xff] %v11095_v52  ;;  %13887 = vst [vmem:[#allocation67_spill] sm:$0xff] %v11097_v18 }
 0xbba   :  { %5143 = vrot.lane.b32.xlu1 %v5137_v60, %s9235_s1  ;;  %5197 = vrot.lane.b32.xlu0 %v5137_v60, %s9253_s12 }
 0xbbe   :  { %5188 = vrot.lane.b32.xlu1 %v5137_v60, %s9217_s16  ;;  %5206 = vrot.lane.b32.xlu0 %v5137_v60, %s9254_s18 }
 0xbc2   :  { %5152 = vrot.lane.b32.xlu1 %v5137_v60, %s9232_s8  ;;  %5241 = vrot.lane.b32.xlu0 %v11086_v53, %s9253_s12  ;;  %v4748_v4 = vpop.f32.mrf.mxu0  ;;  %v4789_v59 = vpop.f32.mrf.mxu1 }
 0xbc3   :  { %v4749_v13 = vadd.f32 %v4748_v4, %v3865_v2  ;;  %v4790_v16 = vadd.f32 %v4789_v59, %v3873_v39 }
 0xbc4   :  { %v4750_v58 = vpop.f32.mrf.mxu0  ;;  %v4791_v32 = vpop.f32.mrf.mxu1 }
 0xbc5   :  { %v4978_v26 = vmul.f32 %v4927_v17, %v4749_v13  ;;  %v4980_v50 = vmul.f32 %v4934_v48, %v4790_v16  ;;  %v4751_v51 = vadd.f32 %v4750_v58, %v3869_v5  ;;  %v4792_v34 = vadd.f32 %v4791_v32, %v3877_v45  ;;  %v11102_v48 = vpop.permute.xlu1 %6312  ;;  %v11104_v32 = vpop.permute.xlu0 %6053  ;;  %v4881_v45 = vld [vmem:[%s13865_s2 + $0x18] sm:$0xff]  ;;  %s14210_s2 = sld [smem:[#allocation24_spill]] }
 0xbc6   :  { %5161 = vrot.lane.b32.xlu1 %v5137_v60, %s9230_s29  ;;  %5250 = vrot.lane.b32.xlu0 %v11086_v53, %s9254_s18  ;;  %v4752_v55 = vpop.f32.mrf.mxu0  ;;  %v4793_v2 = vpop.f32.mrf.mxu1  ;;  %13888 = vst [vmem:[#allocation68_spill] sm:$0xff] %v11102_v48  ;;  %13889 = vst [vmem:[#allocation69_spill] sm:$0xff] %v11104_v32  ;;  %v3881_v58 = vrot.slane %v11072_v20, %v13780_v19 }
 0xbc7   :  { %vm4994_vm5 = vcmp.ge.f32.partialorder %v4978_v26, 0.0  ;;  %v5010_v39 = vmul.f32 0.01, %v4978_v26  ;;  %vm4996_vm8 = vcmp.ge.f32.partialorder %v4980_v50, 0.0  ;;  %v5012_v4 = vmul.f32 0.01, %v4980_v50 }
 0xbc8   :  { %v4979_v59 = vmul.f32 %v4935_v43, %v4751_v51  ;;  %v4981_v52 = vmul.f32 %v4936_v21, %v4792_v34  ;;  %v4753_v14 = vpop.f32.mrf.mxu0  ;;  %v4794_v37 = vpop.f32.mrf.mxu1  ;;  %v3889_v2 = vrot.slane %v11072_v20, %v11031_v31 }
 0xbc9   :  { %v5026_v49 = vsel %vm4994_vm5, %v4978_v26, %v5010_v39  ;;  %v5028_v17 = vsel %vm4996_vm8, %v4980_v50, %v5012_v4  ;;  %v11114_v34 = vpop.permute.xlu1 %6227  ;;  %v11116_v26 = vpop.permute.xlu0 %5994  ;;  %v4944_v39 = vrot.slane %v4881_v45, %v10595_v62  ;;  %v3885_v4 = vrot.slane %v11072_v20, %v13781_v3 }
 0xbca   :  { %5042 = vst [vmem:[#allocation3 + $0x10] sm:$0x1] %v5026_v49  ;;  %v5083_v60 = vrot.slane %v5026_v49, 1  ;;  %5044 = vst [vmem:[#allocation3 + $0x12] sm:$0x1] %v5028_v17  ;;  %v5091_v5 = vrot.slane %v5028_v17, 1  ;;  %5229 = vrot.lane.b32.xlu1 %v11086_v53, %s9217_s16  ;;  %5220 = vrot.lane.b32.xlu0 %v11086_v53, %s9252_s15 }
 0xbcb   :  { %vm4995_vm9 = vcmp.ge.f32.partialorder %v4979_v59, 0.0  ;;  %v5011_v55 = vmul.f32 0.01, %v4979_v59  ;;  %vm4997_vm10 = vcmp.ge.f32.partialorder %v4981_v52, 0.0  ;;  %v5013_v21 = vmul.f32 0.01, %v4981_v52 }
 0xbcc   :  { %5085 = vst [vmem:[#allocation3 + $0x18] sm:$0x1] %v5083_v60  ;;  %5093 = vst [vmem:[#allocation3 + $0x1a] sm:$0x1] %v5091_v5  ;;  %vm5149_vm5 = vcmask 507248   ;;  %vm5194_vm8 = vcmask 605648  }
 0xbcd   :  { %v5027_v43 = vsel %vm4995_vm9, %v4979_v59, %v5011_v55  ;;  %v5029_v14 = vsel %vm4997_vm10, %v4981_v52, %v5013_v21  ;;  %13890 = vst [vmem:[#allocation70_spill] sm:$0xff] %v11114_v34  ;;  %13891 = vst [vmem:[#allocation71_spill] sm:$0xff] %v11116_v26  ;;  %v11122_v37 = vpop.permute.xlu1 %6144  ;;  %v11124_v50 = vpop.permute.xlu0 %5974  ;;  %v4937_v52 = vcombine.high %v4881_v45, %v4881_v45  ;;  %vm13611_vm9 = vcmask 15360  }
 0xbce   :  { %5043 = vst [vmem:[#allocation3 + $0x11] sm:$0x1] %v5027_v43  ;;  %v5087_v51 = vrot.slane %v5027_v43, 1  ;;  %5045 = vst [vmem:[#allocation3 + $0x13] sm:$0x1] %v5029_v14  ;;  %v5095_v49 = vrot.slane %v5029_v14, 1  ;;  %5259 = vrot.lane.b32.xlu1 %v11086_v53, %s9255_s23  ;;  %5268 = vrot.lane.b32.xlu0 %v11086_v53, %s9256_s0  ;;  %v3893_v59 = vrot.slane %v11072_v20, %v11034_v46 }
 0xbcf   :  { %13892 = vst [vmem:[#allocation72_spill] sm:$0xff] %v11122_v37  ;;  %13893 = vst [vmem:[#allocation73_spill] sm:$0xff] %v11124_v50  ;;  %v4952_v14 = vcombine.high %v4944_v39, %v4944_v39  ;;  %vm5203_vm10 = vcmask 835248  }
 0xbd0   :  { %5089 = vst [vmem:[#allocation3 + $0x19] sm:$0x1] %v5087_v51  ;;  %5097 = vst [vmem:[#allocation3 + $0x1b] sm:$0x1] %v5095_v49 }
 0xbd1   :  { %v11127_v13 = vpop.permute.xlu1 %6065  ;;  %v11129_v16 = vpop.permute.xlu0 %5915 }
 0xbd2   :  { %5277 = vrot.lane.b32.xlu1 %v11086_v53, %s9257_s20  ;;  %5286 = vrot.lane.b32.xlu0 %v11086_v53, %s9258_s7  ;;  %13894 = vst [vmem:[#allocation74_spill] sm:$0xff] %v11127_v13  ;;  %13895 = vst [vmem:[#allocation75_spill] sm:$0xff] %v11129_v16  ;;  %v4951_v53 = vrot.slane %v4937_v52, %v10595_v62 }
 0xbd4   :  { %v4953_v45 = vcombine.high %v4951_v53, %v4951_v53 }
 0xbd5   :  { %v11141_v17 = vpop.permute.xlu1 %5986  ;;  %v11143_v60 = vpop.permute.xlu0 %5895 }
 0xbd6   :  { %13896 = vst [vmem:[#allocation76_spill] sm:$0xff] %v11141_v17  ;;  %13897 = vst [vmem:[#allocation77_spill] sm:$0xff] %v11143_v60 }
 0xbd9   :  { %v11145_v17 = vpop.permute.xlu1 %5907  ;;  %v11147_v60 = vpop.permute.xlu0 %5844 }
 0xbda   :  { %13898 = vst [vmem:[#allocation78_spill] sm:$0xff] %v11145_v17  ;;  %13899 = vst [vmem:[#allocation79_spill] sm:$0xff] %v11147_v60 }
 0xbe2   :  { %v4830_v5 = vpop.f32.mrf.mxu0  ;;  %v4871_v55 = vpop.f32.mrf.mxu1 }
 0xbe3   :  { %v4831_v21 = vadd.f32 %v4830_v5, %v3881_v58  ;;  %v4872_v43 = vadd.f32 %v4871_v55, %v3889_v2 }
 0xbe4   :  { %v4832_v51 = vpop.f32.mrf.mxu0  ;;  %v4873_v49 = vpop.f32.mrf.mxu1 }
 0xbe5   :  { %v4982_v31 = vmul.f32 %v4944_v39, %v4831_v21  ;;  %v4984_v62 = vmul.f32 %v4951_v53, %v4872_v43  ;;  %v4833_v52 = vadd.f32 %v4832_v51, %v3885_v4  ;;  %v4874_v19 = vadd.f32 %v4873_v49, %v3893_v59  ;;  %v11149_v43 = vpop.permute.xlu1 %5816 }
 0xbe6   :  { %v4834_v3 = vpop.f32.mrf.mxu0  ;;  %v4875_v13 = vpop.f32.mrf.mxu1 }
 0xbe7   :  { %vm4998_vm13 = vcmp.ge.f32.partialorder %v4982_v31, 0.0  ;;  %v5014_v20 = vmul.f32 0.01, %v4982_v31  ;;  %vm5000_vm2 = vcmp.ge.f32.partialorder %v4984_v62, 0.0  ;;  %v5016_v46 = vmul.f32 0.01, %v4984_v62 }
 0xbe8   :  { %v4983_v58 = vmul.f32 %v4952_v14, %v4833_v52  ;;  %v4985_v2 = vmul.f32 %v4953_v45, %v4874_v19  ;;  %v4835_v5 = vpop.f32.mrf.mxu0  ;;  %v4876_v55 = vpop.f32.mrf.mxu1 }
 0xbe9   :  { %v5030_v37 = vsel %vm4998_vm13, %v4982_v31, %v5014_v20  ;;  %v5032_v34 = vsel %vm5000_vm2, %v4984_v62, %v5016_v46  ;;  %v11151_v31 = vpop.permute.xlu0 %5824  ;;  %v11153_v46 = vpop.permute.xlu1 %5846  ;;  %vm5212_vm13 = vcmask 1048464   ;;  %vm5158_vm2 = vcmask 736848  }
 0xbea   :  { %5046 = vst [vmem:[#allocation3 + $0x14] sm:$0x1] %v5030_v37  ;;  %v5099_v39 = vrot.slane %v5030_v37, 1  ;;  %5048 = vst [vmem:[#allocation3 + $0x16] sm:$0x1] %v5032_v34  ;;  %v5107_v53 = vrot.slane %v5032_v34, 1 }
 0xbeb   :  { %vm4999_vm12 = vcmp.ge.f32.partialorder %v4983_v58, 0.0  ;;  %v5015_v3 = vmul.f32 0.01, %v4983_v58  ;;  %vm5001_vm7 = vcmp.ge.f32.partialorder %v4985_v2, 0.0  ;;  %v5017_v13 = vmul.f32 0.01, %v4985_v2 }
 0xbec   :  { %5101 = vst [vmem:[#allocation3 + $0x1c] sm:$0x1] %v5099_v39  ;;  %5109 = vst [vmem:[#allocation3 + $0x1e] sm:$0x1] %v5107_v53 }
 0xbed   :  { %v5031_v4 = vsel %vm4999_vm12, %v4983_v58, %v5015_v3  ;;  %v5033_v21 = vsel %vm5001_vm7, %v4985_v2, %v5017_v13  ;;  %13900 = vst [vmem:[#allocation80_spill] sm:$0xff] %v11151_v31  ;;  %13901 = vst [vmem:[#allocation81_spill] sm:$0xff] %v11153_v46  ;;  %v11155_v34 = vpop.permute.xlu0 %5765  ;;  %v11161_v51 = vpop.permute.xlu1 %5745  ;;  %vm5167_vm12 = vcmask 966448   ;;  %vm5237_vm7 = vcmask 80896  }
 0xbee   :  { %5047 = vst [vmem:[#allocation3 + $0x15] sm:$0x1] %v5031_v4  ;;  %v5103_v59 = vrot.slane %v5031_v4, 1  ;;  %5049 = vst [vmem:[#allocation3 + $0x17] sm:$0x1] %v5033_v21  ;;  %v5111_v19 = vrot.slane %v5033_v21, 1 }
 0xbef   :  { %13902 = vst [vmem:[#allocation82_spill] sm:$0xff] %v11155_v34  ;;  %13903 = vst [vmem:[#allocation83_spill] sm:$0xff] %v11161_v51 }
 0xbf0   :  { %5105 = vst [vmem:[#allocation3 + $0x1d] sm:$0x1] %v5103_v59  ;;  %5113 = vst [vmem:[#allocation3 + $0x1f] sm:$0x1] %v5111_v19 }
 0xbf1   :  { %v11163_v14 = vpop.permute.xlu0 %5826  ;;  %v11169_v45 = vpop.permute.xlu1 %5767 }
 0xbf2   :  { %13904 = vst [vmem:[#allocation84_spill] sm:$0xff] %v11163_v14  ;;  %13906 = vst [vmem:[#allocation86_spill] sm:$0xff] %v11169_v45 }
 0xbf5   :  { %v5139_v37 = vld [vmem:[#allocation3 + $0x10] sm:$0xff]  ;;  %v11167_v49 = vpop.permute.xlu0 %5686  ;;  %v11177_v20 = vpop.permute.xlu1 %5666 }
 0xbf6   :  { %5172 = vrot.lane.b32.xlu1 %v5139_v37, %s9210_s5  ;;  %5181 = vrot.lane.b32.xlu0 %v5139_v37, %s9252_s15  ;;  %13905 = vst [vmem:[#allocation85_spill] sm:$0xff] %v11167_v49  ;;  %13908 = vst [vmem:[#allocation88_spill] sm:$0xff] %v11177_v20  ;;  %s14017_s5 = sld [smem:[#allocation20_spill]] }
 0xbf7   :  { %v5140_v62 = vld [vmem:[#allocation3 + $0x18] sm:$0xff] }
 0xbf9   :  { %v11173_v52 = vpop.permute.xlu0 %5747  ;;  %v11183_v2 = vpop.permute.xlu1 %5688 }
 0xbfa   :  { %5145 = vrot.lane.b32.xlu1 %v5139_v37, %s9235_s1  ;;  %5154 = vrot.lane.b32.xlu0 %v5139_v37, %s9232_s8  ;;  %13907 = vst [vmem:[#allocation87_spill] sm:$0xff] %v11173_v52  ;;  %13910 = vst [vmem:[#allocation90_spill] sm:$0xff] %v11183_v2  ;;  %s14107_s8 = sld [smem:[#allocation21_spill]] }
 0xbfb   :  { %s14115_s1 = sld [smem:[#allocation23_spill]] }
 0xbfd   :  { %v11181_v58 = vpop.permute.xlu0 %5607  ;;  %v11189_v55 = vpop.permute.xlu1 %5587 }
 0xbfe   :  { %5190 = vrot.lane.b32.xlu1 %v5139_v37, %s9217_s16  ;;  %5199 = vrot.lane.b32.xlu0 %v5139_v37, %s9253_s12  ;;  %13909 = vst [vmem:[#allocation89_spill] sm:$0xff] %v11181_v58  ;;  %13912 = vst [vmem:[#allocation92_spill] sm:$0xff] %v11189_v55 }
 0xc01   :  { %v11187_v5 = vpop.permute.xlu0 %5668  ;;  %v11195_v53 = vpop.permute.xlu1 %5609 }
 0xc02   :  { %5231 = vrot.lane.b32.xlu1 %v5140_v62, %s9217_s16  ;;  %5163 = vrot.lane.b32.xlu0 %v5139_v37, %s9230_s29  ;;  %13911 = vst [vmem:[#allocation91_spill] sm:$0xff] %v11187_v5  ;;  %13914 = vst [vmem:[#allocation94_spill] sm:$0xff] %v11195_v53  ;;  %s14053_s16 = sld [smem:[#allocation22_spill]] }
 0xc05   :  { %v11193_v39 = vpop.permute.xlu0 %5529  ;;  %v11199_v13 = vpop.permute.xlu1 %5509 }
 0xc06   :  { %5222 = vrot.lane.b32.xlu1 %v5140_v62, %s9252_s15  ;;  %5208 = vrot.lane.b32.xlu0 %v5139_v37, %s9254_s18  ;;  %13913 = vst [vmem:[#allocation93_spill] sm:$0xff] %v11193_v39  ;;  %13916 = vst [vmem:[#allocation96_spill] sm:$0xff] %v11199_v13 }
 0xc09   :  { %v11197_v3 = vpop.permute.xlu0 %5589  ;;  %v11203_v59 = vpop.permute.xlu1 %5531 }
 0xc0a   :  { %5261 = vrot.lane.b32.xlu1 %v5140_v62, %s9255_s23  ;;  %5243 = vrot.lane.b32.xlu0 %v5140_v62, %s9253_s12  ;;  %13915 = vst [vmem:[#allocation95_spill] sm:$0xff] %v11197_v3  ;;  %13918 = vst [vmem:[#allocation98_spill] sm:$0xff] %v11203_v59 }
 0xc0d   :  { %v11201_v4 = vpop.permute.xlu0 %5451 }
 0xc0e   :  { %5270 = vrot.lane.b32.xlu1 %v5140_v62, %s9256_s0  ;;  %5252 = vrot.lane.b32.xlu0 %v5140_v62, %s9254_s18  ;;  %13917 = vst [vmem:[#allocation97_spill] sm:$0xff] %v11201_v4 }
 0xc12   :  { %5288 = vrot.lane.b32.xlu1 %v5140_v62, %s9258_s7  ;;  %5279 = vrot.lane.b32.xlu0 %v5140_v62, %s9257_s20 }
 0xc28   :  { %v5180_v21 = vpop.permute.xlu1 %5179  ;;  %v5171_v19 = vpop.permute.xlu0 %5170 }
 0xc29   :  { %5177 = vst.msk [vmem:[#allocation4 + $0x10] sm:$0xff] %vm5176_vm4, %v5171_v19 }
 0xc2a   :  { %5186 = vst.msk [vmem:[#allocation4 + $0x10] sm:$0xff] %vm5185_vm0, %v5180_v21 }
 0xc2c   :  { %v5144_v37 = vpop.permute.xlu1 %5143  ;;  %v5198_v62 = vpop.permute.xlu0 %5197 }
 0xc2d   :  { %5150 = vst.msk [vmem:[#allocation4 + $0x8] sm:$0xff] %vm5149_vm5, %v5144_v37 }
 0xc30   :  { %v5189_v3 = vpop.permute.xlu1 %5188  ;;  %v5207_v53 = vpop.permute.xlu0 %5206 }
 0xc31   :  { %5195 = vst.msk [vmem:[#allocation4 + $0x10] sm:$0xff] %vm5194_vm8, %v5189_v3 }
 0xc32   :  { %5215 = vst.msk [vmem:[#allocation4 + $0x18] sm:$0xff] %vm13611_vm9, %v5207_v53  ;;  %vm5283_vm9 = vcmask 179248  }
 0xc33   :  { %5204 = vst.msk [vmem:[#allocation4 + $0x10] sm:$0xff] %vm5203_vm10, %v5198_v62 }
 0xc34   :  { %5213 = vst.msk [vmem:[#allocation4 + $0x10] sm:$0xff] %vm5212_vm13, %v5207_v53  ;;  %v5153_v21 = vpop.permute.xlu1 %5152  ;;  %v5242_v19 = vpop.permute.xlu0 %5241 }
 0xc35   :  { %5159 = vst.msk [vmem:[#allocation4 + $0x8] sm:$0xff] %vm5158_vm2, %v5153_v21 }
 0xc38   :  { %v5162_v59 = vpop.permute.xlu1 %5161  ;;  %v5251_v5 = vpop.permute.xlu0 %5250 }
 0xc39   :  { %v11213_v37 = vld [vmem:[#allocation4 + $0x18] sm:$0xff]  ;;  %5168 = vst.msk [vmem:[#allocation4 + $0x8] sm:$0xff] %vm5167_vm12, %v5162_v59 }
 0xc3a   :  { %5735 = vrot.lane.b32.xlu1 %v11213_v37, %s9234_s19  ;;  %5814 = vrot.lane.b32.xlu0 %v11213_v37, %s9242_s30 }
 0xc3c   :  { %v5230_v53 = vpop.permute.xlu1 %5229  ;;  %v5221_v3 = vpop.permute.xlu0 %5220 }
 0xc3d   :  { %5238 = vst.msk [vmem:[#allocation4 + $0x30] sm:$0xff] %vm5237_vm7, %v5230_v53 }
 0xc3e   :  { %5227 = vst.msk [vmem:[#allocation4 + $0x28] sm:$0xff] %vm5226_vm14, %v5221_v3  ;;  %5656 = vrot.lane.b32.xlu1 %v11213_v37, %s9243_s26 }
 0xc3f   :  { %5248 = vst.msk [vmem:[#allocation4 + $0x30] sm:$0xff] %vm13612_vm11, %v5242_v19  ;;  %vm5292_vm11 = vcmask 408848  }
 0xc40   :  { %5236 = vst.msk [vmem:[#allocation4 + $0x28] sm:$0xff] %vm5235_vm6, %v5230_v53  ;;  %v5296_v59 = vld [vmem:[#allocation4 + $0x8] sm:$0xff]  ;;  %v5260_v62 = vpop.permute.xlu1 %5259  ;;  %v5269_v21 = vpop.permute.xlu0 %5268 }
 0xc41   :  { %5257 = vst.msk [vmem:[#allocation4 + $0x30] sm:$0xff] %vm5256_vm15, %v5251_v5  ;;  %5810 = vrot.lane.b32.xlu0 %v5296_v59, %s9242_s30 }
 0xc42   :  { %5266 = vst.msk [vmem:[#allocation4 + $0x30] sm:$0xff] %vm5265_vm3, %v5260_v62  ;;  %5577 = vrot.lane.b32.xlu1 %v11213_v37, %s9244_s9 }
 0xc43   :  { %5275 = vst.msk [vmem:[#allocation4 + $0x30] sm:$0xff] %vm5274_vm1, %v5269_v21 }
 0xc44   :  { %v5278_v19 = vpop.permute.xlu1 %5277  ;;  %v5287_v53 = vpop.permute.xlu0 %5286 }
 0xc45   :  { %5284 = vst.msk [vmem:[#allocation4 + $0x38] sm:$0xff] %vm5283_vm9, %v5278_v19  ;;  %5731 = vrot.lane.b32.xlu0 %v5296_v59, %s9234_s19 }
 0xc46   :  { %5499 = vrot.lane.b32.xlu1 %v11213_v37, %s9215_s11  ;;  %5293 = vst.msk [vmem:[#allocation4 + $0x38] sm:$0xff] %vm5292_vm11, %v5287_v53 }
 0xc49   :  { %5652 = vrot.lane.b32.xlu0 %v5296_v59, %s9243_s26 }
 0xc4a   :  { %5421 = vrot.lane.b32.xlu1 %v11213_v37, %s9213_s10 }
 0xc4d   :  { %5573 = vrot.lane.b32.xlu0 %v5296_v59, %s9244_s9 }
 0xc4e   :  { %5343 = vrot.lane.b32.xlu1 %v11213_v37, %s9211_s28 }
 0xc51   :  { %5495 = vrot.lane.b32.xlu0 %v5296_v59, %s9215_s11 }
 0xc52   :  { %6466 = vrot.lane.b32.xlu1 %v11213_v37, %s9245_s13 }
 0xc55   :  { %5417 = vrot.lane.b32.xlu0 %v5296_v59, %s9213_s10 }
 0xc56   :  { %6381 = vrot.lane.b32.xlu1 %v11213_v37, %s9246_s17 }
 0xc59   :  { %5339 = vrot.lane.b32.xlu0 %v5296_v59, %s9211_s28 }
 0xc5a   :  { %6296 = vrot.lane.b32.xlu1 %v11213_v37, %s9247_s21 }
 0xc5d   :  { %6462 = vrot.lane.b32.xlu0 %v5296_v59, %s9245_s13 }
 0xc5e   :  { %6211 = vrot.lane.b32.xlu1 %v11213_v37, %s9248_s25 }
 0xc61   :  { %6377 = vrot.lane.b32.xlu0 %v5296_v59, %s9246_s17 }
 0xc62   :  { %6130 = vrot.lane.b32.xlu1 %v11213_v37, %s9249_s3 }
 0xc65   :  { %6292 = vrot.lane.b32.xlu0 %v5296_v59, %s9247_s21 }
 0xc66   :  { %6051 = vrot.lane.b32.xlu1 %v11213_v37, %s9230_s29 }
 0xc68   :  { %v5173_v5 = vpop.permute.xlu1 %5172  ;;  %v5182_v3 = vpop.permute.xlu0 %5181 }
 0xc69   :  { %5178 = vst.msk [vmem:[#allocation4 + $0x68] sm:$0xff] %vm5176_vm4, %v5173_v5  ;;  %6207 = vrot.lane.b32.xlu0 %v5296_v59, %s9248_s25  ;;  %v5300_v5 = vld [vmem:[#allocation4 + $0x28] sm:$0xff]  ;;  %vm13920_vm4 = vcmask 15360  }
 0xc6a   :  { %5972 = vrot.lane.b32.xlu1 %v11213_v37, %s9250_s14  ;;  %5187 = vst.msk [vmem:[#allocation4 + $0x68] sm:$0xff] %vm5185_vm0, %v5182_v3  ;;  %vm13921_vm0 = vcmask 310448  }
 0xc6c   :  { %v5146_v62 = vpop.permute.xlu1 %5145  ;;  %v5155_v21 = vpop.permute.xlu0 %5154 }
 0xc6d   :  { %5151 = vst.msk [vmem:[#allocation4 + $0x60] sm:$0xff] %vm5149_vm5, %v5146_v62  ;;  %6126 = vrot.lane.b32.xlu0 %v5296_v59, %s9249_s3 }
 0xc6e   :  { %5893 = vrot.lane.b32.xlu1 %v11213_v37, %s9251_s24  ;;  %5160 = vst.msk [vmem:[#allocation4 + $0x60] sm:$0xff] %vm5158_vm2, %v5155_v21  ;;  %v11279_v21 = vld [vmem:[#allocation4 + $0x38] sm:$0xff] }
 0xc6f   :  { %13919 = vst [vmem:[#allocation99_spill] sm:$0xff] %v11279_v21 }
 0xc70   :  { %v5191_v19 = vpop.permute.xlu1 %5190  ;;  %v5200_v53 = vpop.permute.xlu0 %5199 }
 0xc71   :  { %5196 = vst.msk [vmem:[#allocation4 + $0x68] sm:$0xff] %vm5194_vm8, %v5191_v19  ;;  %6047 = vrot.lane.b32.xlu0 %v5296_v59, %s9230_s29 }
 0xc72   :  { %5968 = vrot.lane.b32.xlu1 %v5296_v59, %s9250_s14  ;;  %5205 = vst.msk [vmem:[#allocation4 + $0x68] sm:$0xff] %vm5203_vm10, %v5200_v53  ;;  %vm13987_vm10 = vcmask 1031168  }
 0xc73   :  { %vm13989_vm2 = vmmov %vm13987_vm10 }
 0xc74   :  { %v5232_v3 = vpop.permute.xlu1 %5231  ;;  %v5164_v62 = vpop.permute.xlu0 %5163 }
 0xc75   :  { %5240 = vst.msk [vmem:[#allocation4 + $0x88] sm:$0xff] %vm5237_vm7, %v5232_v3  ;;  %5889 = vrot.lane.b32.xlu0 %v5296_v59, %s9251_s24  ;;  %vm13991_vm7 = vcmask 1039360  }
 0xc76   :  { %5169 = vst.msk [vmem:[#allocation4 + $0x60] sm:$0xff] %vm5167_vm12, %v5164_v62  ;;  %5818 = vrot.lane.b32.xlu1 %v5300_v5, %s9242_s30  ;;  %vm13990_vm12 = vmmov %vm13989_vm2 }
 0xc78   :  { %v5223_v19 = vpop.permute.xlu1 %5222  ;;  %v5209_v2 = vpop.permute.xlu0 %5208 }
 0xc79   :  { %5228 = vst.msk [vmem:[#allocation4 + $0x80] sm:$0xff] %vm5226_vm14, %v5223_v19  ;;  %5743 = vrot.lane.b32.xlu0 %v11279_v21, %s9234_s19  ;;  %vm13719_vm14 = vcmask 818176  }
 0xc7a   :  { %5216 = vst.msk [vmem:[#allocation4 + $0x68] sm:$0xff] %vm5212_vm13, %v5209_v2  ;;  %5739 = vrot.lane.b32.xlu1 %v5300_v5, %s9234_s19  ;;  %vm13988_vm13 = vmmov %vm13987_vm10 }
 0xc7b   :  { %5217 = vst.msk [vmem:[#allocation4 + $0x70] sm:$0xff] %vm13920_vm4, %v5209_v2  ;;  %vm13992_vm4 = vmmov %vm13991_vm7 }
 0xc7c   :  { %5239 = vst.msk [vmem:[#allocation4 + $0x80] sm:$0xff] %vm5235_vm6, %v5232_v3  ;;  %v5262_v59 = vpop.permute.xlu1 %5261  ;;  %v5244_v53 = vpop.permute.xlu0 %5243  ;;  %vm13983_vm6 = vcmask 1022976  }
 0xc7d   :  { %5249 = vst.msk [vmem:[#allocation4 + $0x88] sm:$0xff] %vm13921_vm0, %v5244_v53  ;;  %5664 = vrot.lane.b32.xlu0 %v11279_v21, %s9243_s26  ;;  %v11306_v53 = vld [vmem:[#allocation4 + $0x10] sm:$0xff]  ;;  %v11386_v31 = vld [vmem:[#allocation4 + $0x60] sm:$0xff]  ;;  %vm13984_vm5 = vmmov %vm13983_vm6 }
 0xc7e   :  { %5660 = vrot.lane.b32.xlu1 %v5300_v5, %s9243_s26  ;;  %13929 = vst [vmem:[#allocation107_spill] sm:$0xff] %v11386_v31  ;;  %vm13985_vm8 = vmmov %vm13984_vm5 }
 0xc7f   :  { %vm13993_vm0 = vmmov %vm13992_vm4 }
 0xc80   :  { %v5271_v62 = vpop.permute.xlu1 %5270  ;;  %v5253_v19 = vpop.permute.xlu0 %5252 }
 0xc81   :  { %5258 = vst.msk [vmem:[#allocation4 + $0x88] sm:$0xff] %vm5256_vm15, %v5253_v19  ;;  %5585 = vrot.lane.b32.xlu0 %v11279_v21, %s9244_s9  ;;  %vm5769_vm15 = vcmask 801792  }
 0xc82   :  { %5581 = vrot.lane.b32.xlu1 %v5300_v5, %s9244_s9  ;;  %5267 = vst.msk [vmem:[#allocation4 + $0x88] sm:$0xff] %vm5265_vm3, %v5262_v59  ;;  %v5301_v59 = vld [vmem:[#allocation4 + $0x30] sm:$0xff]  ;;  %vm5848_vm3 = vcmask 793600  }
 0xc83   :  { %5276 = vst.msk [vmem:[#allocation4 + $0x88] sm:$0xff] %vm5274_vm1, %v5271_v62  ;;  %vm5124_vm1 = vcmask 113664   ;;  %v11319_v62 = vld [vmem:[#allocation4] sm:$0xff] }
 0xc84   :  { %v5289_v2 = vpop.permute.xlu1 %5288  ;;  %v5280_v3 = vpop.permute.xlu0 %5279  ;;  %5136 = vst.msk [vmem:[#allocation4 + $0xa8] sm:$0xff] %vm5124_vm1, %v11319_v62  ;;  %5125 = vst.msk [vmem:[#allocation4 + $0x50] sm:$0xff] %vm5124_vm1, %v11319_v62 }
 0xc85   :  { %5285 = vst.msk [vmem:[#allocation4 + $0x90] sm:$0xff] %vm5283_vm9, %v5280_v3  ;;  %5507 = vrot.lane.b32.xlu0 %v11279_v21, %s9215_s11  ;;  %vm13986_vm9 = vmmov %vm13984_vm5 }
 0xc86   :  { %5503 = vrot.lane.b32.xlu1 %v5300_v5, %s9215_s11  ;;  %5294 = vst.msk [vmem:[#allocation4 + $0x90] sm:$0xff] %vm5292_vm11, %v5289_v2  ;;  %vm5690_vm11 = vcmask 809984   ;;  %vm13994_vm1 = vmmov %vm13993_vm0 }
 0xc89   :  { %5429 = vrot.lane.b32.xlu0 %v11279_v21, %s9213_s10 }
 0xc8a   :  { %5425 = vrot.lane.b32.xlu1 %v5300_v5, %s9213_s10 }
 0xc8d   :  { %5970 = vrot.lane.b32.xlu0 %v11306_v53, %s9250_s14 }
 0xc8e   :  { %5347 = vrot.lane.b32.xlu1 %v5300_v5, %s9211_s28 }
 0xc91   :  { %5820 = vrot.lane.b32.xlu0 %v5301_v59, %s9242_s30 }
 0xc92   :  { %6470 = vrot.lane.b32.xlu1 %v5300_v5, %s9245_s13 }
 0xc95   :  { %5741 = vrot.lane.b32.xlu0 %v5301_v59, %s9234_s19 }
 0xc96   :  { %6385 = vrot.lane.b32.xlu1 %v5300_v5, %s9246_s17 }
 0xc99   :  { %5662 = vrot.lane.b32.xlu0 %v5301_v59, %s9243_s26 }
 0xc9a   :  { %6300 = vrot.lane.b32.xlu1 %v5300_v5, %s9247_s21 }
 0xc9d   :  { %5583 = vrot.lane.b32.xlu0 %v5301_v59, %s9244_s9 }
 0xc9e   :  { %6215 = vrot.lane.b32.xlu1 %v5300_v5, %s9248_s25 }
 0xca1   :  { %5505 = vrot.lane.b32.xlu0 %v5301_v59, %s9215_s11 }
 0xca2   :  { %6134 = vrot.lane.b32.xlu1 %v5300_v5, %s9249_s3 }
 0xca5   :  { %5427 = vrot.lane.b32.xlu0 %v5301_v59, %s9213_s10 }
 0xca6   :  { %6055 = vrot.lane.b32.xlu1 %v5300_v5, %s9230_s29 }
 0xca9   :  { %5349 = vrot.lane.b32.xlu0 %v5301_v59, %s9211_s28 }
 0xcaa   :  { %5976 = vrot.lane.b32.xlu1 %v5300_v5, %s9250_s14 }
 0xcac   :  { %v11329_v19 = vpop.permute.xlu1 %5735  ;;  %v11333_v2 = vpop.permute.xlu0 %5814 }
 0xcad   :  { %6472 = vrot.lane.b32.xlu0 %v5301_v59, %s9245_s13 }
 0xcae   :  { %5897 = vrot.lane.b32.xlu1 %v5300_v5, %s9251_s24 }
 0xcb0   :  { %v11335_v3 = vpop.permute.xlu1 %5656 }
 0xcb1   :  { %6387 = vrot.lane.b32.xlu0 %v5301_v59, %s9246_s17 }
 0xcb2   :  { %5822 = vrot.lane.b32.xlu1 %v11279_v21, %s9242_s30 }
 0xcb3   :  { %v11342_v45 = vpop.permute.xlu0 %5810 }
 0xcb4   :  { %v11340_v52 = vpop.permute.xlu1 %5577  ;;  %13922 = vst [vmem:[#allocation100_spill] sm:$0xff] %v11342_v45  ;;  %v11634_v45 = vld [vmem:[#allocation4 + $0x88] sm:$0xff] }
 0xcb5   :  { %6302 = vrot.lane.b32.xlu0 %v5301_v59, %s9247_s21 }
 0xcb6   :  { %5812 = vrot.lane.b32.xlu1 %v11306_v53, %s9242_s30 }
 0xcb7   :  { %v11349_v14 = vpop.permute.xlu0 %5731 }
 0xcb8   :  { %v11347_v5 = vpop.permute.xlu1 %5499  ;;  %13923 = vst [vmem:[#allocation101_spill] sm:$0xff] %v11349_v14 }
 0xcb9   :  { %6217 = vrot.lane.b32.xlu0 %v5301_v59, %s9248_s25 }
 0xcba   :  { %5733 = vrot.lane.b32.xlu1 %v11306_v53, %s9234_s19 }
 0xcbb   :  { %v11356_v4 = vpop.permute.xlu0 %5652 }
 0xcbc   :  { %v11354_v46 = vpop.permute.xlu1 %5421  ;;  %13924 = vst [vmem:[#allocation102_spill] sm:$0xff] %v11356_v4  ;;  %v11582_v4 = vld [vmem:[#allocation4 + $0x50] sm:$0xff] }
 0xcbd   :  { %6136 = vrot.lane.b32.xlu0 %v5301_v59, %s9249_s3 }
 0xcbe   :  { %5654 = vrot.lane.b32.xlu1 %v11306_v53, %s9243_s26 }
 0xcbf   :  { %v11363_v39 = vpop.permute.xlu0 %5573 }
 0xcc0   :  { %v11361_v13 = vpop.permute.xlu1 %5343  ;;  %13925 = vst [vmem:[#allocation103_spill] sm:$0xff] %v11363_v39 }
 0xcc1   :  { %6057 = vrot.lane.b32.xlu0 %v5301_v59, %s9230_s29 }
 0xcc2   :  { %5575 = vrot.lane.b32.xlu1 %v11306_v53, %s9244_s9 }
 0xcc3   :  { %v11370_v58 = vpop.permute.xlu0 %5495 }
 0xcc4   :  { %v11368_v55 = vpop.permute.xlu1 %6466  ;;  %13926 = vst [vmem:[#allocation104_spill] sm:$0xff] %v11370_v58 }
 0xcc5   :  { %5978 = vrot.lane.b32.xlu0 %v5301_v59, %s9250_s14 }
 0xcc6   :  { %5497 = vrot.lane.b32.xlu1 %v11306_v53, %s9215_s11 }
 0xcc7   :  { %v11377_v49 = vpop.permute.xlu0 %5417 }
 0xcc8   :  { %v11375_v20 = vpop.permute.xlu1 %6381  ;;  %13927 = vst [vmem:[#allocation105_spill] sm:$0xff] %v11377_v49 }
 0xcc9   :  { %5899 = vrot.lane.b32.xlu0 %v5301_v59, %s9251_s24  ;;  %v11396_v59 = vld [vmem:[#allocation4 + $0x68] sm:$0xff] }
 0xcca   :  { %5419 = vrot.lane.b32.xlu1 %v11306_v53, %s9213_s10 }
 0xccb   :  { %v11384_v34 = vpop.permute.xlu0 %5339 }
 0xccc   :  { %v11382_v51 = vpop.permute.xlu1 %6296  ;;  %13928 = vst [vmem:[#allocation106_spill] sm:$0xff] %v11384_v34 }
 0xccd   :  { %5909 = vrot.lane.b32.xlu0 %v11386_v31, %s9251_s24 }
 0xcce   :  { %5341 = vrot.lane.b32.xlu1 %v11306_v53, %s9211_s28 }
 0xccf   :  { %v11394_v17 = vpop.permute.xlu0 %6462 }
 0xcd0   :  { %v11392_v60 = vpop.permute.xlu1 %6211  ;;  %13930 = vst [vmem:[#allocation108_spill] sm:$0xff] %v11394_v17 }
 0xcd1   :  { %5832 = vrot.lane.b32.xlu0 %v11396_v59, %s9242_s30 }
 0xcd2   :  { %6464 = vrot.lane.b32.xlu1 %v11306_v53, %s9245_s13 }
 0xcd3   :  { %v11404_v34 = vpop.permute.xlu0 %6377 }
 0xcd4   :  { %v11402_v48 = vpop.permute.xlu1 %6130  ;;  %13932 = vst [vmem:[#allocation110_spill] sm:$0xff] %v11404_v34 }
 0xcd5   :  { %13931 = vst [vmem:[#allocation109_spill] sm:$0xff] %v11402_v48  ;;  %5753 = vrot.lane.b32.xlu0 %v11396_v59, %s9234_s19  ;;  %v11686_v48 = vld [vmem:[#allocation4 + $0x80] sm:$0xff] }
 0xcd6   :  { %6379 = vrot.lane.b32.xlu1 %v11306_v53, %s9246_s17 }
 0xcd7   :  { %v11412_v17 = vpop.permute.xlu0 %6292 }
 0xcd8   :  { %v11410_v49 = vpop.permute.xlu1 %6051  ;;  %13934 = vst [vmem:[#allocation112_spill] sm:$0xff] %v11412_v17 }
 0xcd9   :  { %13933 = vst [vmem:[#allocation111_spill] sm:$0xff] %v11410_v49  ;;  %5674 = vrot.lane.b32.xlu0 %v11396_v59, %s9243_s26 }
 0xcda   :  { %6294 = vrot.lane.b32.xlu1 %v11306_v53, %s9247_s21 }
 0xcdb   :  { %v11420_v25 = vpop.permute.xlu0 %6207 }
 0xcdc   :  { %v11418_v58 = vpop.permute.xlu1 %5972  ;;  %13936 = vst [vmem:[#allocation114_spill] sm:$0xff] %v11420_v25 }
 0xcdd   :  { %13935 = vst [vmem:[#allocation113_spill] sm:$0xff] %v11418_v58  ;;  %5595 = vrot.lane.b32.xlu0 %v11396_v59, %s9244_s9 }
 0xcde   :  { %6209 = vrot.lane.b32.xlu1 %v11306_v53, %s9248_s25 }
 0xcdf   :  { %v11428_v24 = vpop.permute.xlu0 %6126 }
 0xce0   :  { %v11426_v34 = vpop.permute.xlu1 %5893  ;;  %13938 = vst [vmem:[#allocation116_spill] sm:$0xff] %v11428_v24 }
 0xce1   :  { %13937 = vst [vmem:[#allocation115_spill] sm:$0xff] %v11426_v34  ;;  %5517 = vrot.lane.b32.xlu0 %v11396_v59, %s9215_s11 }
 0xce2   :  { %6128 = vrot.lane.b32.xlu1 %v11306_v53, %s9249_s3 }
 0xce3   :  { %v11436_v39 = vpop.permute.xlu0 %6047 }
 0xce4   :  { %v11434_v17 = vpop.permute.xlu1 %5968  ;;  %13940 = vst [vmem:[#allocation118_spill] sm:$0xff] %v11436_v39  ;;  %v11454_v39 = vld [vmem:[#allocation4 + $0x70] sm:$0xff] }
 0xce5   :  { %13939 = vst [vmem:[#allocation117_spill] sm:$0xff] %v11434_v17  ;;  %5439 = vrot.lane.b32.xlu0 %v11396_v59, %s9213_s10 }
 0xce6   :  { %6049 = vrot.lane.b32.xlu1 %v11306_v53, %s9230_s29 }
 0xce7   :  { %v11444_v34 = vpop.permute.xlu0 %5889 }
 0xce8   :  { %v11442_v25 = vpop.permute.xlu1 %5818  ;;  %13942 = vst [vmem:[#allocation120_spill] sm:$0xff] %v11444_v34 }
 0xce9   :  { %13941 = vst [vmem:[#allocation119_spill] sm:$0xff] %v11442_v25  ;;  %5361 = vrot.lane.b32.xlu0 %v11396_v59, %s9211_s28 }
 0xcea   :  { %5891 = vrot.lane.b32.xlu1 %v11306_v53, %s9251_s24 }
 0xceb   :  { %v11452_v17 = vpop.permute.xlu0 %5743 }
 0xcec   :  { %v11450_v24 = vpop.permute.xlu1 %5739  ;;  %13944 = vst [vmem:[#allocation122_spill] sm:$0xff] %v11452_v17 }
 0xced   :  { %13943 = vst [vmem:[#allocation121_spill] sm:$0xff] %v11450_v24  ;;  %6486 = vrot.lane.b32.xlu0 %v11396_v59, %s9245_s13 }
 0xcee   :  { %5834 = vrot.lane.b32.xlu1 %v11454_v39, %s9242_s30 }
 0xcef   :  { %v11462_v34 = vpop.permute.xlu0 %5664 }
 0xcf0   :  { %v11460_v25 = vpop.permute.xlu1 %5660  ;;  %13946 = vst [vmem:[#allocation124_spill] sm:$0xff] %v11462_v34 }
 0xcf1   :  { %13945 = vst [vmem:[#allocation123_spill] sm:$0xff] %v11460_v25  ;;  %6401 = vrot.lane.b32.xlu0 %v11396_v59, %s9246_s17 }
 0xcf2   :  { %5755 = vrot.lane.b32.xlu1 %v11454_v39, %s9234_s19 }
 0xcf3   :  { %v11470_v17 = vpop.permute.xlu0 %5585 }
 0xcf4   :  { %v11468_v24 = vpop.permute.xlu1 %5581  ;;  %13948 = vst [vmem:[#allocation126_spill] sm:$0xff] %v11470_v17 }
 0xcf5   :  { %13947 = vst [vmem:[#allocation125_spill] sm:$0xff] %v11468_v24  ;;  %6316 = vrot.lane.b32.xlu0 %v11396_v59, %s9247_s21 }
 0xcf6   :  { %5676 = vrot.lane.b32.xlu1 %v11454_v39, %s9243_s26 }
 0xcf7   :  { %v11478_v25 = vpop.permute.xlu0 %5507 }
 0xcf8   :  { %v11476_v6 = vpop.permute.xlu1 %5503  ;;  %13950 = vst [vmem:[#allocation128_spill] sm:$0xff] %v11478_v25 }
 0xcf9   :  { %13949 = vst [vmem:[#allocation127_spill] sm:$0xff] %v11476_v6  ;;  %6231 = vrot.lane.b32.xlu0 %v11396_v59, %s9248_s25 }
 0xcfa   :  { %5597 = vrot.lane.b32.xlu1 %v11454_v39, %s9244_s9 }
 0xcfb   :  { %v11486_v24 = vpop.permute.xlu0 %5429 }
 0xcfc   :  { %v11484_v34 = vpop.permute.xlu1 %5425  ;;  %13952 = vst [vmem:[#allocation130_spill] sm:$0xff] %v11486_v24 }
 0xcfd   :  { %13951 = vst [vmem:[#allocation129_spill] sm:$0xff] %v11484_v34  ;;  %6148 = vrot.lane.b32.xlu0 %v11396_v59, %s9249_s3 }
 0xcfe   :  { %5519 = vrot.lane.b32.xlu1 %v11454_v39, %s9215_s11 }
 0xcff   :  { %v11494_v6 = vpop.permute.xlu0 %5970 }
 0xd00   :  { %v11492_v17 = vpop.permute.xlu1 %5347  ;;  %13954 = vst [vmem:[#allocation132_spill] sm:$0xff] %v11494_v6 }
 0xd01   :  { %13953 = vst [vmem:[#allocation131_spill] sm:$0xff] %v11492_v17  ;;  %6069 = vrot.lane.b32.xlu0 %v11396_v59, %s9230_s29 }
 0xd02   :  { %5441 = vrot.lane.b32.xlu1 %v11454_v39, %s9213_s10 }
 0xd03   :  { %v11502_v34 = vpop.permute.xlu0 %5820 }
 0xd04   :  { %v11500_v25 = vpop.permute.xlu1 %6470  ;;  %13956 = vst [vmem:[#allocation134_spill] sm:$0xff] %v11502_v34 }
 0xd05   :  { %13955 = vst [vmem:[#allocation133_spill] sm:$0xff] %v11500_v25  ;;  %5990 = vrot.lane.b32.xlu0 %v11396_v59, %s9250_s14 }
 0xd06   :  { %5363 = vrot.lane.b32.xlu1 %v11454_v39, %s9211_s28 }
 0xd07   :  { %v11510_v17 = vpop.permute.xlu0 %5741 }
 0xd08   :  { %v11508_v24 = vpop.permute.xlu1 %6385  ;;  %13958 = vst [vmem:[#allocation136_spill] sm:$0xff] %v11510_v17 }
 0xd09   :  { %13957 = vst [vmem:[#allocation135_spill] sm:$0xff] %v11508_v24  ;;  %5511 = vrot.lane.b32.xlu0 %v11319_v62, %s9215_s11 }
 0xd0a   :  { %6488 = vrot.lane.b32.xlu1 %v11454_v39, %s9245_s13 }
 0xd0b   :  { %v11518_v25 = vpop.permute.xlu0 %5662 }
 0xd0c   :  { %v11516_v15 = vpop.permute.xlu1 %6300  ;;  %13960 = vst [vmem:[#allocation138_spill] sm:$0xff] %v11518_v25 }
 0xd0d   :  { %13959 = vst [vmem:[#allocation137_spill] sm:$0xff] %v11516_v15  ;;  %5373 = vrot.lane.b32.xlu0 %v11319_v62, %s9211_s28 }
 0xd0e   :  { %6403 = vrot.lane.b32.xlu1 %v11454_v39, %s9246_s17 }
 0xd0f   :  { %v11526_v24 = vpop.permute.xlu0 %5583 }
 0xd10   :  { %v11524_v34 = vpop.permute.xlu1 %6215  ;;  %13962 = vst [vmem:[#allocation140_spill] sm:$0xff] %v11526_v24 }
 0xd11   :  { %13961 = vst [vmem:[#allocation139_spill] sm:$0xff] %v11524_v34  ;;  %5351 = vrot.lane.b32.xlu0 %v11279_v21, %s9211_s28 }
 0xd12   :  { %6318 = vrot.lane.b32.xlu1 %v11454_v39, %s9247_s21 }
 0xd13   :  { %v11534_v15 = vpop.permute.xlu0 %5505 }
 0xd14   :  { %v11532_v17 = vpop.permute.xlu1 %6134  ;;  %13964 = vst [vmem:[#allocation142_spill] sm:$0xff] %v11534_v15 }
 0xd15   :  { %13963 = vst [vmem:[#allocation141_spill] sm:$0xff] %v11532_v17  ;;  %5433 = vrot.lane.b32.xlu0 %v11319_v62, %s9213_s10 }
 0xd16   :  { %6233 = vrot.lane.b32.xlu1 %v11454_v39, %s9248_s25 }
 0xd17   :  { %v11542_v34 = vpop.permute.xlu0 %5427 }
 0xd18   :  { %v11540_v25 = vpop.permute.xlu1 %6055  ;;  %13966 = vst [vmem:[#allocation144_spill] sm:$0xff] %v11542_v34  ;;  %v11564_v34 = vld [vmem:[#allocation4 + $0xa8] sm:$0xff] }
 0xd19   :  { %13965 = vst [vmem:[#allocation143_spill] sm:$0xff] %v11540_v25  ;;  %5355 = vrot.lane.b32.xlu0 %v11319_v62, %s9211_s28 }
 0xd1a   :  { %6150 = vrot.lane.b32.xlu1 %v11454_v39, %s9249_s3 }
 0xd1b   :  { %v11550_v17 = vpop.permute.xlu0 %5349 }
 0xd1c   :  { %v11548_v24 = vpop.permute.xlu1 %5976  ;;  %13968 = vst [vmem:[#allocation146_spill] sm:$0xff] %v11550_v17 }
 0xd1d   :  { %13967 = vst [vmem:[#allocation145_spill] sm:$0xff] %v11548_v24  ;;  %6498 = vrot.lane.b32.xlu0 %v11319_v62, %s9245_s13 }
 0xd1e   :  { %6071 = vrot.lane.b32.xlu1 %v11454_v39, %s9230_s29 }
 0xd1f   :  { %v11558_v25 = vpop.permute.xlu0 %6472 }
 0xd20   :  { %v11556_v15 = vpop.permute.xlu1 %5897  ;;  %13970 = vst [vmem:[#allocation148_spill] sm:$0xff] %v11558_v25 }
 0xd21   :  { %13969 = vst [vmem:[#allocation147_spill] sm:$0xff] %v11556_v15  ;;  %6476 = vrot.lane.b32.xlu0 %v11319_v62, %s9245_s13 }
 0xd22   :  { %5992 = vrot.lane.b32.xlu1 %v11454_v39, %s9250_s14 }
 0xd23   :  { %v11568_v17 = vpop.permute.xlu0 %6387 }
 0xd24   :  { %v11566_v24 = vpop.permute.xlu1 %5822  ;;  %13972 = vst [vmem:[#allocation150_spill] sm:$0xff] %v11568_v17 }
 0xd25   :  { %13971 = vst [vmem:[#allocation149_spill] sm:$0xff] %v11566_v24  ;;  %6502 = vrot.lane.b32.xlu0 %v11564_v34, %s9245_s13 }
 0xd26   :  { %5913 = vrot.lane.b32.xlu1 %v11454_v39, %s9251_s24 }
 0xd27   :  { %v11576_v25 = vpop.permute.xlu0 %6302 }
 0xd28   :  { %v11574_v15 = vpop.permute.xlu1 %5812  ;;  %13973 = vst [vmem:[#allocation151_spill] sm:$0xff] %v11576_v25 }
 0xd29   :  { %6413 = vrot.lane.b32.xlu0 %v11319_v62, %s9246_s17 }
 0xd2a   :  { %5830 = vrot.lane.b32.xlu1 %v11386_v31, %s9242_s30 }
 0xd2b   :  { %v11586_v17 = vpop.permute.xlu0 %6217 }
 0xd2c   :  { %v11584_v24 = vpop.permute.xlu1 %5733  ;;  %13974 = vst [vmem:[#allocation152_spill] sm:$0xff] %v11586_v17 }
 0xd2d   :  { %6480 = vrot.lane.b32.xlu0 %v11582_v4, %s9245_s13 }
 0xd2e   :  { %5751 = vrot.lane.b32.xlu1 %v11386_v31, %s9234_s19 }
 0xd2f   :  { %v11594_v25 = vpop.permute.xlu0 %6136 }
 0xd30   :  { %v11592_v21 = vpop.permute.xlu1 %5654  ;;  %13975 = vst [vmem:[#allocation153_spill] sm:$0xff] %v11594_v25 }
 0xd31   :  { %6391 = vrot.lane.b32.xlu0 %v11319_v62, %s9246_s17 }
 0xd32   :  { %5672 = vrot.lane.b32.xlu1 %v11386_v31, %s9243_s26 }
 0xd33   :  { %v11602_v27 = vpop.permute.xlu0 %6057 }
 0xd34   :  { %v11600_v36 = vpop.permute.xlu1 %5575  ;;  %13976 = vst [vmem:[#allocation154_spill] sm:$0xff] %v11602_v27 }
 0xd35   :  { %6417 = vrot.lane.b32.xlu0 %v11564_v34, %s9246_s17 }
 0xd36   :  { %5593 = vrot.lane.b32.xlu1 %v11386_v31, %s9244_s9 }
 0xd37   :  { %v11610_v14 = vpop.permute.xlu0 %5978 }
 0xd38   :  { %v11608_v17 = vpop.permute.xlu1 %5497  ;;  %13977 = vst [vmem:[#allocation155_spill] sm:$0xff] %v11610_v14 }
 0xd39   :  { %6328 = vrot.lane.b32.xlu0 %v11319_v62, %s9247_s21 }
 0xd3a   :  { %5515 = vrot.lane.b32.xlu1 %v11386_v31, %s9215_s11 }
 0xd3b   :  { %v11618_v41 = vpop.permute.xlu0 %5899 }
 0xd3c   :  { %v11616_v25 = vpop.permute.xlu1 %5419  ;;  %13978 = vst [vmem:[#allocation156_spill] sm:$0xff] %v11618_v41 }
 0xd3d   :  { %6395 = vrot.lane.b32.xlu0 %v11582_v4, %s9246_s17 }
 0xd3e   :  { %5437 = vrot.lane.b32.xlu1 %v11386_v31, %s9213_s10 }
 0xd3f   :  { %v11626_v8 = vpop.permute.xlu0 %5909 }
 0xd40   :  { %v11624_v27 = vpop.permute.xlu1 %5341  ;;  %13979 = vst [vmem:[#allocation157_spill] sm:$0xff] %v11626_v8 }
 0xd41   :  { %6306 = vrot.lane.b32.xlu0 %v11319_v62, %s9247_s21 }
 0xd42   :  { %5359 = vrot.lane.b32.xlu1 %v11386_v31, %s9211_s28 }
 0xd43   :  { %v11636_v41 = vpop.permute.xlu0 %5832 }
 0xd44   :  { %v11632_v14 = vpop.permute.xlu1 %6464 }
 0xd45   :  { %5840 = vrot.lane.b32.xlu0 %v11634_v45, %s9242_s30 }
 0xd46   :  { %6484 = vrot.lane.b32.xlu1 %v11386_v31, %s9245_s13 }
 0xd47   :  { %v11648_v8 = vpop.permute.xlu0 %5753 }
 0xd48   :  { %v11642_v16 = vpop.permute.xlu1 %6379 }
 0xd49   :  { %5761 = vrot.lane.b32.xlu0 %v11634_v45, %s9234_s19 }
 0xd4a   :  { %6399 = vrot.lane.b32.xlu1 %v11386_v31, %s9246_s17 }
 0xd4b   :  { %v11658_v58 = vpop.permute.xlu0 %5674 }
 0xd4c   :  { %v11650_v7 = vpop.permute.xlu1 %6294 }
 0xd4d   :  { %5682 = vrot.lane.b32.xlu0 %v11634_v45, %s9243_s26 }
 0xd4e   :  { %6314 = vrot.lane.b32.xlu1 %v11386_v31, %s9247_s21 }
 0xd4f   :  { %v11670_v26 = vpop.permute.xlu0 %5595 }
 0xd50   :  { %v11656_v6 = vpop.permute.xlu1 %6209 }
 0xd51   :  { %5603 = vrot.lane.b32.xlu0 %v11634_v45, %s9244_s9 }
 0xd52   :  { %6229 = vrot.lane.b32.xlu1 %v11386_v31, %s9248_s25 }
 0xd53   :  { %v11680_v18 = vpop.permute.xlu0 %5517 }
 0xd54   :  { %v11664_v50 = vpop.permute.xlu1 %6128 }
 0xd55   :  { %13980 = vst [vmem:[#allocation158_spill] sm:$0xff] %v11664_v50  ;;  %5525 = vrot.lane.b32.xlu0 %v11634_v45, %s9215_s11 }
 0xd56   :  { %6146 = vrot.lane.b32.xlu1 %v11386_v31, %s9249_s3 }
 0xd58   :  { %v11672_v49 = vpop.permute.xlu1 %6049 }
 0xd59   :  { %13981 = vst [vmem:[#allocation159_spill] sm:$0xff] %v11672_v49  ;;  %5447 = vrot.lane.b32.xlu0 %v11634_v45, %s9213_s10 }
 0xd5a   :  { %6067 = vrot.lane.b32.xlu1 %v11386_v31, %s9230_s29 }
 0xd5c   :  { %v11678_v32 = vpop.permute.xlu1 %5891 }
 0xd5d   :  { %13982 = vst [vmem:[#allocation160_spill] sm:$0xff] %v11678_v32  ;;  %5369 = vrot.lane.b32.xlu0 %v11634_v45, %s9211_s28  ;;  %v11694_v32 = vpop.permute.xlu0 %5439 }
 0xd5e   :  { %5988 = vrot.lane.b32.xlu1 %v11386_v31, %s9250_s14  ;;  %v5852_v31 = vsel %vm5848_vm3, %v11333_v2, %v11149_v43 }
 0xd60   :  { %v5835_v50 = vpop.permute.xlu1 %5834 }
 0xd61   :  { %v5861_v49 = vsel %vm5848_vm3, %v5835_v50, %v10973_v44  ;;  %v5860_v57 = vsel %vm5848_vm3, %v11636_v41, %v5835_v50  ;;  %6332 = vrot.lane.b32.xlu0 %v11564_v34, %s9247_s21  ;;  %v5851_v50 = vsel %vm5848_vm3, %v11574_v15, %v11333_v2  ;;  %v5772_v2 = vsel %vm5769_vm15, %v11584_v24, %v11329_v19 }
 0xd62   :  { %5838 = vrot.lane.b32.xlu1 %v11686_v48, %s9242_s30  ;;  %6624 = vmatprep.subr.mxu1 %v5861_v49 }
 0xd63   :  { %6625 = vmatpush1.msra.mxu1 %v5860_v57  ;;  %v5773_v57 = vsel %vm5769_vm15, %v11329_v19, %v10981_v22  ;;  %v5694_v19 = vsel %vm5690_vm11, %v11335_v3, %v10985_v56 }
 0xd64   :  { %v5756_v28 = vpop.permute.xlu1 %5755  ;;  %6626 = vmatprep.subr.mxu1 %v5852_v31 }
 0xd65   :  { %6627 = vmatpush1.msra.mxu1 %v5851_v50  ;;  %v5782_v49 = vsel %vm5769_vm15, %v5756_v28, %v10979_v61  ;;  %v5781_v44 = vsel %vm5769_vm15, %v11648_v8, %v5756_v28  ;;  %6494 = vrot.lane.b32.xlu0 %v11634_v45, %s9245_s13  ;;  %v11718_v28 = vpop.permute.xlu0 %5361 }
 0xd66   :  { %5759 = vrot.lane.b32.xlu1 %v11686_v48, %s9234_s19  ;;  %6628 = vmatprep.subr.mxu1 %v5782_v49 }
 0xd67   :  { %6629 = vmatpush1.msra.mxu1 %v5781_v44 }
 0xd68   :  { %v5677_v31 = vpop.permute.xlu1 %5676  ;;  %6630 = vmatprep.subr.mxu1 %v5773_v57  ;;  %v5693_v57 = vsel %vm5690_vm11, %v11592_v21, %v11335_v3  ;;  %v5615_v3 = vsel %vm13719_vm14, %v11340_v52, %v10989_v0 }
 0xd69   :  { %6631 = vmatpush1.msra.mxu1 %v5772_v2  ;;  %v5703_v50 = vsel %vm5690_vm11, %v5677_v31, %v10983_v23  ;;  %v5702_v44 = vsel %vm5690_vm11, %v11658_v58, %v5677_v31  ;;  %6409 = vrot.lane.b32.xlu0 %v11634_v45, %s9246_s17 }
 0xd6a   :  { %5680 = vrot.lane.b32.xlu1 %v11686_v48, %s9243_s26  ;;  %6632 = vmatprep.subr.mxu1 %v5703_v50  ;;  %v11740_v50 = vpop.permute.xlu0 %6486 }
 0xd6b   :  { %6633 = vmatpush1.msra.mxu1 %v5702_v44 }
 0xd6c   :  { %v5598_v49 = vpop.permute.xlu1 %5597  ;;  %6634 = vmatprep.subr.mxu1 %v5694_v19  ;;  %v5614_v19 = vsel %vm13719_vm14, %v11600_v36, %v11340_v52 }
 0xd6d   :  { %6635 = vmatpush1.msra.mxu1 %v5693_v57  ;;  %v5624_v31 = vsel %vm13719_vm14, %v5598_v49, %v10987_v40  ;;  %v5623_v2 = vsel %vm13719_vm14, %v11670_v26, %v5598_v49  ;;  %6324 = vrot.lane.b32.xlu0 %v11634_v45, %s9247_s21 }
 0xd6e   :  { %5601 = vrot.lane.b32.xlu1 %v11686_v48, %s9244_s9  ;;  %6636 = vmatprep.subr.mxu1 %v5624_v31  ;;  %v5536_v31 = vsel %vm13985_vm8, %v11347_v5, %v10993_v47  ;;  %vm6334_vm8 = vcmask 351232  }
 0xd6f   :  { %6637 = vmatpush1.msra.mxu1 %v5623_v2  ;;  %v5535_v2 = vsel %vm13986_vm9, %v11608_v17, %v11347_v5  ;;  %v5458_v5 = vsel %vm13989_vm2, %v11354_v46, %v10997_v35  ;;  %vm6249_vm9 = vcmask 359424   ;;  %vm6006_vm2 = vcmask 580608  }
 0xd70   :  { %v5520_v44 = vpop.permute.xlu1 %5519  ;;  %6638 = vmatprep.subr.mxu1 %v5615_v3  ;;  %v11764_v3 = vpop.permute.xlu0 %6401 }
 0xd71   :  { %6639 = vmatpush1.msra.mxu1 %v5614_v19  ;;  %v5545_v49 = vsel %vm13983_vm6, %v5520_v44, %v10991_v12  ;;  %v5544_v57 = vsel %vm13984_vm5, %v11680_v18, %v5520_v44  ;;  %6239 = vrot.lane.b32.xlu0 %v11634_v45, %s9248_s25  ;;  %vm6504_vm6 = vcmask 334848   ;;  %vm6419_vm5 = vcmask 343040  }
 0xd72   :  { %5523 = vrot.lane.b32.xlu1 %v11686_v48, %s9215_s11  ;;  %6640 = vmatprep.subr.mxu1 %v5545_v49 }
 0xd73   :  { %6641 = vmatpush1.msra.mxu1 %v5544_v57  ;;  %v5457_v57 = vsel %vm13990_vm12, %v11616_v25, %v11354_v46  ;;  %v5380_v46 = vsel %vm13993_vm0, %v11361_v13, %v11015_v29  ;;  %vm5927_vm12 = vcmask 588800  }
 0xd74   :  { %v5442_v52 = vpop.permute.xlu1 %5441  ;;  %6642 = vmatprep.subr.mxu1 %v5536_v31 }
 0xd75   :  { %6643 = vmatpush1.msra.mxu1 %v5535_v2  ;;  %v5467_v44 = vsel %vm13987_vm10, %v5442_v52, %v10995_v9  ;;  %v5466_v19 = vsel %vm13988_vm13, %v11694_v32, %v5442_v52  ;;  %6156 = vrot.lane.b32.xlu0 %v11634_v45, %s9249_s3  ;;  %v11786_v2 = vpop.permute.xlu0 %6316  ;;  %vm6164_vm10 = vcmask 564224   ;;  %vm6085_vm13 = vcmask 572416  }
 0xd76   :  { %5445 = vrot.lane.b32.xlu1 %v11686_v48, %s9213_s10  ;;  %6644 = vmatprep.subr.mxu1 %v5467_v44 }
 0xd77   :  { %6645 = vmatpush1.msra.mxu1 %v5466_v19  ;;  %v5379_v19 = vsel %vm13994_vm1, %v11624_v27, %v11361_v13 }
 0xd78   :  { %v5364_v49 = vpop.permute.xlu1 %5363  ;;  %6646 = vmatprep.subr.mxu1 %v5458_v5 }
 0xd79   :  { %6647 = vmatpush1.msra.mxu1 %v5457_v57  ;;  %v5389_v31 = vsel %vm13991_vm7, %v5364_v49, %v11000_v33  ;;  %v5388_v52 = vsel %vm13992_vm4, %v11718_v28, %v5364_v49  ;;  %6077 = vrot.lane.b32.xlu0 %v11634_v45, %s9230_s29  ;;  %v11803_v49 = vpop.permute.xlu0 %6231  ;;  %vm14025_vm7 = vcmask 1022976  }
 0xd7a   :  { %5367 = vrot.lane.b32.xlu1 %v11686_v48, %s9211_s28  ;;  %6648 = vmatprep.subr.mxu1 %v5389_v31  ;;  %vm14027_vm4 = vmmov %vm14025_vm7 }
 0xd7b   :  { %6649 = vmatpush1.msra.mxu1 %v5388_v52  ;;  %vm14029_vm0 = vmmov %vm14027_vm4 }
 0xd7c   :  { %v6489_v44 = vpop.permute.xlu1 %6488  ;;  %6650 = vmatprep.subr.mxu1 %v5380_v46  ;;  %vm14032_vm1 = vmmov %vm14029_vm0 }
 0xd7d   :  { %6651 = vmatpush1.msra.mxu1 %v5379_v19  ;;  %5998 = vrot.lane.b32.xlu0 %v11634_v45, %s9250_s14  ;;  %v6518_v13 = vsel %vm6504_vm6, %v6489_v44, %v11017_v42  ;;  %v11826_v52 = vpop.permute.xlu0 %6148 }
 0xd7e   :  { %6492 = vrot.lane.b32.xlu1 %v11686_v48, %s9245_s13  ;;  %6652 = vmatprep.subr.mxu1 %v11454_v39  ;;  %v6517_v39 = vsel %vm6504_vm6, %v11740_v50, %v6489_v44  ;;  %v6422_v44 = vsel %vm6419_vm5, %v11642_v16, %v11375_v20 }
 0xd7f   :  { %6653 = vmatpush1.msra.mxu1 %v11396_v59 }
 0xd80   :  { %v6404_v5 = vpop.permute.xlu1 %6403  ;;  %6654 = vmatprep.subr.mxu1 %v11213_v37  ;;  %v6508_v37 = vsel %vm6504_vm6, %v11368_v55, %v11019_v63 }
 0xd81   :  { %6655 = vmatpush1.msra.mxu1 %v11306_v53  ;;  %5919 = vrot.lane.b32.xlu0 %v11634_v45, %s9251_s24  ;;  %v6507_v53 = vsel %vm6504_vm6, %v11632_v14, %v11368_v55  ;;  %v6433_v31 = vsel %vm6419_vm5, %v6404_v5, %v11023_v38  ;;  %v6432_v45 = vsel %vm6419_vm5, %v11764_v3, %v6404_v5 }
 0xd82   :  { %6407 = vrot.lane.b32.xlu1 %v11686_v48, %s9246_s17  ;;  %6656 = vmatprep.subr.mxu1 %v6518_v13  ;;  %v6423_v55 = vsel %vm6419_vm5, %v11375_v20, %v11028_v1  ;;  %v6338_v20 = vsel %vm6334_vm8, %v11382_v51, %v11052_v10  ;;  %v14087_v10 = vld [vmem:[#allocation160_spill] sm:$0xff] }
 0xd83   :  { %6657 = vmatpush2.msra.mxu1 %v6517_v39  ;;  %v6337_v39 = vsel %vm6334_vm8, %v11650_v7, %v11382_v51  ;;  %v6253_v51 = vsel %vm6249_vm9, %v11392_v60, %v11060_v11 }
 0xd84   :  { %v6319_v57 = vpop.permute.xlu1 %6318  ;;  %6658 = vmatprep.subr.mxu1 %v6508_v37  ;;  %v11850_v37 = vpop.permute.xlu0 %6069 }
 0xd85   :  { %6659 = vmatpush2.msra.mxu1 %v6507_v53  ;;  %6243 = vrot.lane.b32.xlu0 %v11319_v62, %s9248_s25  ;;  %v6348_v19 = vsel %vm6334_vm8, %v6319_v57, %v11042_v54  ;;  %v6347_v5 = vsel %vm6334_vm8, %v11786_v2, %v6319_v57 }
 0xd86   :  { %6322 = vrot.lane.b32.xlu1 %v11686_v48, %s9247_s21  ;;  %6660 = vmatprep.subr.mxu1 %v6433_v31 }
 0xd87   :  { %6661 = vmatpush2.msra.mxu1 %v6432_v45  ;;  %v6252_v45 = vsel %vm6249_vm9, %v11656_v6, %v11392_v60  ;;  %v13997_v60 = vld [vmem:[#allocation109_spill] sm:$0xff] }
 0xd88   :  { %v6234_v46 = vpop.permute.xlu1 %6233  ;;  %6662 = vmatprep.subr.mxu1 %v6423_v55  ;;  %v13995_v55 = vld [vmem:[#allocation63_spill] sm:$0xff] }
 0xd89   :  { %6663 = vmatpush2.msra.mxu1 %v6422_v44  ;;  %6310 = vrot.lane.b32.xlu0 %v11582_v4, %s9247_s21  ;;  %v6263_v57 = vsel %vm6249_vm9, %v6234_v46, %v11056_v30  ;;  %v6262_v53 = vsel %vm6249_vm9, %v11803_v49, %v6234_v46  ;;  %v14085_v30 = vld [vmem:[#allocation77_spill] sm:$0xff] }
 0xd8a   :  { %6237 = vrot.lane.b32.xlu1 %v11686_v48, %s9248_s25  ;;  %6664 = vmatprep.subr.mxu1 %v6348_v19  ;;  %v11872_v19 = vpop.permute.xlu0 %5990 }
 0xd8b   :  { %6665 = vmatpush2.msra.mxu1 %v6347_v5  ;;  %v13996_v5 = vld [vmem:[#allocation65_spill] sm:$0xff] }
 0xd8c   :  { %v6151_v13 = vpop.permute.xlu1 %6150  ;;  %6666 = vmatprep.subr.mxu1 %v6338_v20  ;;  %v6168_v20 = vsel %vm6164_vm10, %v13997_v60, %v13996_v5  ;;  %v11914_v5 = vld [vmem:[#allocation4 + $0x90] sm:$0xff] }
 0xd8d   :  { %6667 = vmatpush2.msra.mxu1 %v6337_v39  ;;  %6221 = vrot.lane.b32.xlu0 %v11319_v62, %s9248_s25  ;;  %v6177_v44 = vsel %vm6164_vm10, %v6151_v13, %v13995_v55  ;;  %v6176_v46 = vsel %vm6164_vm10, %v11826_v52, %v6151_v13 }
 0xd8e   :  { %6154 = vrot.lane.b32.xlu1 %v11686_v48, %s9249_s3  ;;  %6668 = vmatprep.subr.mxu1 %v6263_v57  ;;  %v13998_v57 = vld [vmem:[#allocation158_spill] sm:$0xff] }
 0xd8f   :  { %6669 = vmatpush2.msra.mxu1 %v6262_v53  ;;  %v6167_v53 = vsel %vm6164_vm10, %v13998_v57, %v13997_v60 }
 0xd90   :  { %v6072_v31 = vpop.permute.xlu1 %6071  ;;  %6670 = vmatprep.subr.mxu1 %v6253_v51  ;;  %v13999_v51 = vld [vmem:[#allocation67_spill] sm:$0xff] }
 0xd91   :  { %6671 = vmatpush2.msra.mxu1 %v6252_v45  ;;  %6247 = vrot.lane.b32.xlu0 %v11564_v34, %s9248_s25  ;;  %v6098_v13 = vsel %vm6085_vm13, %v6072_v31, %v13999_v51  ;;  %v6097_v34 = vsel %vm6085_vm13, %v11850_v37, %v6072_v31  ;;  %v14000_v45 = vld [vmem:[#allocation69_spill] sm:$0xff]  ;;  %v14004_v31 = vld [vmem:[#allocation71_spill] sm:$0xff] }
 0xd92   :  { %6075 = vrot.lane.b32.xlu1 %v11686_v48, %s9230_s29  ;;  %6672 = vmatprep.subr.mxu1 %v6177_v44  ;;  %v14001_v44 = vld [vmem:[#allocation111_spill] sm:$0xff] }
 0xd93   :  { %6673 = vmatpush2.msra.mxu1 %v6176_v46  ;;  %v6089_v46 = vsel %vm6085_vm13, %v14001_v44, %v14000_v45 }
 0xd94   :  { %v5993_v39 = vpop.permute.xlu1 %5992  ;;  %6674 = vmatprep.subr.mxu1 %v6168_v20  ;;  %v14002_v20 = vld [vmem:[#allocation159_spill] sm:$0xff] }
 0xd95   :  { %6675 = vmatpush2.msra.mxu1 %v6167_v53  ;;  %6160 = vrot.lane.b32.xlu0 %v11319_v62, %s9249_s3  ;;  %v6088_v53 = vsel %vm6085_vm13, %v14002_v20, %v14001_v44  ;;  %v6019_v51 = vsel %vm6006_vm2, %v5993_v39, %v14004_v31  ;;  %v14006_v44 = vld [vmem:[#allocation113_spill] sm:$0xff] }
 0xd96   :  { %5996 = vrot.lane.b32.xlu1 %v11686_v48, %s9250_s14  ;;  %6676 = vmatprep.subr.mxu1 %v6098_v13  ;;  %v11898_v13 = vpop.permute.xlu0 %5511 }
 0xd97   :  { %6677 = vmatpush2.msra.mxu1 %v6097_v34  ;;  %14003 = vst [vmem:[#allocation109_spill] sm:$0xff] %v11898_v13  ;;  %v6018_v34 = vsel %vm6006_vm2, %v11872_v19, %v5993_v39  ;;  %v14008_v39 = vld [vmem:[#allocation50_spill] sm:$0xff] }
 0xd98   :  { %v11893_v60 = vpop.permute.xlu1 %5913  ;;  %6678 = vmatprep.subr.mxu1 %v6089_v46  ;;  %v14005_v46 = vld [vmem:[#allocation73_spill] sm:$0xff] }
 0xd99   :  { %6679 = vmatpush2.msra.mxu1 %v6088_v53  ;;  %6225 = vrot.lane.b32.xlu0 %v11582_v4, %s9248_s25  ;;  %v6010_v45 = vsel %vm6006_vm2, %v14006_v44, %v14005_v46  ;;  %v14007_v53 = vld [vmem:[#allocation132_spill] sm:$0xff] }
 0xd9a   :  { %5917 = vrot.lane.b32.xlu1 %v11686_v48, %s9251_s24  ;;  %6680 = vmatprep.subr.mxu1 %v6019_v51  ;;  %v6009_v31 = vsel %vm6006_vm2, %v14007_v53, %v14006_v44  ;;  %v14009_v51 = vld [vmem:[#allocation75_spill] sm:$0xff]  ;;  %v14011_v44 = vld [vmem:[#allocation34_spill] sm:$0xff] }
 0xd9b   :  { %6681 = vmatpush2.msra.mxu1 %v6018_v34  ;;  %v11925_v34 = vpop.permute.xlu0 %5373 }
 0xd9c   :  { %v5831_v13 = vpop.permute.xlu1 %5830  ;;  %6682 = vmatprep.subr.mxu1 %v6010_v45  ;;  %v5940_v45 = vsel %vm5927_vm12, %v11893_v60, %v14009_v51  ;;  %v14012_v51 = vld [vmem:[#allocation51_spill] sm:$0xff] }
 0xd9d   :  { %6683 = vmatpush2.msra.mxu1 %v6009_v31  ;;  %v5859_v48 = vsel %vm5848_vm3, %v5831_v13, %v11636_v41  ;;  %v5858_v4 = vsel %vm5848_vm3, %v14008_v39, %v5831_v13  ;;  %6140 = vrot.lane.b32.xlu0 %v11319_v62, %s9249_s3  ;;  %v14010_v31 = vld [vmem:[#allocation100_spill] sm:$0xff] }
 0xd9e   :  { %5842 = vrot.lane.b32.xlu1 %v11914_v5, %s9242_s30  ;;  %6553 = vmatprep.subr.mxu0 %v5859_v48  ;;  %v5850_v13 = vsel %vm5848_vm3, %v14010_v31, %v11574_v15  ;;  %v5849_v48 = vsel %vm5848_vm3, %v14011_v44, %v14010_v31 }
 0xd9f   :  { %6684 = vmatprep.subr.mxu1 %v5940_v45  ;;  %6554 = vmatpush1.msra.mxu0 %v5858_v4  ;;  %v14013_v4 = vld [vmem:[#allocation101_spill] sm:$0xff]  ;;  %v11946_v31 = vpop.permute.xlu0 %5351 }
 0xda0   :  { %v5752_v41 = vpop.permute.xlu1 %5751  ;;  %6555 = vmatprep.subr.mxu0 %v5850_v13  ;;  %v5771_v45 = vsel %vm5769_vm15, %v14013_v4, %v11584_v24  ;;  %v14015_v13 = vld [vmem:[#allocation54_spill] sm:$0xff]  ;;  %v14016_v24 = vld [vmem:[#allocation99_spill] sm:$0xff] }
 0xda1   :  { %v5780_v39 = vsel %vm5769_vm15, %v5752_v41, %v11648_v8  ;;  %v5779_v46 = vsel %vm5769_vm15, %v14012_v51, %v5752_v41  ;;  %6556 = vmatpush1.msra.mxu0 %v5849_v48  ;;  %6081 = vrot.lane.b32.xlu0 %v11319_v62, %s9230_s29  ;;  %v14014_v8 = vld [vmem:[#allocation35_spill] sm:$0xff]  ;;  %v14018_v48 = vld [vmem:[#allocation102_spill] sm:$0xff] }
 0xda2   :  { %5763 = vrot.lane.b32.xlu1 %v11914_v5, %s9234_s19  ;;  %6557 = vmatprep.subr.mxu0 %v5780_v39  ;;  %v5770_v51 = vsel %vm5769_vm15, %v14014_v8, %v14013_v4  ;;  %v5692_v39 = vsel %vm5690_vm11, %v14018_v48, %v11592_v21 }
 0xda3   :  { %6558 = vmatpush1.msra.mxu0 %v5779_v46 }
 0xda4   :  { %v5673_v15 = vpop.permute.xlu1 %5672  ;;  %6559 = vmatprep.subr.mxu0 %v5771_v45  ;;  %v14020_v45 = vld [vmem:[#allocation56_spill] sm:$0xff] }
 0xda5   :  { %v5701_v41 = vsel %vm5690_vm11, %v5673_v15, %v11658_v58  ;;  %v5700_v44 = vsel %vm5690_vm11, %v14015_v13, %v5673_v15  ;;  %6560 = vmatpush1.msra.mxu0 %v5770_v51  ;;  %6059 = vrot.lane.b32.xlu0 %v14016_v24, %s9230_s29  ;;  %v14019_v58 = vld [vmem:[#allocation36_spill] sm:$0xff]  ;;  %v11971_v51 = vpop.permute.xlu0 %5433 }
 0xda6   :  { %5684 = vrot.lane.b32.xlu1 %v11914_v5, %s9243_s26  ;;  %6561 = vmatprep.subr.mxu0 %v5701_v41  ;;  %v5691_v15 = vsel %vm5690_vm11, %v14019_v58, %v14018_v48  ;;  %14021 = vst [vmem:[#allocation158_spill] sm:$0xff] %v11971_v51  ;;  %v14022_v41 = vld [vmem:[#allocation103_spill] sm:$0xff] }
 0xda7   :  { %6562 = vmatpush1.msra.mxu0 %v5700_v44  ;;  %v5613_v13 = vsel %vm13719_vm14, %v14022_v41, %v11600_v36  ;;  %v14024_v44 = vld [vmem:[#allocation37_spill] sm:$0xff] }
 0xda8   :  { %v5594_v46 = vpop.permute.xlu1 %5593  ;;  %6563 = vmatprep.subr.mxu0 %v5692_v39  ;;  %v14026_v39 = vld [vmem:[#allocation58_spill] sm:$0xff] }
 0xda9   :  { %v5622_v4 = vsel %vm13719_vm14, %v5594_v46, %v11670_v26  ;;  %v5621_v8 = vsel %vm13719_vm14, %v14020_v45, %v5594_v46  ;;  %6564 = vmatpush1.msra.mxu0 %v5691_v15  ;;  %6142 = vrot.lane.b32.xlu0 %v11319_v62, %s9249_s3  ;;  %v11979_v26 = vld [vmem:[%s14017_s5 + $0x8] sm:$0xff]  ;;  %v5612_v46 = vsel %vm13719_vm14, %v14024_v44, %v14022_v41  ;;  %v14031_v45 = vld [vmem:[#allocation38_spill] sm:$0xff]  ;;  %v14036_v44 = vld [vmem:[#allocation105_spill] sm:$0xff] }
 0xdaa   :  { %5605 = vrot.lane.b32.xlu1 %v11914_v5, %s9244_s9  ;;  %6565 = vmatprep.subr.mxu0 %v5622_v4  ;;  %14023 = vst [vmem:[#allocation111_spill] sm:$0xff] %v11979_v26  ;;  %v14028_v15 = vld [vmem:[#allocation104_spill] sm:$0xff] }
 0xdab   :  { %6566 = vmatpush1.msra.mxu0 %v5621_v8  ;;  %6688 = vmatprep.mubr.f32.mxu1 %v11979_v26  ;;  %v5534_v4 = vsel %vm14029_vm0, %v14028_v15, %v11608_v17  ;;  %v5533_v8 = vsel %vm14032_vm1, %v14031_v45, %v14028_v15  ;;  %v14034_v41 = vld [vmem:[#allocation60_spill] sm:$0xff]  ;;  %v14043_v15 = vld [vmem:[#allocation106_spill] sm:$0xff] }
 0xdac   :  { %v5516_v21 = vpop.permute.xlu1 %5515  ;;  %6567 = vmatprep.subr.mxu0 %v5613_v13  ;;  %6617 = vmatprep.mubr.f32.mxu0 %v11979_v26  ;;  %v14088_v26 = vld [vmem:[#allocation120_spill] sm:$0xff] }
 0xdad   :  { %v5543_v48 = vsel %vm14025_vm7, %v5516_v21, %v11680_v18  ;;  %v5542_v58 = vsel %vm14027_vm4, %v14026_v39, %v5516_v21  ;;  %6568 = vmatpush1.msra.mxu0 %v5612_v46  ;;  %6002 = vrot.lane.b32.xlu0 %v11319_v62, %s9250_s14  ;;  %v11997_v18 = vpop.permute.xlu0 %5355  ;;  %vm14033_vm7 = vcmask 1031168   ;;  %v5929_v54 = vsel %vm5927_vm12, %v14088_v26, %v14087_v10 }
 0xdae   :  { %5527 = vrot.lane.b32.xlu1 %v11914_v5, %s9215_s11  ;;  %6569 = vmatprep.subr.mxu0 %v5543_v48  ;;  %14030 = vst [vmem:[#allocation159_spill] sm:$0xff] %v11997_v18  ;;  %vm14035_vm4 = vmmov %vm14033_vm7 }
 0xdaf   :  { %6570 = vmatpush1.msra.mxu0 %v5542_v58  ;;  %vm14037_vm0 = vmmov %vm14035_vm4  ;;  %v14041_v58 = vld [vmem:[#allocation62_spill] sm:$0xff] }
 0xdb0   :  { %v5438_v36 = vpop.permute.xlu1 %5437  ;;  %6571 = vmatprep.subr.mxu0 %v5534_v4  ;;  %v5456_v46 = vsel %vm14037_vm0, %v14036_v44, %v11616_v25  ;;  %vm14039_vm1 = vmmov %vm14037_vm0 }
 0xdb1   :  { %v5465_v21 = vsel %vm14033_vm7, %v5438_v36, %v11694_v32  ;;  %v5464_v13 = vsel %vm14035_vm4, %v14034_v41, %v5438_v36  ;;  %6572 = vmatpush1.msra.mxu0 %v5533_v8  ;;  %5980 = vrot.lane.b32.xlu0 %v14016_v24, %s9250_s14  ;;  %v14038_v32 = vld [vmem:[#allocation39_spill] sm:$0xff]  ;;  %vm14040_vm7 = vcmask 1039360   ;;  %v12022_v24 = vpop.permute.xlu0 %6498 }
 0xdb2   :  { %5449 = vrot.lane.b32.xlu1 %v11914_v5, %s9213_s10  ;;  %6573 = vmatprep.subr.mxu0 %v5465_v21  ;;  %v5455_v48 = vsel %vm14039_vm1, %v14038_v32, %v14036_v44  ;;  %vm14042_vm4 = vmmov %vm14040_vm7  ;;  %v14049_v32 = vld [vmem:[#allocation108_spill] sm:$0xff] }
 0xdb3   :  { %6574 = vmatpush1.msra.mxu0 %v5464_v13  ;;  %vm14044_vm0 = vmmov %vm14042_vm4  ;;  %v12045_v13 = vld [vmem:[#allocation4 + $0x38] sm:$0xff] }
 0xdb4   :  { %v5360_v17 = vpop.permute.xlu1 %5359  ;;  %6575 = vmatprep.subr.mxu0 %v5456_v46  ;;  %v5378_v4 = vsel %vm14044_vm0, %v14043_v15, %v11624_v27  ;;  %vm14046_vm1 = vmmov %vm14044_vm0  ;;  %v9121_v27 = vld [vmem:[#allocation4 + $0x8] sm:$0xff] }
 0xdb5   :  { %v5387_v39 = vsel %vm14040_vm7, %v5360_v17, %v11718_v28  ;;  %v5386_v36 = vsel %vm14042_vm4, %v14041_v58, %v5360_v17  ;;  %6576 = vmatpush1.msra.mxu0 %v5455_v48  ;;  %6063 = vrot.lane.b32.xlu0 %v11319_v62, %s9230_s29  ;;  %v14045_v28 = vld [vmem:[#allocation40_spill] sm:$0xff]  ;;  %v12038_v21 = vpop.permute.xlu0 %6476  ;;  %v6506_v48 = vsel %vm6504_vm6, %v14049_v32, %v11632_v14  ;;  %vm14114_vm7 = vcmask 1022976  }
 0xdb6   :  { %5911 = vrot.lane.b32.xlu1 %v11396_v59, %s9251_s24  ;;  %6577 = vmatprep.subr.mxu0 %v5387_v39  ;;  %v5377_v45 = vsel %vm14046_vm1, %v14045_v28, %v14043_v15  ;;  %v14047_v59 = vld [vmem:[#allocation107_spill] sm:$0xff]  ;;  %v14048_v17 = vld [vmem:[#allocation64_spill] sm:$0xff]  ;;  %v14050_v39 = vld [vmem:[#allocation41_spill] sm:$0xff] }
 0xdb7   :  { %6578 = vmatpush1.msra.mxu0 %v5386_v36  ;;  %vm14116_vm4 = vmmov %vm14114_vm7 }
 0xdb8   :  { %v6485_v25 = vpop.permute.xlu1 %6484  ;;  %6579 = vmatprep.subr.mxu0 %v5378_v4  ;;  %v14054_v4 = vld [vmem:[#allocation110_spill] sm:$0xff]  ;;  %vm14117_vm0 = vmmov %vm14116_vm4 }
 0xdb9   :  { %6580 = vmatpush1.msra.mxu0 %v5377_v45  ;;  %5923 = vrot.lane.b32.xlu0 %v11319_v62, %s9251_s24  ;;  %v6516_v41 = vsel %vm6504_vm6, %v6485_v25, %v11740_v50  ;;  %v6515_v44 = vsel %vm6504_vm6, %v14048_v17, %v6485_v25  ;;  %v6505_v50 = vsel %vm6504_vm6, %v14050_v39, %v14049_v32  ;;  %v12061_v36 = vpop.permute.xlu0 %6502  ;;  %v14052_v25 = vld [vmem:[#allocation66_spill] sm:$0xff]  ;;  %vm14118_vm1 = vmmov %vm14117_vm0 }
 0xdba   :  { %5431 = vrot.lane.b32.xlu1 %v11319_v62, %s9213_s10  ;;  %6581 = vmatprep.subr.mxu0 %v14047_v59  ;;  %14051 = vst [vmem:[#allocation113_spill] sm:$0xff] %v12061_v36  ;;  %v6421_v28 = vsel %vm6419_vm5, %v14054_v4, %v11642_v16  ;;  %v14055_v45 = vld [vmem:[#allocation42_spill] sm:$0xff] }
 0xdbb   :  { %6582 = vmatpush1.msra.mxu0 %v11319_v62  ;;  %v14059_v39 = vld [vmem:[#allocation70_spill] sm:$0xff] }
 0xdbc   :  { %v6400_v8 = vpop.permute.xlu1 %6399  ;;  %6583 = vmatprep.subr.mxu0 %v9121_v27 }
 0xdbd   :  { %6584 = vmatpush1.msra.mxu0 %v11319_v62  ;;  %5901 = vrot.lane.b32.xlu0 %v12045_v13, %s9251_s24  ;;  %v6431_v58 = vsel %vm6419_vm5, %v6400_v8, %v11764_v3  ;;  %v6430_v14 = vsel %vm6419_vm5, %v14052_v25, %v6400_v8  ;;  %v6420_v3 = vsel %vm6419_vm5, %v14055_v45, %v14054_v4  ;;  %v14056_v8 = vld [vmem:[#allocation68_spill] sm:$0xff]  ;;  %v12085_v32 = vpop.permute.xlu0 %6413 }
 0xdbe   :  { %5371 = vrot.lane.b32.xlu1 %v11914_v5, %s9211_s28  ;;  %6585 = vmatprep.subr.mxu0 %v6516_v41  ;;  %v14057_v41 = vld [vmem:[#allocation112_spill] sm:$0xff] }
 0xdbf   :  { %6586 = vmatpush2.msra.mxu0 %v6515_v44  ;;  %v6336_v17 = vsel %vm6334_vm8, %v14057_v41, %v11650_v7  ;;  %v6910_v44 = vld [vmem:[%s14053_s16] sm:$0xff]  ;;  %v14064_v45 = vld [vmem:[#allocation116_spill] sm:$0xff] }
 0xdc0   :  { %v6315_v46 = vpop.permute.xlu1 %6314  ;;  %6587 = vmatprep.subr.mxu0 %v6506_v48  ;;  %v14058_v48 = vld [vmem:[#allocation43_spill] sm:$0xff] }
 0xdc1   :  { %6588 = vmatpush2.msra.mxu0 %v6505_v50  ;;  %5984 = vrot.lane.b32.xlu0 %v11319_v62, %s9250_s14  ;;  %v6346_v59 = vsel %vm6334_vm8, %v6315_v46, %v11786_v2  ;;  %v6345_v27 = vsel %vm6334_vm8, %v14056_v8, %v6315_v46  ;;  %v6335_v2 = vsel %vm6334_vm8, %v14058_v48, %v14057_v41  ;;  %v14068_v48 = vld [vmem:[#allocation46_spill] sm:$0xff] }
 0xdc2   :  { %5453 = vrot.lane.b32.xlu1 %v11319_v62, %s9213_s10  ;;  %6589 = vmatprep.subr.mxu0 %v6431_v58  ;;  %v14060_v58 = vld [vmem:[#allocation114_spill] sm:$0xff] }
 0xdc3   :  { %6590 = vmatpush2.msra.mxu0 %v6430_v14  ;;  %v6251_v25 = vsel %vm6249_vm9, %v14060_v58, %v11656_v6  ;;  %v14061_v14 = vld [vmem:[#allocation44_spill] sm:$0xff] }
 0xdc4   :  { %v6230_v15 = vpop.permute.xlu1 %6229  ;;  %6591 = vmatprep.subr.mxu0 %v6421_v28  ;;  %v6250_v4 = vsel %vm6249_vm9, %v14061_v14, %v14060_v58 }
 0xdc5   :  { %6592 = vmatpush2.msra.mxu0 %v6420_v3  ;;  %5905 = vrot.lane.b32.xlu0 %v11319_v62, %s9251_s24  ;;  %v6261_v46 = vsel %vm6249_vm9, %v6230_v15, %v11803_v49  ;;  %v6260_v7 = vsel %vm6249_vm9, %v14059_v39, %v6230_v15  ;;  %v12106_v49 = vpop.permute.xlu0 %6480  ;;  %v14063_v15 = vld [vmem:[#allocation72_spill] sm:$0xff]  ;;  %v6166_v3 = vsel %vm6164_vm10, %v14064_v45, %v13998_v57  ;;  %v14067_v57 = vld [vmem:[#allocation118_spill] sm:$0xff] }
 0xdc6   :  { %5353 = vrot.lane.b32.xlu1 %v11319_v62, %s9211_s28  ;;  %6593 = vmatprep.subr.mxu0 %v6346_v59  ;;  %14062 = vst [vmem:[#allocation132_spill] sm:$0xff] %v12106_v49  ;;  %v14065_v59 = vld [vmem:[#allocation45_spill] sm:$0xff]  ;;  %v14069_v39 = vld [vmem:[#allocation76_spill] sm:$0xff] }
 0xdc7   :  { %6594 = vmatpush2.msra.mxu0 %v6345_v27  ;;  %v6165_v8 = vsel %vm6164_vm10, %v14065_v59, %v14064_v45  ;;  %v14066_v27 = vld [vmem:[#allocation74_spill] sm:$0xff] }
 0xdc8   :  { %v6147_v16 = vpop.permute.xlu1 %6146  ;;  %6595 = vmatprep.subr.mxu0 %v6336_v17  ;;  %v6087_v17 = vsel %vm6085_vm13, %v14067_v57, %v14002_v20 }
 0xdc9   :  { %6596 = vmatpush2.msra.mxu0 %v6335_v2  ;;  %7045 = vperm.xlu0 %8931, %v6910_v44   ;;  %v6174_v28 = vsel %vm6164_vm10, %v14063_v15, %v6147_v16  ;;  %v12127_v44 = vpop.permute.xlu0 %6391  ;;  %v6086_v2 = vsel %vm6085_vm13, %v14068_v48, %v14067_v57 }
 0xdca   :  { %5375 = vrot.lane.b32.xlu1 %v11319_v62, %s9211_s28  ;;  %6597 = vmatprep.subr.mxu0 %v6261_v46  ;;  %v6175_v62 = vsel %vm6164_vm10, %v6147_v16, %v11826_v52 }
 0xdcb   :  { %6598 = vmatpush2.msra.mxu0 %v6260_v7 }
 0xdcc   :  { %v6068_v50 = vpop.permute.xlu1 %6067  ;;  %6599 = vmatprep.subr.mxu0 %v6251_v25  ;;  %v14071_v25 = vld [vmem:[#allocation47_spill] sm:$0xff] }
 0xdcd   :  { %6600 = vmatpush2.msra.mxu0 %v6250_v4  ;;  %v6096_v52 = vsel %vm6085_vm13, %v6068_v50, %v11850_v37  ;;  %v6095_v16 = vsel %vm6085_vm13, %v14066_v27, %v6068_v50  ;;  %v12132_v37 = vld [vmem:[#allocation4] sm:$0xff]  ;;  %v14070_v50 = vld [vmem:[#allocation117_spill] sm:$0xff] }
 0xdce   :  { %6496 = vrot.lane.b32.xlu1 %v11914_v5, %s9245_s13  ;;  %6601 = vmatprep.subr.mxu0 %v6175_v62  ;;  %v6008_v58 = vsel %vm6006_vm2, %v14070_v50, %v14007_v53  ;;  %v6007_v14 = vsel %vm6006_vm2, %v14071_v25, %v14070_v50 }
 0xdcf   :  { %6602 = vmatpush2.msra.mxu0 %v6174_v28 }
 0xdd0   :  { %v5989_v6 = vpop.permute.xlu1 %5988  ;;  %6603 = vmatprep.subr.mxu0 %v6166_v3 }
 0xdd1   :  { %6604 = vmatpush2.msra.mxu0 %v6165_v8  ;;  %v6017_v46 = vsel %vm6006_vm2, %v5989_v6, %v11872_v19  ;;  %v6016_v20 = vsel %vm6006_vm2, %v14069_v39, %v5989_v6  ;;  %v12150_v19 = vpop.permute.xlu0 %6417 }
 0xdd2   :  { %6474 = vrot.lane.b32.xlu1 %v12045_v13, %s9245_s13  ;;  %6605 = vmatprep.subr.mxu0 %v6096_v52  ;;  %14072 = vst [vmem:[#allocation50_spill] sm:$0xff] %v12150_v19 }
 0xdd3   :  { %6606 = vmatpush2.msra.mxu0 %v6095_v16 }
 0xdd4   :  { %v12122_v41 = vpop.permute.xlu1 %5838  ;;  %6607 = vmatprep.subr.mxu0 %v6087_v17 }
 0xdd5   :  { %6608 = vmatpush2.msra.mxu0 %v6086_v2  ;;  %v12158_v15 = vpop.permute.xlu0 %6328 }
 0xdd6   :  { %6500 = vrot.lane.b32.xlu1 %v12132_v37, %s9245_s13  ;;  %6609 = vmatprep.subr.mxu0 %v6017_v46  ;;  %14073 = vst [vmem:[#allocation100_spill] sm:$0xff] %v12158_v15  ;;  %v14086_v15 = vld [vmem:[#allocation115_spill] sm:$0xff] }
 0xdd7   :  { %6610 = vmatpush2.msra.mxu0 %v6016_v20 }
 0xdd8   :  { %v12140_v7 = vpop.permute.xlu1 %5759  ;;  %6611 = vmatprep.subr.mxu0 %v6008_v58 }
 0xdd9   :  { %6612 = vmatpush2.msra.mxu0 %v6007_v14  ;;  %v12166_v28 = vpop.permute.xlu0 %6395 }
 0xdda   :  { %6411 = vrot.lane.b32.xlu1 %v11914_v5, %s9246_s17  ;;  %14074 = vst [vmem:[#allocation34_spill] sm:$0xff] %v12166_v28 }
 0xddc   :  { %v12152_v4 = vpop.permute.xlu1 %5680 }
 0xddd   :  { %v12174_v3 = vpop.permute.xlu0 %6306 }
 0xdde   :  { %6478 = vrot.lane.b32.xlu1 %v12132_v37, %s9245_s13  ;;  %14075 = vst [vmem:[#allocation51_spill] sm:$0xff] %v12174_v3 }
 0xde0   :  { %v12156_v62 = vpop.permute.xlu1 %5601 }
 0xde1   :  { %v5841_v8 = vpop.permute.xlu0 %5840 }
 0xde2   :  { %6389 = vrot.lane.b32.xlu1 %v12045_v13, %s9246_s17 }
 0xde4   :  { %v12162_v53 = vpop.permute.xlu1 %5523 }
 0xde5   :  { %v12188_v16 = vpop.permute.xlu0 %5761 }
 0xde6   :  { %6415 = vrot.lane.b32.xlu1 %v12132_v37, %s9246_s17 }
 0xde8   :  { %v12168_v6 = vpop.permute.xlu1 %5445 }
 0xde9   :  { %v12196_v17 = vpop.permute.xlu0 %5682 }
 0xdea   :  { %6326 = vrot.lane.b32.xlu1 %v11914_v5, %s9247_s21 }
 0xdec   :  { %v12172_v45 = vpop.permute.xlu1 %5367 }
 0xded   :  { %v12204_v46 = vpop.permute.xlu0 %5603 }
 0xdee   :  { %6393 = vrot.lane.b32.xlu1 %v12132_v37, %s9246_s17 }
 0xdf0   :  { %v12178_v59 = vpop.permute.xlu1 %6492 }
 0xdf1   :  { %v12212_v20 = vpop.permute.xlu0 %5525 }
 0xdf2   :  { %6304 = vrot.lane.b32.xlu1 %v12045_v13, %s9247_s21 }
 0xdf4   :  { %v12182_v52 = vpop.permute.xlu1 %6407 }
 0xdf5   :  { %v12218_v25 = vpop.permute.xlu0 %5447 }
 0xdf6   :  { %6330 = vrot.lane.b32.xlu1 %v12132_v37, %s9247_s21 }
 0xdf8   :  { %v12186_v27 = vpop.permute.xlu1 %6322 }
 0xdf9   :  { %14076 = vst [vmem:[#allocation101_spill] sm:$0xff] %v12186_v27  ;;  %v12224_v28 = vpop.permute.xlu0 %5369  ;;  %v12264_v27 = vld [vmem:[%s14017_s5] sm:$0xff] }
 0xdfa   :  { %6241 = vrot.lane.b32.xlu1 %v11914_v5, %s9248_s25  ;;  %14089 = vst [vmem:[#allocation103_spill] sm:$0xff] %v12264_v27 }
 0xdfc   :  { %v12192_v57 = vpop.permute.xlu1 %6237 }
 0xdfd   :  { %14077 = vst [vmem:[#allocation35_spill] sm:$0xff] %v12192_v57  ;;  %v12232_v36 = vpop.permute.xlu0 %6332  ;;  %v5931_v57 = vsel %vm5927_vm12, %v14086_v15, %v14085_v30 }
 0xdfe   :  { %6308 = vrot.lane.b32.xlu1 %v12132_v37, %s9247_s21  ;;  %14082 = vst [vmem:[#allocation56_spill] sm:$0xff] %v12232_v36  ;;  %v14083_v36 = vld [vmem:[#allocation157_spill] sm:$0xff] }
 0xe00   :  { %v12198_v48 = vpop.permute.xlu1 %6154 }
 0xe01   :  { %14078 = vst [vmem:[#allocation54_spill] sm:$0xff] %v12198_v48  ;;  %v12240_v51 = vpop.permute.xlu0 %6494  ;;  %v14084_v48 = vld [vmem:[#allocation78_spill] sm:$0xff] }
 0xe02   :  { %6219 = vrot.lane.b32.xlu1 %v12045_v13, %s9248_s25  ;;  %v5937_v11 = vsel %vm5927_vm12, %v14084_v48, %v14083_v36  ;;  %v14091_v48 = vld [vmem:[#allocation79_spill] sm:$0xff] }
 0xe04   :  { %v12202_v2 = vpop.permute.xlu1 %6075 }
 0xe05   :  { %14079 = vst [vmem:[#allocation99_spill] sm:$0xff] %v12202_v2  ;;  %v12246_v3 = vpop.permute.xlu0 %6409 }
 0xe06   :  { %6245 = vrot.lane.b32.xlu1 %v12132_v37, %s9248_s25 }
 0xe08   :  { %v12208_v39 = vpop.permute.xlu1 %5996 }
 0xe09   :  { %14080 = vst [vmem:[#allocation102_spill] sm:$0xff] %v12208_v39 }
 0xe0a   :  { %6158 = vrot.lane.b32.xlu1 %v11914_v5, %s9249_s3 }
 0xe0c   :  { %v12214_v50 = vpop.permute.xlu1 %5917 }
 0xe0d   :  { %14081 = vst [vmem:[#allocation36_spill] sm:$0xff] %v12214_v50 }
 0xe0e   :  { %6223 = vrot.lane.b32.xlu1 %v12132_v37, %s9248_s25 }
 0xe10   :  { %v5843_v58 = vpop.permute.xlu1 %5842 }
 0xe12   :  { %6138 = vrot.lane.b32.xlu1 %v12045_v13, %s9249_s3 }
 0xe14   :  { %v5764_v14 = vpop.permute.xlu1 %5763 }
 0xe16   :  { %6079 = vrot.lane.b32.xlu1 %v11914_v5, %s9230_s29 }
 0xe18   :  { %v12226_v19 = vpop.permute.xlu1 %5684 }
 0xe1a   :  { %6162 = vrot.lane.b32.xlu1 %v12132_v37, %s9249_s3 }
 0xe1c   :  { %v12230_v49 = vpop.permute.xlu1 %5605 }
 0xe1e   :  { %6061 = vrot.lane.b32.xlu1 %v12132_v37, %s9230_s29 }
 0xe20   :  { %v12236_v18 = vpop.permute.xlu1 %5527 }
 0xe22   :  { %6000 = vrot.lane.b32.xlu1 %v11914_v5, %s9250_s14 }
 0xe24   :  { %v12242_v50 = vpop.permute.xlu1 %5449 }
 0xe26   :  { %6083 = vrot.lane.b32.xlu1 %v12132_v37, %s9230_s29 }
 0xe28   :  { %v5912_v39 = vpop.permute.xlu1 %5911 }
 0xe29   :  { %v5938_v2 = vsel %vm5927_vm12, %v14083_v36, %v5912_v39  ;;  %v5939_v55 = vsel %vm5927_vm12, %v5912_v39, %v11893_v60  ;;  %v5930_v36 = vsel %vm5927_vm12, %v14087_v10, %v14086_v15  ;;  %v5864_v10 = vsel %vm5848_vm3, %v5841_v8, %v5843_v58  ;;  %v14093_v39 = vld [vmem:[#allocation80_spill] sm:$0xff] }
 0xe2a   :  { %5982 = vrot.lane.b32.xlu1 %v12132_v37, %s9250_s14  ;;  %6613 = vmatprep.subr.mxu0 %v5938_v2  ;;  %v5865_v2 = vsel %vm5848_vm3, %v5843_v58, %v14091_v48  ;;  %v14096_v48 = vld [vmem:[#allocation119_spill] sm:$0xff]  ;;  %v14097_v58 = vld [vmem:[#allocation82_spill] sm:$0xff] }
 0xe2b   :  { %6685 = vmatpush2.msra.mxu1 %v5939_v55  ;;  %6614 = vmatpush2.msra.mxu0 %v5937_v11  ;;  %v14090_v11 = vld [vmem:[#allocation49_spill] sm:$0xff] }
 0xe2c   :  { %6686 = vmatprep.subr.mxu1 %v5931_v57  ;;  %v12266_v60 = vpop.permute.xlu1 %5431  ;;  %6615 = vmatprep.subr.mxu0 %v5929_v54  ;;  %v5928_v55 = vsel %vm5927_vm12, %v14090_v11, %v14088_v26  ;;  %v12277_v57 = vpop.permute.xlu0 %6324  ;;  %v5863_v54 = vsel %vm5848_vm3, %v12122_v41, %v5841_v8  ;;  %v14092_v26 = vld [vmem:[#allocation48_spill] sm:$0xff] }
 0xe2d   :  { %6687 = vmatpush2.msra.mxu1 %v5930_v36  ;;  %6616 = vmatpush2.msra.mxu0 %v5928_v55  ;;  %v5862_v15 = vsel %vm5848_vm3, %v14092_v26, %v12122_v41  ;;  %v14094_v36 = vld [vmem:[#allocation149_spill] sm:$0xff]  ;;  %v5853_v41 = vsel %vm5848_vm3, %v11149_v43, %v14096_v48  ;;  %v5783_v43 = vsel %vm5769_vm15, %v10979_v61, %v12140_v7 }
 0xe2e   :  { %6689 = vmatmul.mubr.f32.vlgmr.msra.gmra.mxu1 %v12264_v27  ;;  %6766 = vmatprep.subr.mxu1 %v5865_v2  ;;  %v5856_v11 = vsel %vm5848_vm3, %v14094_v36, %v14093_v39  ;;  %v14095_v2 = vld [vmem:[#allocation134_spill] sm:$0xff] }
 0xe2f   :  { %5921 = vrot.lane.b32.xlu1 %v11914_v5, %s9251_s24  ;;  %6618 = vmatmul.mubr.f32.vlgmr.msra.gmra.mxu0 %v12264_v27  ;;  %v5854_v27 = vsel %vm5848_vm3, %v14096_v48, %v14095_v2  ;;  %v5855_v8 = vsel %vm5848_vm3, %v14095_v2, %v14094_v36  ;;  %v14099_v36 = vld [vmem:[#allocation122_spill] sm:$0xff]  ;;  %v14100_v2 = vld [vmem:[#allocation136_spill] sm:$0xff] }
 0xe30   :  { %6695 = vmatprep.subr.mxu0 %v5863_v54  ;;  %6767 = vmatpush1.msra.mxu1 %v5864_v10  ;;  %v12291_v55 = vpop.permute.xlu1 %5371  ;;  %v5786_v54 = vsel %vm5769_vm15, %v5764_v14, %v14097_v58  ;;  %v5784_v10 = vsel %vm5769_vm15, %v12140_v7, %v12188_v16  ;;  %v12316_v26 = vpop.permute.xlu0 %6239  ;;  %v5776_v61 = vsel %vm5769_vm15, %v14100_v2, %v14099_v36 }
 0xe31   :  { %6696 = vmatpush1.msra.mxu0 %v5862_v15  ;;  %6768 = vmatprep.subr.mxu1 %v5856_v11  ;;  %v14098_v15 = vld [vmem:[#allocation83_spill] sm:$0xff] }
 0xe32   :  { %6697 = vmatprep.subr.mxu0 %v5854_v27  ;;  %6769 = vmatpush1.msra.mxu1 %v5855_v8  ;;  %v5785_v27 = vsel %vm5769_vm15, %v12188_v16, %v5764_v14  ;;  %v5777_v11 = vsel %vm5769_vm15, %v14099_v36, %v14098_v15  ;;  %v14101_v8 = vld [vmem:[#allocation121_spill] sm:$0xff]  ;;  %v14104_v36 = vld [vmem:[#allocation124_spill] sm:$0xff] }
 0xe33   :  { %6698 = vmatpush1.msra.mxu0 %v5853_v41  ;;  %6770 = vmatprep.subr.mxu1 %v5786_v54  ;;  %v5775_v41 = vsel %vm5769_vm15, %v14101_v8, %v14100_v2  ;;  %v5774_v7 = vsel %vm5769_vm15, %v10981_v22, %v14101_v8  ;;  %v14102_v16 = vld [vmem:[#allocation85_spill] sm:$0xff]  ;;  %v5705_v54 = vsel %vm5690_vm11, %v12152_v4, %v12196_v17  ;;  %v14105_v2 = vld [vmem:[#allocation138_spill] sm:$0xff]  ;;  %v14106_v8 = vld [vmem:[#allocation123_spill] sm:$0xff] }
 0xe34   :  { %6004 = vrot.lane.b32.xlu1 %v12132_v37, %s9250_s14  ;;  %6699 = vmatprep.subr.mxu0 %v5784_v10  ;;  %v12314_v48 = vpop.permute.xlu1 %5453  ;;  %v5707_v14 = vsel %vm5690_vm11, %v12226_v19, %v14102_v16  ;;  %v5706_v10 = vsel %vm5690_vm11, %v12196_v17, %v12226_v19  ;;  %v5704_v22 = vsel %vm5690_vm11, %v10983_v23, %v12152_v4  ;;  %v12355_v17 = vpop.permute.xlu0 %6156  ;;  %v14108_v4 = vld [vmem:[#allocation89_spill] sm:$0xff] }
 0xe35   :  { %6771 = vmatpush1.msra.mxu1 %v5785_v27  ;;  %6700 = vmatpush1.msra.mxu0 %v5783_v43  ;;  %v14103_v43 = vld [vmem:[#allocation88_spill] sm:$0xff]  ;;  %v5697_v19 = vsel %vm5690_vm11, %v14105_v2, %v14104_v36  ;;  %v5695_v23 = vsel %vm5690_vm11, %v10985_v56, %v14106_v8  ;;  %v5627_v56 = vsel %vm13719_vm14, %v12204_v46, %v12230_v49 }
 0xe36   :  { %6772 = vmatprep.subr.mxu1 %v5777_v11  ;;  %6701 = vmatprep.subr.mxu0 %v5775_v41  ;;  %v5698_v11 = vsel %vm5690_vm11, %v14104_v36, %v14103_v43  ;;  %v5696_v41 = vsel %vm5690_vm11, %v14106_v8, %v14105_v2  ;;  %v14112_v2 = vld [vmem:[#allocation125_spill] sm:$0xff] }
 0xe37   :  { %6773 = vmatpush1.msra.mxu1 %v5776_v61  ;;  %6702 = vmatpush1.msra.mxu0 %v5774_v7  ;;  %v5628_v61 = vsel %vm13719_vm14, %v12230_v49, %v14108_v4  ;;  %v5626_v7 = vsel %vm13719_vm14, %v12156_v62, %v12204_v46 }
 0xe38   :  { %6774 = vmatprep.subr.mxu1 %v5707_v14  ;;  %5903 = vrot.lane.b32.xlu1 %v12132_v37, %s9251_s24  ;;  %v12341_v27 = vpop.permute.xlu1 %5353 }
 0xe39   :  { %6703 = vmatprep.subr.mxu0 %v5705_v54  ;;  %6775 = vmatpush1.msra.mxu1 %v5706_v10  ;;  %v5625_v54 = vsel %vm13719_vm14, %v10987_v40, %v12156_v62  ;;  %v14109_v10 = vld [vmem:[#allocation92_spill] sm:$0xff]  ;;  %v5616_v40 = vsel %vm13719_vm14, %v10989_v0, %v14112_v2  ;;  %v14113_v62 = vld [vmem:[#allocation93_spill] sm:$0xff]  ;;  %v5548_v0 = vsel %vm14117_vm0, %v12212_v20, %v12236_v18 }
 0xe3a   :  { %6704 = vmatpush1.msra.mxu0 %v5704_v22  ;;  %6776 = vmatprep.subr.mxu1 %v5698_v11  ;;  %v14110_v22 = vld [vmem:[#allocation126_spill] sm:$0xff]  ;;  %v14111_v11 = vld [vmem:[#allocation140_spill] sm:$0xff]  ;;  %v5549_v46 = vsel %vm14114_vm7, %v12236_v18, %v14113_v62  ;;  %vm14121_vm7 = vmmov %vm14117_vm0 }
 0xe3b   :  { %6705 = vmatprep.subr.mxu0 %v5696_v41  ;;  %6777 = vmatpush1.msra.mxu1 %v5697_v19  ;;  %v5619_v36 = vsel %vm13719_vm14, %v14110_v22, %v14109_v10  ;;  %v5617_v8 = vsel %vm13719_vm14, %v14112_v2, %v14111_v11  ;;  %v6547_v41 = vld [vmem:[%s14107_s8] sm:$0xff]  ;;  %v5618_v49 = vsel %vm13719_vm14, %v14111_v11, %v14110_v22  ;;  %vm14124_vm14 = vmmov %vm14117_vm0 }
 0xe3c   :  { %6706 = vmatpush1.msra.mxu0 %v5695_v23  ;;  %6778 = vmatprep.subr.mxu1 %v5628_v61  ;;  %v12366_v14 = vpop.permute.xlu1 %5375  ;;  %v12394_v23 = vpop.permute.xlu0 %6077  ;;  %v5547_v61 = vsel %vm14116_vm4, %v12162_v53, %v12212_v20  ;;  %v14123_v11 = vld [vmem:[#allocation127_spill] sm:$0xff]  ;;  %vm14125_vm4 = vmmov %vm14117_vm0 }
 0xe3d   :  { %5925 = vrot.lane.b32.xlu1 %v12132_v37, %s9251_s24  ;;  %6707 = vmatprep.subr.mxu0 %v5626_v7  ;;  %v5546_v7 = vsel %vm14118_vm1, %v10991_v12, %v12162_v53  ;;  %v6911_v20 = vld [vmem:[%s14115_s1] sm:$0xff]  ;;  %v5537_v12 = vsel %vm14117_vm0, %v10993_v47, %v14123_v11  ;;  %v14126_v53 = vld [vmem:[#allocation97_spill] sm:$0xff]  ;;  %vm14127_vm1 = vcmask 1031168  }
 0xe3e   :  { %6779 = vmatpush1.msra.mxu1 %v5627_v56  ;;  %6708 = vmatpush1.msra.mxu0 %v5625_v54  ;;  %v14119_v56 = vld [vmem:[#allocation96_spill] sm:$0xff]  ;;  %vm14132_vm0 = vmmov %vm14127_vm1 }
 0xe3f   :  { %6780 = vmatprep.subr.mxu1 %v5619_v36  ;;  %6709 = vmatprep.subr.mxu0 %v5617_v8  ;;  %v14120_v54 = vld [vmem:[#allocation128_spill] sm:$0xff]  ;;  %v14122_v36 = vld [vmem:[#allocation142_spill] sm:$0xff]  ;;  %v5471_v8 = vsel %vm14127_vm1, %v12242_v50, %v14126_v53 }
 0xe40   :  { %6781 = vmatpush1.msra.mxu1 %v5618_v49  ;;  %6710 = vmatpush1.msra.mxu0 %v5616_v40  ;;  %v12392_v19 = vpop.permute.xlu1 %6496  ;;  %v5540_v22 = vsel %vm14121_vm7, %v14120_v54, %v14119_v56  ;;  %v5538_v2 = vsel %vm14124_vm14, %v14123_v11, %v14122_v36  ;;  %v5539_v18 = vsel %vm14125_vm4, %v14122_v36, %v14120_v54  ;;  %vm14128_vm14 = vmmov %vm14127_vm1  ;;  %v14134_v54 = vld [vmem:[#allocation129_spill] sm:$0xff] }
 0xe41   :  { %6782 = vmatprep.subr.mxu1 %v5549_v46  ;;  %6550 = vperm.xlu1 %8932, %v6547_v41   ;;  %v5469_v49 = vsel %vm14128_vm14, %v12168_v6, %v12218_v25  ;;  %vm14129_vm7 = vmmov %vm14127_vm1  ;;  %v12432_v46 = vpop.permute.xlu0 %5998 }
 0xe42   :  { %6711 = vmatprep.subr.mxu0 %v5547_v61  ;;  %6783 = vmatpush1.msra.mxu1 %v5548_v0  ;;  %v5470_v40 = vsel %vm14129_vm7, %v12218_v25, %v12242_v50  ;;  %vm14130_vm4 = vmmov %vm14127_vm1  ;;  %v14131_v61 = vld [vmem:[#allocation130_spill] sm:$0xff] }
 0xe43   :  { %6712 = vmatpush1.msra.mxu0 %v5546_v7  ;;  %6784 = vmatprep.subr.mxu1 %v5540_v22  ;;  %v5468_v47 = vsel %vm14130_vm4, %v10995_v9, %v12168_v6  ;;  %v5462_v0 = vsel %vm14132_vm0, %v14131_v61, %v12266_v60  ;;  %v14133_v7 = vld [vmem:[#allocation144_spill] sm:$0xff]  ;;  %vm14135_vm1 = vmmov %vm14132_vm0  ;;  %vm14138_vm4 = vcmask 1039360  }
 0xe44   :  { %6713 = vmatprep.subr.mxu0 %v5538_v2  ;;  %6785 = vmatpush1.msra.mxu1 %v5539_v18  ;;  %v12421_v41 = vpop.permute.xlu1 %6474  ;;  %v5460_v22 = vsel %vm14135_vm1, %v14134_v54, %v14133_v7  ;;  %vm14136_vm14 = vmmov %vm14132_vm0  ;;  %v5393_v25 = vsel %vm14138_vm4, %v12291_v55, %v11925_v34  ;;  %v14143_v18 = vld [vmem:[#allocation146_spill] sm:$0xff] }
 0xe45   :  { %6714 = vmatpush1.msra.mxu0 %v5537_v12  ;;  %6786 = vmatprep.subr.mxu1 %v5471_v8  ;;  %v5461_v50 = vsel %vm14136_vm14, %v14133_v7, %v14131_v61  ;;  %vm14137_vm7 = vmmov %vm14132_vm0  ;;  %v9124_v8 = vld [vmem:[#allocation4 + $0x80] sm:$0xff]  ;;  %v6519_v61 = vsel %vm6504_vm6, %v11017_v42, %v12178_v59  ;;  %v6512_v7 = vsel %vm6504_vm6, %v12421_v41, %v12038_v21 }
 0xe46   :  { %7060 = vperm.xlu1 %8932, %v6911_v20   ;;  %6715 = vmatprep.subr.mxu0 %v5469_v49  ;;  %v5459_v9 = vsel %vm14137_vm7, %v10997_v35, %v14134_v54  ;;  %vm14139_vm0 = vmmov %vm14138_vm4  ;;  %v14144_v20 = vld [vmem:[#allocation131_spill] sm:$0xff]  ;;  %v14147_v54 = vld [vmem:[#allocation148_spill] sm:$0xff] }
 0xe47   :  { %6787 = vmatpush1.msra.mxu1 %v5470_v40  ;;  %6716 = vmatpush1.msra.mxu0 %v5468_v47  ;;  %v5391_v36 = vsel %vm14139_vm0, %v12172_v45, %v12224_v28  ;;  %vm14140_vm1 = vmmov %vm14139_vm0  ;;  %v9125_v49 = vld [vmem:[#allocation4 + $0x88] sm:$0xff]  ;;  %v6520_v47 = vsel %vm6504_vm6, %v12178_v59, %v12240_v51 }
 0xe48   :  { %6788 = vmatprep.subr.mxu1 %v5462_v0  ;;  %6717 = vmatprep.subr.mxu0 %v5460_v22  ;;  %v12446_v6 = vpop.permute.xlu1 %6500  ;;  %v5392_v11 = vsel %vm14140_vm1, %v12224_v28, %v12291_v55  ;;  %vm14141_vm14 = vmmov %vm14139_vm0  ;;  %v5383_v28 = vsel %vm14139_vm0, %v14143_v18, %v11946_v31  ;;  %v12472_v55 = vpop.permute.xlu0 %5919  ;;  %v14148_v22 = vld [vmem:[#allocation133_spill] sm:$0xff] }
 0xe49   :  { %6789 = vmatpush1.msra.mxu1 %v5461_v50  ;;  %6718 = vmatpush1.msra.mxu0 %v5459_v9  ;;  %v5390_v35 = vsel %vm14141_vm14, %v11000_v33, %v12172_v45  ;;  %vm14142_vm7 = vmmov %vm14139_vm0  ;;  %v6510_v50 = vsel %vm6504_vm6, %v14148_v22, %v14147_v54  ;;  %v6509_v42 = vsel %vm6504_vm6, %v11019_v63, %v14148_v22  ;;  %vm14192_vm14 = vcmask 818176  }
 0xe4a   :  { %6790 = vmatprep.subr.mxu1 %v5393_v25  ;;  %6719 = vmatprep.subr.mxu0 %v5391_v36  ;;  %v5384_v2 = vsel %vm14142_vm7, %v11946_v31, %v12341_v27  ;;  %vm14145_vm4 = vmmov %vm14139_vm0  ;;  %v9126_v31 = vld [vmem:[#allocation4 + $0x28] sm:$0xff]  ;;  %v6435_v9 = vsel %vm6419_vm5, %v12182_v52, %v12246_v3  ;;  %v6434_v63 = vsel %vm6419_vm5, %v11023_v38, %v12182_v52  ;;  %v14149_v36 = vld [vmem:[#allocation150_spill] sm:$0xff] }
 0xe4b   :  { %6791 = vmatpush1.msra.mxu1 %v5392_v11  ;;  %6720 = vmatpush1.msra.mxu0 %v5390_v35  ;;  %v5382_v12 = vsel %vm14145_vm4, %v14144_v20, %v14143_v18  ;;  %vm14146_vm1 = vmmov %vm14139_vm0  ;;  %v14150_v35 = vld [vmem:[#allocation135_spill] sm:$0xff]  ;;  %v14151_v38 = vld [vmem:[#allocation101_spill] sm:$0xff]  ;;  %vm14196_vm4 = vcmask 1022976  }
 0xe4c   :  { %6792 = vmatprep.subr.mxu1 %v5384_v2  ;;  %6721 = vmatprep.subr.mxu0 %v5382_v12  ;;  %v5381_v33 = vsel %vm14146_vm1, %v11015_v29, %v14144_v20  ;;  %v6412_v45 = vpop.permute.xlu1 %6411  ;;  %v9127_v29 = vld [vmem:[#allocation4 + $0x30] sm:$0xff]  ;;  %v12492_v0 = vpop.permute.xlu0 %6243  ;;  %v6425_v2 = vsel %vm6419_vm5, %v14150_v35, %v14149_v36  ;;  %v6424_v18 = vsel %vm6419_vm5, %v11028_v1, %v14150_v35  ;;  %v14152_v12 = vld [vmem:[#allocation55_spill] sm:$0xff]  ;;  %vm14194_vm7 = vmmov %vm14192_vm14  ;;  %vm14199_vm1 = vcmask 1031168  }
 0xe4d   :  { %6793 = vmatpush1.msra.mxu1 %v5383_v28  ;;  %6722 = vmatpush1.msra.mxu0 %v5381_v33  ;;  %v6350_v52 = vsel %vm6334_vm8, %v14151_v38, %v12277_v57  ;;  %v6349_v28 = vsel %vm6334_vm8, %v14152_v12, %v14151_v38  ;;  %v14153_v33 = vld [vmem:[#allocation111_spill] sm:$0xff]  ;;  %v14166_v35 = vld [vmem:[#allocation141_spill] sm:$0xff]  ;;  %vm14198_vm0 = vmmov %vm14196_vm4 }
 0xe4e   :  { %6794 = vmatprep.subr.mxu1 %v11914_v5  ;;  %6723 = vmatprep.subr.mxu0 %v9124_v8  ;;  %v6522_v5 = vsel %vm6504_vm6, %v12392_v19, %v12022_v24  ;;  %v14154_v1 = vld [vmem:[#allocation151_spill] sm:$0xff] }
 0xe4f   :  { %6795 = vmatpush1.msra.mxu1 %v9125_v49  ;;  %6724 = vmatpush1.msra.mxu0 %v12132_v37  ;;  %v14156_v49 = vld [vmem:[#allocation57_spill] sm:$0xff] }
 0xe50   :  { %6796 = vmatprep.subr.mxu1 %v12045_v13  ;;  %6725 = vmatprep.subr.mxu0 %v9126_v31  ;;  %v12477_v40 = vpop.permute.xlu1 %6478  ;;  %v6521_v13 = vsel %vm6504_vm6, %v12240_v51, %v12392_v19  ;;  %v6511_v51 = vsel %vm6504_vm6, %v14147_v54, %v12421_v41  ;;  %v6437_v19 = vsel %vm6419_vm5, %v6412_v45, %v12085_v32  ;;  %v12528_v20 = vpop.permute.xlu0 %6310  ;;  %v14159_v54 = vld [vmem:[#allocation59_spill] sm:$0xff] }
 0xe51   :  { %6797 = vmatpush1.msra.mxu1 %v9127_v29  ;;  %6726 = vmatpush1.msra.mxu0 %v12132_v37  ;;  %v6436_v41 = vsel %vm6419_vm5, %v12246_v3, %v6412_v45  ;;  %v14155_v45 = vld [vmem:[#allocation137_spill] sm:$0xff] }
 0xe52   :  { %6798 = vmatprep.subr.mxu1 %v6522_v5  ;;  %6727 = vmatprep.subr.mxu0 %v6520_v47  ;;  %v6340_v8 = vsel %vm6334_vm8, %v14155_v45, %v14154_v1  ;;  %v6339_v31 = vsel %vm6334_vm8, %v14156_v49, %v14155_v45  ;;  %v14157_v5 = vld [vmem:[#allocation35_spill] sm:$0xff] }
 0xe53   :  { %6799 = vmatpush2.msra.mxu1 %v6521_v13  ;;  %6728 = vmatpush2.msra.mxu0 %v6519_v61  ;;  %v6265_v47 = vsel %vm6249_vm9, %v14157_v5, %v12316_v26  ;;  %v14158_v13 = vld [vmem:[#allocation100_spill] sm:$0xff]  ;;  %v6264_v22 = vsel %vm6249_vm9, %v14159_v54, %v14157_v5  ;;  %v14173_v54 = vld [vmem:[#allocation69_spill] sm:$0xff] }
 0xe54   :  { %6800 = vmatprep.subr.mxu1 %v6512_v7  ;;  %6729 = vmatprep.subr.mxu0 %v6510_v50  ;;  %v6390_v59 = vpop.permute.xlu1 %6389  ;;  %v12554_v50 = vpop.permute.xlu0 %6221 }
 0xe55   :  { %6801 = vmatpush2.msra.mxu1 %v6511_v51  ;;  %6730 = vmatpush2.msra.mxu0 %v6509_v42  ;;  %v6427_v25 = vsel %vm6419_vm5, %v6390_v59, %v12127_v44  ;;  %v6426_v11 = vsel %vm6419_vm5, %v14149_v36, %v6390_v59  ;;  %v14160_v51 = vld [vmem:[#allocation152_spill] sm:$0xff]  ;;  %v14161_v42 = vld [vmem:[#allocation139_spill] sm:$0xff] }
 0xe56   :  { %6802 = vmatprep.subr.mxu1 %v6437_v19  ;;  %6731 = vmatprep.subr.mxu0 %v6435_v9  ;;  %v6255_v59 = vsel %vm6249_vm9, %v14161_v42, %v14160_v51  ;;  %v14162_v19 = vld [vmem:[#allocation61_spill] sm:$0xff] }
 0xe57   :  { %6803 = vmatpush2.msra.mxu1 %v6436_v41  ;;  %6732 = vmatpush2.msra.mxu0 %v6434_v63  ;;  %v6254_v9 = vsel %vm6249_vm9, %v14162_v19, %v14161_v42  ;;  %v14164_v63 = vld [vmem:[#allocation63_spill] sm:$0xff] }
 0xe58   :  { %6733 = vmatprep.subr.mxu0 %v6425_v2  ;;  %6804 = vmatprep.subr.mxu1 %v6427_v25  ;;  %v12526_v3 = vpop.permute.xlu1 %6415  ;;  %v14163_v25 = vld [vmem:[#allocation54_spill] sm:$0xff]  ;;  %v12576_v12 = vpop.permute.xlu0 %6247  ;;  %v14175_v19 = vld [vmem:[#allocation71_spill] sm:$0xff] }
 0xe59   :  { %6734 = vmatpush2.msra.mxu0 %v6424_v18  ;;  %6805 = vmatpush2.msra.mxu1 %v6426_v11  ;;  %v6179_v41 = vsel %vm6164_vm10, %v14163_v25, %v12355_v17  ;;  %v6178_v36 = vsel %vm6164_vm10, %v14164_v63, %v14163_v25  ;;  %v14165_v11 = vld [vmem:[#allocation153_spill] sm:$0xff] }
 0xe5a   :  { %6735 = vmatprep.subr.mxu0 %v6350_v52  ;;  %6759 = vmatprep.mubr.f32.mxu0 %v14153_v33  ;;  %v6170_v2 = vsel %vm6164_vm10, %v14166_v35, %v14165_v11  ;;  %v14167_v18 = vld [vmem:[#allocation65_spill] sm:$0xff] }
 0xe5b   :  { %6736 = vmatpush2.msra.mxu0 %v6349_v28  ;;  %6830 = vmatprep.mubr.f32.mxu1 %v14153_v33  ;;  %v6169_v38 = vsel %vm6164_vm10, %v14167_v18, %v14166_v35  ;;  %v14168_v28 = vld [vmem:[#allocation99_spill] sm:$0xff]  ;;  %v14177_v63 = vld [vmem:[#allocation145_spill] sm:$0xff] }
 0xe5c   :  { %6737 = vmatprep.subr.mxu0 %v6340_v8  ;;  %v6327_v29 = vpop.permute.xlu1 %6326  ;;  %v6100_v45 = vsel %vm6085_vm13, %v14168_v28, %v12394_v23  ;;  %v14169_v8 = vld [vmem:[#allocation51_spill] sm:$0xff]  ;;  %v12602_v25 = vpop.permute.xlu0 %6160  ;;  %v14178_v35 = vld [vmem:[#allocation73_spill] sm:$0xff] }
 0xe5d   :  { %6738 = vmatpush2.msra.mxu0 %v6339_v31  ;;  %v6352_v61 = vsel %vm6334_vm8, %v6327_v29, %v14158_v13  ;;  %v6351_v7 = vsel %vm6334_vm8, %v12277_v57, %v6327_v29  ;;  %v14170_v29 = vld [vmem:[#allocation67_spill] sm:$0xff] }
 0xe5e   :  { %6739 = vmatprep.subr.mxu0 %v6265_v47  ;;  %6806 = vmatprep.subr.mxu1 %v6352_v61  ;;  %v6099_v5 = vsel %vm6085_vm13, %v14170_v29, %v14168_v28  ;;  %v14171_v47 = vld [vmem:[#allocation154_spill] sm:$0xff]  ;;  %v14172_v61 = vld [vmem:[#allocation143_spill] sm:$0xff]  ;;  %v14181_v29 = vld [vmem:[#allocation156_spill] sm:$0xff] }
 0xe5f   :  { %6740 = vmatpush2.msra.mxu0 %v6264_v22  ;;  %6807 = vmatpush2.msra.mxu1 %v6351_v7  ;;  %v6091_v7 = vsel %vm6085_vm13, %v14172_v61, %v14171_v47  ;;  %v6090_v22 = vsel %vm6085_vm13, %v14173_v54, %v14172_v61 }
 0xe60   :  { %6741 = vmatprep.subr.mxu0 %v6255_v59  ;;  %v12562_v57 = vpop.permute.xlu1 %6393 }
 0xe61   :  { %6742 = vmatpush2.msra.mxu0 %v6254_v9 }
 0xe62   :  { %6743 = vmatprep.subr.mxu0 %v6179_v41  ;;  %v14176_v41 = vld [vmem:[#allocation155_spill] sm:$0xff] }
 0xe63   :  { %6744 = vmatpush2.msra.mxu0 %v6178_v36  ;;  %v6012_v36 = vsel %vm6006_vm2, %v14177_v63, %v14176_v41 }
 0xe64   :  { %6745 = vmatprep.subr.mxu0 %v6170_v2  ;;  %v6305_v52 = vpop.permute.xlu1 %6304  ;;  %v6011_v2 = vsel %vm6006_vm2, %v14178_v35, %v14177_v63 }
 0xe65   :  { %6746 = vmatpush2.msra.mxu0 %v6169_v38  ;;  %v6342_v49 = vsel %vm6334_vm8, %v6305_v52, %v14169_v8  ;;  %v6341_v31 = vsel %vm6334_vm8, %v14154_v1, %v6305_v52  ;;  %v14174_v1 = vld [vmem:[#allocation102_spill] sm:$0xff]  ;;  %v14179_v38 = vld [vmem:[#allocation36_spill] sm:$0xff] }
 0xe66   :  { %6747 = vmatprep.subr.mxu0 %v6100_v45  ;;  %6808 = vmatprep.subr.mxu1 %v6342_v49  ;;  %v6021_v59 = vsel %vm6006_vm2, %v14174_v1, %v12432_v46  ;;  %v6020_v9 = vsel %vm6006_vm2, %v14175_v19, %v14174_v1  ;;  %v5942_v52 = vsel %vm5927_vm12, %v14179_v38, %v12472_v55  ;;  %v14180_v49 = vld [vmem:[#allocation75_spill] sm:$0xff]  ;;  %v14184_v1 = vld [vmem:[#allocation81_spill] sm:$0xff] }
 0xe67   :  { %6748 = vmatpush2.msra.mxu0 %v6099_v5  ;;  %6809 = vmatpush2.msra.mxu1 %v6341_v31  ;;  %v5941_v31 = vsel %vm5927_vm12, %v14180_v49, %v14179_v38  ;;  %v14182_v5 = vld [vmem:[#allocation147_spill] sm:$0xff] }
 0xe68   :  { %6749 = vmatprep.subr.mxu0 %v6091_v7  ;;  %v12594_v42 = vpop.permute.xlu1 %6330  ;;  %v5933_v61 = vsel %vm5927_vm12, %v14182_v5, %v14181_v29  ;;  %v5932_v7 = vsel %vm5927_vm12, %v14085_v30, %v14182_v5 }
 0xe69   :  { %6750 = vmatpush2.msra.mxu0 %v6090_v22  ;;  %v14183_v22 = vld [vmem:[#allocation103_spill] sm:$0xff] }
 0xe6a   :  { %6751 = vmatprep.subr.mxu0 %v6021_v59  ;;  %v14185_v59 = vld [vmem:[#allocation79_spill] sm:$0xff] }
 0xe6b   :  { %6752 = vmatpush2.msra.mxu0 %v6020_v9  ;;  %v5866_v19 = vsel %vm5848_vm3, %v14185_v59, %v14184_v1  ;;  %v14186_v9 = vld [vmem:[#allocation84_spill] sm:$0xff]  ;;  %v14195_v59 = vld [vmem:[#allocation98_spill] sm:$0xff] }
 0xe6c   :  { %6753 = vmatprep.subr.mxu0 %v6012_v36  ;;  %v6242_v18 = vpop.permute.xlu1 %6241  ;;  %v5857_v30 = vsel %vm5848_vm3, %v14093_v39, %v14186_v9  ;;  %v14188_v39 = vld [vmem:[#allocation87_spill] sm:$0xff] }
 0xe6d   :  { %6754 = vmatpush2.msra.mxu0 %v6011_v2  ;;  %v6267_v28 = vsel %vm6249_vm9, %v6242_v18, %v12492_v0  ;;  %v6266_v45 = vsel %vm6249_vm9, %v12316_v26, %v6242_v18  ;;  %v12628_v26 = vpop.permute.xlu0 %6225  ;;  %v14187_v2 = vld [vmem:[#allocation86_spill] sm:$0xff]  ;;  %v5778_v38 = vsel %vm5769_vm15, %v14098_v15, %v14188_v39 }
 0xe6e   :  { %6755 = vmatprep.subr.mxu0 %v5942_v52  ;;  %6810 = vmatprep.subr.mxu1 %v6267_v28  ;;  %v14190_v28 = vld [vmem:[#allocation91_spill] sm:$0xff] }
 0xe6f   :  { %6756 = vmatpush2.msra.mxu0 %v5941_v31  ;;  %6811 = vmatpush2.msra.mxu1 %v6266_v45  ;;  %v5699_v45 = vsel %vm5690_vm11, %v14103_v43, %v14190_v28  ;;  %v14193_v43 = vld [vmem:[#allocation95_spill] sm:$0xff] }
 0xe70   :  { %6757 = vmatprep.subr.mxu0 %v5933_v61  ;;  %v12626_v54 = vpop.permute.xlu1 %6308  ;;  %v14191_v61 = vld [vmem:[#allocation94_spill] sm:$0xff] }
 0xe71   :  { %6758 = vmatpush2.msra.mxu0 %v5932_v7  ;;  %v12648_v18 = vpop.permute.xlu0 %6140  ;;  %v5620_v7 = vsel %vm14194_vm7, %v14109_v10, %v14193_v43  ;;  %vm14202_vm7 = vcmask 1039360  }
 0xe72   :  { %6760 = vmatmul.mubr.f32.vlgmr.msra.gmra.mxu0 %v14183_v22  ;;  %6837 = vmatprep.subr.mxu0 %v14184_v1 }
 0xe73   :  { %6838 = vmatpush1.msra.mxu0 %v5866_v19  ;;  %6901 = vmatprep.mubr.f32.mxu0 %v14153_v33  ;;  %v5787_v33 = vsel %vm5769_vm15, %v14097_v58, %v14187_v2 }
 0xe74   :  { %6839 = vmatprep.subr.mxu0 %v14186_v9  ;;  %v6220_v63 = vpop.permute.xlu1 %6219 }
 0xe75   :  { %6840 = vmatpush1.msra.mxu0 %v5857_v30  ;;  %v6257_v36 = vsel %vm6249_vm9, %v6220_v63, %v12554_v50  ;;  %v6256_v35 = vsel %vm6249_vm9, %v14160_v51, %v6220_v63  ;;  %v14189_v51 = vld [vmem:[#allocation90_spill] sm:$0xff]  ;;  %v12664_v31 = vpop.permute.xlu0 %6081 }
 0xe76   :  { %6841 = vmatprep.subr.mxu0 %v14187_v2  ;;  %6812 = vmatprep.subr.mxu1 %v6257_v36  ;;  %v5708_v58 = vsel %vm5690_vm11, %v14102_v16, %v14189_v51  ;;  %v5629_v16 = vsel %vm14192_vm14, %v14108_v4, %v14191_v61  ;;  %v14197_v4 = vld [vmem:[#allocation109_spill] sm:$0xff]  ;;  %v14200_v36 = vld [vmem:[#allocation158_spill] sm:$0xff]  ;;  %vm14201_vm14 = vmmov %vm14199_vm1 }
 0xe77   :  { %6842 = vmatpush1.msra.mxu0 %v5787_v33  ;;  %6813 = vmatpush2.msra.mxu1 %v6256_v35  ;;  %v5541_v9 = vsel %vm14198_vm0, %v14119_v56, %v14197_v4  ;;  %v5463_v56 = vsel %vm14201_vm14, %v12266_v60, %v14200_v36  ;;  %v14203_v60 = vld [vmem:[#allocation159_spill] sm:$0xff]  ;;  %vm6982_vm0 = vcmask 449536  }
 0xe78   :  { %6843 = vmatprep.subr.mxu0 %v14188_v39  ;;  %v12654_v52 = vpop.permute.xlu1 %6245 }
 0xe79   :  { %6844 = vmatpush1.msra.mxu0 %v5778_v38  ;;  %v6060_v19 = vpop.permute.xlu0 %6059 }
 0xe7a   :  { %6845 = vmatprep.subr.mxu0 %v14189_v51  ;;  %v6523_v51 = vsel %vm6504_vm6, %v12022_v24, %v12446_v6 }
 0xe7b   :  { %6846 = vmatpush1.msra.mxu0 %v5708_v58  ;;  %v6092_v58 = vsel %vm6085_vm13, %v14171_v47, %v6060_v19 }
 0xe7c   :  { %6847 = vmatprep.subr.mxu0 %v14190_v28  ;;  %v6159_v49 = vpop.permute.xlu1 %6158  ;;  %v14206_v28 = vld [vmem:[#allocation132_spill] sm:$0xff] }
 0xe7d   :  { %6848 = vmatpush1.msra.mxu0 %v5699_v45  ;;  %v6181_v15 = vsel %vm6164_vm10, %v6159_v49, %v12602_v25  ;;  %v6180_v5 = vsel %vm6164_vm10, %v12355_v17, %v6159_v49  ;;  %v5550_v17 = vsel %vm14196_vm4, %v14113_v62, %v14195_v59  ;;  %v5472_v62 = vsel %vm14199_vm1, %v14126_v53, %v12314_v48  ;;  %v12700_v2 = vpop.permute.xlu0 %6142  ;;  %vm14204_vm4 = vmmov %vm14202_vm7 }
 0xe7e   :  { %6849 = vmatprep.subr.mxu0 %v14191_v61  ;;  %6814 = vmatprep.subr.mxu1 %v6181_v15  ;;  %v5385_v53 = vsel %vm14204_vm4, %v12341_v27, %v14203_v60  ;;  %v6514_v45 = vsel %vm6504_vm6, %v12477_v40, %v14206_v28  ;;  %v6513_v49 = vsel %vm6504_vm6, %v12038_v21, %v12477_v40  ;;  %v14207_v61 = vld [vmem:[#allocation50_spill] sm:$0xff] }
 0xe7f   :  { %6850 = vmatpush1.msra.mxu0 %v5629_v16  ;;  %6815 = vmatpush2.msra.mxu1 %v6180_v5  ;;  %v6439_v24 = vsel %vm6419_vm5, %v12526_v3, %v14207_v61  ;;  %v6438_v16 = vsel %vm6419_vm5, %v12085_v32, %v12526_v3  ;;  %v14208_v21 = vld [vmem:[#allocation34_spill] sm:$0xff]  ;;  %v6353_v32 = vsel %vm6334_vm8, %v14158_v13, %v12594_v42 }
 0xe80   :  { %6851 = vmatprep.subr.mxu0 %v14193_v43  ;;  %v12678_v1 = vpop.permute.xlu1 %6223  ;;  %v6429_v40 = vsel %vm6419_vm5, %v12562_v57, %v14208_v21  ;;  %v6428_v43 = vsel %vm6419_vm5, %v12127_v44, %v12562_v57  ;;  %v6343_v44 = vsel %vm6334_vm8, %v14169_v8, %v12626_v54  ;;  %v6268_v13 = vsel %vm6249_vm9, %v12492_v0, %v12654_v52 }
 0xe81   :  { %6852 = vmatpush1.msra.mxu0 %v5620_v7  ;;  %v6259_v8 = vsel %vm6249_vm9, %v12678_v1, %v12628_v26 }
 0xe82   :  { %6853 = vmatprep.subr.mxu0 %v14195_v59 }
 0xe83   :  { %6854 = vmatpush1.msra.mxu0 %v5550_v17  ;;  %v6344_v17 = vsel %vm6334_vm8, %v12626_v54, %v12528_v20 }
 0xe84   :  { %6855 = vmatprep.subr.mxu0 %v14197_v4  ;;  %v6139_v30 = vpop.permute.xlu1 %6138 }
 0xe85   :  { %6856 = vmatpush1.msra.mxu0 %v5541_v9  ;;  %v6172_v10 = vsel %vm6164_vm10, %v6139_v30, %v12648_v18  ;;  %v6171_v63 = vsel %vm6164_vm10, %v14165_v11, %v6139_v30 }
 0xe86   :  { %6857 = vmatprep.subr.mxu0 %v12314_v48  ;;  %6816 = vmatprep.subr.mxu1 %v6172_v10  ;;  %v5394_v48 = vsel %vm14202_vm7, %v11925_v34, %v12366_v14 }
 0xe87   :  { %6858 = vmatpush1.msra.mxu0 %v5472_v62  ;;  %6817 = vmatpush2.msra.mxu1 %v6171_v63 }
 0xe88   :  { %6859 = vmatprep.subr.mxu0 %v14200_v36  ;;  %v6080_v35 = vpop.permute.xlu1 %6079 }
 0xe89   :  { %6860 = vmatpush1.msra.mxu0 %v5463_v56  ;;  %v6102_v11 = vsel %vm6085_vm13, %v6080_v35, %v12664_v31  ;;  %v6101_v33 = vsel %vm6085_vm13, %v12394_v23, %v6080_v35  ;;  %v12715_v23 = vpop.permute.xlu0 %6002 }
 0xe8a   :  { %6861 = vmatprep.subr.mxu0 %v12366_v14  ;;  %6818 = vmatprep.subr.mxu1 %v6102_v11  ;;  %v14205_v14 = vld [vmem:[#allocation113_spill] sm:$0xff] }
 0xe8b   :  { %6862 = vmatpush1.msra.mxu0 %v5394_v48  ;;  %6819 = vmatpush2.msra.mxu1 %v6101_v33  ;;  %v6524_v38 = vsel %vm6504_vm6, %v12446_v6, %v14205_v14  ;;  %v6908_v33 = vld [vmem:[%s14210_s2] sm:$0xff] }
 0xe8c   :  { %6863 = vmatprep.subr.mxu0 %v14203_v60  ;;  %v6163_v39 = vpop.permute.xlu1 %6162  ;;  %v14211_v60 = vld [vmem:[#allocation26_spill] sm:$0xff] }
 0xe8d   :  { %6864 = vmatpush1.msra.mxu0 %v5385_v53  ;;  %v5981_v5 = vpop.permute.xlu0 %5980  ;;  %v6182_v0 = vsel %vm6164_vm10, %v12602_v25, %v6163_v39  ;;  %v12808_v53 = vrot.slane %v6908_v33, %v14211_v60 }
 0xe8e   :  { %6865 = vmatprep.subr.mxu0 %v12132_v37  ;;  %v6013_v20 = vsel %vm6006_vm2, %v14176_v41, %v5981_v5 }
 0xe8f   :  { %6866 = vmatpush1.msra.mxu0 %v12132_v37 }
 0xe90   :  { %6867 = vmatprep.subr.mxu0 %v12132_v37  ;;  %v12719_v34 = vpop.permute.xlu1 %6061 }
 0xe91   :  { %6868 = vmatpush1.msra.mxu0 %v12132_v37  ;;  %v6093_v27 = vsel %vm6085_vm13, %v6060_v19, %v12719_v34  ;;  %v6064_v3 = vpop.permute.xlu0 %6063  ;;  %v6269_v19 = vsel %vm6249_vm9, %v12654_v52, %v12576_v12  ;;  %v6258_v12 = vsel %vm6249_vm9, %v12554_v50, %v12678_v1  ;;  %v6173_v50 = vsel %vm6164_vm10, %v12648_v18, %v12700_v2 }
 0xe92   :  { %6869 = vmatprep.subr.mxu0 %v6524_v38  ;;  %6820 = vmatprep.subr.mxu1 %v6093_v27 }
 0xe93   :  { %6870 = vmatpush2.msra.mxu0 %v6523_v51  ;;  %6821 = vmatpush2.msra.mxu1 %v6092_v58  ;;  %v14213_v51 = vld [vmem:[#allocation27_spill] sm:$0xff] }
 0xe94   :  { %6871 = vmatprep.subr.mxu0 %v6514_v45  ;;  %v6001_v15 = vpop.permute.xlu1 %6000 }
 0xe95   :  { %6872 = vmatpush2.msra.mxu0 %v6513_v49  ;;  %v6023_v6 = vsel %vm6006_vm2, %v6001_v15, %v12715_v23  ;;  %v6022_v47 = vsel %vm6006_vm2, %v12432_v46, %v6001_v15  ;;  %v14209_v46 = vld [vmem:[#allocation56_spill] sm:$0xff]  ;;  %v14214_v49 = vld [vmem:[#allocation30_spill] sm:$0xff] }
 0xe96   :  { %6873 = vmatprep.subr.mxu0 %v6439_v24  ;;  %6822 = vmatprep.subr.mxu1 %v6023_v6  ;;  %v6354_v59 = vsel %vm6334_vm8, %v12594_v42, %v14209_v46  ;;  %v5924_v42 = vpop.permute.xlu0 %5923  ;;  %v12819_v15 = vrot.slane %v6908_v33, %v14214_v49  ;;  %v14215_v6 = vld [vmem:[#allocation29_spill] sm:$0xff]  ;;  %v14216_v46 = vld [vmem:[#allocation32_spill] sm:$0xff] }
 0xe97   :  { %6874 = vmatpush2.msra.mxu0 %v6438_v16  ;;  %6823 = vmatpush2.msra.mxu1 %v6022_v47  ;;  %v12823_v47 = vrot.slane %v6908_v33, %v14215_v6 }
 0xe98   :  { %6875 = vmatprep.subr.mxu0 %v6429_v40  ;;  %v6084_v7 = vpop.permute.xlu1 %6083 }
 0xe99   :  { %6876 = vmatpush2.msra.mxu0 %v6428_v43  ;;  %v6103_v26 = vsel %vm6085_vm13, %v12664_v31, %v6084_v7 }
 0xe9a   :  { %6877 = vmatprep.subr.mxu0 %v6354_v59  ;;  %v5902_v1 = vpop.permute.xlu0 %5901  ;;  %v12828_v59 = vrot.slane %v6908_v33, %v14216_v46 }
 0xe9b   :  { %6878 = vmatpush2.msra.mxu0 %v6353_v32  ;;  %v5934_v63 = vsel %vm5927_vm12, %v14181_v29, %v5902_v1 }
 0xe9c   :  { %6879 = vmatprep.subr.mxu0 %v6344_v17  ;;  %v5983_v57 = vpop.permute.xlu1 %5982 }
 0xe9d   :  { %6880 = vmatpush2.msra.mxu0 %v6343_v44  ;;  %v6014_v4 = vsel %vm6006_vm2, %v5981_v5, %v5983_v57  ;;  %v14217_v44 = vld [vmem:[#allocation52_spill] sm:$0xff] }
 0xe9e   :  { %6881 = vmatprep.subr.mxu0 %v6269_v19  ;;  %6824 = vmatprep.subr.mxu1 %v6014_v4  ;;  %v5985_v18 = vpop.permute.xlu0 %5984 }
 0xe9f   :  { %6882 = vmatpush2.msra.mxu0 %v6268_v13  ;;  %6825 = vmatpush2.msra.mxu1 %v6013_v20  ;;  %v6015_v31 = vsel %vm6006_vm2, %v5983_v57, %v5985_v18  ;;  %v12832_v57 = vrot.slane %v6908_v33, %v14217_v44  ;;  %v14218_v13 = vld [vmem:[#allocation53_spill] sm:$0xff] }
 0xea0   :  { %6883 = vmatprep.subr.mxu0 %v6259_v8  ;;  %v12835_v20 = vrot.slane %v6908_v33, %v14218_v13 }
 0xea1   :  { %6884 = vmatpush2.msra.mxu0 %v6258_v12  ;;  %v5922_v54 = vpop.permute.xlu1 %5921  ;;  %v6909_v12 = vld [vmem:[%s14210_s2 + $0x8] sm:$0x3] }
 0xea2   :  { %6885 = vmatprep.subr.mxu0 %v6163_v39  ;;  %v5944_v41 = vsel %vm5927_vm12, %v5922_v54, %v5924_v42  ;;  %v5943_v52 = vsel %vm5927_vm12, %v12472_v55, %v5922_v54  ;;  %v6094_v55 = vsel %vm6085_vm13, %v12719_v34, %v6064_v3  ;;  %v5906_v56 = vpop.permute.xlu0 %5905 }
 0xea3   :  { %6886 = vmatpush2.msra.mxu0 %v6182_v0  ;;  %6826 = vmatprep.subr.mxu1 %v5944_v41 }
 0xea4   :  { %6887 = vmatprep.subr.mxu0 %v12700_v2  ;;  %6827 = vmatpush2.msra.mxu1 %v5943_v52 }
 0xea5   :  { %6888 = vmatpush2.msra.mxu0 %v6173_v50 }
 0xea6   :  { %6889 = vmatprep.subr.mxu0 %v6084_v7  ;;  %v6005_v25 = vpop.permute.xlu1 %6004 }
 0xea7   :  { %6890 = vmatpush2.msra.mxu0 %v6103_v26  ;;  %v6024_v9 = vsel %vm6006_vm2, %v12715_v23, %v6005_v25  ;;  %v14212_v23 = vld [vmem:[#allocation28_spill] sm:$0xff] }
 0xea8   :  { %6891 = vmatprep.subr.mxu0 %v6064_v3  ;;  %v12811_v34 = vrot.slane %v6908_v33, %v14212_v23  ;;  %v12841_v50 = vrot.slane %v6909_v12, %v14212_v23 }
 0xea9   :  { %6892 = vmatpush2.msra.mxu0 %v6094_v55  ;;  %v12844_v55 = vrot.slane %v6909_v12, %v14211_v60 }
 0xeaa   :  { %6893 = vmatprep.subr.mxu0 %v6005_v25  ;;  %v5904_v30 = vpop.permute.xlu1 %5903 }
 0xeab   :  { %6894 = vmatpush2.msra.mxu0 %v6024_v9  ;;  %v5935_v10 = vsel %vm5927_vm12, %v5902_v1, %v5904_v30  ;;  %v5936_v35 = vsel %vm5927_vm12, %v5904_v30, %v5906_v56 }
 0xeac   :  { %6895 = vmatprep.subr.mxu0 %v5985_v18  ;;  %6828 = vmatprep.subr.mxu1 %v5935_v10 }
 0xead   :  { %6896 = vmatpush2.msra.mxu0 %v6015_v31  ;;  %6829 = vmatpush2.msra.mxu1 %v5934_v63 }
 0xeae   :  { %6831 = vmatmul.mubr.f32.vlgmr.msra.gmra.mxu1 %v14183_v22 }
 0xeaf   :  { %v5926_v62 = vpop.permute.xlu1 %5925  ;;  %7747 = vmatprep.mubr.f32.mxu1 %v12132_v37 }
 0xeb0   :  { %6897 = vmatprep.subr.mxu0 %v5926_v62  ;;  %v5945_v36 = vsel %vm5927_vm12, %v5924_v42, %v5926_v62 }
 0xeb1   :  { %6898 = vmatpush2.msra.mxu0 %v5945_v36  ;;  %v12849_v36 = vpop.permute.xlu0 %7045 }
 0xeb2   :  { %6899 = vmatprep.subr.mxu0 %v5906_v56 }
 0xeb3   :  { %6900 = vmatpush2.msra.mxu0 %v5936_v35 }
 0xeb4   :  { %6902 = vmatmul.mubr.f32.vlgmr.msra.gmra.mxu0 %v14183_v22  ;;  %v12815_v22 = vrot.slane %v6908_v33, %v14213_v51 }
 0xeb5   :  { %7889 = vmatprep.mubr.f32.mxu0 %v12132_v37 }
 0xebc   :  { %v6551_v11 = vpop.permute.xlu1 %6550 }
 0xeee   :  { %v6690_v14 = vpop.f32.mrf.mxu1 }
 0xeef   :  { %v6619_v29 = vpop.f32.mrf.mxu0  ;;  %v6691_v27 = vadd.f32 %v6690_v14, %v6551_v11 }
 0xef0   :  { %v6620_v39 = vadd.f32 %v6619_v29, %v6551_v11  ;;  %v6692_v58 = vpop.f32.mrf.mxu1 }
 0xef1   :  { %v6621_v2 = vpop.f32.mrf.mxu0  ;;  %v6966_v5 = vmul.f32 %v12815_v22, %v6691_v27  ;;  %v6693_v61 = vadd.f32 %v6692_v58, %v6551_v11 }
 0xef2   :  { %v6622_v48 = vadd.f32 %v6621_v2, %v6551_v11  ;;  %v6964_v37 = vmul.f32 %v12811_v34, %v6620_v39 }
 0xef3   :  { %v6967_v40 = vmul.f32 %v12819_v15, %v6693_v61 }
 0xef4   :  { %v6965_v38 = vmul.f32 %v12808_v53, %v6622_v48 }
 0xef6   :  { %v6974_v45 = vadd.f32 %v6965_v38, %v6964_v37 }
 0xef8   :  { %v6975_v21 = vadd.f32 %v6974_v45, %v6966_v5 }
 0xefa   :  { %v6976_v32 = vadd.f32 %v6975_v21, %v6967_v40 }
 0xf32   :  { %v6761_v28 = vpop.f32.mrf.mxu0 }
 0xf33   :  { %v6762_v24 = vadd.f32 %v6761_v28, %v6551_v11 }
 0xf34   :  { %v6763_v16 = vpop.f32.mrf.mxu0 }
 0xf35   :  { %v6968_v43 = vmul.f32 %v12823_v47, %v6762_v24  ;;  %v6764_v7 = vadd.f32 %v6763_v16, %v6551_v11 }
 0xf37   :  { %v6977_v3 = vadd.f32 %v6976_v32, %v6968_v43  ;;  %v6969_v17 = vmul.f32 %v12828_v59, %v6764_v7 }
 0xf39   :  { %v6978_v42 = vadd.f32 %v6977_v3, %v6969_v17 }
 0xf6e   :  { %v6832_v19 = vpop.f32.mrf.mxu1 }
 0xf6f   :  { %v6833_v4 = vadd.f32 %v6832_v19, %v6551_v11 }
 0xf70   :  { %v6834_v8 = vpop.f32.mrf.mxu1 }
 0xf71   :  { %v6970_v54 = vmul.f32 %v12832_v57, %v6833_v4  ;;  %v6835_v0 = vadd.f32 %v6834_v8, %v6551_v11 }
 0xf73   :  { %v6979_v41 = vadd.f32 %v6978_v42, %v6970_v54  ;;  %v6971_v52 = vmul.f32 %v12835_v20, %v6835_v0 }
 0xf74   :  { %v6903_v26 = vpop.f32.mrf.mxu0 }
 0xf75   :  { %v6980_v25 = vadd.f32 %v6979_v41, %v6971_v52  ;;  %v6904_v1 = vadd.f32 %v6903_v26, %v6551_v11  ;;  %v12890_v26 = vpop.permute.xlu1 %7060 }
 0xf76   :  { %v6905_v9 = vpop.f32.mrf.mxu0 }
 0xf77   :  { %v6972_v30 = vmul.f32 %v12841_v50, %v6904_v1  ;;  %v6906_v18 = vadd.f32 %v6905_v9, %v6551_v11 }
 0xf79   :  { %v6981_v10 = vadd.f32 %v6980_v25, %v6972_v30  ;;  %v6973_v31 = vmul.f32 %v12844_v55, %v6906_v18 }
 0xf7b   :  { %v6983_v63 = vsel %vm6982_vm0, %v6973_v31, 0.0 }
 0xf7c   :  { %v6984_v62 = vadd.f32 %v6983_v63, %v6981_v10 }
 0xf7e   :  { %6985 = vadd.xlane.f32.xlu0 %v6984_v62 }
0x1007   :  { %v6986_v56 = vpop.xlane.xlu0 %6985 }
0x1008   :  { %v6987_v35 = vmul.f32 0.0023923444, %v6986_v56 }
0x100a   :  { %v6988_v29 = vsub.f32 %v6620_v39, %v6987_v35  ;;  %v6989_v2 = vsub.f32 %v6622_v48, %v6987_v35  ;;  %v6990_v33 = vsub.f32 %v6691_v27, %v6987_v35  ;;  %v12851_v60 = vsub.f32 %v6693_v61, %v6987_v35 }
0x100b   :  { %v12853_v11 = vsub.f32 %v6762_v24, %v6987_v35  ;;  %v12855_v37 = vsub.f32 %v6764_v7, %v6987_v35  ;;  %v12861_v49 = vsub.f32 %v6833_v4, %v6987_v35  ;;  %v12866_v5 = vsub.f32 %v6835_v0, %v6987_v35 }
0x100c   :  { %v6998_v14 = vmul.f32 %v6988_v29, %v6988_v29  ;;  %v6999_v38 = vmul.f32 %v6989_v2, %v6989_v2  ;;  %v7000_v51 = vmul.f32 %v6990_v33, %v6990_v33  ;;  %v7001_v58 = vmul.f32 %v12851_v60, %v12851_v60 }
0x100d   :  { %v7002_v48 = vmul.f32 %v12853_v11, %v12853_v11  ;;  %v7003_v61 = vmul.f32 %v12855_v37, %v12855_v37  ;;  %v12871_v16 = vsub.f32 %v6906_v18, %v6987_v35  ;;  %v12873_v21 = vsub.f32 %v6904_v1, %v6987_v35 }
0x100e   :  { %v7008_v28 = vmul.f32 %v6998_v14, %v12811_v34  ;;  %v7009_v45 = vmul.f32 %v6999_v38, %v12808_v53  ;;  %v7010_v39 = vmul.f32 %v7000_v51, %v12815_v22  ;;  %v7011_v24 = vmul.f32 %v7001_v58, %v12819_v15 }
0x100f   :  { %v7004_v40 = vmul.f32 %v12861_v49, %v12861_v49  ;;  %v7012_v43 = vmul.f32 %v7002_v48, %v12823_v47  ;;  %v7005_v46 = vmul.f32 %v12866_v5, %v12866_v5  ;;  %v7013_v32 = vmul.f32 %v7003_v61, %v12828_v59 }
0x1010   :  { %v7018_v27 = vadd.f32 %v7009_v45, %v7008_v28  ;;  %v7007_v17 = vmul.f32 %v12871_v16, %v12871_v16  ;;  %v7006_v44 = vmul.f32 %v12873_v21, %v12873_v21 }
0x1011   :  { %v7014_v19 = vmul.f32 %v7004_v40, %v12832_v57  ;;  %v7015_v13 = vmul.f32 %v7005_v46, %v12835_v20 }
0x1012   :  { %v7019_v6 = vadd.f32 %v7018_v27, %v7010_v39  ;;  %v7017_v12 = vmul.f32 %v7007_v17, %v12844_v55  ;;  %v7016_v42 = vmul.f32 %v7006_v44, %v12841_v50 }
0x1014   :  { %v7020_v7 = vadd.f32 %v7019_v6, %v7011_v24  ;;  %v7026_v41 = vsel %vm6982_vm0, %v7017_v12, 0.0 }
0x1016   :  { %v7021_v3 = vadd.f32 %v7020_v7, %v7012_v43 }
0x1018   :  { %v7022_v4 = vadd.f32 %v7021_v3, %v7013_v32 }
0x101a   :  { %v7023_v8 = vadd.f32 %v7022_v4, %v7014_v19 }
0x101c   :  { %v7024_v54 = vadd.f32 %v7023_v8, %v7015_v13 }
0x101e   :  { %v7025_v0 = vadd.f32 %v7024_v54, %v7016_v42 }
0x1020   :  { %v7027_v52 = vadd.f32 %v7026_v41, %v7025_v0 }
0x1022   :  { %7028 = vadd.xlane.f32.xlu1 %v7027_v52 }
0x10ab   :  { %v7029_v25 = vpop.xlane.xlu1 %7028 }
0x10ac   :  { %v7030_v1 = vmul.f32 0.0023923444, %v7029_v25 }
0x10ae   :  { %v7031_v9 = vadd.f32 1e-05, %v7030_v1 }
0x10b0   :  { %9079 = vrsqrt.f32 %v7031_v9 }
0x10bd   :  { %v12892_v30 = vpop.eup %9079 }
0x10be   :  { %v7035_v18 = vmul.f32 %v12892_v30, %v6990_v33  ;;  %v7034_v10 = vmul.f32 %v12892_v30, %v6989_v2  ;;  %v7033_v31 = vmul.f32 %v12892_v30, %v6988_v29  ;;  %v7038_v40 = vmul.f32 %v12892_v30, %v12855_v37 }
0x10bf   :  { %v7039_v32 = vmul.f32 %v12892_v30, %v12861_v49 }
0x10c0   :  { %v7050_v63 = vmul.f32 %v12849_v36, %v7035_v18  ;;  %v7049_v62 = vmul.f32 %v12849_v36, %v7034_v10  ;;  %v7048_v56 = vmul.f32 %v12849_v36, %v7033_v31  ;;  %v7053_v46 = vmul.f32 %v12849_v36, %v7038_v40 }
0x10c2   :  { %v7065_v35 = vadd.f32 %v12890_v26, %v7050_v63  ;;  %v7064_v14 = vadd.f32 %v12890_v26, %v7049_v62  ;;  %v7063_v38 = vadd.f32 %v12890_v26, %v7048_v56  ;;  %v7068_v3 = vadd.f32 %v12890_v26, %v7053_v46 }
0x10c4   :  { %vm7075_vm1 = vcmp.ge.f32.partialorder %v7065_v35, 0.0  ;;  %v7085_v51 = vmul.f32 0.01, %v7065_v35  ;;  %vm7074_vm14 = vcmp.ge.f32.partialorder %v7064_v14, 0.0  ;;  %v7084_v33 = vmul.f32 0.01, %v7064_v14 }
0x10c5   :  { %vm7073_vm7 = vcmp.ge.f32.partialorder %v7063_v38, 0.0  ;;  %v7083_v2 = vmul.f32 0.01, %v7063_v38  ;;  %v7088_v49 = vmul.f32 0.01, %v7068_v3 }
0x10c6   :  { %v7095_v58 = vsel %vm7075_vm1, %v7065_v35, %v7085_v51  ;;  %v7094_v29 = vsel %vm7074_vm14, %v7064_v14, %v7084_v33  ;;  %vm7078_vm1 = vcmp.ge.f32.partialorder %v7068_v3, 0.0 }
0x10c7   :  { %v12904_v28 = vmul.f32 %v7095_v58, %v12815_v22  ;;  %v12907_v45 = vmul.f32 %v7094_v29, %v12808_v53  ;;  %v7093_v48 = vsel %vm7073_vm7, %v7063_v38, %v7083_v2  ;;  %v7036_v53 = vmul.f32 %v12892_v30, %v12851_v60 }
0x10c8   :  { %v12914_v39 = vmul.f32 %v7093_v48, %v12811_v34  ;;  %v7037_v22 = vmul.f32 %v12892_v30, %v12853_v11  ;;  %vm14219_vm7 = vcmask 818176  }
0x10c9   :  { %7638 = vrot.lane.b32.xlu1 %v12904_v28, %s9245_s13  ;;  %7636 = vrot.lane.b32.xlu0 %v12907_v45, %s9245_s13  ;;  %v7051_v34 = vmul.f32 %v12849_v36, %v7036_v53 }
0x10ca   :  { %v7052_v60 = vmul.f32 %v12849_v36, %v7037_v22 }
0x10cb   :  { %v7066_v27 = vadd.f32 %v12890_v26, %v7051_v34 }
0x10cc   :  { %v7067_v24 = vadd.f32 %v12890_v26, %v7052_v60 }
0x10cd   :  { %7598 = vrot.lane.b32.xlu1 %v12907_v45, %s9246_s17  ;;  %7634 = vrot.lane.b32.xlu0 %v12914_v39, %s9245_s13  ;;  %v7086_v61 = vmul.f32 0.01, %v7066_v27  ;;  %vm7076_vm4 = vcmp.ge.f32.partialorder %v7066_v27, 0.0 }
0x10ce   :  { %v7087_v6 = vmul.f32 0.01, %v7067_v24  ;;  %vm7077_vm0 = vcmp.ge.f32.partialorder %v7067_v24, 0.0 }
0x10cf   :  { %v7096_v11 = vsel %vm7076_vm4, %v7066_v27, %v7086_v61  ;;  %vm14220_vm4 = vmmov %vm14219_vm7 }
0x10d0   :  { %v13011_v43 = vmul.f32 %v7096_v11, %v12819_v15  ;;  %v7097_v7 = vsel %vm7077_vm0, %v7067_v24, %v7087_v6  ;;  %v7054_v15 = vmul.f32 %v12849_v36, %v7039_v32  ;;  %vm14221_vm0 = vcmask 1022976  }
0x10d1   :  { %7596 = vrot.lane.b32.xlu1 %v12914_v39, %s9246_s17  ;;  %7600 = vrot.lane.b32.xlu0 %v12904_v28, %s9246_s17  ;;  %v13021_v37 = vmul.f32 %v7097_v7, %v12823_v47  ;;  %v7098_v47 = vsel %vm7078_vm1, %v7068_v3, %v7088_v49  ;;  %vm14222_vm1 = vmmov %vm14221_vm0 }
0x10d2   :  { %v7069_v17 = vadd.f32 %v12890_v26, %v7054_v15  ;;  %v13039_v19 = vmul.f32 %v7098_v47, %v12828_v59 }
0x10d4   :  { %v7089_v44 = vmul.f32 0.01, %v7069_v17  ;;  %vm7079_vm14 = vcmp.ge.f32.partialorder %v7069_v17, 0.0 }
0x10d5   :  { %7562 = vrot.lane.b32.xlu1 %v12904_v28, %s9247_s21  ;;  %7560 = vrot.lane.b32.xlu0 %v12907_v45, %s9247_s21 }
0x10d6   :  { %v7099_v4 = vsel %vm7079_vm14, %v7069_v17, %v7089_v44 }
0x10d7   :  { %v13046_v13 = vmul.f32 %v7099_v4, %v12832_v57 }
0x10d9   :  { %7522 = vrot.lane.b32.xlu1 %v12907_v45, %s9248_s25  ;;  %7558 = vrot.lane.b32.xlu0 %v12914_v39, %s9247_s21 }
0x10dd   :  { %7520 = vrot.lane.b32.xlu1 %v12914_v39, %s9248_s25  ;;  %7524 = vrot.lane.b32.xlu0 %v12904_v28, %s9248_s25 }
0x10e1   :  { %7486 = vrot.lane.b32.xlu1 %v12904_v28, %s9249_s3  ;;  %7484 = vrot.lane.b32.xlu0 %v12907_v45, %s9249_s3 }
0x10e5   :  { %7446 = vrot.lane.b32.xlu1 %v12907_v45, %s9230_s29  ;;  %7482 = vrot.lane.b32.xlu0 %v12914_v39, %s9249_s3 }
0x10e9   :  { %7444 = vrot.lane.b32.xlu1 %v12914_v39, %s9230_s29  ;;  %7448 = vrot.lane.b32.xlu0 %v12904_v28, %s9230_s29 }
0x10ed   :  { %7410 = vrot.lane.b32.xlu1 %v12904_v28, %s9250_s14  ;;  %7408 = vrot.lane.b32.xlu0 %v12907_v45, %s9250_s14 }
0x10f1   :  { %7370 = vrot.lane.b32.xlu1 %v12907_v45, %s9251_s24  ;;  %7406 = vrot.lane.b32.xlu0 %v12914_v39, %s9250_s14 }
0x10f5   :  { %7368 = vrot.lane.b32.xlu1 %v12914_v39, %s9251_s24  ;;  %7372 = vrot.lane.b32.xlu0 %v12904_v28, %s9251_s24 }
0x10f9   :  { %7336 = vrot.lane.b32.xlu1 %v12904_v28, %s9242_s30  ;;  %7334 = vrot.lane.b32.xlu0 %v12907_v45, %s9242_s30 }
0x10fd   :  { %7299 = vrot.lane.b32.xlu1 %v12907_v45, %s9234_s19  ;;  %7332 = vrot.lane.b32.xlu0 %v12914_v39, %s9242_s30 }
0x1101   :  { %7297 = vrot.lane.b32.xlu1 %v12914_v39, %s9234_s19  ;;  %7301 = vrot.lane.b32.xlu0 %v12904_v28, %s9234_s19 }
0x1105   :  { %7266 = vrot.lane.b32.xlu1 %v12904_v28, %s9243_s26  ;;  %7264 = vrot.lane.b32.xlu0 %v12907_v45, %s9243_s26 }
0x1109   :  { %7229 = vrot.lane.b32.xlu1 %v12907_v45, %s9244_s9  ;;  %7262 = vrot.lane.b32.xlu0 %v12914_v39, %s9243_s26 }
0x110d   :  { %7227 = vrot.lane.b32.xlu1 %v12914_v39, %s9244_s9  ;;  %7231 = vrot.lane.b32.xlu0 %v12904_v28, %s9244_s9 }
0x1111   :  { %7196 = vrot.lane.b32.xlu1 %v12904_v28, %s9215_s11  ;;  %7194 = vrot.lane.b32.xlu0 %v12907_v45, %s9215_s11 }
0x1115   :  { %7159 = vrot.lane.b32.xlu1 %v12907_v45, %s9213_s10  ;;  %7192 = vrot.lane.b32.xlu0 %v12914_v39, %s9215_s11 }
0x1119   :  { %7157 = vrot.lane.b32.xlu1 %v12914_v39, %s9213_s10  ;;  %7161 = vrot.lane.b32.xlu0 %v12904_v28, %s9213_s10 }
0x111d   :  { %7126 = vrot.lane.b32.xlu1 %v12904_v28, %s9211_s28  ;;  %7124 = vrot.lane.b32.xlu0 %v12907_v45, %s9211_s28 }
0x1121   :  { %7640 = vrot.lane.b32.xlu1 %v13011_v43, %s9245_s13  ;;  %7122 = vrot.lane.b32.xlu0 %v12914_v39, %s9211_s28 }
0x1125   :  { %7602 = vrot.lane.b32.xlu1 %v13011_v43, %s9246_s17  ;;  %7642 = vrot.lane.b32.xlu0 %v13021_v37, %s9245_s13 }
0x1129   :  { %7564 = vrot.lane.b32.xlu1 %v13011_v43, %s9247_s21  ;;  %7604 = vrot.lane.b32.xlu0 %v13021_v37, %s9246_s17 }
0x112d   :  { %7526 = vrot.lane.b32.xlu1 %v13011_v43, %s9248_s25  ;;  %7566 = vrot.lane.b32.xlu0 %v13021_v37, %s9247_s21 }
0x1131   :  { %7644 = vrot.lane.b32.xlu1 %v13039_v19, %s9245_s13  ;;  %7528 = vrot.lane.b32.xlu0 %v13021_v37, %s9248_s25 }
0x1135   :  { %7488 = vrot.lane.b32.xlu1 %v13011_v43, %s9249_s3  ;;  %7646 = vrot.lane.b32.xlu0 %v13046_v13, %s9245_s13 }
0x1139   :  { %7606 = vrot.lane.b32.xlu1 %v13039_v19, %s9246_s17  ;;  %7490 = vrot.lane.b32.xlu0 %v13021_v37, %s9249_s3 }
0x113b   :  { %v13056_v59 = vpop.permute.xlu1 %7638  ;;  %v7637_v8 = vpop.permute.xlu0 %7636 }
0x113c   :  { %v7655_v12 = vsel %vm6504_vm6, %v7637_v8, %v13056_v59 }
0x113d   :  { %7683 = vmatprep.subr.mxu1 %v7655_v12  ;;  %7450 = vrot.lane.b32.xlu1 %v13011_v43, %s9230_s29 }
0x113e   :  { %7608 = vrot.lane.b32.xlu0 %v13046_v13, %s9246_s17 }
0x113f   :  { %v7599_v57 = vpop.permute.xlu1 %7598  ;;  %v7635_v42 = vpop.permute.xlu0 %7634 }
0x1140   :  { %v7654_v54 = vsel %vm6504_vm6, %v7635_v42, %v7637_v8 }
0x1141   :  { %7568 = vrot.lane.b32.xlu1 %v13039_v19, %s9247_s21  ;;  %7684 = vmatpush1.msra.mxu1 %v7654_v54 }
0x1142   :  { %7452 = vrot.lane.b32.xlu0 %v13021_v37, %s9230_s29 }
0x1143   :  { %v7597_v0 = vpop.permute.xlu1 %7596  ;;  %v13069_v41 = vpop.permute.xlu0 %7600 }
0x1144   :  { %v7616_v52 = vsel %vm6419_vm5, %v7597_v0, %v7599_v57  ;;  %v7617_v25 = vsel %vm6419_vm5, %v7599_v57, %v13069_v41 }
0x1145   :  { %7412 = vrot.lane.b32.xlu1 %v13011_v43, %s9250_s14  ;;  %7685 = vmatprep.subr.mxu1 %v7617_v25 }
0x1146   :  { %7570 = vrot.lane.b32.xlu0 %v13046_v13, %s9247_s21  ;;  %7686 = vmatpush1.msra.mxu1 %v7616_v52 }
0x1147   :  { %v13078_v1 = vpop.permute.xlu1 %7562  ;;  %v7561_v9 = vpop.permute.xlu0 %7560 }
0x1148   :  { %v7579_v18 = vsel %vm6334_vm8, %v7561_v9, %v13078_v1 }
0x1149   :  { %7530 = vrot.lane.b32.xlu1 %v13039_v19, %s9248_s25  ;;  %7687 = vmatprep.subr.mxu1 %v7579_v18  ;;  %v7040_v18 = vmul.f32 %v12892_v30, %v12866_v5  ;;  %v7041_v5 = vmul.f32 %v12892_v30, %v12873_v21 }
0x114a   :  { %7414 = vrot.lane.b32.xlu0 %v13021_v37, %s9250_s14 }
0x114b   :  { %v7523_v10 = vpop.permute.xlu1 %7522  ;;  %v7559_v31 = vpop.permute.xlu0 %7558 }
0x114c   :  { %v7578_v63 = vsel %vm6334_vm8, %v7559_v31, %v7561_v9 }
0x114d   :  { %7374 = vrot.lane.b32.xlu1 %v13011_v43, %s9251_s24  ;;  %7688 = vmatpush1.msra.mxu1 %v7578_v63 }
0x114e   :  { %7532 = vrot.lane.b32.xlu0 %v13046_v13, %s9248_s25 }
0x114f   :  { %v7521_v62 = vpop.permute.xlu1 %7520  ;;  %v13091_v56 = vpop.permute.xlu0 %7524 }
0x1150   :  { %v7540_v35 = vsel %vm6249_vm9, %v7521_v62, %v7523_v10  ;;  %v7541_v14 = vsel %vm6249_vm9, %v7523_v10, %v13091_v56 }
0x1151   :  { %7492 = vrot.lane.b32.xlu1 %v13039_v19, %s9249_s3  ;;  %7689 = vmatprep.subr.mxu1 %v7541_v14 }
0x1152   :  { %7376 = vrot.lane.b32.xlu0 %v13021_v37, %s9251_s24  ;;  %7690 = vmatpush1.msra.mxu1 %v7540_v35  ;;  %v7055_v35 = vmul.f32 %v12849_v36, %v7040_v18 }
0x1153   :  { %v13100_v38 = vpop.permute.xlu1 %7486  ;;  %v7485_v51 = vpop.permute.xlu0 %7484 }
0x1154   :  { %v7503_v33 = vsel %vm6164_vm10, %v7485_v51, %v13100_v38 }
0x1155   :  { %7338 = vrot.lane.b32.xlu1 %v13011_v43, %s9242_s30  ;;  %7691 = vmatprep.subr.mxu1 %v7503_v33 }
0x1156   :  { %7494 = vrot.lane.b32.xlu0 %v13046_v13, %s9249_s3 }
0x1157   :  { %v7447_v2 = vpop.permute.xlu1 %7446  ;;  %v7483_v58 = vpop.permute.xlu0 %7482 }
0x1158   :  { %v7502_v29 = vsel %vm6164_vm10, %v7483_v58, %v7485_v51  ;;  %v7056_v58 = vmul.f32 %v12849_v36, %v7041_v5 }
0x1159   :  { %7454 = vrot.lane.b32.xlu1 %v13039_v19, %s9230_s29  ;;  %7692 = vmatpush1.msra.mxu1 %v7502_v29 }
0x115a   :  { %7340 = vrot.lane.b32.xlu0 %v13021_v37, %s9242_s30 }
0x115b   :  { %v7445_v48 = vpop.permute.xlu1 %7444  ;;  %v13113_v53 = vpop.permute.xlu0 %7448 }
0x115c   :  { %v7464_v34 = vsel %vm6085_vm13, %v7445_v48, %v7447_v2  ;;  %v7465_v22 = vsel %vm6085_vm13, %v7447_v2, %v13113_v53  ;;  %v7070_v2 = vadd.f32 %v12890_v26, %v7055_v35 }
0x115d   :  { %7303 = vrot.lane.b32.xlu1 %v13011_v43, %s9234_s19  ;;  %7693 = vmatprep.subr.mxu1 %v7465_v22  ;;  %v7071_v22 = vadd.f32 %v12890_v26, %v7056_v58 }
0x115e   :  { %7456 = vrot.lane.b32.xlu0 %v13046_v13, %s9230_s29  ;;  %7694 = vmatpush1.msra.mxu1 %v7464_v34  ;;  %v7090_v34 = vmul.f32 0.01, %v7070_v2  ;;  %vm7080_vm14 = vcmp.ge.f32.partialorder %v7070_v2, 0.0 }
0x115f   :  { %v13122_v27 = vpop.permute.xlu1 %7410  ;;  %v7409_v60 = vpop.permute.xlu0 %7408 }
0x1160   :  { %v7427_v61 = vsel %vm6006_vm2, %v7409_v60, %v13122_v27 }
0x1161   :  { %7416 = vrot.lane.b32.xlu1 %v13039_v19, %s9250_s14  ;;  %7695 = vmatprep.subr.mxu1 %v7427_v61 }
0x1162   :  { %7305 = vrot.lane.b32.xlu0 %v13021_v37, %s9234_s19 }
0x1163   :  { %v7371_v24 = vpop.permute.xlu1 %7370  ;;  %v7407_v11 = vpop.permute.xlu0 %7406 }
0x1164   :  { %v7426_v6 = vsel %vm6006_vm2, %v7407_v11, %v7409_v60 }
0x1165   :  { %7268 = vrot.lane.b32.xlu1 %v13011_v43, %s9243_s26  ;;  %7696 = vmatpush1.msra.mxu1 %v7426_v6  ;;  %v7100_v6 = vsel %vm7080_vm14, %v7070_v2, %v7090_v34 }
0x1166   :  { %7418 = vrot.lane.b32.xlu0 %v13046_v13, %s9250_s14 }
0x1167   :  { %v7369_v40 = vpop.permute.xlu1 %7368  ;;  %v13135_v7 = vpop.permute.xlu0 %7372 }
0x1168   :  { %v7388_v46 = vsel %vm5927_vm12, %v7369_v40, %v7371_v24  ;;  %v7389_v32 = vsel %vm5927_vm12, %v7371_v24, %v13135_v7  ;;  %v7091_v40 = vmul.f32 0.01, %v7071_v22 }
0x1169   :  { %7378 = vrot.lane.b32.xlu1 %v13039_v19, %s9251_s24  ;;  %7697 = vmatprep.subr.mxu1 %v7389_v32 }
0x116a   :  { %7270 = vrot.lane.b32.xlu0 %v13021_v37, %s9243_s26  ;;  %7698 = vmatpush1.msra.mxu1 %v7388_v46 }
0x116b   :  { %v13144_v3 = vpop.permute.xlu1 %7336  ;;  %v7335_v15 = vpop.permute.xlu0 %7334 }
0x116c   :  { %v7351_v49 = vsel %vm5848_vm3, %v7335_v15, %v13144_v3 }
0x116d   :  { %7233 = vrot.lane.b32.xlu1 %v13011_v43, %s9244_s9  ;;  %7699 = vmatprep.subr.mxu1 %v7351_v49 }
0x116e   :  { %7380 = vrot.lane.b32.xlu0 %v13046_v13, %s9251_s24 }
0x116f   :  { %v7300_v17 = vpop.permute.xlu1 %7299  ;;  %v7333_v47 = vpop.permute.xlu0 %7332 }
0x1170   :  { %v7350_v44 = vsel %vm5848_vm3, %v7333_v47, %v7335_v15  ;;  %v13221_v15 = vmul.f32 %v7100_v6, %v12835_v20  ;;  %v13236_v20 = vld [vmem:[%s9403_s27] sm:$0x1] }
0x1171   :  { %7342 = vrot.lane.b32.xlu1 %v13039_v19, %s9242_s30  ;;  %7700 = vmatpush1.msra.mxu1 %v7350_v44 }
0x1172   :  { %7235 = vrot.lane.b32.xlu0 %v13021_v37, %s9244_s9 }
0x1173   :  { %v7298_v4 = vpop.permute.xlu1 %7297  ;;  %v13157_v8 = vpop.permute.xlu0 %7301 }
0x1174   :  { %v7315_v12 = vsel %vm5769_vm15, %v7298_v4, %v7300_v17  ;;  %v7316_v57 = vsel %vm5769_vm15, %v7300_v17, %v13157_v8 }
0x1175   :  { %7198 = vrot.lane.b32.xlu1 %v13011_v43, %s9215_s11  ;;  %7701 = vmatprep.subr.mxu1 %v7316_v57 }
0x1176   :  { %7344 = vrot.lane.b32.xlu0 %v13046_v13, %s9242_s30  ;;  %7702 = vmatpush1.msra.mxu1 %v7315_v12 }
0x1177   :  { %v13166_v42 = vpop.permute.xlu1 %7266  ;;  %v7265_v54 = vpop.permute.xlu0 %7264 }
0x1178   :  { %v7281_v0 = vsel %vm5690_vm11, %v7265_v54, %v13166_v42 }
0x1179   :  { %7307 = vrot.lane.b32.xlu1 %v13039_v19, %s9234_s19  ;;  %7703 = vmatprep.subr.mxu1 %v7281_v0 }
0x117a   :  { %7200 = vrot.lane.b32.xlu0 %v13021_v37, %s9215_s11 }
0x117b   :  { %v7230_v52 = vpop.permute.xlu1 %7229  ;;  %v7263_v25 = vpop.permute.xlu0 %7262 }
0x117c   :  { %v7280_v9 = vsel %vm5690_vm11, %v7263_v25, %v7265_v54  ;;  %v13252_v25 = vld [vmem:[#allocation4] sm:$0xff] }
0x117d   :  { %7163 = vrot.lane.b32.xlu1 %v13011_v43, %s9213_s10  ;;  %7704 = vmatpush1.msra.mxu1 %v7280_v9 }
0x117e   :  { %7309 = vrot.lane.b32.xlu0 %v13046_v13, %s9234_s19 }
0x117f   :  { %v7228_v10 = vpop.permute.xlu1 %7227  ;;  %v13181_v31 = vpop.permute.xlu0 %7231 }
0x1180   :  { %v7245_v63 = vsel %vm14219_vm7, %v7228_v10, %v7230_v52  ;;  %v7246_v62 = vsel %vm14220_vm4, %v7230_v52, %v13181_v31  ;;  %vm14223_vm7 = vcmask 1031168  }
0x1181   :  { %7272 = vrot.lane.b32.xlu1 %v13039_v19, %s9243_s26  ;;  %7705 = vmatprep.subr.mxu1 %v7246_v62  ;;  %vm14224_vm4 = vmmov %vm14223_vm7 }
0x1182   :  { %7165 = vrot.lane.b32.xlu0 %v13021_v37, %s9213_s10  ;;  %7706 = vmatpush1.msra.mxu1 %v7245_v63 }
0x1183   :  { %v13193_v14 = vpop.permute.xlu1 %7196  ;;  %v7195_v51 = vpop.permute.xlu0 %7194 }
0x1184   :  { %v7211_v33 = vsel %vm14221_vm0, %v7195_v51, %v13193_v14  ;;  %vm7081_vm0 = vcmp.ge.f32.partialorder %v7071_v22, 0.0 }
0x1185   :  { %7128 = vrot.lane.b32.xlu1 %v13011_v43, %s9211_s28  ;;  %7707 = vmatprep.subr.mxu1 %v7211_v33  ;;  %v7101_v17 = vsel %vm7081_vm0, %v7071_v22, %v7091_v40 }
0x1186   :  { %7274 = vrot.lane.b32.xlu0 %v13046_v13, %s9243_s26  ;;  %v13231_v12 = vmul.f32 %v7101_v17, %v12841_v50  ;;  %v7042_v50 = vmul.f32 %v12892_v30, %v12871_v16 }
0x1187   :  { %v7160_v21 = vpop.permute.xlu1 %7159  ;;  %v7193_v29 = vpop.permute.xlu0 %7192 }
0x1188   :  { %v7210_v48 = vsel %vm14222_vm1, %v7193_v29, %v7195_v51  ;;  %vm14225_vm1 = vcmask 1039360   ;;  %v7057_v16 = vmul.f32 %v12849_v36, %v7042_v50 }
0x1189   :  { %7237 = vrot.lane.b32.xlu1 %v13039_v19, %s9244_s9  ;;  %7708 = vmatpush1.msra.mxu1 %v7210_v48  ;;  %vm14226_vm14 = vmmov %vm14225_vm1 }
0x118a   :  { %7130 = vrot.lane.b32.xlu0 %v13021_v37, %s9211_s28  ;;  %v7072_v63 = vadd.f32 %v12890_v26, %v7057_v16 }
0x118b   :  { %v7158_v60 = vpop.permute.xlu1 %7157  ;;  %v13209_v61 = vpop.permute.xlu0 %7161 }
0x118c   :  { %v7175_v24 = vsel %vm14223_vm7, %v7158_v60, %v7160_v21  ;;  %v7176_v11 = vsel %vm14224_vm4, %v7160_v21, %v13209_v61  ;;  %v7092_v5 = vmul.f32 0.01, %v7072_v63  ;;  %vm7082_vm7 = vcmp.ge.f32.partialorder %v7072_v63, 0.0 }
0x118d   :  { %7202 = vrot.lane.b32.xlu1 %v13039_v19, %s9215_s11  ;;  %7709 = vmatprep.subr.mxu1 %v7176_v11  ;;  %vm14227_vm4 = vcmask 818176  }
0x118e   :  { %7239 = vrot.lane.b32.xlu0 %v13046_v13, %s9244_s9  ;;  %7710 = vmatpush1.msra.mxu1 %v7175_v24  ;;  %v7102_v2 = vsel %vm7082_vm7, %v7072_v63, %v7092_v5  ;;  %vm14228_vm0 = vmmov %vm14227_vm4  ;;  %vm14232_vm7 = vcmask 1031168  }
0x118f   :  { %v13218_v46 = vpop.permute.xlu1 %7126  ;;  %v7125_v32 = vpop.permute.xlu0 %7124  ;;  %v13291_v29 = vmul.f32 %v7102_v2, %v12844_v55 }
0x1190   :  { %v7141_v49 = vsel %vm14225_vm1, %v7125_v32, %v13218_v46  ;;  %vm14230_vm1 = vcmask 1022976  }
0x1191   :  { %7648 = vrot.lane.b32.xlu1 %v13221_v15, %s9245_s13  ;;  %7711 = vmatprep.subr.mxu1 %v7141_v49 }
0x1192   :  { %7204 = vrot.lane.b32.xlu0 %v13046_v13, %s9215_s11 }
0x1193   :  { %v7641_v47 = vpop.permute.xlu1 %7640  ;;  %v7123_v44 = vpop.permute.xlu0 %7122 }
0x1194   :  { %v7140_v4 = vsel %vm14226_vm14, %v7123_v44, %v7125_v32  ;;  %v7656_v52 = vsel %vm6504_vm6, %v13056_v59, %v7641_v47  ;;  %vm14231_vm14 = vmmov %vm14230_vm1 }
0x1195   :  { %7167 = vrot.lane.b32.xlu1 %v13039_v19, %s9213_s10  ;;  %7712 = vmatpush1.msra.mxu1 %v7140_v4 }
0x1196   :  { %7650 = vrot.lane.b32.xlu0 %v13231_v12, %s9245_s13  ;;  %7713 = vmatprep.subr.mxu1 %v12907_v45 }
0x1197   :  { %v7603_v57 = vpop.permute.xlu1 %7602  ;;  %7714 = vmatpush1.msra.mxu1 %v12914_v39  ;;  %v7643_v54 = vpop.permute.xlu0 %7642 }
0x1198   :  { %v7657_v0 = vsel %vm6504_vm6, %v7641_v47, %v7643_v54  ;;  %7748 = vmatmul.mubr.f32.vlgmr.msra.gmra.mxu1 %v13236_v20  ;;  %v7618_v30 = vsel %vm6419_vm5, %v13069_v41, %v7603_v57 }
0x1199   :  { %7610 = vrot.lane.b32.xlu1 %v13221_v15, %s9246_s17  ;;  %7754 = vmatprep.subr.mxu1 %v7657_v0 }
0x119a   :  { %7169 = vrot.lane.b32.xlu0 %v13046_v13, %s9213_s10  ;;  %7755 = vmatpush1.msra.mxu1 %v7656_v52 }
0x119b   :  { %v7565_v45 = vpop.permute.xlu1 %7564  ;;  %v7605_v39 = vpop.permute.xlu0 %7604  ;;  %7818 = vmatprep.mubr.f32.mxu1 %v13252_v25 }
0x119c   :  { %v7619_v9 = vsel %vm6419_vm5, %v7603_v57, %v7605_v39  ;;  %v7580_v36 = vsel %vm6334_vm8, %v13078_v1, %v7565_v45 }
0x119d   :  { %7132 = vrot.lane.b32.xlu1 %v13039_v19, %s9211_s28  ;;  %7756 = vmatprep.subr.mxu1 %v7619_v9 }
0x119e   :  { %7612 = vrot.lane.b32.xlu0 %v13231_v12, %s9246_s17  ;;  %7757 = vmatpush1.msra.mxu1 %v7618_v30 }
0x119f   :  { %v7527_v59 = vpop.permute.xlu1 %7526  ;;  %v7567_v18 = vpop.permute.xlu0 %7566 }
0x11a0   :  { %v7581_v10 = vsel %vm6334_vm8, %v7565_v45, %v7567_v18  ;;  %v7542_v26 = vsel %vm6249_vm9, %v13091_v56, %v7527_v59 }
0x11a1   :  { %7572 = vrot.lane.b32.xlu1 %v13221_v15, %s9247_s21  ;;  %7758 = vmatprep.subr.mxu1 %v7581_v10 }
0x11a2   :  { %7134 = vrot.lane.b32.xlu0 %v13046_v13, %s9211_s28  ;;  %7759 = vmatpush1.msra.mxu1 %v7580_v36 }
0x11a3   :  { %v7645_v41 = vpop.permute.xlu1 %7644  ;;  %v13271_v62 = vpop.permute.xlu0 %7528 }
0x11a4   :  { %v7543_v35 = vsel %vm6249_vm9, %v7527_v59, %v13271_v62  ;;  %v7658_v58 = vsel %vm6504_vm6, %v7643_v54, %v7645_v41 }
0x11a5   :  { %7534 = vrot.lane.b32.xlu1 %v13221_v15, %s9248_s25  ;;  %7760 = vmatprep.subr.mxu1 %v7543_v35 }
0x11a6   :  { %7574 = vrot.lane.b32.xlu0 %v13231_v12, %s9247_s21  ;;  %7761 = vmatpush1.msra.mxu1 %v7542_v26 }
0x11a7   :  { %v7489_v1 = vpop.permute.xlu1 %7488  ;;  %v13281_v51 = vpop.permute.xlu0 %7646 }
0x11a8   :  { %v7659_v33 = vsel %vm6504_vm6, %v7645_v41, %v13281_v51  ;;  %v7504_v34 = vsel %vm6164_vm10, %v13100_v38, %v7489_v1 }
0x11a9   :  { %7496 = vrot.lane.b32.xlu1 %v13221_v15, %s9249_s3  ;;  %7825 = vmatprep.subr.mxu0 %v7659_v33 }
0x11aa   :  { %7536 = vrot.lane.b32.xlu0 %v13231_v12, %s9248_s25  ;;  %7826 = vmatpush1.msra.mxu0 %v7658_v58 }
0x11ab   :  { %v7607_v56 = vpop.permute.xlu1 %7606  ;;  %v7491_v21 = vpop.permute.xlu0 %7490 }
0x11ac   :  { %v7505_v48 = vsel %vm6164_vm10, %v7489_v1, %v7491_v21  ;;  %v7620_v24 = vsel %vm6419_vm5, %v7605_v39, %v7607_v56 }
0x11ad   :  { %7652 = vrot.lane.b32.xlu1 %v13291_v29, %s9245_s13  ;;  %7762 = vmatprep.subr.mxu1 %v7505_v48 }
0x11ae   :  { %7498 = vrot.lane.b32.xlu0 %v13231_v12, %s9249_s3  ;;  %7763 = vmatpush1.msra.mxu1 %v7504_v34 }
0x11af   :  { %v7451_v22 = vpop.permute.xlu1 %7450 }
0x11b0   :  { %v13300_v60 = vpop.permute.xlu0 %7608  ;;  %v7466_v40 = vsel %vm6085_vm13, %v13113_v53, %v7451_v22 }
0x11b1   :  { %7460 = vrot.lane.b32.xlu1 %v13231_v12, %s9230_s29  ;;  %v7621_v55 = vsel %vm6419_vm5, %v7607_v56, %v13300_v60 }
0x11b2   :  { %7458 = vrot.lane.b32.xlu0 %v13221_v15, %s9230_s29  ;;  %7827 = vmatprep.subr.mxu0 %v7621_v55 }
0x11b3   :  { %7828 = vmatpush1.msra.mxu0 %v7620_v24  ;;  %v7569_v38 = vpop.permute.xlu1 %7568 }
0x11b4   :  { %v7453_v11 = vpop.permute.xlu0 %7452  ;;  %v7582_v47 = vsel %vm6334_vm8, %v7567_v18, %v7569_v38 }
0x11b5   :  { %7420 = vrot.lane.b32.xlu1 %v13221_v15, %s9250_s14  ;;  %v7467_v6 = vsel %vm6085_vm13, %v7451_v22, %v7453_v11 }
0x11b6   :  { %7614 = vrot.lane.b32.xlu0 %v13291_v29, %s9246_s17  ;;  %7764 = vmatprep.subr.mxu1 %v7467_v6 }
0x11b7   :  { %7765 = vmatpush1.msra.mxu1 %v7466_v40  ;;  %v7413_v32 = vpop.permute.xlu1 %7412 }
0x11b8   :  { %v13316_v49 = vpop.permute.xlu0 %7570  ;;  %v7428_v57 = vsel %vm6006_vm2, %v13122_v27, %v7413_v32 }
0x11b9   :  { %7576 = vrot.lane.b32.xlu1 %v13291_v29, %s9247_s21  ;;  %v7583_v17 = vsel %vm6334_vm8, %v7569_v38, %v13316_v49 }
0x11ba   :  { %7422 = vrot.lane.b32.xlu0 %v13231_v12, %s9250_s14  ;;  %7829 = vmatprep.subr.mxu0 %v7583_v17 }
0x11bb   :  { %7830 = vmatpush1.msra.mxu0 %v7582_v47  ;;  %v7531_v53 = vpop.permute.xlu1 %7530 }
0x11bc   :  { %v7415_v44 = vpop.permute.xlu0 %7414  ;;  %v7544_v52 = vsel %vm6249_vm9, %v13271_v62, %v7531_v53 }
0x11bd   :  { %7384 = vrot.lane.b32.xlu1 %v13231_v12, %s9251_s24  ;;  %v7429_v4 = vsel %vm6006_vm2, %v7413_v32, %v7415_v44 }
0x11be   :  { %7382 = vrot.lane.b32.xlu0 %v13221_v15, %s9251_s24  ;;  %7766 = vmatprep.subr.mxu1 %v7429_v4  ;;  %v14229_v4 = vld [vmem:[#allocation31_spill] sm:$0xff] }
0x11bf   :  { %7767 = vmatpush1.msra.mxu1 %v7428_v57  ;;  %v7375_v54 = vpop.permute.xlu1 %7374 }
0x11c0   :  { %v13332_v0 = vpop.permute.xlu0 %7532  ;;  %v7390_v9 = vsel %vm5927_vm12, %v13135_v7, %v7375_v54 }
0x11c1   :  { %7346 = vrot.lane.b32.xlu1 %v13221_v15, %s9242_s30  ;;  %v7545_v50 = vsel %vm6249_vm9, %v7531_v53, %v13332_v0 }
0x11c2   :  { %7538 = vrot.lane.b32.xlu0 %v13291_v29, %s9248_s25  ;;  %7831 = vmatprep.subr.mxu0 %v7545_v50 }
0x11c3   :  { %7832 = vmatpush1.msra.mxu0 %v7544_v52  ;;  %v7493_v27 = vpop.permute.xlu1 %7492 }
0x11c4   :  { %v7377_v45 = vpop.permute.xlu0 %7376  ;;  %v7506_v18 = vsel %vm6164_vm10, %v7491_v21, %v7493_v27 }
0x11c5   :  { %7500 = vrot.lane.b32.xlu1 %v13291_v29, %s9249_s3  ;;  %v7391_v39 = vsel %vm5927_vm12, %v7375_v54, %v7377_v45 }
0x11c6   :  { %7348 = vrot.lane.b32.xlu0 %v13231_v12, %s9242_s30  ;;  %7768 = vmatprep.subr.mxu1 %v7391_v39 }
0x11c7   :  { %7769 = vmatpush1.msra.mxu1 %v7390_v9  ;;  %v7339_v16 = vpop.permute.xlu1 %7338 }
0x11c8   :  { %v13349_v30 = vpop.permute.xlu0 %7494  ;;  %v7352_v36 = vsel %vm5848_vm3, %v13144_v3, %v7339_v16 }
0x11c9   :  { %7313 = vrot.lane.b32.xlu1 %v13231_v12, %s9234_s19  ;;  %v7507_v59 = vsel %vm6164_vm10, %v7493_v27, %v13349_v30 }
0x11ca   :  { %7311 = vrot.lane.b32.xlu0 %v13221_v15, %s9234_s19  ;;  %7833 = vmatprep.subr.mxu0 %v7507_v59 }
0x11cb   :  { %7834 = vmatpush1.msra.mxu0 %v7506_v18  ;;  %v7455_v7 = vpop.permute.xlu1 %7454 }
0x11cc   :  { %v7341_v10 = vpop.permute.xlu0 %7340  ;;  %v7468_v5 = vsel %vm6085_vm13, %v7453_v11, %v7455_v7 }
0x11cd   :  { %7276 = vrot.lane.b32.xlu1 %v13221_v15, %s9243_s26  ;;  %v7353_v63 = vsel %vm5848_vm3, %v7339_v16, %v7341_v10 }
0x11ce   :  { %7462 = vrot.lane.b32.xlu0 %v13291_v29, %s9230_s29  ;;  %7770 = vmatprep.subr.mxu1 %v7353_v63 }
0x11cf   :  { %7771 = vmatpush1.msra.mxu1 %v7352_v36  ;;  %v7304_v41 = vpop.permute.xlu1 %7303 }
0x11d0   :  { %v13365_v62 = vpop.permute.xlu0 %7456  ;;  %v7317_v33 = vsel %vm5769_vm15, %v13157_v8, %v7304_v41 }
0x11d1   :  { %7424 = vrot.lane.b32.xlu1 %v13291_v29, %s9250_s14  ;;  %v7469_v35 = vsel %vm6085_vm13, %v7455_v7, %v13365_v62 }
0x11d2   :  { %7278 = vrot.lane.b32.xlu0 %v13231_v12, %s9243_s26  ;;  %7835 = vmatprep.subr.mxu0 %v7469_v35 }
0x11d3   :  { %7836 = vmatpush1.msra.mxu0 %v7468_v5  ;;  %v7417_v3 = vpop.permute.xlu1 %7416 }
0x11d4   :  { %v7306_v26 = vpop.permute.xlu0 %7305  ;;  %v7430_v21 = vsel %vm6006_vm2, %v7415_v44, %v7417_v3 }
0x11d5   :  { %7243 = vrot.lane.b32.xlu1 %v13231_v12, %s9244_s9  ;;  %v7318_v1 = vsel %vm5769_vm15, %v7304_v41, %v7306_v26 }
0x11d6   :  { %7241 = vrot.lane.b32.xlu0 %v13221_v15, %s9244_s9  ;;  %7772 = vmatprep.subr.mxu1 %v7318_v1 }
0x11d7   :  { %7773 = vmatpush1.msra.mxu1 %v7317_v33  ;;  %v7269_v2 = vpop.permute.xlu1 %7268 }
0x11d8   :  { %v13381_v58 = vpop.permute.xlu0 %7418  ;;  %v7282_v22 = vsel %vm5690_vm11, %v13166_v42, %v7269_v2  ;;  %v7673_v42 = vld [vmem:[#allocation5] sm:$0x1] }
0x11d9   :  { %7206 = vrot.lane.b32.xlu1 %v13221_v15, %s9215_s11  ;;  %v7431_v56 = vsel %vm6006_vm2, %v7417_v3, %v13381_v58 }
0x11da   :  { %7386 = vrot.lane.b32.xlu0 %v13291_v29, %s9251_s24  ;;  %7837 = vmatprep.subr.mxu0 %v7431_v56 }
0x11db   :  { %7838 = vmatpush1.msra.mxu0 %v7430_v21  ;;  %v7379_v8 = vpop.permute.xlu1 %7378 }
0x11dc   :  { %v7271_v48 = vpop.permute.xlu0 %7270  ;;  %v7392_v38 = vsel %vm5927_vm12, %v7377_v45, %v7379_v8 }
0x11dd   :  { %7171 = vrot.lane.b32.xlu1 %v13221_v15, %s9213_s10  ;;  %v7283_v34 = vsel %vm5690_vm11, %v7269_v2, %v7271_v48 }
0x11de   :  { %7208 = vrot.lane.b32.xlu0 %v13231_v12, %s9215_s11  ;;  %7774 = vmatprep.subr.mxu1 %v7283_v34 }
0x11df   :  { %7775 = vmatpush1.msra.mxu1 %v7282_v22  ;;  %v7234_v55 = vpop.permute.xlu1 %7233 }
0x11e0   :  { %v13397_v24 = vpop.permute.xlu0 %7380  ;;  %v7247_v32 = vsel %vm14228_vm0, %v13181_v31, %v7234_v55  ;;  %vm14234_vm0 = vcmask 1039360  }
0x11e1   :  { %7136 = vrot.lane.b32.xlu1 %v13221_v15, %s9211_s28  ;;  %v7393_v29 = vsel %vm5927_vm12, %v7379_v8, %v13397_v24 }
0x11e2   :  { %7173 = vrot.lane.b32.xlu0 %v13231_v12, %s9213_s10  ;;  %7839 = vmatprep.subr.mxu0 %v7393_v29 }
0x11e3   :  { %7840 = vmatpush1.msra.mxu0 %v7392_v38  ;;  %v7343_v11 = vpop.permute.xlu1 %7342 }
0x11e4   :  { %v7236_v6 = vpop.permute.xlu0 %7235  ;;  %v7354_v44 = vsel %vm5848_vm3, %v7341_v10, %v7343_v11 }
0x11e5   :  { %7676 = vperm.xlu1 %8932, %v7673_v42   ;;  %v7248_v40 = vsel %vm14227_vm4, %v7234_v55, %v7236_v6  ;;  %vm14233_vm4 = vmmov %vm14232_vm7 }
0x11e6   :  { %7138 = vrot.lane.b32.xlu0 %v13231_v12, %s9211_s28  ;;  %7776 = vmatprep.subr.mxu1 %v7248_v40 }
0x11e7   :  { %7777 = vmatpush1.msra.mxu1 %v7247_v32  ;;  %v7199_v17 = vpop.permute.xlu1 %7198 }
0x11e8   :  { %v13411_v47 = vpop.permute.xlu0 %7344  ;;  %v7212_v50 = vsel %vm14231_vm14, %v13193_v14, %v7199_v17  ;;  %vm14236_vm14 = vcmask 818176  }
0x11e9   :  { %v7355_v53 = vsel %vm5848_vm3, %v7343_v11, %v13411_v47 }
0x11ea   :  { %3605 = vrot.lane.b32.xlu0 %v14229_v4, %s9204_s22  ;;  %7841 = vmatprep.subr.mxu0 %v7355_v53 }
0x11eb   :  { %7842 = vmatpush1.msra.mxu0 %v7354_v44  ;;  %v7308_v57 = vpop.permute.xlu1 %7307 }
0x11ec   :  { %v7201_v31 = vpop.permute.xlu0 %7200  ;;  %v7319_v39 = vsel %vm5769_vm15, %v7306_v26, %v7308_v57 }
0x11ed   :  { %v7213_v54 = vsel %vm14230_vm1, %v7199_v17, %v7201_v31  ;;  %vm14235_vm1 = vmmov %vm14234_vm0 }
0x11ee   :  { %7778 = vmatprep.subr.mxu1 %v7213_v54 }
0x11ef   :  { %7779 = vmatpush1.msra.mxu1 %v7212_v50  ;;  %v7164_v52 = vpop.permute.xlu1 %7163 }
0x11f0   :  { %v13421_v27 = vpop.permute.xlu0 %7309  ;;  %v7177_v18 = vsel %vm14233_vm4, %v13209_v61, %v7164_v52  ;;  %vm14238_vm4 = vcmask 1022976  }
0x11f1   :  { %v7320_v45 = vsel %vm5769_vm15, %v7308_v57, %v13421_v27 }
0x11f2   :  { %7843 = vmatprep.subr.mxu0 %v7320_v45 }
0x11f3   :  { %7844 = vmatpush1.msra.mxu0 %v7319_v39  ;;  %v7273_v9 = vpop.permute.xlu1 %7272 }
0x11f4   :  { %v7166_v16 = vpop.permute.xlu0 %7165  ;;  %v7284_v63 = vsel %vm5690_vm11, %v7271_v48, %v7273_v9 }
0x11f5   :  { %v7178_v59 = vsel %vm14232_vm7, %v7164_v52, %v7166_v16  ;;  %vm14237_vm7 = vmmov %vm14236_vm14 }
0x11f6   :  { %7780 = vmatprep.subr.mxu1 %v7178_v59 }
0x11f7   :  { %7781 = vmatpush1.msra.mxu1 %v7177_v18  ;;  %v7129_v14 = vpop.permute.xlu1 %7128 }
0x11f8   :  { %v13429_v7 = vpop.permute.xlu0 %7274  ;;  %v7142_v5 = vsel %vm14235_vm1, %v13218_v46, %v7129_v14  ;;  %vm14240_vm1 = vcmask 1031168  }
0x11f9   :  { %v7285_v10 = vsel %vm5690_vm11, %v7273_v9, %v13429_v7 }
0x11fa   :  { %7845 = vmatprep.subr.mxu0 %v7285_v10 }
0x11fb   :  { %7846 = vmatpush1.msra.mxu0 %v7284_v63  ;;  %v7238_v36 = vpop.permute.xlu1 %7237 }
0x11fc   :  { %v7131_v41 = vpop.permute.xlu0 %7130  ;;  %v7249_v1 = vsel %vm14237_vm7, %v7236_v6, %v7238_v36  ;;  %vm14242_vm7 = vcmask 1039360  }
0x11fd   :  { %v7143_v35 = vsel %vm14234_vm0, %v7129_v14, %v7131_v41  ;;  %vm14239_vm0 = vmmov %vm14238_vm4 }
0x11fe   :  { %7782 = vmatprep.subr.mxu1 %v7143_v35 }
0x11ff   :  { %7783 = vmatpush1.msra.mxu1 %v7142_v5  ;;  %v7203_v61 = vpop.permute.xlu1 %7202 }
0x1200   :  { %7784 = vmatprep.subr.mxu1 %v13011_v43  ;;  %v13438_v3 = vpop.permute.xlu0 %7239  ;;  %v7214_v2 = vsel %vm14239_vm0, %v7201_v31, %v7203_v61  ;;  %vm14244_vm0 = vmmov 0  }
0x1201   :  { %7785 = vmatpush1.msra.mxu1 %v12904_v28  ;;  %v7250_v26 = vsel %vm14236_vm14, %v7238_v36, %v13438_v3  ;;  %vm14241_vm14 = vmmov %vm14240_vm1 }
0x1202   :  { %7819 = vmatmul.mubr.f32.vlgmr.msra.gmra.mxu1 %v13236_v20  ;;  %7847 = vmatprep.subr.mxu0 %v7250_v26 }
0x1203   :  { %7848 = vmatpush1.msra.mxu0 %v7249_v1  ;;  %v7649_v33 = vpop.permute.xlu1 %7648  ;;  %7960 = vmatprep.mubr.f32.mxu1 %v13252_v25 }
0x1204   :  { %v13446_v46 = vpop.permute.xlu0 %7204  ;;  %v7660_v8 = vsel %vm6504_vm6, %v13281_v51, %v7649_v33 }
0x1205   :  { %v7215_v43 = vsel %vm14238_vm4, %v7203_v61, %v13446_v46  ;;  %vm14243_vm4 = vmmov %vm14242_vm7 }
0x1206   :  { %7849 = vmatprep.subr.mxu0 %v7215_v43 }
0x1207   :  { %7850 = vmatpush1.msra.mxu0 %v7214_v2  ;;  %v7168_v28 = vpop.permute.xlu1 %7167 }
0x1208   :  { %v7651_v56 = vpop.permute.xlu0 %7650  ;;  %v7179_v55 = vsel %vm14241_vm14, %v7166_v16, %v7168_v28 }
0x1209   :  { %v7661_v21 = vsel %vm6504_vm6, %v7649_v33, %v7651_v56 }
0x120a   :  { %7896 = vmatprep.subr.mxu1 %v7661_v21 }
0x120b   :  { %7897 = vmatpush1.msra.mxu1 %v7660_v8  ;;  %v7611_v48 = vpop.permute.xlu1 %7610 }
0x120c   :  { %v13454_v34 = vpop.permute.xlu0 %7169  ;;  %v7622_v11 = vsel %vm6419_vm5, %v13300_v60, %v7611_v48 }
0x120d   :  { %v7180_v22 = vsel %vm14240_vm1, %v7168_v28, %v13454_v34 }
0x120e   :  { %7851 = vmatprep.subr.mxu0 %v7180_v22 }
0x120f   :  { %7852 = vmatpush1.msra.mxu0 %v7179_v55  ;;  %v7133_v29 = vpop.permute.xlu1 %7132 }
0x1210   :  { %v7613_v38 = vpop.permute.xlu0 %7612  ;;  %v7144_v32 = vsel %vm14243_vm4, %v7131_v41, %v7133_v29 }
0x1211   :  { %v7623_v42 = vsel %vm6419_vm5, %v7611_v48, %v7613_v38 }
0x1212   :  { %7898 = vmatprep.subr.mxu1 %v7623_v42 }
0x1213   :  { %7899 = vmatpush1.msra.mxu1 %v7622_v11  ;;  %v7573_v51 = vpop.permute.xlu1 %7572 }
0x1214   :  { %v13462_v6 = vpop.permute.xlu0 %7134  ;;  %v7584_v44 = vsel %vm6334_vm8, %v13316_v49, %v7573_v51 }
0x1215   :  { %v7145_v40 = vsel %vm14242_vm7, %v7133_v29, %v13462_v6 }
0x1216   :  { %7853 = vmatprep.subr.mxu0 %v7145_v40 }
0x1217   :  { %7854 = vmatpush1.msra.mxu0 %v7144_v32  ;;  %v7535_v17 = vpop.permute.xlu1 %7534 }
0x1218   :  { %7855 = vmatprep.subr.mxu0 %v13039_v19  ;;  %v7575_v53 = vpop.permute.xlu0 %7574 }
0x1219   :  { %7856 = vmatpush1.msra.mxu0 %v13021_v37  ;;  %v7585_v60 = vsel %vm6334_vm8, %v7573_v51, %v7575_v53  ;;  %v7546_v37 = vsel %vm6249_vm9, %v13332_v0, %v7535_v17 }
0x121a   :  { %7890 = vmatmul.mubr.f32.vlgmr.msra.gmra.mxu0 %v13236_v20  ;;  %7900 = vmatprep.subr.mxu1 %v7585_v60 }
0x121b   :  { %7901 = vmatpush1.msra.mxu1 %v7584_v44  ;;  %v7497_v4 = vpop.permute.xlu1 %7496  ;;  %8809 = vmatprep.subr.mxu0 %v13252_v25 }
0x121c   :  { %v7537_v57 = vpop.permute.xlu0 %7536  ;;  %8841 = vmatprep.mubr.msk.f32.mxu0 %vm14244_vm0, %v13252_v25  ;;  %v7508_v52 = vsel %vm6164_vm10, %v13349_v30, %v7497_v4 }
0x121d   :  { %v7547_v19 = vsel %vm6249_vm9, %v7535_v17, %v7537_v57 }
0x121e   :  { %7902 = vmatprep.subr.mxu1 %v7547_v19 }
0x121f   :  { %7903 = vmatpush1.msra.mxu1 %v7546_v37  ;;  %v7653_v31 = vpop.permute.xlu1 %7652 }
0x1220   :  { %v7662_v49 = vsel %vm6504_vm6, %v7651_v56, %v7653_v31  ;;  %v7499_v54 = vpop.permute.xlu0 %7498 }
0x1221   :  { %v7509_v50 = vsel %vm6164_vm10, %v7497_v4, %v7499_v54  ;;  %8810 = vmatpush3.msra.mxu0 %v7662_v49 }
0x1222   :  { %7904 = vmatprep.subr.mxu1 %v7509_v50  ;;  %8811 = vmatprep.subr.mxu0 %v13252_v25  ;;  %v14253_v50 = vld [vmem:[#allocation33_spill] sm:$0xff] }
0x1223   :  { %7905 = vmatpush1.msra.mxu1 %v7508_v52  ;;  %v7461_v45 = vpop.permute.xlu1 %7460 }
0x1224   :  { %v7459_v39 = vpop.permute.xlu0 %7458 }
0x1225   :  { %v7470_v0 = vsel %vm6085_vm13, %v13365_v62, %v7459_v39  ;;  %v7471_v9 = vsel %vm6085_vm13, %v7459_v39, %v7461_v45 }
0x1226   :  { %7906 = vmatprep.subr.mxu1 %v7471_v9 }
0x1227   :  { %7907 = vmatpush1.msra.mxu1 %v7470_v0  ;;  %v7421_v16 = vpop.permute.xlu1 %7420 }
0x1228   :  { %v7615_v59 = vpop.permute.xlu0 %7614  ;;  %v7432_v62 = vsel %vm6006_vm2, %v13381_v58, %v7421_v16 }
0x1229   :  { %v7624_v18 = vsel %vm6419_vm5, %v7613_v38, %v7615_v59  ;;  %vm14249_vm5 = vmmov %vm14240_vm1 }
0x122a   :  { %8812 = vmatpush3.msra.mxu0 %v7624_v18 }
0x122b   :  { %v7577_v14 = vpop.permute.xlu1 %7576  ;;  %8813 = vmatprep.subr.mxu0 %v13252_v25 }
0x122c   :  { %v7586_v30 = vsel %vm6334_vm8, %v7575_v53, %v7577_v14  ;;  %v7423_v10 = vpop.permute.xlu0 %7422  ;;  %vm14250_vm8 = vmmov %vm14240_vm1 }
0x122d   :  { %v7433_v63 = vsel %vm6006_vm2, %v7421_v16, %v7423_v10  ;;  %8814 = vmatpush3.msra.mxu0 %v7586_v30 }
0x122e   :  { %7908 = vmatprep.subr.mxu1 %v7433_v63  ;;  %8815 = vmatprep.subr.mxu0 %v13252_v25 }
0x122f   :  { %7909 = vmatpush1.msra.mxu1 %v7432_v62  ;;  %v7385_v36 = vpop.permute.xlu1 %7384 }
0x1230   :  { %v7383_v41 = vpop.permute.xlu0 %7382 }
0x1231   :  { %v7394_v35 = vsel %vm5927_vm12, %v13397_v24, %v7383_v41  ;;  %v7395_v5 = vsel %vm5927_vm12, %v7383_v41, %v7385_v36 }
0x1232   :  { %7910 = vmatprep.subr.mxu1 %v7395_v5 }
0x1233   :  { %7911 = vmatpush1.msra.mxu1 %v7394_v35  ;;  %v7347_v61 = vpop.permute.xlu1 %7346 }
0x1234   :  { %v7539_v26 = vpop.permute.xlu0 %7538  ;;  %v7356_v24 = vsel %vm5848_vm3, %v13411_v47, %v7347_v61 }
0x1235   :  { %v7548_v1 = vsel %vm6249_vm9, %v7537_v57, %v7539_v26  ;;  %vm14251_vm9 = vmmov %vm14243_vm4 }
0x1236   :  { %8816 = vmatpush3.msra.mxu0 %v7548_v1 }
0x1237   :  { %v7501_v33 = vpop.permute.xlu1 %7500  ;;  %8817 = vmatprep.subr.mxu0 %v13252_v25 }
0x1238   :  { %v7510_v58 = vsel %vm6164_vm10, %v7499_v54, %v7501_v33  ;;  %v7349_v43 = vpop.permute.xlu0 %7348  ;;  %vm14252_vm10 = vmmov %vm14243_vm4 }
0x1239   :  { %v7357_v2 = vsel %vm5848_vm3, %v7347_v61, %v7349_v43  ;;  %8818 = vmatpush3.msra.mxu0 %v7510_v58  ;;  %vm14245_vm3 = vcmask 818176  }
0x123a   :  { %7912 = vmatprep.subr.mxu1 %v7357_v2  ;;  %8819 = vmatprep.subr.mxu0 %v13252_v25 }
0x123b   :  { %7913 = vmatpush1.msra.mxu1 %v7356_v24  ;;  %v7314_v28 = vpop.permute.xlu1 %7313 }
0x123c   :  { %v7312_v56 = vpop.permute.xlu0 %7311 }
0x123d   :  { %v7321_v21 = vsel %vm5769_vm15, %v13421_v27, %v7312_v56  ;;  %v7322_v8 = vsel %vm5769_vm15, %v7312_v56, %v7314_v28  ;;  %vm14246_vm15 = vmmov %vm14245_vm3 }
0x123e   :  { %7914 = vmatprep.subr.mxu1 %v7322_v8 }
0x123f   :  { %7915 = vmatpush1.msra.mxu1 %v7321_v21  ;;  %v7277_v48 = vpop.permute.xlu1 %7276 }
0x1240   :  { %v7463_v22 = vpop.permute.xlu0 %7462  ;;  %v7286_v27 = vsel %vm5690_vm11, %v13429_v7, %v7277_v48 }
0x1241   :  { %v7472_v55 = vsel %vm6085_vm13, %v7461_v45, %v7463_v22  ;;  %vm14254_vm13 = vcmask 523264  }
0x1242   :  { %8820 = vmatpush3.msra.mxu0 %v7472_v55 }
0x1243   :  { %v7425_v29 = vpop.permute.xlu1 %7424  ;;  %8821 = vmatprep.subr.mxu0 %v13252_v25 }
0x1244   :  { %v7434_v47 = vsel %vm6006_vm2, %v7423_v10, %v7425_v29  ;;  %v7279_v38 = vpop.permute.xlu0 %7278  ;;  %vm14255_vm2 = vcmask 785408  }
0x1245   :  { %v7287_v42 = vsel %vm5690_vm11, %v7277_v48, %v7279_v38  ;;  %8822 = vmatpush3.msra.mxu0 %v7434_v47  ;;  %vm14247_vm11 = vcmask 1022976  }
0x1246   :  { %7916 = vmatprep.subr.mxu1 %v7287_v42  ;;  %8823 = vmatprep.subr.mxu0 %v13252_v25  ;;  %vm14248_vm6 = vmmov %vm14247_vm11 }
0x1247   :  { %7917 = vmatpush1.msra.mxu1 %v7286_v27  ;;  %v7244_v11 = vpop.permute.xlu1 %7243 }
0x1248   :  { %v7242_v51 = vpop.permute.xlu0 %7241 }
0x1249   :  { %v7251_v40 = vsel %vm14245_vm3, %v13438_v3, %v7242_v51  ;;  %v7252_v32 = vsel %vm14246_vm15, %v7242_v51, %v7244_v11 }
0x124a   :  { %7918 = vmatprep.subr.mxu1 %v7252_v32 }
0x124b   :  { %7919 = vmatpush1.msra.mxu1 %v7251_v40  ;;  %v7207_v17 = vpop.permute.xlu1 %7206 }
0x124c   :  { %v7387_v53 = vpop.permute.xlu0 %7386  ;;  %v7216_v3 = vsel %vm14248_vm6, %v13446_v46, %v7207_v17 }
0x124d   :  { %v7396_v60 = vsel %vm5927_vm12, %v7385_v36, %v7387_v53  ;;  %vm14257_vm12 = vmmov %vm14255_vm2 }
0x124e   :  { %8824 = vmatpush3.msra.mxu0 %v7396_v60 }
0x124f   :  { %8825 = vmatprep.subr.mxu0 %v13252_v25  ;;  %v7172_v44 = vpop.permute.xlu1 %7171 }
0x1250   :  { %8826 = vmatpush3.msra.mxu0 %v7349_v43  ;;  %v7209_v7 = vpop.permute.xlu0 %7208  ;;  %v7181_v37 = vsel %vm14250_vm8, %v13454_v34, %v7172_v44 }
0x1251   :  { %8827 = vmatprep.subr.mxu0 %v13252_v25  ;;  %v7217_v4 = vsel %vm14247_vm11, %v7207_v17, %v7209_v7 }
0x1252   :  { %7920 = vmatprep.subr.mxu1 %v7217_v4  ;;  %8828 = vmatpush3.msra.mxu0 %v7314_v28 }
0x1253   :  { %7921 = vmatpush1.msra.mxu1 %v7216_v3  ;;  %8829 = vmatprep.subr.mxu0 %v13252_v25  ;;  %v7137_v31 = vpop.permute.xlu1 %7136 }
0x1254   :  { %8830 = vmatpush3.msra.mxu0 %v7279_v38  ;;  %v7174_v57 = vpop.permute.xlu0 %7173  ;;  %v7146_v54 = vsel %vm14252_vm10, %v13462_v6, %v7137_v31 }
0x1255   :  { %8831 = vmatprep.subr.mxu0 %v13252_v25  ;;  %v7182_v19 = vsel %vm14249_vm5, %v7172_v44, %v7174_v57 }
0x1256   :  { %7922 = vmatprep.subr.mxu1 %v7182_v19  ;;  %8832 = vmatpush3.msra.mxu0 %v7244_v11 }
0x1257   :  { %7923 = vmatpush1.msra.mxu1 %v7181_v37  ;;  %8833 = vmatprep.subr.mxu0 %v13252_v25 }
0x1258   :  { %8834 = vmatpush3.msra.mxu0 %v7209_v7  ;;  %v7139_v46 = vpop.permute.xlu0 %7138  ;;  %v7749_v6 = vpop.f32.mrf.mxu1 }
0x1259   :  { %8835 = vmatprep.subr.mxu0 %v13252_v25  ;;  %v7147_v49 = vsel %vm14251_vm9, %v7137_v31, %v7139_v46 }
0x125a   :  { %7924 = vmatprep.subr.mxu1 %v7147_v49  ;;  %8836 = vmatpush3.msra.mxu0 %v7174_v57 }
0x125b   :  { %7925 = vmatpush1.msra.mxu1 %v7146_v54  ;;  %8837 = vmatprep.subr.mxu0 %v13252_v25 }
0x125c   :  { %7926 = vmatprep.subr.mxu1 %v13221_v15  ;;  %8838 = vmatpush3.msra.mxu0 %v7139_v46  ;;  %v3606_v34 = vpop.permute.xlu0 %3605  ;;  %v7751_v15 = vpop.f32.mrf.mxu1  ;;  %v9259_v46 = vmov 1966171168  }
0x125d   :  { %v3608_v52 = vsel %vm14254_vm13, %v14253_v50, %v3606_v34  ;;  %7927 = vmatpush1.msra.mxu1 %v13046_v13  ;;  %8839 = vmatprep.subr.mxu0 %v13252_v25  ;;  %v8106_v49 = vunpack.c.l.s4 %v9259_v46 }
0x125e   :  { %v3609_v45 = vsel %vm14255_vm2, %v3608_v52, 0.0  ;;  %7961 = vmatmul.mubr.f32.vlgmr.msra.gmra.mxu1 %v13236_v20  ;;  %8840 = vmatpush3.msra.mxu0 %v13231_v12 }
0x125f   :  { %3610 = vst [vmem:[%s9411_s4] sm:$0x3] %v3609_v45  ;;  %8842 = vmatmul.mubr.f32.vlgmr.msra.gmra.mxu0 %v13236_v20  ;;  %v8107_v52 = vunpack.c.0.s8 %v8106_v49 }
0x1260   :  { %v7677_v39 = vpop.permute.xlu1 %7676 }
0x1261   :  { %v7682_v9 = vrot.slane %v7677_v39, %v14212_v23 }
0x1263   :  { %v7750_v13 = vadd.f32 %v7749_v6, %v7682_v9  ;;  %v7752_v25 = vadd.f32 %v7751_v15, %v7682_v9 }
0x1265   :  { %v8037_v10 = vsub.f32 0.0, %v7750_v13  ;;  %v8038_v12 = vsub.f32 0.0, %v7752_v25 }
0x1267   :  { %v8046_v20 = vmul.f32 1.442695, %v8037_v10  ;;  %v8048_v61 = vmul.f32 1.442695, %v8038_v12  ;;  %v14258_v12 = vlaneseq }
0x1269   :  { %9081 = vpow2.f32 %v8046_v20  ;;  %vm8169_vm1 = vcmp.lt.s32.totalorder %v14258_v12, 128 }
0x1276   :  { %v9082_v38 = vpop.eup %9081 }
0x1277   :  { %v8064_v51 = vadd.f32 1.0, %v9082_v38 }
0x12c2   :  { %v7820_v0 = vpop.f32.mrf.mxu1 }
0x12c3   :  { %v7821_v30 = vadd.f32 %v7820_v0, %v7682_v9 }
0x12c4   :  { %v7822_v16 = vpop.f32.mrf.mxu1 }
0x12c5   :  { %v7823_v18 = vadd.f32 %v7822_v16, %v7682_v9  ;;  %v8039_v41 = vsub.f32 0.0, %v7821_v30 }
0x12c7   :  { %v8040_v63 = vsub.f32 0.0, %v7823_v18  ;;  %v8050_v1 = vmul.f32 1.442695, %v8039_v41 }
0x12c9   :  { %v8052_v35 = vmul.f32 1.442695, %v8040_v63 }
0x12cb   :  { %9083 = vpow2.f32 %v8052_v35 }
0x12cc   :  { %9085 = vpow2.f32 %v8048_v61 }
0x12cd   :  { %9087 = vpow2.f32 %v8050_v1 }
0x12d8   :  { %v9084_v42 = vpop.eup %9083 }
0x12d9   :  { %v9086_v27 = vpop.eup %9085  ;;  %v8067_v40 = vadd.f32 1.0, %v9084_v42 }
0x12da   :  { %v7891_v59 = vpop.f32.mrf.mxu0  ;;  %v9088_v11 = vpop.eup %9087  ;;  %v8065_v17 = vadd.f32 1.0, %v9086_v27 }
0x12db   :  { %v7892_v36 = vadd.f32 %v7891_v59, %v7682_v9  ;;  %v8066_v60 = vadd.f32 1.0, %v9088_v11 }
0x12dc   :  { %v7893_v14 = vpop.f32.mrf.mxu0 }
0x12dd   :  { %v7894_v62 = vadd.f32 %v7893_v14, %v7682_v9  ;;  %v8041_v26 = vsub.f32 0.0, %v7892_v36 }
0x12df   :  { %v8042_v5 = vsub.f32 0.0, %v7894_v62  ;;  %v8054_v33 = vmul.f32 1.442695, %v8041_v26 }
0x12e1   :  { %v8056_v23 = vmul.f32 1.442695, %v8042_v5 }
0x12e3   :  { %9089 = vpow2.f32 %v8056_v23 }
0x12e4   :  { %9091 = vpow2.f32 %v8054_v33 }
0x12f0   :  { %v9090_v32 = vpop.eup %9089 }
0x12f1   :  { %v9092_v53 = vpop.eup %9091  ;;  %v8069_v7 = vadd.f32 1.0, %v9090_v32 }
0x12f2   :  { %v8068_v44 = vadd.f32 1.0, %v9092_v53 }
0x131e   :  { %v7962_v58 = vpop.f32.mrf.mxu1 }
0x131f   :  { %v7963_v43 = vadd.f32 %v7962_v58, %v7682_v9  ;;  %v8033_v2 = vpop.f32.mrf.mxu0 }
0x1320   :  { %v8034_v24 = vadd.f32 %v8033_v2, %v7682_v9  ;;  %v7964_v28 = vpop.f32.mrf.mxu1 }
0x1321   :  { %v8043_v56 = vsub.f32 0.0, %v7963_v43  ;;  %v7965_v21 = vadd.f32 %v7964_v28, %v7682_v9  ;;  %v8843_v8 = vpop.f32.mrf.mxu0  ;;  %v14256_v9 = vld [vmem:[#allocation25_spill] sm:$0xff] }
0x1322   :  { %v8045_v48 = vsub.f32 0.0, %v8034_v24  ;;  %v8110_v16 = vsub.s32 %v8107_v52, %v14256_v9 }
0x1323   :  { %v8058_v22 = vmul.f32 1.442695, %v8043_v56  ;;  %v8044_v55 = vsub.f32 0.0, %v7965_v21 }
0x1324   :  { %v8062_v29 = vmul.f32 1.442695, %v8045_v48 }
0x1325   :  { %9093 = vpow2.f32 %v8058_v22  ;;  %v8060_v47 = vmul.f32 1.442695, %v8044_v55 }
0x1326   :  { %9095 = vpow2.f32 %v8062_v29 }
0x1327   :  { %9097 = vpow2.f32 %v8060_v47 }
0x1328   :  { %9099 = vrcp.f32 %v8064_v51 }
0x1329   :  { %9101 = vrcp.f32 %v8067_v40 }
0x132a   :  { %9103 = vrcp.f32 %v8065_v17 }
0x132b   :  { %9105 = vrcp.f32 %v8066_v60 }
0x132c   :  { %9107 = vrcp.f32 %v8069_v7 }
0x132d   :  { %9109 = vrcp.f32 %v8068_v44 }
0x1332   :  { %v9094_v4 = vpop.eup %9093 }
0x1333   :  { %v9096_v3 = vpop.eup %9095  ;;  %v8070_v57 = vadd.f32 1.0, %v9094_v4 }
0x1334   :  { %v9098_v19 = vpop.eup %9097  ;;  %v8072_v37 = vadd.f32 1.0, %v9096_v3 }
0x1335   :  { %9111 = vrcp.f32 %v8070_v57  ;;  %v8071_v31 = vadd.f32 1.0, %v9098_v19  ;;  %v9100_v54 = vpop.eup %9099 }
0x1336   :  { %9113 = vrcp.f32 %v8072_v37  ;;  %v9102_v34 = vpop.eup %9101 }
0x1337   :  { %9115 = vrcp.f32 %v8071_v31  ;;  %v9104_v50 = vpop.eup %9103 }
0x1338   :  { %v9106_v45 = vpop.eup %9105  ;;  %v8101_v0 = vcombine.low %v9100_v54, %v9104_v50 }
0x1339   :  { %v8102_v6 = vcombine.low %v9106_v45, %v9102_v34  ;;  %v9108_v15 = vpop.eup %9107 }
0x133a   :  { %v9110_v39 = vpop.eup %9109  ;;  %v8111_v10 = vrot.slane %v8101_v0, %v8110_v16 }
0x133b   :  { %v8118_v18 = vrot.slane %v8102_v6, %v8110_v16  ;;  %v8103_v25 = vcombine.low %v9110_v39, %v9108_v15 }
0x133d   :  { %v8133_v36 = vcombine.low %v8111_v10, %v8118_v18  ;;  %v8125_v41 = vrot.slane %v8103_v25, %v8110_v16 }
0x133f   :  { %v8141_v61 = vrot.slane %v8133_v36, %v8110_v16 }
0x1342   :  { %v9112_v59 = vpop.eup %9111 }
0x1343   :  { %v9114_v13 = vpop.eup %9113 }
0x1344   :  { %v9116_v14 = vpop.eup %9115  ;;  %v8091_v30 = vsel %vm14257_vm12, %v9114_v13, 0.0 }
0x1345   :  { %v8156_v63 = vrot.slane %v8091_v30, %v8110_v16  ;;  %v8104_v62 = vcombine.low %v9112_v59, %v9116_v14 }
0x1347   :  { %v8163_v20 = vrot.slane %v8156_v63, %v8110_v16  ;;  %v8132_v35 = vrot.slane %v8104_v62, %v8110_v16 }
0x1349   :  { %8171 = vst.msk [vmem:[%s9416_s6 + $0x8] sm:$0x1] %vm8169_vm1, %v8163_v20  ;;  %v8134_v5 = vcombine.low %v8125_v41, %v8132_v35 }
0x134b   :  { %v8148_v26 = vrot.slane %v8134_v5, %v8110_v16 }
0x134d   :  { %v8149_v1 = vcombine.low %v8141_v61, %v8148_v26 }
0x134f   :  { %8166 = vst [vmem:[%s9416_s6] sm:$0xff] %v8149_v1 }
0x1350   :  { %8180 = vsyncpa [#allocation7], 1 }
0x1351   :  { %8181 = vsyncpa [#allocation9], 1 }

</bundles_post_ra>
